<compile_context>
chip_gen: v5e
topology: v5e:2x2
jax: 0.10.0
libtpu: 0.0.40
codegen_flags: <defaults>
</compile_context>

<pallas_src>
import functools

import jax
import jax.numpy as jnp
from jax.experimental import pallas as pl
from jax.experimental.pallas import tpu as pltpu

_VMEM_LIMIT = 32 * 1024 * 1024  # safe on v5e (128 MiB), v6e (128 MiB), v7x (64 MiB)


def _round_up(x, m):
    return (x + m - 1) // m * m


def _pick_tile(total, cap, quantum):
    """Largest multiple of `quantum` <= cap that divides `total`."""
    best = quantum
    t = quantum
    limit = min(cap, total)
    while t <= limit:
        if total % t == 0:
            best = t
        t += quantum
    return best


# ---------------------------------------------------------------------------
# Fused tiled matmul: out = act((A @ B) * scale + shift [+ residual])
# ---------------------------------------------------------------------------
def _fused_matmul_kernel(*refs, relu, has_res):
    if has_res:
        a_ref, b_ref, s_ref, t_ref, r_ref, o_ref, acc_ref = refs
    else:
        a_ref, b_ref, s_ref, t_ref, o_ref, acc_ref = refs
        r_ref = None
    k = pl.program_id(2)

    @pl.when(k == 0)
    def _init():
        acc_ref[...] = jnp.zeros_like(acc_ref)

    acc_ref[...] += jnp.dot(a_ref[...], b_ref[...],
                            preferred_element_type=jnp.float32)

    @pl.when(k == pl.num_programs(2) - 1)
    def _writeback():
        y = acc_ref[...] * s_ref[...] + t_ref[...]        # BN / bias epilogue (f32)
        if has_res:
            y = y + r_ref[...].astype(jnp.float32)        # residual add (f32)
        if relu:
            y = jnp.maximum(y, 0.0)
        o_ref[...] = y.astype(o_ref.dtype)


def fused_matmul(a, b, scale, shift, residual=None, relu=False,
                 out_dtype=jnp.bfloat16):
    """a:(M,K) bf16, b:(K,N) bf16 with K,N multiples of 128; scale/shift:(1,N) f32."""
    M, K = a.shape
    Kb, N = b.shape
    assert K == Kb and K % 128 == 0 and N % 128 == 0, (a.shape, b.shape)

    Mp = _round_up(M, 8)
    if Mp != M:
        a = jnp.pad(a, ((0, Mp - M), (0, 0)))
        if residual is not None:
            residual = jnp.pad(residual, ((0, Mp - M), (0, 0)))

    tm = _pick_tile(Mp, 512, 8)
    tn = _pick_tile(N, 256, 128)
    tk = _pick_tile(K, 512, 128)
    grid = (Mp // tm, N // tn, K // tk)

    in_specs = [
        pl.BlockSpec((tm, tk), lambda i, j, k: (i, k)),
        pl.BlockSpec((tk, tn), lambda i, j, k: (k, j)),
        pl.BlockSpec((1, tn), lambda i, j, k: (0, j)),   # k-invariant: single fetch
        pl.BlockSpec((1, tn), lambda i, j, k: (0, j)),
    ]
    args = [a, b, scale, shift]
    if residual is not None:
        in_specs.append(pl.BlockSpec((tm, tn), lambda i, j, k: (i, j)))
        args.append(residual)

    out = pl.pallas_call(
        functools.partial(_fused_matmul_kernel, relu=relu,
                          has_res=residual is not None),
        out_shape=jax.ShapeDtypeStruct((Mp, N), out_dtype),
        grid=grid,
        in_specs=in_specs,
        out_specs=pl.BlockSpec((tm, tn), lambda i, j, k: (i, j)),
        scratch_shapes=[pltpu.VMEM((tm, tn), jnp.float32)],
        compiler_params=pltpu.CompilerParams(
            dimension_semantics=("parallel", "parallel", "arbitrary"),
            vmem_limit_bytes=_VMEM_LIMIT),
    )(*args)
    if Mp != M:
        out = out[:M]
    return out


# ---------------------------------------------------------------------------
# Conv2d (bias=False) + BatchNorm [+ residual] [+ ReLU] as one fused matmul
# ---------------------------------------------------------------------------
def conv2d_bn_act(x, p, ksize, stride, padding, relu, residual=None,
                  out_dtype=jnp.bfloat16):
    """x: (N,H,W,Cin) bf16 with Cin already lane-padded.
    p: dict(wm=(Kp,Np) bf16, scale=(1,Np) f32, shift=(1,Np) f32)."""
    N, H, W, Cin = x.shape
    Ho = (H + 2 * padding - ksize) // stride + 1
    Wo = (W + 2 * padding - ksize) // stride + 1
    xp = x if padding == 0 else jnp.pad(
        x, ((0, 0), (padding, padding), (padding, padding), (0, 0)))
    cols = []
    for kh in range(ksize):
        for kw in range(ksize):
            cols.append(xp[:, kh:kh + stride * Ho:stride,
                           kw:kw + stride * Wo:stride, :])
    patches = jnp.concatenate(cols, axis=-1).reshape(
        N * Ho * Wo, ksize * ksize * Cin)
    Kp = p['wm'].shape[0]
    if patches.shape[1] < Kp:                         # only conv1 (K = 7*7*3)
        patches = jnp.pad(patches, ((0, 0), (0, Kp - patches.shape[1])))
    res_flat = None
    if residual is not None:
        res_flat = residual.reshape(N * Ho * Wo, residual.shape[-1])
    out = fused_matmul(patches, p['wm'], p['scale'], p['shift'],
                       residual=res_flat, relu=relu, out_dtype=out_dtype)
    return out.reshape(N, Ho, Wo, p['wm'].shape[1])


# ---------------------------------------------------------------------------
# MaxPool2d(kernel=3, stride=2, padding=1): tiled, running max over 9 taps
# ---------------------------------------------------------------------------
def _maxpool_kernel(*refs):
    o_ref = refs[-1]
    acc = refs[0][...]
    for r in refs[1:-1]:
        acc = jnp.maximum(acc, r[...])
    o_ref[...] = acc


def maxpool_3x3_s2_p1(x):
    N, H, W, C = x.shape
    Ho = (H + 2 - 3) // 2 + 1
    Wo = (W + 2 - 3) // 2 + 1
    neg = float(jnp.finfo(x.dtype).min)
    xp = jnp.pad(x, ((0, 0), (1, 1), (1, 1), (0, 0)), constant_values=neg)
    M = N * Ho * Wo
    Mp = _round_up(M, 8)
    taps = []
    for kh in range(3):
        for kw in range(3):
            t = xp[:, kh:kh + 2 * Ho:2, kw:kw + 2 * Wo:2, :].reshape(M, C)
            if Mp != M:
                t = jnp.pad(t, ((0, Mp - M), (0, 0)), constant_values=neg)
            taps.append(t)
    tm = _pick_tile(Mp, 512, 8)
    out = pl.pallas_call(
        _maxpool_kernel,
        out_shape=jax.ShapeDtypeStruct((Mp, C), x.dtype),
        grid=(Mp // tm,),
        in_specs=[pl.BlockSpec((tm, C), lambda i: (i, 0)) for _ in range(9)],
        out_specs=pl.BlockSpec((tm, C), lambda i: (i, 0)),
        compiler_params=pltpu.CompilerParams(
            dimension_semantics=("parallel",),
            vmem_limit_bytes=_VMEM_LIMIT),
    )(*taps)
    return out[:M].reshape(N, Ho, Wo, C)


# ---------------------------------------------------------------------------
# AdaptiveAvgPool2d((1,1)) + flatten
# ---------------------------------------------------------------------------
def _avgpool_kernel(x_ref, o_ref, *, inv_hw):
    s = jnp.sum(x_ref[...].astype(jnp.float32), axis=1) * inv_hw
    o_ref[...] = s.astype(o_ref.dtype)


def global_avgpool(x):
    N, H, W, C = x.shape
    xr = x.reshape(N, H * W, C)
    return pl.pallas_call(
        functools.partial(_avgpool_kernel, inv_hw=1.0 / (H * W)),
        out_shape=jax.ShapeDtypeStruct((N, C), x.dtype),
        grid=(1,),
        in_specs=[pl.BlockSpec((N, H * W, C), lambda i: (0, 0, 0))],
        out_specs=pl.BlockSpec((N, C), lambda i: (0, 0)),
        compiler_params=pltpu.CompilerParams(
            dimension_semantics=("arbitrary",),
            vmem_limit_bytes=_VMEM_LIMIT),
    )(xr)


# ---------------------------------------------------------------------------
# ResNet forward (BasicBlock)
# ---------------------------------------------------------------------------
def basic_block(x, p, stride):
    out = conv2d_bn_act(x, p['conv1'], ksize=3, stride=stride, padding=1,
                        relu=True)                       # conv1 + bn1 + relu
    if 'down' in p:
        idn = conv2d_bn_act(x, p['down'], ksize=1, stride=stride, padding=0,
                            relu=False)                  # downsample conv + bn
    else:
        idn = x
    # conv2 + bn2 + residual add + relu fused into one kernel epilogue
    return conv2d_bn_act(out, p['conv2'], ksize=3, stride=1, padding=1,
                         relu=True, residual=idn)


def resnet_forward(params, x_nchw, num_classes):
    x = jnp.transpose(x_nchw, (0, 2, 3, 1)).astype(jnp.bfloat16)   # NCHW -> NHWC
    x = conv2d_bn_act(x, params['conv1'], ksize=7, stride=2, padding=3,
                      relu=True)                                   # conv1+bn1+relu
    x = maxpool_3x3_s2_p1(x)
    for li, layer in enumerate(params['layers']):
        for bi, blk in enumerate(layer):
            stride = 2 if (li > 0 and bi == 0) else 1
            x = basic_block(x, blk, stride)
    pooled = global_avgpool(x)                                     # (N, 512) == flatten
    logits = fused_matmul(pooled, params['fc']['wm'], params['fc']['scale'],
                          params['fc']['shift'], relu=False,
                          out_dtype=jnp.float32)                   # fc + bias fused
    return logits[:, :num_classes]


# ---------------------------------------------------------------------------
# Deterministic parameter init, pre-folded into matmul-ready (lane-padded) form
# ---------------------------------------------------------------------------
def init_params(key, layers=(1, 1, 1, 1), num_classes=10, eps=1e-5):
    # BatchNorm (eval): gamma=1, beta=0, running_mean=0, running_var=1
    def bn_fold(cout, lanes):
        scale = jnp.ones((cout,), jnp.float32) / jnp.sqrt(1.0 + eps)
        shift = jnp.zeros((cout,), jnp.float32)
        scale = jnp.pad(scale, (0, lanes - cout)).reshape(1, lanes)
        shift = jnp.pad(shift, (0, lanes - cout)).reshape(1, lanes)
        return scale, shift

    def prep_conv(k, cout, cin, ksz, cin_lanes):
        std = (2.0 / (cout * ksz * ksz)) ** 0.5        # kaiming_normal_, fan_out
        w = std * jax.random.normal(k, (cout, cin, ksz, ksz), jnp.float32)
        if cin_lanes > cin:                            # match lane-padded input
            w = jnp.pad(w, ((0, 0), (0, cin_lanes - cin), (0, 0), (0, 0)))
        lanes = _round_up(cout, 128)
        wm = jnp.transpose(w, (2, 3, 1, 0)).reshape(ksz * ksz * cin_lanes, cout)
        kp = _round_up(wm.shape[0], 128)
        wm = jnp.pad(wm, ((0, kp - wm.shape[0]), (0, lanes - cout)))
        scale, shift = bn_fold(cout, lanes)
        return {'wm': wm.astype(jnp.bfloat16), 'scale': scale, 'shift': shift}

    keys = iter(jax.random.split(key, 64))
    params = {'conv1': prep_conv(next(keys), 64, 3, 7, 3)}

    inplanes = 64
    layer_list = []
    for li, (planes, nblocks) in enumerate(zip((64, 128, 256, 512), layers)):
        blocks = []
        for bi in range(nblocks):
            stride = 2 if (li > 0 and bi == 0) else 1
            in_lanes = _round_up(inplanes, 128)
            blk = {'conv1': prep_conv(next(keys), planes, inplanes, 3, in_lanes),
                   'conv2': prep_conv(next(keys), planes, planes, 3,
                                      _round_up(planes, 128))}
            if stride != 1 or inplanes != planes:
                blk['down'] = prep_conv(next(keys), planes, inplanes, 1, in_lanes)
            inplanes = planes
            blocks.append(blk)
        layer_list.append(blocks)
    params['layers'] = layer_list

    bound = 1.0 / (512 ** 0.5)
    fc_w = jax.random.uniform(next(keys), (512, num_classes), jnp.float32,
                              -bound, bound)
    fc_b = jax.random.uniform(next(keys), (num_classes,), jnp.float32,
                              -bound, bound)
    n_lanes = _round_up(num_classes, 128)
    params['fc'] = {
        'wm': jnp.pad(fc_w, ((0, 0), (0, n_lanes - num_classes))).astype(jnp.bfloat16),
        'scale': jnp.pad(jnp.ones((num_classes,), jnp.float32),
                         (0, n_lanes - num_classes)).reshape(1, n_lanes),
        'shift': jnp.pad(fc_b, (0, n_lanes - num_classes)).reshape(1, n_lanes),
    }
    return params


if __name__ == "__main__":
    key = jax.random.PRNGKey(0)
    pkey, xkey = jax.random.split(key)
    num_classes = 10
    params = init_params(pkey, layers=(1, 1, 1, 1), num_classes=num_classes)
    x = jax.random.normal(xkey, (2, 3, 32, 32), jnp.float32)   # NCHW like PyTorch

    fwd = jax.jit(functools.partial(resnet_forward, num_classes=num_classes))
    out = jax.block_until_ready(fwd(params, x))

    assert out.shape == (2, num_classes), out.shape
    assert bool(jnp.all(jnp.isfinite(out)))
    print("KERNEL_OK")
</pallas_src>

<mosaic_0001>
module attributes {stable_mosaic.version = 11 : i64} {
  func.func @_fused_matmul_kernel(%arg0: i32, %arg1: i32, %arg2: i32, %arg3: memref<512x256xbf16, #tpu.memory_space<vmem>>, %arg4: memref<256x128xbf16, #tpu.memory_space<vmem>>, %arg5: memref<1x128xf32, #tpu.memory_space<vmem>>, %arg6: memref<1x128xf32, #tpu.memory_space<vmem>>, %arg7: memref<512x128xbf16, #tpu.memory_space<vmem>>, %arg8: memref<512x128xf32, #tpu.memory_space<vmem>>) attributes {dimension_semantics = [#tpu.dimension_semantics<parallel>, #tpu.dimension_semantics<parallel>, #tpu.dimension_semantics<arbitrary>], iteration_bounds = array<i64: 1, 1, 1>, scalar_prefetch = 0 : i64, scratch_operands = 1 : i64, tpu.core_type = #tpu.core_type<tc>, window_params = [{transform_indices = @transform_0, window_bounds = array<i64: 512, 256>}, {transform_indices = @transform_1, window_bounds = array<i64: 256, 128>}, {transform_indices = @transform_2, window_bounds = array<i64: 1, 128>}, {transform_indices = @transform_3, window_bounds = array<i64: 1, 128>}, {transform_indices = @transform_4, window_bounds = array<i64: 512, 128>}]} {
    %c0_i32 = arith.constant 0 : i32
    %0 = arith.cmpi eq, %arg2, %c0_i32 : i32
    %1 = arith.extui %0 : i1 to i32
    %c0_i32_0 = arith.constant 0 : i32
    %2 = arith.cmpi ne, %1, %c0_i32_0 : i32
    scf.if %2 {
      %cst_10 = arith.constant 0.000000e+00 : f32
      %12 = vector.broadcast %cst_10 : f32 to vector<512x128xf32>
      %c0_11 = arith.constant 0 : index
      %c0_12 = arith.constant 0 : index
      %13 = vector.load %arg8[%c0_11, %c0_12] : memref<512x128xf32, #tpu.memory_space<vmem>>, vector<512x128xf32>
      tpu.vector_store %arg8[%c0_11, %c0_12], %12 {strides = array<i32>} : memref<512x128xf32, #tpu.memory_space<vmem>>, vector<512x128xf32>,
    } else {
    }
    %c0 = arith.constant 0 : index
    %c0_1 = arith.constant 0 : index
    %3 = vector.load %arg8[%c0, %c0_1] : memref<512x128xf32, #tpu.memory_space<vmem>>, vector<512x128xf32>
    %c0_2 = arith.constant 0 : index
    %c0_3 = arith.constant 0 : index
    %4 = vector.load %arg3[%c0_2, %c0_3] : memref<512x256xbf16, #tpu.memory_space<vmem>>, vector<512x256xbf16>
    %c0_4 = arith.constant 0 : index
    %c0_5 = arith.constant 0 : index
    %5 = vector.load %arg4[%c0_4, %c0_5] : memref<256x128xbf16, #tpu.memory_space<vmem>>, vector<256x128xbf16>
    %cst = arith.constant dense<0.000000e+00> : vector<512x128xf32>
    %6 = tpu.matmul %4, %5, %cst {dimension_numbers = #tpu.dot_dimension_numbers<[1], [0], [0], [1], [0, 0, 1, 1], [], []>} : vector<512x256xbf16>, vector<256x128xbf16>, vector<512x128xf32> -> vector<512x128xf32>
    %7 = arith.addf %3, %6 : vector<512x128xf32>
    %c0_6 = arith.constant 0 : index
    %c0_7 = arith.constant 0 : index
    %8 = vector.load %arg8[%c0_6, %c0_7] : memref<512x128xf32, #tpu.memory_space<vmem>>, vector<512x128xf32>
    tpu.vector_store %arg8[%c0_6, %c0_7], %7 {strides = array<i32>} : memref<512x128xf32, #tpu.memory_space<vmem>>, vector<512x128xf32>,
    %c0_i32_8 = arith.constant 0 : i32
    %9 = arith.cmpi eq, %arg2, %c0_i32_8 : i32
    %10 = arith.extui %9 : i1 to i32
    %c0_i32_9 = arith.constant 0 : i32
    %11 = arith.cmpi ne, %10, %c0_i32_9 : i32
    scf.if %11 {
      %c0_10 = arith.constant 0 : index
      %c0_11 = arith.constant 0 : index
      %12 = vector.load %arg8[%c0_10, %c0_11] : memref<512x128xf32, #tpu.memory_space<vmem>>, vector<512x128xf32>
      %c0_12 = arith.constant 0 : index
      %c0_13 = arith.constant 0 : index
      %13 = vector.load %arg5[%c0_12, %c0_13] : memref<1x128xf32, #tpu.memory_space<vmem>>, vector<1x128xf32>
      %14 = vector.broadcast %13 : vector<1x128xf32> to vector<512x128xf32>
      %15 = arith.mulf %12, %14 : vector<512x128xf32>
      %c0_14 = arith.constant 0 : index
      %c0_15 = arith.constant 0 : index
      %16 = vector.load %arg6[%c0_14, %c0_15] : memref<1x128xf32, #tpu.memory_space<vmem>>, vector<1x128xf32>
      %17 = vector.broadcast %16 : vector<1x128xf32> to vector<512x128xf32>
      %18 = arith.addf %15, %17 : vector<512x128xf32>
      %cst_16 = arith.constant 0.000000e+00 : f32
      %19 = vector.broadcast %cst_16 : f32 to vector<512x128xf32>
      %20 = arith.maximumf %18, %19 : vector<512x128xf32>
      %21 = arith.truncf %20 : vector<512x128xf32> to vector<512x128xbf16>
      %c0_17 = arith.constant 0 : index
      %c0_18 = arith.constant 0 : index
      %22 = vector.load %arg7[%c0_17, %c0_18] : memref<512x128xbf16, #tpu.memory_space<vmem>>, vector<512x128xbf16>
      tpu.vector_store %arg7[%c0_17, %c0_18], %21 {strides = array<i32>} : memref<512x128xbf16, #tpu.memory_space<vmem>>, vector<512x128xbf16>,
    } else {
    }
    return
  }
  func.func @transform_0(%arg0: i32, %arg1: i32, %arg2: i32) -> (i32, i32) {
    %c0_i32 = arith.constant 0 : i32
    return %arg0, %arg2 : i32, i32
  }
  func.func @transform_1(%arg0: i32, %arg1: i32, %arg2: i32) -> (i32, i32) {
    %c0_i32 = arith.constant 0 : i32
    return %arg2, %arg1 : i32, i32
  }
  func.func @transform_2(%arg0: i32, %arg1: i32, %arg2: i32) -> (i32, i32) {
    %c0_i32 = arith.constant 0 : i32
    %c0_i32_0 = arith.constant 0 : i32
    return %c0_i32, %arg1 : i32, i32
  }
  func.func @transform_3(%arg0: i32, %arg1: i32, %arg2: i32) -> (i32, i32) {
    %c0_i32 = arith.constant 0 : i32
    %c0_i32_0 = arith.constant 0 : i32
    return %c0_i32, %arg1 : i32, i32
  }
  func.func @transform_4(%arg0: i32, %arg1: i32, %arg2: i32) -> (i32, i32) {
    %c0_i32 = arith.constant 0 : i32
    return %arg0, %arg1 : i32, i32
  }
}

module attributes {stable_mosaic.version = 11 : i64} {
  func.func @_maxpool_kernel(%arg0: i32, %arg1: memref<128x128xbf16, #tpu.memory_space<vmem>>, %arg2: memref<128x128xbf16, #tpu.memory_space<vmem>>, %arg3: memref<128x128xbf16, #tpu.memory_space<vmem>>, %arg4: memref<128x128xbf16, #tpu.memory_space<vmem>>, %arg5: memref<128x128xbf16, #tpu.memory_space<vmem>>, %arg6: memref<128x128xbf16, #tpu.memory_space<vmem>>, %arg7: memref<128x128xbf16, #tpu.memory_space<vmem>>, %arg8: memref<128x128xbf16, #tpu.memory_space<vmem>>, %arg9: memref<128x128xbf16, #tpu.memory_space<vmem>>, %arg10: memref<128x128xbf16, #tpu.memory_space<vmem>>) attributes {dimension_semantics = [#tpu.dimension_semantics<parallel>], iteration_bounds = array<i64: 1>, scalar_prefetch = 0 : i64, scratch_operands = 0 : i64, tpu.core_type = #tpu.core_type<tc>, window_params = [{transform_indices = @transform_0, window_bounds = array<i64: 128, 128>}, {transform_indices = @transform_1, window_bounds = array<i64: 128, 128>}, {transform_indices = @transform_2, window_bounds = array<i64: 128, 128>}, {transform_indices = @transform_3, window_bounds = array<i64: 128, 128>}, {transform_indices = @transform_4, window_bounds = array<i64: 128, 128>}, {transform_indices = @transform_5, window_bounds = array<i64: 128, 128>}, {transform_indices = @transform_6, window_bounds = array<i64: 128, 128>}, {transform_indices = @transform_7, window_bounds = array<i64: 128, 128>}, {transform_indices = @transform_8, window_bounds = array<i64: 128, 128>}, {transform_indices = @transform_9, window_bounds = array<i64: 128, 128>}]} {
    %c0 = arith.constant 0 : index
    %c0_0 = arith.constant 0 : index
    %0 = vector.load %arg1[%c0, %c0_0] : memref<128x128xbf16, #tpu.memory_space<vmem>>, vector<128x128xbf16>
    %c0_1 = arith.constant 0 : index
    %c0_2 = arith.constant 0 : index
    %1 = vector.load %arg2[%c0_1, %c0_2] : memref<128x128xbf16, #tpu.memory_space<vmem>>, vector<128x128xbf16>
    %2 = arith.maximumf %0, %1 : vector<128x128xbf16>
    %c0_3 = arith.constant 0 : index
    %c0_4 = arith.constant 0 : index
    %3 = vector.load %arg3[%c0_3, %c0_4] : memref<128x128xbf16, #tpu.memory_space<vmem>>, vector<128x128xbf16>
    %4 = arith.maximumf %2, %3 : vector<128x128xbf16>
    %c0_5 = arith.constant 0 : index
    %c0_6 = arith.constant 0 : index
    %5 = vector.load %arg4[%c0_5, %c0_6] : memref<128x128xbf16, #tpu.memory_space<vmem>>, vector<128x128xbf16>
    %6 = arith.maximumf %4, %5 : vector<128x128xbf16>
    %c0_7 = arith.constant 0 : index
    %c0_8 = arith.constant 0 : index
    %7 = vector.load %arg5[%c0_7, %c0_8] : memref<128x128xbf16, #tpu.memory_space<vmem>>, vector<128x128xbf16>
    %8 = arith.maximumf %6, %7 : vector<128x128xbf16>
    %c0_9 = arith.constant 0 : index
    %c0_10 = arith.constant 0 : index
    %9 = vector.load %arg6[%c0_9, %c0_10] : memref<128x128xbf16, #tpu.memory_space<vmem>>, vector<128x128xbf16>
    %10 = arith.maximumf %8, %9 : vector<128x128xbf16>
    %c0_11 = arith.constant 0 : index
    %c0_12 = arith.constant 0 : index
    %11 = vector.load %arg7[%c0_11, %c0_12] : memref<128x128xbf16, #tpu.memory_space<vmem>>, vector<128x128xbf16>
    %12 = arith.maximumf %10, %11 : vector<128x128xbf16>
    %c0_13 = arith.constant 0 : index
    %c0_14 = arith.constant 0 : index
    %13 = vector.load %arg8[%c0_13, %c0_14] : memref<128x128xbf16, #tpu.memory_space<vmem>>, vector<128x128xbf16>
    %14 = arith.maximumf %12, %13 : vector<128x128xbf16>
    %c0_15 = arith.constant 0 : index
    %c0_16 = arith.constant 0 : index
    %15 = vector.load %arg9[%c0_15, %c0_16] : memref<128x128xbf16, #tpu.memory_space<vmem>>, vector<128x128xbf16>
    %16 = arith.maximumf %14, %15 : vector<128x128xbf16>
    %c0_17 = arith.constant 0 : index
    %c0_18 = arith.constant 0 : index
    %17 = vector.load %arg10[%c0_17, %c0_18] : memref<128x128xbf16, #tpu.memory_space<vmem>>, vector<128x128xbf16>
    tpu.vector_store %arg10[%c0_17, %c0_18], %16 {strides = array<i32>} : memref<128x128xbf16, #tpu.memory_space<vmem>>, vector<128x128xbf16>,
    return
  }
  func.func @transform_0(%arg0: i32) -> (i32, i32) {
    %c0_i32 = arith.constant 0 : i32
    %c0_i32_0 = arith.constant 0 : i32
    return %arg0, %c0_i32 : i32, i32
  }
  func.func @transform_1(%arg0: i32) -> (i32, i32) {
    %c0_i32 = arith.constant 0 : i32
    %c0_i32_0 = arith.constant 0 : i32
    return %arg0, %c0_i32 : i32, i32
  }
  func.func @transform_2(%arg0: i32) -> (i32, i32) {
    %c0_i32 = arith.constant 0 : i32
    %c0_i32_0 = arith.constant 0 : i32
    return %arg0, %c0_i32 : i32, i32
  }
  func.func @transform_3(%arg0: i32) -> (i32, i32) {
    %c0_i32 = arith.constant 0 : i32
    %c0_i32_0 = arith.constant 0 : i32
    return %arg0, %c0_i32 : i32, i32
  }
  func.func @transform_4(%arg0: i32) -> (i32, i32) {
    %c0_i32 = arith.constant 0 : i32
    %c0_i32_0 = arith.constant 0 : i32
    return %arg0, %c0_i32 : i32, i32
  }
  func.func @transform_5(%arg0: i32) -> (i32, i32) {
    %c0_i32 = arith.constant 0 : i32
    %c0_i32_0 = arith.constant 0 : i32
    return %arg0, %c0_i32 : i32, i32
  }
  func.func @transform_6(%arg0: i32) -> (i32, i32) {
    %c0_i32 = arith.constant 0 : i32
    %c0_i32_0 = arith.constant 0 : i32
    return %arg0, %c0_i32 : i32, i32
  }
  func.func @transform_7(%arg0: i32) -> (i32, i32) {
    %c0_i32 = arith.constant 0 : i32
    %c0_i32_0 = arith.constant 0 : i32
    return %arg0, %c0_i32 : i32, i32
  }
  func.func @transform_8(%arg0: i32) -> (i32, i32) {
    %c0_i32 = arith.constant 0 : i32
    %c0_i32_0 = arith.constant 0 : i32
    return %arg0, %c0_i32 : i32, i32
  }
  func.func @transform_9(%arg0: i32) -> (i32, i32) {
    %c0_i32 = arith.constant 0 : i32
    %c0_i32_0 = arith.constant 0 : i32
    return %arg0, %c0_i32 : i32, i32
  }
}

module attributes {stable_mosaic.version = 11 : i64} {
  func.func @_fused_matmul_kernel(%arg0: i32, %arg1: i32, %arg2: i32, %arg3: memref<128x384xbf16, #tpu.memory_space<vmem>>, %arg4: memref<384x128xbf16, #tpu.memory_space<vmem>>, %arg5: memref<1x128xf32, #tpu.memory_space<vmem>>, %arg6: memref<1x128xf32, #tpu.memory_space<vmem>>, %arg7: memref<128x128xbf16, #tpu.memory_space<vmem>>, %arg8: memref<128x128xf32, #tpu.memory_space<vmem>>) attributes {dimension_semantics = [#tpu.dimension_semantics<parallel>, #tpu.dimension_semantics<parallel>, #tpu.dimension_semantics<arbitrary>], iteration_bounds = array<i64: 1, 1, 3>, scalar_prefetch = 0 : i64, scratch_operands = 1 : i64, tpu.core_type = #tpu.core_type<tc>, window_params = [{transform_indices = @transform_0, window_bounds = array<i64: 128, 384>}, {transform_indices = @transform_1, window_bounds = array<i64: 384, 128>}, {transform_indices = @transform_2, window_bounds = array<i64: 1, 128>}, {transform_indices = @transform_3, window_bounds = array<i64: 1, 128>}, {transform_indices = @transform_4, window_bounds = array<i64: 128, 128>}]} {
    %c0_i32 = arith.constant 0 : i32
    %0 = arith.cmpi eq, %arg2, %c0_i32 : i32
    %1 = arith.extui %0 : i1 to i32
    %c0_i32_0 = arith.constant 0 : i32
    %2 = arith.cmpi ne, %1, %c0_i32_0 : i32
    scf.if %2 {
      %cst_9 = arith.constant 0.000000e+00 : f32
      %12 = vector.broadcast %cst_9 : f32 to vector<128x128xf32>
      %c0_10 = arith.constant 0 : index
      %c0_11 = arith.constant 0 : index
      %13 = vector.load %arg8[%c0_10, %c0_11] : memref<128x128xf32, #tpu.memory_space<vmem>>, vector<128x128xf32>
      tpu.vector_store %arg8[%c0_10, %c0_11], %12 {strides = array<i32>} : memref<128x128xf32, #tpu.memory_space<vmem>>, vector<128x128xf32>,
    } else {
    }
    %c0 = arith.constant 0 : index
    %c0_1 = arith.constant 0 : index
    %3 = vector.load %arg8[%c0, %c0_1] : memref<128x128xf32, #tpu.memory_space<vmem>>, vector<128x128xf32>
    %c0_2 = arith.constant 0 : index
    %c0_3 = arith.constant 0 : index
    %4 = vector.load %arg3[%c0_2, %c0_3] : memref<128x384xbf16, #tpu.memory_space<vmem>>, vector<128x384xbf16>
    %c0_4 = arith.constant 0 : index
    %c0_5 = arith.constant 0 : index
    %5 = vector.load %arg4[%c0_4, %c0_5] : memref<384x128xbf16, #tpu.memory_space<vmem>>, vector<384x128xbf16>
    %cst = arith.constant dense<0.000000e+00> : vector<128x128xf32>
    %6 = tpu.matmul %4, %5, %cst {dimension_numbers = #tpu.dot_dimension_numbers<[1], [0], [0], [1], [0, 0, 1, 1], [], []>} : vector<128x384xbf16>, vector<384x128xbf16>, vector<128x128xf32> -> vector<128x128xf32>
    %7 = arith.addf %3, %6 : vector<128x128xf32>
    %c0_6 = arith.constant 0 : index
    %c0_7 = arith.constant 0 : index
    %8 = vector.load %arg8[%c0_6, %c0_7] : memref<128x128xf32, #tpu.memory_space<vmem>>, vector<128x128xf32>
    tpu.vector_store %arg8[%c0_6, %c0_7], %7 {strides = array<i32>} : memref<128x128xf32, #tpu.memory_space<vmem>>, vector<128x128xf32>,
    %c2_i32 = arith.constant 2 : i32
    %9 = arith.cmpi eq, %arg2, %c2_i32 : i32
    %10 = arith.extui %9 : i1 to i32
    %c0_i32_8 = arith.constant 0 : i32
    %11 = arith.cmpi ne, %10, %c0_i32_8 : i32
    scf.if %11 {
      %c0_9 = arith.constant 0 : index
      %c0_10 = arith.constant 0 : index
      %12 = vector.load %arg8[%c0_9, %c0_10] : memref<128x128xf32, #tpu.memory_space<vmem>>, vector<128x128xf32>
      %c0_11 = arith.constant 0 : index
      %c0_12 = arith.constant 0 : index
      %13 = vector.load %arg5[%c0_11, %c0_12] : memref<1x128xf32, #tpu.memory_space<vmem>>, vector<1x128xf32>
      %14 = vector.broadcast %13 : vector<1x128xf32> to vector<128x128xf32>
      %15 = arith.mulf %12, %14 : vector<128x128xf32>
      %c0_13 = arith.constant 0 : index
      %c0_14 = arith.constant 0 : index
      %16 = vector.load %arg6[%c0_13, %c0_14] : memref<1x128xf32, #tpu.memory_space<vmem>>, vector<1x128xf32>
      %17 = vector.broadcast %16 : vector<1x128xf32> to vector<128x128xf32>
      %18 = arith.addf %15, %17 : vector<128x128xf32>
      %cst_15 = arith.constant 0.000000e+00 : f32
      %19 = vector.broadcast %cst_15 : f32 to vector<128x128xf32>
      %20 = arith.maximumf %18, %19 : vector<128x128xf32>
      %21 = arith.truncf %20 : vector<128x128xf32> to vector<128x128xbf16>
      %c0_16 = arith.constant 0 : index
      %c0_17 = arith.constant 0 : index
      %22 = vector.load %arg7[%c0_16, %c0_17] : memref<128x128xbf16, #tpu.memory_space<vmem>>, vector<128x128xbf16>
      tpu.vector_store %arg7[%c0_16, %c0_17], %21 {strides = array<i32>} : memref<128x128xbf16, #tpu.memory_space<vmem>>, vector<128x128xbf16>,
    } else {
    }
    return
  }
  func.func @transform_0(%arg0: i32, %arg1: i32, %arg2: i32) -> (i32, i32) {
    %c0_i32 = arith.constant 0 : i32
    return %arg0, %arg2 : i32, i32
  }
  func.func @transform_1(%arg0: i32, %arg1: i32, %arg2: i32) -> (i32, i32) {
    %c0_i32 = arith.constant 0 : i32
    return %arg2, %arg1 : i32, i32
  }
  func.func @transform_2(%arg0: i32, %arg1: i32, %arg2: i32) -> (i32, i32) {
    %c0_i32 = arith.constant 0 : i32
    %c0_i32_0 = arith.constant 0 : i32
    return %c0_i32, %arg1 : i32, i32
  }
  func.func @transform_3(%arg0: i32, %arg1: i32, %arg2: i32) -> (i32, i32) {
    %c0_i32 = arith.constant 0 : i32
    %c0_i32_0 = arith.constant 0 : i32
    return %c0_i32, %arg1 : i32, i32
  }
  func.func @transform_4(%arg0: i32, %arg1: i32, %arg2: i32) -> (i32, i32) {
    %c0_i32 = arith.constant 0 : i32
    return %arg0, %arg1 : i32, i32
  }
}

module attributes {stable_mosaic.version = 11 : i64} {
  func.func @_fused_matmul_kernel(%arg0: i32, %arg1: i32, %arg2: i32, %arg3: memref<128x384xbf16, #tpu.memory_space<vmem>>, %arg4: memref<384x128xbf16, #tpu.memory_space<vmem>>, %arg5: memref<1x128xf32, #tpu.memory_space<vmem>>, %arg6: memref<1x128xf32, #tpu.memory_space<vmem>>, %arg7: memref<128x128xbf16, #tpu.memory_space<vmem>>, %arg8: memref<128x128xbf16, #tpu.memory_space<vmem>>, %arg9: memref<128x128xf32, #tpu.memory_space<vmem>>) attributes {dimension_semantics = [#tpu.dimension_semantics<parallel>, #tpu.dimension_semantics<parallel>, #tpu.dimension_semantics<arbitrary>], iteration_bounds = array<i64: 1, 1, 3>, scalar_prefetch = 0 : i64, scratch_operands = 1 : i64, tpu.core_type = #tpu.core_type<tc>, window_params = [{transform_indices = @transform_0, window_bounds = array<i64: 128, 384>}, {transform_indices = @transform_1, window_bounds = array<i64: 384, 128>}, {transform_indices = @transform_2, window_bounds = array<i64: 1, 128>}, {transform_indices = @transform_3, window_bounds = array<i64: 1, 128>}, {transform_indices = @transform_4, window_bounds = array<i64: 128, 128>}, {transform_indices = @transform_5, window_bounds = array<i64: 128, 128>}]} {
    %c0_i32 = arith.constant 0 : i32
    %0 = arith.cmpi eq, %arg2, %c0_i32 : i32
    %1 = arith.extui %0 : i1 to i32
    %c0_i32_0 = arith.constant 0 : i32
    %2 = arith.cmpi ne, %1, %c0_i32_0 : i32
    scf.if %2 {
      %cst_9 = arith.constant 0.000000e+00 : f32
      %12 = vector.broadcast %cst_9 : f32 to vector<128x128xf32>
      %c0_10 = arith.constant 0 : index
      %c0_11 = arith.constant 0 : index
      %13 = vector.load %arg9[%c0_10, %c0_11] : memref<128x128xf32, #tpu.memory_space<vmem>>, vector<128x128xf32>
      tpu.vector_store %arg9[%c0_10, %c0_11], %12 {strides = array<i32>} : memref<128x128xf32, #tpu.memory_space<vmem>>, vector<128x128xf32>,
    } else {
    }
    %c0 = arith.constant 0 : index
    %c0_1 = arith.constant 0 : index
    %3 = vector.load %arg9[%c0, %c0_1] : memref<128x128xf32, #tpu.memory_space<vmem>>, vector<128x128xf32>
    %c0_2 = arith.constant 0 : index
    %c0_3 = arith.constant 0 : index
    %4 = vector.load %arg3[%c0_2, %c0_3] : memref<128x384xbf16, #tpu.memory_space<vmem>>, vector<128x384xbf16>
    %c0_4 = arith.constant 0 : index
    %c0_5 = arith.constant 0 : index
    %5 = vector.load %arg4[%c0_4, %c0_5] : memref<384x128xbf16, #tpu.memory_space<vmem>>, vector<384x128xbf16>
    %cst = arith.constant dense<0.000000e+00> : vector<128x128xf32>
    %6 = tpu.matmul %4, %5, %cst {dimension_numbers = #tpu.dot_dimension_numbers<[1], [0], [0], [1], [0, 0, 1, 1], [], []>} : vector<128x384xbf16>, vector<384x128xbf16>, vector<128x128xf32> -> vector<128x128xf32>
    %7 = arith.addf %3, %6 : vector<128x128xf32>
    %c0_6 = arith.constant 0 : index
    %c0_7 = arith.constant 0 : index
    %8 = vector.load %arg9[%c0_6, %c0_7] : memref<128x128xf32, #tpu.memory_space<vmem>>, vector<128x128xf32>
    tpu.vector_store %arg9[%c0_6, %c0_7], %7 {strides = array<i32>} : memref<128x128xf32, #tpu.memory_space<vmem>>, vector<128x128xf32>,
    %c2_i32 = arith.constant 2 : i32
    %9 = arith.cmpi eq, %arg2, %c2_i32 : i32
    %10 = arith.extui %9 : i1 to i32
    %c0_i32_8 = arith.constant 0 : i32
    %11 = arith.cmpi ne, %10, %c0_i32_8 : i32
    scf.if %11 {
      %c0_9 = arith.constant 0 : index
      %c0_10 = arith.constant 0 : index
      %12 = vector.load %arg9[%c0_9, %c0_10] : memref<128x128xf32, #tpu.memory_space<vmem>>, vector<128x128xf32>
      %c0_11 = arith.constant 0 : index
      %c0_12 = arith.constant 0 : index
      %13 = vector.load %arg5[%c0_11, %c0_12] : memref<1x128xf32, #tpu.memory_space<vmem>>, vector<1x128xf32>
      %14 = vector.broadcast %13 : vector<1x128xf32> to vector<128x128xf32>
      %15 = arith.mulf %12, %14 : vector<128x128xf32>
      %c0_13 = arith.constant 0 : index
      %c0_14 = arith.constant 0 : index
      %16 = vector.load %arg6[%c0_13, %c0_14] : memref<1x128xf32, #tpu.memory_space<vmem>>, vector<1x128xf32>
      %17 = vector.broadcast %16 : vector<1x128xf32> to vector<128x128xf32>
      %18 = arith.addf %15, %17 : vector<128x128xf32>
      %c0_15 = arith.constant 0 : index
      %c0_16 = arith.constant 0 : index
      %19 = vector.load %arg7[%c0_15, %c0_16] : memref<128x128xbf16, #tpu.memory_space<vmem>>, vector<128x128xbf16>
      %20 = arith.extf %19 : vector<128x128xbf16> to vector<128x128xf32>
      %21 = arith.addf %18, %20 : vector<128x128xf32>
      %cst_17 = arith.constant 0.000000e+00 : f32
      %22 = vector.broadcast %cst_17 : f32 to vector<128x128xf32>
      %23 = arith.maximumf %21, %22 : vector<128x128xf32>
      %24 = arith.truncf %23 : vector<128x128xf32> to vector<128x128xbf16>
      %c0_18 = arith.constant 0 : index
      %c0_19 = arith.constant 0 : index
      %25 = vector.load %arg8[%c0_18, %c0_19] : memref<128x128xbf16, #tpu.memory_space<vmem>>, vector<128x128xbf16>
      tpu.vector_store %arg8[%c0_18, %c0_19], %24 {strides = array<i32>} : memref<128x128xbf16, #tpu.memory_space<vmem>>, vector<128x128xbf16>,
    } else {
    }
    return
  }
  func.func @transform_0(%arg0: i32, %arg1: i32, %arg2: i32) -> (i32, i32) {
    %c0_i32 = arith.constant 0 : i32
    return %arg0, %arg2 : i32, i32
  }
  func.func @transform_1(%arg0: i32, %arg1: i32, %arg2: i32) -> (i32, i32) {
    %c0_i32 = arith.constant 0 : i32
    return %arg2, %arg1 : i32, i32
  }
  func.func @transform_2(%arg0: i32, %arg1: i32, %arg2: i32) -> (i32, i32) {
    %c0_i32 = arith.constant 0 : i32
    %c0_i32_0 = arith.constant 0 : i32
    return %c0_i32, %arg1 : i32, i32
  }
  func.func @transform_3(%arg0: i32, %arg1: i32, %arg2: i32) -> (i32, i32) {
    %c0_i32 = arith.constant 0 : i32
    %c0_i32_0 = arith.constant 0 : i32
    return %c0_i32, %arg1 : i32, i32
  }
  func.func @transform_4(%arg0: i32, %arg1: i32, %arg2: i32) -> (i32, i32) {
    %c0_i32 = arith.constant 0 : i32
    return %arg0, %arg1 : i32, i32
  }
  func.func @transform_5(%arg0: i32, %arg1: i32, %arg2: i32) -> (i32, i32) {
    %c0_i32 = arith.constant 0 : i32
    return %arg0, %arg1 : i32, i32
  }
}

module attributes {stable_mosaic.version = 11 : i64} {
  func.func @_fused_matmul_kernel(%arg0: i32, %arg1: i32, %arg2: i32, %arg3: memref<32x384xbf16, #tpu.memory_space<vmem>>, %arg4: memref<384x128xbf16, #tpu.memory_space<vmem>>, %arg5: memref<1x128xf32, #tpu.memory_space<vmem>>, %arg6: memref<1x128xf32, #tpu.memory_space<vmem>>, %arg7: memref<32x128xbf16, #tpu.memory_space<vmem>>, %arg8: memref<32x128xf32, #tpu.memory_space<vmem>>) attributes {dimension_semantics = [#tpu.dimension_semantics<parallel>, #tpu.dimension_semantics<parallel>, #tpu.dimension_semantics<arbitrary>], iteration_bounds = array<i64: 1, 1, 3>, scalar_prefetch = 0 : i64, scratch_operands = 1 : i64, tpu.core_type = #tpu.core_type<tc>, window_params = [{transform_indices = @transform_0, window_bounds = array<i64: 32, 384>}, {transform_indices = @transform_1, window_bounds = array<i64: 384, 128>}, {transform_indices = @transform_2, window_bounds = array<i64: 1, 128>}, {transform_indices = @transform_3, window_bounds = array<i64: 1, 128>}, {transform_indices = @transform_4, window_bounds = array<i64: 32, 128>}]} {
    %c0_i32 = arith.constant 0 : i32
    %0 = arith.cmpi eq, %arg2, %c0_i32 : i32
    %1 = arith.extui %0 : i1 to i32
    %c0_i32_0 = arith.constant 0 : i32
    %2 = arith.cmpi ne, %1, %c0_i32_0 : i32
    scf.if %2 {
      %cst_9 = arith.constant 0.000000e+00 : f32
      %12 = vector.broadcast %cst_9 : f32 to vector<32x128xf32>
      %c0_10 = arith.constant 0 : index
      %c0_11 = arith.constant 0 : index
      %13 = vector.load %arg8[%c0_10, %c0_11] : memref<32x128xf32, #tpu.memory_space<vmem>>, vector<32x128xf32>
      tpu.vector_store %arg8[%c0_10, %c0_11], %12 {strides = array<i32>} : memref<32x128xf32, #tpu.memory_space<vmem>>, vector<32x128xf32>,
    } else {
    }
    %c0 = arith.constant 0 : index
    %c0_1 = arith.constant 0 : index
    %3 = vector.load %arg8[%c0, %c0_1] : memref<32x128xf32, #tpu.memory_space<vmem>>, vector<32x128xf32>
    %c0_2 = arith.constant 0 : index
    %c0_3 = arith.constant 0 : index
    %4 = vector.load %arg3[%c0_2, %c0_3] : memref<32x384xbf16, #tpu.memory_space<vmem>>, vector<32x384xbf16>
    %c0_4 = arith.constant 0 : index
    %c0_5 = arith.constant 0 : index
    %5 = vector.load %arg4[%c0_4, %c0_5] : memref<384x128xbf16, #tpu.memory_space<vmem>>, vector<384x128xbf16>
    %cst = arith.constant dense<0.000000e+00> : vector<32x128xf32>
    %6 = tpu.matmul %4, %5, %cst {dimension_numbers = #tpu.dot_dimension_numbers<[1], [0], [0], [1], [0, 0, 1, 1], [], []>} : vector<32x384xbf16>, vector<384x128xbf16>, vector<32x128xf32> -> vector<32x128xf32>
    %7 = arith.addf %3, %6 : vector<32x128xf32>
    %c0_6 = arith.constant 0 : index
    %c0_7 = arith.constant 0 : index
    %8 = vector.load %arg8[%c0_6, %c0_7] : memref<32x128xf32, #tpu.memory_space<vmem>>, vector<32x128xf32>
    tpu.vector_store %arg8[%c0_6, %c0_7], %7 {strides = array<i32>} : memref<32x128xf32, #tpu.memory_space<vmem>>, vector<32x128xf32>,
    %c2_i32 = arith.constant 2 : i32
    %9 = arith.cmpi eq, %arg2, %c2_i32 : i32
    %10 = arith.extui %9 : i1 to i32
    %c0_i32_8 = arith.constant 0 : i32
    %11 = arith.cmpi ne, %10, %c0_i32_8 : i32
    scf.if %11 {
      %c0_9 = arith.constant 0 : index
      %c0_10 = arith.constant 0 : index
      %12 = vector.load %arg8[%c0_9, %c0_10] : memref<32x128xf32, #tpu.memory_space<vmem>>, vector<32x128xf32>
      %c0_11 = arith.constant 0 : index
      %c0_12 = arith.constant 0 : index
      %13 = vector.load %arg5[%c0_11, %c0_12] : memref<1x128xf32, #tpu.memory_space<vmem>>, vector<1x128xf32>
      %14 = vector.broadcast %13 : vector<1x128xf32> to vector<32x128xf32>
      %15 = arith.mulf %12, %14 : vector<32x128xf32>
      %c0_13 = arith.constant 0 : index
      %c0_14 = arith.constant 0 : index
      %16 = vector.load %arg6[%c0_13, %c0_14] : memref<1x128xf32, #tpu.memory_space<vmem>>, vector<1x128xf32>
      %17 = vector.broadcast %16 : vector<1x128xf32> to vector<32x128xf32>
      %18 = arith.addf %15, %17 : vector<32x128xf32>
      %cst_15 = arith.constant 0.000000e+00 : f32
      %19 = vector.broadcast %cst_15 : f32 to vector<32x128xf32>
      %20 = arith.maximumf %18, %19 : vector<32x128xf32>
      %21 = arith.truncf %20 : vector<32x128xf32> to vector<32x128xbf16>
      %c0_16 = arith.constant 0 : index
      %c0_17 = arith.constant 0 : index
      %22 = vector.load %arg7[%c0_16, %c0_17] : memref<32x128xbf16, #tpu.memory_space<vmem>>, vector<32x128xbf16>
      tpu.vector_store %arg7[%c0_16, %c0_17], %21 {strides = array<i32>} : memref<32x128xbf16, #tpu.memory_space<vmem>>, vector<32x128xbf16>,
    } else {
    }
    return
  }
  func.func @transform_0(%arg0: i32, %arg1: i32, %arg2: i32) -> (i32, i32) {
    %c0_i32 = arith.constant 0 : i32
    return %arg0, %arg2 : i32, i32
  }
  func.func @transform_1(%arg0: i32, %arg1: i32, %arg2: i32) -> (i32, i32) {
    %c0_i32 = arith.constant 0 : i32
    return %arg2, %arg1 : i32, i32
  }
  func.func @transform_2(%arg0: i32, %arg1: i32, %arg2: i32) -> (i32, i32) {
    %c0_i32 = arith.constant 0 : i32
    %c0_i32_0 = arith.constant 0 : i32
    return %c0_i32, %arg1 : i32, i32
  }
  func.func @transform_3(%arg0: i32, %arg1: i32, %arg2: i32) -> (i32, i32) {
    %c0_i32 = arith.constant 0 : i32
    %c0_i32_0 = arith.constant 0 : i32
    return %c0_i32, %arg1 : i32, i32
  }
  func.func @transform_4(%arg0: i32, %arg1: i32, %arg2: i32) -> (i32, i32) {
    %c0_i32 = arith.constant 0 : i32
    return %arg0, %arg1 : i32, i32
  }
}

module attributes {stable_mosaic.version = 11 : i64} {
  func.func @_fused_matmul_kernel(%arg0: i32, %arg1: i32, %arg2: i32, %arg3: memref<32x128xbf16, #tpu.memory_space<vmem>>, %arg4: memref<128x128xbf16, #tpu.memory_space<vmem>>, %arg5: memref<1x128xf32, #tpu.memory_space<vmem>>, %arg6: memref<1x128xf32, #tpu.memory_space<vmem>>, %arg7: memref<32x128xbf16, #tpu.memory_space<vmem>>, %arg8: memref<32x128xf32, #tpu.memory_space<vmem>>) attributes {dimension_semantics = [#tpu.dimension_semantics<parallel>, #tpu.dimension_semantics<parallel>, #tpu.dimension_semantics<arbitrary>], iteration_bounds = array<i64: 1, 1, 1>, scalar_prefetch = 0 : i64, scratch_operands = 1 : i64, tpu.core_type = #tpu.core_type<tc>, window_params = [{transform_indices = @transform_0, window_bounds = array<i64: 32, 128>}, {transform_indices = @transform_1, window_bounds = array<i64: 128, 128>}, {transform_indices = @transform_2, window_bounds = array<i64: 1, 128>}, {transform_indices = @transform_3, window_bounds = array<i64: 1, 128>}, {transform_indices = @transform_4, window_bounds = array<i64: 32, 128>}]} {
    %c0_i32 = arith.constant 0 : i32
    %0 = arith.cmpi eq, %arg2, %c0_i32 : i32
    %1 = arith.extui %0 : i1 to i32
    %c0_i32_0 = arith.constant 0 : i32
    %2 = arith.cmpi ne, %1, %c0_i32_0 : i32
    scf.if %2 {
      %cst_10 = arith.constant 0.000000e+00 : f32
      %12 = vector.broadcast %cst_10 : f32 to vector<32x128xf32>
      %c0_11 = arith.constant 0 : index
      %c0_12 = arith.constant 0 : index
      %13 = vector.load %arg8[%c0_11, %c0_12] : memref<32x128xf32, #tpu.memory_space<vmem>>, vector<32x128xf32>
      tpu.vector_store %arg8[%c0_11, %c0_12], %12 {strides = array<i32>} : memref<32x128xf32, #tpu.memory_space<vmem>>, vector<32x128xf32>,
    } else {
    }
    %c0 = arith.constant 0 : index
    %c0_1 = arith.constant 0 : index
    %3 = vector.load %arg8[%c0, %c0_1] : memref<32x128xf32, #tpu.memory_space<vmem>>, vector<32x128xf32>
    %c0_2 = arith.constant 0 : index
    %c0_3 = arith.constant 0 : index
    %4 = vector.load %arg3[%c0_2, %c0_3] : memref<32x128xbf16, #tpu.memory_space<vmem>>, vector<32x128xbf16>
    %c0_4 = arith.constant 0 : index
    %c0_5 = arith.constant 0 : index
    %5 = vector.load %arg4[%c0_4, %c0_5] : memref<128x128xbf16, #tpu.memory_space<vmem>>, vector<128x128xbf16>
    %cst = arith.constant dense<0.000000e+00> : vector<32x128xf32>
    %6 = tpu.matmul %4, %5, %cst {dimension_numbers = #tpu.dot_dimension_numbers<[1], [0], [0], [1], [0, 0, 1, 1], [], []>} : vector<32x128xbf16>, vector<128x128xbf16>, vector<32x128xf32> -> vector<32x128xf32>
    %7 = arith.addf %3, %6 : vector<32x128xf32>
    %c0_6 = arith.constant 0 : index
    %c0_7 = arith.constant 0 : index
    %8 = vector.load %arg8[%c0_6, %c0_7] : memref<32x128xf32, #tpu.memory_space<vmem>>, vector<32x128xf32>
    tpu.vector_store %arg8[%c0_6, %c0_7], %7 {strides = array<i32>} : memref<32x128xf32, #tpu.memory_space<vmem>>, vector<32x128xf32>,
    %c0_i32_8 = arith.constant 0 : i32
    %9 = arith.cmpi eq, %arg2, %c0_i32_8 : i32
    %10 = arith.extui %9 : i1 to i32
    %c0_i32_9 = arith.constant 0 : i32
    %11 = arith.cmpi ne, %10, %c0_i32_9 : i32
    scf.if %11 {
      %c0_10 = arith.constant 0 : index
      %c0_11 = arith.constant 0 : index
      %12 = vector.load %arg8[%c0_10, %c0_11] : memref<32x128xf32, #tpu.memory_space<vmem>>, vector<32x128xf32>
      %c0_12 = arith.constant 0 : index
      %c0_13 = arith.constant 0 : index
      %13 = vector.load %arg5[%c0_12, %c0_13] : memref<1x128xf32, #tpu.memory_space<vmem>>, vector<1x128xf32>
      %14 = vector.broadcast %13 : vector<1x128xf32> to vector<32x128xf32>
      %15 = arith.mulf %12, %14 : vector<32x128xf32>
      %c0_14 = arith.constant 0 : index
      %c0_15 = arith.constant 0 : index
      %16 = vector.load %arg6[%c0_14, %c0_15] : memref<1x128xf32, #tpu.memory_space<vmem>>, vector<1x128xf32>
      %17 = vector.broadcast %16 : vector<1x128xf32> to vector<32x128xf32>
      %18 = arith.addf %15, %17 : vector<32x128xf32>
      %19 = arith.truncf %18 : vector<32x128xf32> to vector<32x128xbf16>
      %c0_16 = arith.constant 0 : index
      %c0_17 = arith.constant 0 : index
      %20 = vector.load %arg7[%c0_16, %c0_17] : memref<32x128xbf16, #tpu.memory_space<vmem>>, vector<32x128xbf16>
      tpu.vector_store %arg7[%c0_16, %c0_17], %19 {strides = array<i32>} : memref<32x128xbf16, #tpu.memory_space<vmem>>, vector<32x128xbf16>,
    } else {
    }
    return
  }
  func.func @transform_0(%arg0: i32, %arg1: i32, %arg2: i32) -> (i32, i32) {
    %c0_i32 = arith.constant 0 : i32
    return %arg0, %arg2 : i32, i32
  }
  func.func @transform_1(%arg0: i32, %arg1: i32, %arg2: i32) -> (i32, i32) {
    %c0_i32 = arith.constant 0 : i32
    return %arg2, %arg1 : i32, i32
  }
  func.func @transform_2(%arg0: i32, %arg1: i32, %arg2: i32) -> (i32, i32) {
    %c0_i32 = arith.constant 0 : i32
    %c0_i32_0 = arith.constant 0 : i32
    return %c0_i32, %arg1 : i32, i32
  }
  func.func @transform_3(%arg0: i32, %arg1: i32, %arg2: i32) -> (i32, i32) {
    %c0_i32 = arith.constant 0 : i32
    %c0_i32_0 = arith.constant 0 : i32
    return %c0_i32, %arg1 : i32, i32
  }
  func.func @transform_4(%arg0: i32, %arg1: i32, %arg2: i32) -> (i32, i32) {
    %c0_i32 = arith.constant 0 : i32
    return %arg0, %arg1 : i32, i32
  }
}

module attributes {stable_mosaic.version = 11 : i64} {
  func.func @_fused_matmul_kernel(%arg0: i32, %arg1: i32, %arg2: i32, %arg3: memref<32x384xbf16, #tpu.memory_space<vmem>>, %arg4: memref<384x128xbf16, #tpu.memory_space<vmem>>, %arg5: memref<1x128xf32, #tpu.memory_space<vmem>>, %arg6: memref<1x128xf32, #tpu.memory_space<vmem>>, %arg7: memref<32x128xbf16, #tpu.memory_space<vmem>>, %arg8: memref<32x128xbf16, #tpu.memory_space<vmem>>, %arg9: memref<32x128xf32, #tpu.memory_space<vmem>>) attributes {dimension_semantics = [#tpu.dimension_semantics<parallel>, #tpu.dimension_semantics<parallel>, #tpu.dimension_semantics<arbitrary>], iteration_bounds = array<i64: 1, 1, 3>, scalar_prefetch = 0 : i64, scratch_operands = 1 : i64, tpu.core_type = #tpu.core_type<tc>, window_params = [{transform_indices = @transform_0, window_bounds = array<i64: 32, 384>}, {transform_indices = @transform_1, window_bounds = array<i64: 384, 128>}, {transform_indices = @transform_2, window_bounds = array<i64: 1, 128>}, {transform_indices = @transform_3, window_bounds = array<i64: 1, 128>}, {transform_indices = @transform_4, window_bounds = array<i64: 32, 128>}, {transform_indices = @transform_5, window_bounds = array<i64: 32, 128>}]} {
    %c0_i32 = arith.constant 0 : i32
    %0 = arith.cmpi eq, %arg2, %c0_i32 : i32
    %1 = arith.extui %0 : i1 to i32
    %c0_i32_0 = arith.constant 0 : i32
    %2 = arith.cmpi ne, %1, %c0_i32_0 : i32
    scf.if %2 {
      %cst_9 = arith.constant 0.000000e+00 : f32
      %12 = vector.broadcast %cst_9 : f32 to vector<32x128xf32>
      %c0_10 = arith.constant 0 : index
      %c0_11 = arith.constant 0 : index
      %13 = vector.load %arg9[%c0_10, %c0_11] : memref<32x128xf32, #tpu.memory_space<vmem>>, vector<32x128xf32>
      tpu.vector_store %arg9[%c0_10, %c0_11], %12 {strides = array<i32>} : memref<32x128xf32, #tpu.memory_space<vmem>>, vector<32x128xf32>,
    } else {
    }
    %c0 = arith.constant 0 : index
    %c0_1 = arith.constant 0 : index
    %3 = vector.load %arg9[%c0, %c0_1] : memref<32x128xf32, #tpu.memory_space<vmem>>, vector<32x128xf32>
    %c0_2 = arith.constant 0 : index
    %c0_3 = arith.constant 0 : index
    %4 = vector.load %arg3[%c0_2, %c0_3] : memref<32x384xbf16, #tpu.memory_space<vmem>>, vector<32x384xbf16>
    %c0_4 = arith.constant 0 : index
    %c0_5 = arith.constant 0 : index
    %5 = vector.load %arg4[%c0_4, %c0_5] : memref<384x128xbf16, #tpu.memory_space<vmem>>, vector<384x128xbf16>
    %cst = arith.constant dense<0.000000e+00> : vector<32x128xf32>
    %6 = tpu.matmul %4, %5, %cst {dimension_numbers = #tpu.dot_dimension_numbers<[1], [0], [0], [1], [0, 0, 1, 1], [], []>} : vector<32x384xbf16>, vector<384x128xbf16>, vector<32x128xf32> -> vector<32x128xf32>
    %7 = arith.addf %3, %6 : vector<32x128xf32>
    %c0_6 = arith.constant 0 : index
    %c0_7 = arith.constant 0 : index
    %8 = vector.load %arg9[%c0_6, %c0_7] : memref<32x128xf32, #tpu.memory_space<vmem>>, vector<32x128xf32>
    tpu.vector_store %arg9[%c0_6, %c0_7], %7 {strides = array<i32>} : memref<32x128xf32, #tpu.memory_space<vmem>>, vector<32x128xf32>,
    %c2_i32 = arith.constant 2 : i32
    %9 = arith.cmpi eq, %arg2, %c2_i32 : i32
    %10 = arith.extui %9 : i1 to i32
    %c0_i32_8 = arith.constant 0 : i32
    %11 = arith.cmpi ne, %10, %c0_i32_8 : i32
    scf.if %11 {
      %c0_9 = arith.constant 0 : index
      %c0_10 = arith.constant 0 : index
      %12 = vector.load %arg9[%c0_9, %c0_10] : memref<32x128xf32, #tpu.memory_space<vmem>>, vector<32x128xf32>
      %c0_11 = arith.constant 0 : index
      %c0_12 = arith.constant 0 : index
      %13 = vector.load %arg5[%c0_11, %c0_12] : memref<1x128xf32, #tpu.memory_space<vmem>>, vector<1x128xf32>
      %14 = vector.broadcast %13 : vector<1x128xf32> to vector<32x128xf32>
      %15 = arith.mulf %12, %14 : vector<32x128xf32>
      %c0_13 = arith.constant 0 : index
      %c0_14 = arith.constant 0 : index
      %16 = vector.load %arg6[%c0_13, %c0_14] : memref<1x128xf32, #tpu.memory_space<vmem>>, vector<1x128xf32>
      %17 = vector.broadcast %16 : vector<1x128xf32> to vector<32x128xf32>
      %18 = arith.addf %15, %17 : vector<32x128xf32>
      %c0_15 = arith.constant 0 : index
      %c0_16 = arith.constant 0 : index
      %19 = vector.load %arg7[%c0_15, %c0_16] : memref<32x128xbf16, #tpu.memory_space<vmem>>, vector<32x128xbf16>
      %20 = arith.extf %19 : vector<32x128xbf16> to vector<32x128xf32>
      %21 = arith.addf %18, %20 : vector<32x128xf32>
      %cst_17 = arith.constant 0.000000e+00 : f32
      %22 = vector.broadcast %cst_17 : f32 to vector<32x128xf32>
      %23 = arith.maximumf %21, %22 : vector<32x128xf32>
      %24 = arith.truncf %23 : vector<32x128xf32> to vector<32x128xbf16>
      %c0_18 = arith.constant 0 : index
      %c0_19 = arith.constant 0 : index
      %25 = vector.load %arg8[%c0_18, %c0_19] : memref<32x128xbf16, #tpu.memory_space<vmem>>, vector<32x128xbf16>
      tpu.vector_store %arg8[%c0_18, %c0_19], %24 {strides = array<i32>} : memref<32x128xbf16, #tpu.memory_space<vmem>>, vector<32x128xbf16>,
    } else {
    }
    return
  }
  func.func @transform_0(%arg0: i32, %arg1: i32, %arg2: i32) -> (i32, i32) {
    %c0_i32 = arith.constant 0 : i32
    return %arg0, %arg2 : i32, i32
  }
  func.func @transform_1(%arg0: i32, %arg1: i32, %arg2: i32) -> (i32, i32) {
    %c0_i32 = arith.constant 0 : i32
    return %arg2, %arg1 : i32, i32
  }
  func.func @transform_2(%arg0: i32, %arg1: i32, %arg2: i32) -> (i32, i32) {
    %c0_i32 = arith.constant 0 : i32
    %c0_i32_0 = arith.constant 0 : i32
    return %c0_i32, %arg1 : i32, i32
  }
  func.func @transform_3(%arg0: i32, %arg1: i32, %arg2: i32) -> (i32, i32) {
    %c0_i32 = arith.constant 0 : i32
    %c0_i32_0 = arith.constant 0 : i32
    return %c0_i32, %arg1 : i32, i32
  }
  func.func @transform_4(%arg0: i32, %arg1: i32, %arg2: i32) -> (i32, i32) {
    %c0_i32 = arith.constant 0 : i32
    return %arg0, %arg1 : i32, i32
  }
  func.func @transform_5(%arg0: i32, %arg1: i32, %arg2: i32) -> (i32, i32) {
    %c0_i32 = arith.constant 0 : i32
    return %arg0, %arg1 : i32, i32
  }
}

module attributes {stable_mosaic.version = 11 : i64} {
  func.func @_fused_matmul_kernel(%arg0: i32, %arg1: i32, %arg2: i32, %arg3: memref<8x384xbf16, #tpu.memory_space<vmem>>, %arg4: memref<384x256xbf16, #tpu.memory_space<vmem>>, %arg5: memref<1x256xf32, #tpu.memory_space<vmem>>, %arg6: memref<1x256xf32, #tpu.memory_space<vmem>>, %arg7: memref<8x256xbf16, #tpu.memory_space<vmem>>, %arg8: memref<8x256xf32, #tpu.memory_space<vmem>>) attributes {dimension_semantics = [#tpu.dimension_semantics<parallel>, #tpu.dimension_semantics<parallel>, #tpu.dimension_semantics<arbitrary>], iteration_bounds = array<i64: 1, 1, 3>, scalar_prefetch = 0 : i64, scratch_operands = 1 : i64, tpu.core_type = #tpu.core_type<tc>, window_params = [{transform_indices = @transform_0, window_bounds = array<i64: 8, 384>}, {transform_indices = @transform_1, window_bounds = array<i64: 384, 256>}, {transform_indices = @transform_2, window_bounds = array<i64: 1, 256>}, {transform_indices = @transform_3, window_bounds = array<i64: 1, 256>}, {transform_indices = @transform_4, window_bounds = array<i64: 8, 256>}]} {
    %c0_i32 = arith.constant 0 : i32
    %0 = arith.cmpi eq, %arg2, %c0_i32 : i32
    %1 = arith.extui %0 : i1 to i32
    %c0_i32_0 = arith.constant 0 : i32
    %2 = arith.cmpi ne, %1, %c0_i32_0 : i32
    scf.if %2 {
      %cst_9 = arith.constant 0.000000e+00 : f32
      %12 = vector.broadcast %cst_9 : f32 to vector<8x256xf32>
      %c0_10 = arith.constant 0 : index
      %c0_11 = arith.constant 0 : index
      %13 = vector.load %arg8[%c0_10, %c0_11] : memref<8x256xf32, #tpu.memory_space<vmem>>, vector<8x256xf32>
      tpu.vector_store %arg8[%c0_10, %c0_11], %12 {strides = array<i32>} : memref<8x256xf32, #tpu.memory_space<vmem>>, vector<8x256xf32>,
    } else {
    }
    %c0 = arith.constant 0 : index
    %c0_1 = arith.constant 0 : index
    %3 = vector.load %arg8[%c0, %c0_1] : memref<8x256xf32, #tpu.memory_space<vmem>>, vector<8x256xf32>
    %c0_2 = arith.constant 0 : index
    %c0_3 = arith.constant 0 : index
    %4 = vector.load %arg3[%c0_2, %c0_3] : memref<8x384xbf16, #tpu.memory_space<vmem>>, vector<8x384xbf16>
    %c0_4 = arith.constant 0 : index
    %c0_5 = arith.constant 0 : index
    %5 = vector.load %arg4[%c0_4, %c0_5] : memref<384x256xbf16, #tpu.memory_space<vmem>>, vector<384x256xbf16>
    %cst = arith.constant dense<0.000000e+00> : vector<8x256xf32>
    %6 = tpu.matmul %4, %5, %cst {dimension_numbers = #tpu.dot_dimension_numbers<[1], [0], [0], [1], [0, 0, 1, 1], [], []>} : vector<8x384xbf16>, vector<384x256xbf16>, vector<8x256xf32> -> vector<8x256xf32>
    %7 = arith.addf %3, %6 : vector<8x256xf32>
    %c0_6 = arith.constant 0 : index
    %c0_7 = arith.constant 0 : index
    %8 = vector.load %arg8[%c0_6, %c0_7] : memref<8x256xf32, #tpu.memory_space<vmem>>, vector<8x256xf32>
    tpu.vector_store %arg8[%c0_6, %c0_7], %7 {strides = array<i32>} : memref<8x256xf32, #tpu.memory_space<vmem>>, vector<8x256xf32>,
    %c2_i32 = arith.constant 2 : i32
    %9 = arith.cmpi eq, %arg2, %c2_i32 : i32
    %10 = arith.extui %9 : i1 to i32
    %c0_i32_8 = arith.constant 0 : i32
    %11 = arith.cmpi ne, %10, %c0_i32_8 : i32
    scf.if %11 {
      %c0_9 = arith.constant 0 : index
      %c0_10 = arith.constant 0 : index
      %12 = vector.load %arg8[%c0_9, %c0_10] : memref<8x256xf32, #tpu.memory_space<vmem>>, vector<8x256xf32>
      %c0_11 = arith.constant 0 : index
      %c0_12 = arith.constant 0 : index
      %13 = vector.load %arg5[%c0_11, %c0_12] : memref<1x256xf32, #tpu.memory_space<vmem>>, vector<1x256xf32>
      %14 = vector.broadcast %13 : vector<1x256xf32> to vector<8x256xf32>
      %15 = arith.mulf %12, %14 : vector<8x256xf32>
      %c0_13 = arith.constant 0 : index
      %c0_14 = arith.constant 0 : index
      %16 = vector.load %arg6[%c0_13, %c0_14] : memref<1x256xf32, #tpu.memory_space<vmem>>, vector<1x256xf32>
      %17 = vector.broadcast %16 : vector<1x256xf32> to vector<8x256xf32>
      %18 = arith.addf %15, %17 : vector<8x256xf32>
      %cst_15 = arith.constant 0.000000e+00 : f32
      %19 = vector.broadcast %cst_15 : f32 to vector<8x256xf32>
      %20 = arith.maximumf %18, %19 : vector<8x256xf32>
      %21 = arith.truncf %20 : vector<8x256xf32> to vector<8x256xbf16>
      %c0_16 = arith.constant 0 : index
      %c0_17 = arith.constant 0 : index
      %22 = vector.load %arg7[%c0_16, %c0_17] : memref<8x256xbf16, #tpu.memory_space<vmem>>, vector<8x256xbf16>
      tpu.vector_store %arg7[%c0_16, %c0_17], %21 {strides = array<i32>} : memref<8x256xbf16, #tpu.memory_space<vmem>>, vector<8x256xbf16>,
    } else {
    }
    return
  }
  func.func @transform_0(%arg0: i32, %arg1: i32, %arg2: i32) -> (i32, i32) {
    %c0_i32 = arith.constant 0 : i32
    return %arg0, %arg2 : i32, i32
  }
  func.func @transform_1(%arg0: i32, %arg1: i32, %arg2: i32) -> (i32, i32) {
    %c0_i32 = arith.constant 0 : i32
    return %arg2, %arg1 : i32, i32
  }
  func.func @transform_2(%arg0: i32, %arg1: i32, %arg2: i32) -> (i32, i32) {
    %c0_i32 = arith.constant 0 : i32
    %c0_i32_0 = arith.constant 0 : i32
    return %c0_i32, %arg1 : i32, i32
  }
  func.func @transform_3(%arg0: i32, %arg1: i32, %arg2: i32) -> (i32, i32) {
    %c0_i32 = arith.constant 0 : i32
    %c0_i32_0 = arith.constant 0 : i32
    return %c0_i32, %arg1 : i32, i32
  }
  func.func @transform_4(%arg0: i32, %arg1: i32, %arg2: i32) -> (i32, i32) {
    %c0_i32 = arith.constant 0 : i32
    return %arg0, %arg1 : i32, i32
  }
}

module attributes {stable_mosaic.version = 11 : i64} {
  func.func @_fused_matmul_kernel(%arg0: i32, %arg1: i32, %arg2: i32, %arg3: memref<8x128xbf16, #tpu.memory_space<vmem>>, %arg4: memref<128x256xbf16, #tpu.memory_space<vmem>>, %arg5: memref<1x256xf32, #tpu.memory_space<vmem>>, %arg6: memref<1x256xf32, #tpu.memory_space<vmem>>, %arg7: memref<8x256xbf16, #tpu.memory_space<vmem>>, %arg8: memref<8x256xf32, #tpu.memory_space<vmem>>) attributes {dimension_semantics = [#tpu.dimension_semantics<parallel>, #tpu.dimension_semantics<parallel>, #tpu.dimension_semantics<arbitrary>], iteration_bounds = array<i64: 1, 1, 1>, scalar_prefetch = 0 : i64, scratch_operands = 1 : i64, tpu.core_type = #tpu.core_type<tc>, window_params = [{transform_indices = @transform_0, window_bounds = array<i64: 8, 128>}, {transform_indices = @transform_1, window_bounds = array<i64: 128, 256>}, {transform_indices = @transform_2, window_bounds = array<i64: 1, 256>}, {transform_indices = @transform_3, window_bounds = array<i64: 1, 256>}, {transform_indices = @transform_4, window_bounds = array<i64: 8, 256>}]} {
    %c0_i32 = arith.constant 0 : i32
    %0 = arith.cmpi eq, %arg2, %c0_i32 : i32
    %1 = arith.extui %0 : i1 to i32
    %c0_i32_0 = arith.constant 0 : i32
    %2 = arith.cmpi ne, %1, %c0_i32_0 : i32
    scf.if %2 {
      %cst_10 = arith.constant 0.000000e+00 : f32
      %12 = vector.broadcast %cst_10 : f32 to vector<8x256xf32>
      %c0_11 = arith.constant 0 : index
      %c0_12 = arith.constant 0 : index
      %13 = vector.load %arg8[%c0_11, %c0_12] : memref<8x256xf32, #tpu.memory_space<vmem>>, vector<8x256xf32>
      tpu.vector_store %arg8[%c0_11, %c0_12], %12 {strides = array<i32>} : memref<8x256xf32, #tpu.memory_space<vmem>>, vector<8x256xf32>,
    } else {
    }
    %c0 = arith.constant 0 : index
    %c0_1 = arith.constant 0 : index
    %3 = vector.load %arg8[%c0, %c0_1] : memref<8x256xf32, #tpu.memory_space<vmem>>, vector<8x256xf32>
    %c0_2 = arith.constant 0 : index
    %c0_3 = arith.constant 0 : index
    %4 = vector.load %arg3[%c0_2, %c0_3] : memref<8x128xbf16, #tpu.memory_space<vmem>>, vector<8x128xbf16>
    %c0_4 = arith.constant 0 : index
    %c0_5 = arith.constant 0 : index
    %5 = vector.load %arg4[%c0_4, %c0_5] : memref<128x256xbf16, #tpu.memory_space<vmem>>, vector<128x256xbf16>
    %cst = arith.constant dense<0.000000e+00> : vector<8x256xf32>
    %6 = tpu.matmul %4, %5, %cst {dimension_numbers = #tpu.dot_dimension_numbers<[1], [0], [0], [1], [0, 0, 1, 1], [], []>} : vector<8x128xbf16>, vector<128x256xbf16>, vector<8x256xf32> -> vector<8x256xf32>
    %7 = arith.addf %3, %6 : vector<8x256xf32>
    %c0_6 = arith.constant 0 : index
    %c0_7 = arith.constant 0 : index
    %8 = vector.load %arg8[%c0_6, %c0_7] : memref<8x256xf32, #tpu.memory_space<vmem>>, vector<8x256xf32>
    tpu.vector_store %arg8[%c0_6, %c0_7], %7 {strides = array<i32>} : memref<8x256xf32, #tpu.memory_space<vmem>>, vector<8x256xf32>,
    %c0_i32_8 = arith.constant 0 : i32
    %9 = arith.cmpi eq, %arg2, %c0_i32_8 : i32
    %10 = arith.extui %9 : i1 to i32
    %c0_i32_9 = arith.constant 0 : i32
    %11 = arith.cmpi ne, %10, %c0_i32_9 : i32
    scf.if %11 {
      %c0_10 = arith.constant 0 : index
      %c0_11 = arith.constant 0 : index
      %12 = vector.load %arg8[%c0_10, %c0_11] : memref<8x256xf32, #tpu.memory_space<vmem>>, vector<8x256xf32>
      %c0_12 = arith.constant 0 : index
      %c0_13 = arith.constant 0 : index
      %13 = vector.load %arg5[%c0_12, %c0_13] : memref<1x256xf32, #tpu.memory_space<vmem>>, vector<1x256xf32>
      %14 = vector.broadcast %13 : vector<1x256xf32> to vector<8x256xf32>
      %15 = arith.mulf %12, %14 : vector<8x256xf32>
      %c0_14 = arith.constant 0 : index
      %c0_15 = arith.constant 0 : index
      %16 = vector.load %arg6[%c0_14, %c0_15] : memref<1x256xf32, #tpu.memory_space<vmem>>, vector<1x256xf32>
      %17 = vector.broadcast %16 : vector<1x256xf32> to vector<8x256xf32>
      %18 = arith.addf %15, %17 : vector<8x256xf32>
      %19 = arith.truncf %18 : vector<8x256xf32> to vector<8x256xbf16>
      %c0_16 = arith.constant 0 : index
      %c0_17 = arith.constant 0 : index
      %20 = vector.load %arg7[%c0_16, %c0_17] : memref<8x256xbf16, #tpu.memory_space<vmem>>, vector<8x256xbf16>
      tpu.vector_store %arg7[%c0_16, %c0_17], %19 {strides = array<i32>} : memref<8x256xbf16, #tpu.memory_space<vmem>>, vector<8x256xbf16>,
    } else {
    }
    return
  }
  func.func @transform_0(%arg0: i32, %arg1: i32, %arg2: i32) -> (i32, i32) {
    %c0_i32 = arith.constant 0 : i32
    return %arg0, %arg2 : i32, i32
  }
  func.func @transform_1(%arg0: i32, %arg1: i32, %arg2: i32) -> (i32, i32) {
    %c0_i32 = arith.constant 0 : i32
    return %arg2, %arg1 : i32, i32
  }
  func.func @transform_2(%arg0: i32, %arg1: i32, %arg2: i32) -> (i32, i32) {
    %c0_i32 = arith.constant 0 : i32
    %c0_i32_0 = arith.constant 0 : i32
    return %c0_i32, %arg1 : i32, i32
  }
  func.func @transform_3(%arg0: i32, %arg1: i32, %arg2: i32) -> (i32, i32) {
    %c0_i32 = arith.constant 0 : i32
    %c0_i32_0 = arith.constant 0 : i32
    return %c0_i32, %arg1 : i32, i32
  }
  func.func @transform_4(%arg0: i32, %arg1: i32, %arg2: i32) -> (i32, i32) {
    %c0_i32 = arith.constant 0 : i32
    return %arg0, %arg1 : i32, i32
  }
}

module attributes {stable_mosaic.version = 11 : i64} {
  func.func @_fused_matmul_kernel(%arg0: i32, %arg1: i32, %arg2: i32, %arg3: memref<8x384xbf16, #tpu.memory_space<vmem>>, %arg4: memref<384x256xbf16, #tpu.memory_space<vmem>>, %arg5: memref<1x256xf32, #tpu.memory_space<vmem>>, %arg6: memref<1x256xf32, #tpu.memory_space<vmem>>, %arg7: memref<8x256xbf16, #tpu.memory_space<vmem>>, %arg8: memref<8x256xbf16, #tpu.memory_space<vmem>>, %arg9: memref<8x256xf32, #tpu.memory_space<vmem>>) attributes {dimension_semantics = [#tpu.dimension_semantics<parallel>, #tpu.dimension_semantics<parallel>, #tpu.dimension_semantics<arbitrary>], iteration_bounds = array<i64: 1, 1, 6>, scalar_prefetch = 0 : i64, scratch_operands = 1 : i64, tpu.core_type = #tpu.core_type<tc>, window_params = [{transform_indices = @transform_0, window_bounds = array<i64: 8, 384>}, {transform_indices = @transform_1, window_bounds = array<i64: 384, 256>}, {transform_indices = @transform_2, window_bounds = array<i64: 1, 256>}, {transform_indices = @transform_3, window_bounds = array<i64: 1, 256>}, {transform_indices = @transform_4, window_bounds = array<i64: 8, 256>}, {transform_indices = @transform_5, window_bounds = array<i64: 8, 256>}]} {
    %c0_i32 = arith.constant 0 : i32
    %0 = arith.cmpi eq, %arg2, %c0_i32 : i32
    %1 = arith.extui %0 : i1 to i32
    %c0_i32_0 = arith.constant 0 : i32
    %2 = arith.cmpi ne, %1, %c0_i32_0 : i32
    scf.if %2 {
      %cst_9 = arith.constant 0.000000e+00 : f32
      %12 = vector.broadcast %cst_9 : f32 to vector<8x256xf32>
      %c0_10 = arith.constant 0 : index
      %c0_11 = arith.constant 0 : index
      %13 = vector.load %arg9[%c0_10, %c0_11] : memref<8x256xf32, #tpu.memory_space<vmem>>, vector<8x256xf32>
      tpu.vector_store %arg9[%c0_10, %c0_11], %12 {strides = array<i32>} : memref<8x256xf32, #tpu.memory_space<vmem>>, vector<8x256xf32>,
    } else {
    }
    %c0 = arith.constant 0 : index
    %c0_1 = arith.constant 0 : index
    %3 = vector.load %arg9[%c0, %c0_1] : memref<8x256xf32, #tpu.memory_space<vmem>>, vector<8x256xf32>
    %c0_2 = arith.constant 0 : index
    %c0_3 = arith.constant 0 : index
    %4 = vector.load %arg3[%c0_2, %c0_3] : memref<8x384xbf16, #tpu.memory_space<vmem>>, vector<8x384xbf16>
    %c0_4 = arith.constant 0 : index
    %c0_5 = arith.constant 0 : index
    %5 = vector.load %arg4[%c0_4, %c0_5] : memref<384x256xbf16, #tpu.memory_space<vmem>>, vector<384x256xbf16>
    %cst = arith.constant dense<0.000000e+00> : vector<8x256xf32>
    %6 = tpu.matmul %4, %5, %cst {dimension_numbers = #tpu.dot_dimension_numbers<[1], [0], [0], [1], [0, 0, 1, 1], [], []>} : vector<8x384xbf16>, vector<384x256xbf16>, vector<8x256xf32> -> vector<8x256xf32>
    %7 = arith.addf %3, %6 : vector<8x256xf32>
    %c0_6 = arith.constant 0 : index
    %c0_7 = arith.constant 0 : index
    %8 = vector.load %arg9[%c0_6, %c0_7] : memref<8x256xf32, #tpu.memory_space<vmem>>, vector<8x256xf32>
    tpu.vector_store %arg9[%c0_6, %c0_7], %7 {strides = array<i32>} : memref<8x256xf32, #tpu.memory_space<vmem>>, vector<8x256xf32>,
    %c5_i32 = arith.constant 5 : i32
    %9 = arith.cmpi eq, %arg2, %c5_i32 : i32
    %10 = arith.extui %9 : i1 to i32
    %c0_i32_8 = arith.constant 0 : i32
    %11 = arith.cmpi ne, %10, %c0_i32_8 : i32
    scf.if %11 {
      %c0_9 = arith.constant 0 : index
      %c0_10 = arith.constant 0 : index
      %12 = vector.load %arg9[%c0_9, %c0_10] : memref<8x256xf32, #tpu.memory_space<vmem>>, vector<8x256xf32>
      %c0_11 = arith.constant 0 : index
      %c0_12 = arith.constant 0 : index
      %13 = vector.load %arg5[%c0_11, %c0_12] : memref<1x256xf32, #tpu.memory_space<vmem>>, vector<1x256xf32>
      %14 = vector.broadcast %13 : vector<1x256xf32> to vector<8x256xf32>
      %15 = arith.mulf %12, %14 : vector<8x256xf32>
      %c0_13 = arith.constant 0 : index
      %c0_14 = arith.constant 0 : index
      %16 = vector.load %arg6[%c0_13, %c0_14] : memref<1x256xf32, #tpu.memory_space<vmem>>, vector<1x256xf32>
      %17 = vector.broadcast %16 : vector<1x256xf32> to vector<8x256xf32>
      %18 = arith.addf %15, %17 : vector<8x256xf32>
      %c0_15 = arith.constant 0 : index
      %c0_16 = arith.constant 0 : index
      %19 = vector.load %arg7[%c0_15, %c0_16] : memref<8x256xbf16, #tpu.memory_space<vmem>>, vector<8x256xbf16>
      %20 = arith.extf %19 : vector<8x256xbf16> to vector<8x256xf32>
      %21 = arith.addf %18, %20 : vector<8x256xf32>
      %cst_17 = arith.constant 0.000000e+00 : f32
      %22 = vector.broadcast %cst_17 : f32 to vector<8x256xf32>
      %23 = arith.maximumf %21, %22 : vector<8x256xf32>
      %24 = arith.truncf %23 : vector<8x256xf32> to vector<8x256xbf16>
      %c0_18 = arith.constant 0 : index
      %c0_19 = arith.constant 0 : index
      %25 = vector.load %arg8[%c0_18, %c0_19] : memref<8x256xbf16, #tpu.memory_space<vmem>>, vector<8x256xbf16>
      tpu.vector_store %arg8[%c0_18, %c0_19], %24 {strides = array<i32>} : memref<8x256xbf16, #tpu.memory_space<vmem>>, vector<8x256xbf16>,
    } else {
    }
    return
  }
  func.func @transform_0(%arg0: i32, %arg1: i32, %arg2: i32) -> (i32, i32) {
    %c0_i32 = arith.constant 0 : i32
    return %arg0, %arg2 : i32, i32
  }
  func.func @transform_1(%arg0: i32, %arg1: i32, %arg2: i32) -> (i32, i32) {
    %c0_i32 = arith.constant 0 : i32
    return %arg2, %arg1 : i32, i32
  }
  func.func @transform_2(%arg0: i32, %arg1: i32, %arg2: i32) -> (i32, i32) {
    %c0_i32 = arith.constant 0 : i32
    %c0_i32_0 = arith.constant 0 : i32
    return %c0_i32, %arg1 : i32, i32
  }
  func.func @transform_3(%arg0: i32, %arg1: i32, %arg2: i32) -> (i32, i32) {
    %c0_i32 = arith.constant 0 : i32
    %c0_i32_0 = arith.constant 0 : i32
    return %c0_i32, %arg1 : i32, i32
  }
  func.func @transform_4(%arg0: i32, %arg1: i32, %arg2: i32) -> (i32, i32) {
    %c0_i32 = arith.constant 0 : i32
    return %arg0, %arg1 : i32, i32
  }
  func.func @transform_5(%arg0: i32, %arg1: i32, %arg2: i32) -> (i32, i32) {
    %c0_i32 = arith.constant 0 : i32
    return %arg0, %arg1 : i32, i32
  }
}

module attributes {stable_mosaic.version = 11 : i64} {
  func.func @_fused_matmul_kernel(%arg0: i32, %arg1: i32, %arg2: i32, %arg3: memref<8x384xbf16, #tpu.memory_space<vmem>>, %arg4: memref<384x256xbf16, #tpu.memory_space<vmem>>, %arg5: memref<1x256xf32, #tpu.memory_space<vmem>>, %arg6: memref<1x256xf32, #tpu.memory_space<vmem>>, %arg7: memref<8x256xbf16, #tpu.memory_space<vmem>>, %arg8: memref<8x256xf32, #tpu.memory_space<vmem>>) attributes {dimension_semantics = [#tpu.dimension_semantics<parallel>, #tpu.dimension_semantics<parallel>, #tpu.dimension_semantics<arbitrary>], iteration_bounds = array<i64: 1, 2, 6>, scalar_prefetch = 0 : i64, scratch_operands = 1 : i64, tpu.core_type = #tpu.core_type<tc>, window_params = [{transform_indices = @transform_0, window_bounds = array<i64: 8, 384>}, {transform_indices = @transform_1, window_bounds = array<i64: 384, 256>}, {transform_indices = @transform_2, window_bounds = array<i64: 1, 256>}, {transform_indices = @transform_3, window_bounds = array<i64: 1, 256>}, {transform_indices = @transform_4, window_bounds = array<i64: 8, 256>}]} {
    %c0_i32 = arith.constant 0 : i32
    %0 = arith.cmpi eq, %arg2, %c0_i32 : i32
    %1 = arith.extui %0 : i1 to i32
    %c0_i32_0 = arith.constant 0 : i32
    %2 = arith.cmpi ne, %1, %c0_i32_0 : i32
    scf.if %2 {
      %cst_9 = arith.constant 0.000000e+00 : f32
      %12 = vector.broadcast %cst_9 : f32 to vector<8x256xf32>
      %c0_10 = arith.constant 0 : index
      %c0_11 = arith.constant 0 : index
      %13 = vector.load %arg8[%c0_10, %c0_11] : memref<8x256xf32, #tpu.memory_space<vmem>>, vector<8x256xf32>
      tpu.vector_store %arg8[%c0_10, %c0_11], %12 {strides = array<i32>} : memref<8x256xf32, #tpu.memory_space<vmem>>, vector<8x256xf32>,
    } else {
    }
    %c0 = arith.constant 0 : index
    %c0_1 = arith.constant 0 : index
    %3 = vector.load %arg8[%c0, %c0_1] : memref<8x256xf32, #tpu.memory_space<vmem>>, vector<8x256xf32>
    %c0_2 = arith.constant 0 : index
    %c0_3 = arith.constant 0 : index
    %4 = vector.load %arg3[%c0_2, %c0_3] : memref<8x384xbf16, #tpu.memory_space<vmem>>, vector<8x384xbf16>
    %c0_4 = arith.constant 0 : index
    %c0_5 = arith.constant 0 : index
    %5 = vector.load %arg4[%c0_4, %c0_5] : memref<384x256xbf16, #tpu.memory_space<vmem>>, vector<384x256xbf16>
    %cst = arith.constant dense<0.000000e+00> : vector<8x256xf32>
    %6 = tpu.matmul %4, %5, %cst {dimension_numbers = #tpu.dot_dimension_numbers<[1], [0], [0], [1], [0, 0, 1, 1], [], []>} : vector<8x384xbf16>, vector<384x256xbf16>, vector<8x256xf32> -> vector<8x256xf32>
    %7 = arith.addf %3, %6 : vector<8x256xf32>
    %c0_6 = arith.constant 0 : index
    %c0_7 = arith.constant 0 : index
    %8 = vector.load %arg8[%c0_6, %c0_7] : memref<8x256xf32, #tpu.memory_space<vmem>>, vector<8x256xf32>
    tpu.vector_store %arg8[%c0_6, %c0_7], %7 {strides = array<i32>} : memref<8x256xf32, #tpu.memory_space<vmem>>, vector<8x256xf32>,
    %c5_i32 = arith.constant 5 : i32
    %9 = arith.cmpi eq, %arg2, %c5_i32 : i32
    %10 = arith.extui %9 : i1 to i32
    %c0_i32_8 = arith.constant 0 : i32
    %11 = arith.cmpi ne, %10, %c0_i32_8 : i32
    scf.if %11 {
      %c0_9 = arith.constant 0 : index
      %c0_10 = arith.constant 0 : index
      %12 = vector.load %arg8[%c0_9, %c0_10] : memref<8x256xf32, #tpu.memory_space<vmem>>, vector<8x256xf32>
      %c0_11 = arith.constant 0 : index
      %c0_12 = arith.constant 0 : index
      %13 = vector.load %arg5[%c0_11, %c0_12] : memref<1x256xf32, #tpu.memory_space<vmem>>, vector<1x256xf32>
      %14 = vector.broadcast %13 : vector<1x256xf32> to vector<8x256xf32>
      %15 = arith.mulf %12, %14 : vector<8x256xf32>
      %c0_13 = arith.constant 0 : index
      %c0_14 = arith.constant 0 : index
      %16 = vector.load %arg6[%c0_13, %c0_14] : memref<1x256xf32, #tpu.memory_space<vmem>>, vector<1x256xf32>
      %17 = vector.broadcast %16 : vector<1x256xf32> to vector<8x256xf32>
      %18 = arith.addf %15, %17 : vector<8x256xf32>
      %cst_15 = arith.constant 0.000000e+00 : f32
      %19 = vector.broadcast %cst_15 : f32 to vector<8x256xf32>
      %20 = arith.maximumf %18, %19 : vector<8x256xf32>
      %21 = arith.truncf %20 : vector<8x256xf32> to vector<8x256xbf16>
      %c0_16 = arith.constant 0 : index
      %c0_17 = arith.constant 0 : index
      %22 = vector.load %arg7[%c0_16, %c0_17] : memref<8x256xbf16, #tpu.memory_space<vmem>>, vector<8x256xbf16>
      tpu.vector_store %arg7[%c0_16, %c0_17], %21 {strides = array<i32>} : memref<8x256xbf16, #tpu.memory_space<vmem>>, vector<8x256xbf16>,
    } else {
    }
    return
  }
  func.func @transform_0(%arg0: i32, %arg1: i32, %arg2: i32) -> (i32, i32) {
    %c0_i32 = arith.constant 0 : i32
    return %arg0, %arg2 : i32, i32
  }
  func.func @transform_1(%arg0: i32, %arg1: i32, %arg2: i32) -> (i32, i32) {
    %c0_i32 = arith.constant 0 : i32
    return %arg2, %arg1 : i32, i32
  }
  func.func @transform_2(%arg0: i32, %arg1: i32, %arg2: i32) -> (i32, i32) {
    %c0_i32 = arith.constant 0 : i32
    %c0_i32_0 = arith.constant 0 : i32
    return %c0_i32, %arg1 : i32, i32
  }
  func.func @transform_3(%arg0: i32, %arg1: i32, %arg2: i32) -> (i32, i32) {
    %c0_i32 = arith.constant 0 : i32
    %c0_i32_0 = arith.constant 0 : i32
    return %c0_i32, %arg1 : i32, i32
  }
  func.func @transform_4(%arg0: i32, %arg1: i32, %arg2: i32) -> (i32, i32) {
    %c0_i32 = arith.constant 0 : i32
    return %arg0, %arg1 : i32, i32
  }
}

module attributes {stable_mosaic.version = 11 : i64} {
  func.func @_fused_matmul_kernel(%arg0: i32, %arg1: i32, %arg2: i32, %arg3: memref<8x512xbf16, #tpu.memory_space<vmem>>, %arg4: memref<512x256xbf16, #tpu.memory_space<vmem>>, %arg5: memref<1x256xf32, #tpu.memory_space<vmem>>, %arg6: memref<1x256xf32, #tpu.memory_space<vmem>>, %arg7: memref<8x256xbf16, #tpu.memory_space<vmem>>, %arg8: memref<8x256xbf16, #tpu.memory_space<vmem>>, %arg9: memref<8x256xf32, #tpu.memory_space<vmem>>) attributes {dimension_semantics = [#tpu.dimension_semantics<parallel>, #tpu.dimension_semantics<parallel>, #tpu.dimension_semantics<arbitrary>], iteration_bounds = array<i64: 1, 2, 9>, scalar_prefetch = 0 : i64, scratch_operands = 1 : i64, tpu.core_type = #tpu.core_type<tc>, window_params = [{transform_indices = @transform_0, window_bounds = array<i64: 8, 512>}, {transform_indices = @transform_1, window_bounds = array<i64: 512, 256>}, {transform_indices = @transform_2, window_bounds = array<i64: 1, 256>}, {transform_indices = @transform_3, window_bounds = array<i64: 1, 256>}, {transform_indices = @transform_4, window_bounds = array<i64: 8, 256>}, {transform_indices = @transform_5, window_bounds = array<i64: 8, 256>}]} {
    %c0_i32 = arith.constant 0 : i32
    %0 = arith.cmpi eq, %arg2, %c0_i32 : i32
    %1 = arith.extui %0 : i1 to i32
    %c0_i32_0 = arith.constant 0 : i32
    %2 = arith.cmpi ne, %1, %c0_i32_0 : i32
    scf.if %2 {
      %cst_9 = arith.constant 0.000000e+00 : f32
      %12 = vector.broadcast %cst_9 : f32 to vector<8x256xf32>
      %c0_10 = arith.constant 0 : index
      %c0_11 = arith.constant 0 : index
      %13 = vector.load %arg9[%c0_10, %c0_11] : memref<8x256xf32, #tpu.memory_space<vmem>>, vector<8x256xf32>
      tpu.vector_store %arg9[%c0_10, %c0_11], %12 {strides = array<i32>} : memref<8x256xf32, #tpu.memory_space<vmem>>, vector<8x256xf32>,
    } else {
    }
    %c0 = arith.constant 0 : index
    %c0_1 = arith.constant 0 : index
    %3 = vector.load %arg9[%c0, %c0_1] : memref<8x256xf32, #tpu.memory_space<vmem>>, vector<8x256xf32>
    %c0_2 = arith.constant 0 : index
    %c0_3 = arith.constant 0 : index
    %4 = vector.load %arg3[%c0_2, %c0_3] : memref<8x512xbf16, #tpu.memory_space<vmem>>, vector<8x512xbf16>
    %c0_4 = arith.constant 0 : index
    %c0_5 = arith.constant 0 : index
    %5 = vector.load %arg4[%c0_4, %c0_5] : memref<512x256xbf16, #tpu.memory_space<vmem>>, vector<512x256xbf16>
    %cst = arith.constant dense<0.000000e+00> : vector<8x256xf32>
    %6 = tpu.matmul %4, %5, %cst {dimension_numbers = #tpu.dot_dimension_numbers<[1], [0], [0], [1], [0, 0, 1, 1], [], []>} : vector<8x512xbf16>, vector<512x256xbf16>, vector<8x256xf32> -> vector<8x256xf32>
    %7 = arith.addf %3, %6 : vector<8x256xf32>
    %c0_6 = arith.constant 0 : index
    %c0_7 = arith.constant 0 : index
    %8 = vector.load %arg9[%c0_6, %c0_7] : memref<8x256xf32, #tpu.memory_space<vmem>>, vector<8x256xf32>
    tpu.vector_store %arg9[%c0_6, %c0_7], %7 {strides = array<i32>} : memref<8x256xf32, #tpu.memory_space<vmem>>, vector<8x256xf32>,
    %c8_i32 = arith.constant 8 : i32
    %9 = arith.cmpi eq, %arg2, %c8_i32 : i32
    %10 = arith.extui %9 : i1 to i32
    %c0_i32_8 = arith.constant 0 : i32
    %11 = arith.cmpi ne, %10, %c0_i32_8 : i32
    scf.if %11 {
      %c0_9 = arith.constant 0 : index
      %c0_10 = arith.constant 0 : index
      %12 = vector.load %arg9[%c0_9, %c0_10] : memref<8x256xf32, #tpu.memory_space<vmem>>, vector<8x256xf32>
      %c0_11 = arith.constant 0 : index
      %c0_12 = arith.constant 0 : index
      %13 = vector.load %arg5[%c0_11, %c0_12] : memref<1x256xf32, #tpu.memory_space<vmem>>, vector<1x256xf32>
      %14 = vector.broadcast %13 : vector<1x256xf32> to vector<8x256xf32>
      %15 = arith.mulf %12, %14 : vector<8x256xf32>
      %c0_13 = arith.constant 0 : index
      %c0_14 = arith.constant 0 : index
      %16 = vector.load %arg6[%c0_13, %c0_14] : memref<1x256xf32, #tpu.memory_space<vmem>>, vector<1x256xf32>
      %17 = vector.broadcast %16 : vector<1x256xf32> to vector<8x256xf32>
      %18 = arith.addf %15, %17 : vector<8x256xf32>
      %c0_15 = arith.constant 0 : index
      %c0_16 = arith.constant 0 : index
      %19 = vector.load %arg7[%c0_15, %c0_16] : memref<8x256xbf16, #tpu.memory_space<vmem>>, vector<8x256xbf16>
      %20 = arith.extf %19 : vector<8x256xbf16> to vector<8x256xf32>
      %21 = arith.addf %18, %20 : vector<8x256xf32>
      %cst_17 = arith.constant 0.000000e+00 : f32
      %22 = vector.broadcast %cst_17 : f32 to vector<8x256xf32>
      %23 = arith.maximumf %21, %22 : vector<8x256xf32>
      %24 = arith.truncf %23 : vector<8x256xf32> to vector<8x256xbf16>
      %c0_18 = arith.constant 0 : index
      %c0_19 = arith.constant 0 : index
      %25 = vector.load %arg8[%c0_18, %c0_19] : memref<8x256xbf16, #tpu.memory_space<vmem>>, vector<8x256xbf16>
      tpu.vector_store %arg8[%c0_18, %c0_19], %24 {strides = array<i32>} : memref<8x256xbf16, #tpu.memory_space<vmem>>, vector<8x256xbf16>,
    } else {
    }
    return
  }
  func.func @transform_0(%arg0: i32, %arg1: i32, %arg2: i32) -> (i32, i32) {
    %c0_i32 = arith.constant 0 : i32
    return %arg0, %arg2 : i32, i32
  }
  func.func @transform_1(%arg0: i32, %arg1: i32, %arg2: i32) -> (i32, i32) {
    %c0_i32 = arith.constant 0 : i32
    return %arg2, %arg1 : i32, i32
  }
  func.func @transform_2(%arg0: i32, %arg1: i32, %arg2: i32) -> (i32, i32) {
    %c0_i32 = arith.constant 0 : i32
    %c0_i32_0 = arith.constant 0 : i32
    return %c0_i32, %arg1 : i32, i32
  }
  func.func @transform_3(%arg0: i32, %arg1: i32, %arg2: i32) -> (i32, i32) {
    %c0_i32 = arith.constant 0 : i32
    %c0_i32_0 = arith.constant 0 : i32
    return %c0_i32, %arg1 : i32, i32
  }
  func.func @transform_4(%arg0: i32, %arg1: i32, %arg2: i32) -> (i32, i32) {
    %c0_i32 = arith.constant 0 : i32
    return %arg0, %arg1 : i32, i32
  }
  func.func @transform_5(%arg0: i32, %arg1: i32, %arg2: i32) -> (i32, i32) {
    %c0_i32 = arith.constant 0 : i32
    return %arg0, %arg1 : i32, i32
  }
}

module attributes {stable_mosaic.version = 11 : i64} {
  func.func @_fused_matmul_kernel(%arg0: i32, %arg1: i32, %arg2: i32, %arg3: memref<8x256xbf16, #tpu.memory_space<vmem>>, %arg4: memref<256x256xbf16, #tpu.memory_space<vmem>>, %arg5: memref<1x256xf32, #tpu.memory_space<vmem>>, %arg6: memref<1x256xf32, #tpu.memory_space<vmem>>, %arg7: memref<8x256xbf16, #tpu.memory_space<vmem>>, %arg8: memref<8x256xf32, #tpu.memory_space<vmem>>) attributes {dimension_semantics = [#tpu.dimension_semantics<parallel>, #tpu.dimension_semantics<parallel>, #tpu.dimension_semantics<arbitrary>], iteration_bounds = array<i64: 1, 2, 1>, scalar_prefetch = 0 : i64, scratch_operands = 1 : i64, tpu.core_type = #tpu.core_type<tc>, window_params = [{transform_indices = @transform_0, window_bounds = array<i64: 8, 256>}, {transform_indices = @transform_1, window_bounds = array<i64: 256, 256>}, {transform_indices = @transform_2, window_bounds = array<i64: 1, 256>}, {transform_indices = @transform_3, window_bounds = array<i64: 1, 256>}, {transform_indices = @transform_4, window_bounds = array<i64: 8, 256>}]} {
    %c0_i32 = arith.constant 0 : i32
    %0 = arith.cmpi eq, %arg2, %c0_i32 : i32
    %1 = arith.extui %0 : i1 to i32
    %c0_i32_0 = arith.constant 0 : i32
    %2 = arith.cmpi ne, %1, %c0_i32_0 : i32
    scf.if %2 {
      %cst_10 = arith.constant 0.000000e+00 : f32
      %12 = vector.broadcast %cst_10 : f32 to vector<8x256xf32>
      %c0_11 = arith.constant 0 : index
      %c0_12 = arith.constant 0 : index
      %13 = vector.load %arg8[%c0_11, %c0_12] : memref<8x256xf32, #tpu.memory_space<vmem>>, vector<8x256xf32>
      tpu.vector_store %arg8[%c0_11, %c0_12], %12 {strides = array<i32>} : memref<8x256xf32, #tpu.memory_space<vmem>>, vector<8x256xf32>,
    } else {
    }
    %c0 = arith.constant 0 : index
    %c0_1 = arith.constant 0 : index
    %3 = vector.load %arg8[%c0, %c0_1] : memref<8x256xf32, #tpu.memory_space<vmem>>, vector<8x256xf32>
    %c0_2 = arith.constant 0 : index
    %c0_3 = arith.constant 0 : index
    %4 = vector.load %arg3[%c0_2, %c0_3] : memref<8x256xbf16, #tpu.memory_space<vmem>>, vector<8x256xbf16>
    %c0_4 = arith.constant 0 : index
    %c0_5 = arith.constant 0 : index
    %5 = vector.load %arg4[%c0_4, %c0_5] : memref<256x256xbf16, #tpu.memory_space<vmem>>, vector<256x256xbf16>
    %cst = arith.constant dense<0.000000e+00> : vector<8x256xf32>
    %6 = tpu.matmul %4, %5, %cst {dimension_numbers = #tpu.dot_dimension_numbers<[1], [0], [0], [1], [0, 0, 1, 1], [], []>} : vector<8x256xbf16>, vector<256x256xbf16>, vector<8x256xf32> -> vector<8x256xf32>
    %7 = arith.addf %3, %6 : vector<8x256xf32>
    %c0_6 = arith.constant 0 : index
    %c0_7 = arith.constant 0 : index
    %8 = vector.load %arg8[%c0_6, %c0_7] : memref<8x256xf32, #tpu.memory_space<vmem>>, vector<8x256xf32>
    tpu.vector_store %arg8[%c0_6, %c0_7], %7 {strides = array<i32>} : memref<8x256xf32, #tpu.memory_space<vmem>>, vector<8x256xf32>,
    %c0_i32_8 = arith.constant 0 : i32
    %9 = arith.cmpi eq, %arg2, %c0_i32_8 : i32
    %10 = arith.extui %9 : i1 to i32
    %c0_i32_9 = arith.constant 0 : i32
    %11 = arith.cmpi ne, %10, %c0_i32_9 : i32
    scf.if %11 {
      %c0_10 = arith.constant 0 : index
      %c0_11 = arith.constant 0 : index
      %12 = vector.load %arg8[%c0_10, %c0_11] : memref<8x256xf32, #tpu.memory_space<vmem>>, vector<8x256xf32>
      %c0_12 = arith.constant 0 : index
      %c0_13 = arith.constant 0 : index
      %13 = vector.load %arg5[%c0_12, %c0_13] : memref<1x256xf32, #tpu.memory_space<vmem>>, vector<1x256xf32>
      %14 = vector.broadcast %13 : vector<1x256xf32> to vector<8x256xf32>
      %15 = arith.mulf %12, %14 : vector<8x256xf32>
      %c0_14 = arith.constant 0 : index
      %c0_15 = arith.constant 0 : index
      %16 = vector.load %arg6[%c0_14, %c0_15] : memref<1x256xf32, #tpu.memory_space<vmem>>, vector<1x256xf32>
      %17 = vector.broadcast %16 : vector<1x256xf32> to vector<8x256xf32>
      %18 = arith.addf %15, %17 : vector<8x256xf32>
      %19 = arith.truncf %18 : vector<8x256xf32> to vector<8x256xbf16>
      %c0_16 = arith.constant 0 : index
      %c0_17 = arith.constant 0 : index
      %20 = vector.load %arg7[%c0_16, %c0_17] : memref<8x256xbf16, #tpu.memory_space<vmem>>, vector<8x256xbf16>
      tpu.vector_store %arg7[%c0_16, %c0_17], %19 {strides = array<i32>} : memref<8x256xbf16, #tpu.memory_space<vmem>>, vector<8x256xbf16>,
    } else {
    }
    return
  }
  func.func @transform_0(%arg0: i32, %arg1: i32, %arg2: i32) -> (i32, i32) {
    %c0_i32 = arith.constant 0 : i32
    return %arg0, %arg2 : i32, i32
  }
  func.func @transform_1(%arg0: i32, %arg1: i32, %arg2: i32) -> (i32, i32) {
    %c0_i32 = arith.constant 0 : i32
    return %arg2, %arg1 : i32, i32
  }
  func.func @transform_2(%arg0: i32, %arg1: i32, %arg2: i32) -> (i32, i32) {
    %c0_i32 = arith.constant 0 : i32
    %c0_i32_0 = arith.constant 0 : i32
    return %c0_i32, %arg1 : i32, i32
  }
  func.func @transform_3(%arg0: i32, %arg1: i32, %arg2: i32) -> (i32, i32) {
    %c0_i32 = arith.constant 0 : i32
    %c0_i32_0 = arith.constant 0 : i32
    return %c0_i32, %arg1 : i32, i32
  }
  func.func @transform_4(%arg0: i32, %arg1: i32, %arg2: i32) -> (i32, i32) {
    %c0_i32 = arith.constant 0 : i32
    return %arg0, %arg1 : i32, i32
  }
}

module attributes {stable_mosaic.version = 11 : i64} {
  func.func @_avgpool_kernel(%arg0: i32, %arg1: memref<2x1x512xbf16, #tpu.memory_space<vmem>>, %arg2: memref<2x512xbf16, #tpu.memory_space<vmem>>) attributes {dimension_semantics = [#tpu.dimension_semantics<arbitrary>], iteration_bounds = array<i64: 1>, scalar_prefetch = 0 : i64, scratch_operands = 0 : i64, tpu.core_type = #tpu.core_type<tc>, window_params = [{pipeline_mode = #tpu.pipeline_mode<synchronous>, transform_indices = @transform_0, window_bounds = array<i64: 2, 1, 512>}, {pipeline_mode = #tpu.pipeline_mode<synchronous>, transform_indices = @transform_1, window_bounds = array<i64: 2, 512>}]} {
    %c0 = arith.constant 0 : index
    %c0_0 = arith.constant 0 : index
    %c0_1 = arith.constant 0 : index
    %0 = vector.load %arg1[%c0, %c0_0, %c0_1] : memref<2x1x512xbf16, #tpu.memory_space<vmem>>, vector<2x1x512xbf16>
    %1 = arith.extf %0 : vector<2x1x512xbf16> to vector<2x1x512xf32>
    %cst = arith.constant dense<0.000000e+00> : vector<2x512xf32>
    %2 = vector.multi_reduction <add>, %1, %cst [1] : vector<2x1x512xf32> to vector<2x512xf32>
    %cst_2 = arith.constant 1.000000e+00 : f32
    %3 = vector.broadcast %cst_2 : f32 to vector<2x512xf32>
    %4 = arith.mulf %2, %3 : vector<2x512xf32>
    %5 = arith.truncf %4 : vector<2x512xf32> to vector<2x512xbf16>
    %c0_3 = arith.constant 0 : index
    %c0_4 = arith.constant 0 : index
    %6 = vector.load %arg2[%c0_3, %c0_4] : memref<2x512xbf16, #tpu.memory_space<vmem>>, vector<2x512xbf16>
    tpu.vector_store %arg2[%c0_3, %c0_4], %5 {strides = array<i32>} : memref<2x512xbf16, #tpu.memory_space<vmem>>, vector<2x512xbf16>,
    return
  }
  func.func @transform_0(%arg0: i32) -> (i32, i32, i32) {
    %c0_i32 = arith.constant 0 : i32
    %c0_i32_0 = arith.constant 0 : i32
    %c0_i32_1 = arith.constant 0 : i32
    %c0_i32_2 = arith.constant 0 : i32
    return %c0_i32, %c0_i32_0, %c0_i32_1 : i32, i32, i32
  }
  func.func @transform_1(%arg0: i32) -> (i32, i32) {
    %c0_i32 = arith.constant 0 : i32
    %c0_i32_0 = arith.constant 0 : i32
    %c0_i32_1 = arith.constant 0 : i32
    return %c0_i32, %c0_i32_0 : i32, i32
  }
}

module attributes {stable_mosaic.version = 11 : i64} {
  func.func @_fused_matmul_kernel(%arg0: i32, %arg1: i32, %arg2: i32, %arg3: memref<8x512xbf16, #tpu.memory_space<vmem>>, %arg4: memref<512x128xbf16, #tpu.memory_space<vmem>>, %arg5: memref<1x128xf32, #tpu.memory_space<vmem>>, %arg6: memref<1x128xf32, #tpu.memory_space<vmem>>, %arg7: memref<8x128xf32, #tpu.memory_space<vmem>>, %arg8: memref<8x128xf32, #tpu.memory_space<vmem>>) attributes {dimension_semantics = [#tpu.dimension_semantics<parallel>, #tpu.dimension_semantics<parallel>, #tpu.dimension_semantics<arbitrary>], iteration_bounds = array<i64: 1, 1, 1>, scalar_prefetch = 0 : i64, scratch_operands = 1 : i64, tpu.core_type = #tpu.core_type<tc>, window_params = [{transform_indices = @transform_0, window_bounds = array<i64: 8, 512>}, {transform_indices = @transform_1, window_bounds = array<i64: 512, 128>}, {transform_indices = @transform_2, window_bounds = array<i64: 1, 128>}, {transform_indices = @transform_3, window_bounds = array<i64: 1, 128>}, {transform_indices = @transform_4, window_bounds = array<i64: 8, 128>}]} {
    %c0_i32 = arith.constant 0 : i32
    %0 = arith.cmpi eq, %arg2, %c0_i32 : i32
    %1 = arith.extui %0 : i1 to i32
    %c0_i32_0 = arith.constant 0 : i32
    %2 = arith.cmpi ne, %1, %c0_i32_0 : i32
    scf.if %2 {
      %cst_10 = arith.constant 0.000000e+00 : f32
      %12 = vector.broadcast %cst_10 : f32 to vector<8x128xf32>
      %c0_11 = arith.constant 0 : index
      %c0_12 = arith.constant 0 : index
      %13 = vector.load %arg8[%c0_11, %c0_12] : memref<8x128xf32, #tpu.memory_space<vmem>>, vector<8x128xf32>
      tpu.vector_store %arg8[%c0_11, %c0_12], %12 {strides = array<i32>} : memref<8x128xf32, #tpu.memory_space<vmem>>, vector<8x128xf32>,
    } else {
    }
    %c0 = arith.constant 0 : index
    %c0_1 = arith.constant 0 : index
    %3 = vector.load %arg8[%c0, %c0_1] : memref<8x128xf32, #tpu.memory_space<vmem>>, vector<8x128xf32>
    %c0_2 = arith.constant 0 : index
    %c0_3 = arith.constant 0 : index
    %4 = vector.load %arg3[%c0_2, %c0_3] : memref<8x512xbf16, #tpu.memory_space<vmem>>, vector<8x512xbf16>
    %c0_4 = arith.constant 0 : index
    %c0_5 = arith.constant 0 : index
    %5 = vector.load %arg4[%c0_4, %c0_5] : memref<512x128xbf16, #tpu.memory_space<vmem>>, vector<512x128xbf16>
    %cst = arith.constant dense<0.000000e+00> : vector<8x128xf32>
    %6 = tpu.matmul %4, %5, %cst {dimension_numbers = #tpu.dot_dimension_numbers<[1], [0], [0], [1], [0, 0, 1, 1], [], []>} : vector<8x512xbf16>, vector<512x128xbf16>, vector<8x128xf32> -> vector<8x128xf32>
    %7 = arith.addf %3, %6 : vector<8x128xf32>
    %c0_6 = arith.constant 0 : index
    %c0_7 = arith.constant 0 : index
    %8 = vector.load %arg8[%c0_6, %c0_7] : memref<8x128xf32, #tpu.memory_space<vmem>>, vector<8x128xf32>
    tpu.vector_store %arg8[%c0_6, %c0_7], %7 {strides = array<i32>} : memref<8x128xf32, #tpu.memory_space<vmem>>, vector<8x128xf32>,
    %c0_i32_8 = arith.constant 0 : i32
    %9 = arith.cmpi eq, %arg2, %c0_i32_8 : i32
    %10 = arith.extui %9 : i1 to i32
    %c0_i32_9 = arith.constant 0 : i32
    %11 = arith.cmpi ne, %10, %c0_i32_9 : i32
    scf.if %11 {
      %c0_10 = arith.constant 0 : index
      %c0_11 = arith.constant 0 : index
      %12 = vector.load %arg8[%c0_10, %c0_11] : memref<8x128xf32, #tpu.memory_space<vmem>>, vector<8x128xf32>
      %c0_12 = arith.constant 0 : index
      %c0_13 = arith.constant 0 : index
      %13 = vector.load %arg5[%c0_12, %c0_13] : memref<1x128xf32, #tpu.memory_space<vmem>>, vector<1x128xf32>
      %14 = vector.broadcast %13 : vector<1x128xf32> to vector<8x128xf32>
      %15 = arith.mulf %12, %14 : vector<8x128xf32>
      %c0_14 = arith.constant 0 : index
      %c0_15 = arith.constant 0 : index
      %16 = vector.load %arg6[%c0_14, %c0_15] : memref<1x128xf32, #tpu.memory_space<vmem>>, vector<1x128xf32>
      %17 = vector.broadcast %16 : vector<1x128xf32> to vector<8x128xf32>
      %18 = arith.addf %15, %17 : vector<8x128xf32>
      %c0_16 = arith.constant 0 : index
      %c0_17 = arith.constant 0 : index
      %19 = vector.load %arg7[%c0_16, %c0_17] : memref<8x128xf32, #tpu.memory_space<vmem>>, vector<8x128xf32>
      tpu.vector_store %arg7[%c0_16, %c0_17], %18 {strides = array<i32>} : memref<8x128xf32, #tpu.memory_space<vmem>>, vector<8x128xf32>,
    } else {
    }
    return
  }
  func.func @transform_0(%arg0: i32, %arg1: i32, %arg2: i32) -> (i32, i32) {
    %c0_i32 = arith.constant 0 : i32
    return %arg0, %arg2 : i32, i32
  }
  func.func @transform_1(%arg0: i32, %arg1: i32, %arg2: i32) -> (i32, i32) {
    %c0_i32 = arith.constant 0 : i32
    return %arg2, %arg1 : i32, i32
  }
  func.func @transform_2(%arg0: i32, %arg1: i32, %arg2: i32) -> (i32, i32) {
    %c0_i32 = arith.constant 0 : i32
    %c0_i32_0 = arith.constant 0 : i32
    return %c0_i32, %arg1 : i32, i32
  }
  func.func @transform_3(%arg0: i32, %arg1: i32, %arg2: i32) -> (i32, i32) {
    %c0_i32 = arith.constant 0 : i32
    %c0_i32_0 = arith.constant 0 : i32
    return %c0_i32, %arg1 : i32, i32
  }
  func.func @transform_4(%arg0: i32, %arg1: i32, %arg2: i32) -> (i32, i32) {
    %c0_i32 = arith.constant 0 : i32
    return %arg0, %arg1 : i32, i32
  }
}

</mosaic_0001>

<bundles_post_ra>
// kernel: resnet_forward.16
= control target key start
LH: loop header
LB: loop body
LE: loop exit
PB: predicated region body
PF: predicated region fallthrough
CT: control target
= control target key end

     0   :  { %s1404_s0 = inlined_call_operand.vmem [shape: bf16[128,128], index: 0, kind: input, shape index: {}]   ;;  %s1405_s1 = inlined_call_operand.vmem [shape: bf16[128,128], index: 1, kind: input, shape index: {}]   ;;  %s1406_s2 = inlined_call_operand.vmem [shape: bf16[128,128], index: 2, kind: input, shape index: {}]   ;;  %s1407_s3 = inlined_call_operand.vmem [shape: bf16[128,128], index: 3, kind: input, shape index: {}]   ;;  %s1408_s4 = inlined_call_operand.vmem [shape: bf16[128,128], index: 4, kind: input, shape index: {}]   ;;  %s1409_s5 = inlined_call_operand.vmem [shape: bf16[128,128], index: 5, kind: input, shape index: {}]   ;;  %s1410_s6 = inlined_call_operand.vmem [shape: bf16[128,128], index: 6, kind: input, shape index: {}]   ;;  %s1411_s7 = inlined_call_operand.vmem [shape: bf16[128,128], index: 7, kind: input, shape index: {}]   ;;  %s1412_s8 = inlined_call_operand.vmem [shape: bf16[128,128], index: 8, kind: input, shape index: {}]   ;;  %s1413_s9 = inlined_call_operand.vmem [shape: bf16[128,128], index: 9, kind: output, shape index: {}]  }
   0x1   :  { %v709_v0 = vld [vmem:[%s1404_s0] sm:$0xff]   ;;  %v1036_v20 = vld [vmem:[%s1404_s0 + $0x8] sm:$0xff]   ;;  %v1037_v61 = vld [vmem:[%s1404_s0 + $0x10] sm:$0xff]  }
   0x2   :  { %v741_v1 = vld [vmem:[%s1405_s1] sm:$0xff]   ;;  %v710_v3 = vunpack.c.l.bf16 %v709_v0  ;;  %v711_v4 = vunpack.c.h.bf16 %v709_v0  ;;  %v1043_v25 = vld [vmem:[%s1405_s1 + $0x8] sm:$0xff]   ;;  %v714_v34 = vunpack.c.l.bf16 %v1036_v20  ;;  %v715_v35 = vunpack.c.h.bf16 %v1036_v20 }
   0x3   :  { %v773_v2 = vld [vmem:[%s1406_s2] sm:$0xff]   ;;  %v742_v5 = vunpack.c.l.bf16 %v741_v1  ;;  %v743_v6 = vunpack.c.h.bf16 %v741_v1  ;;  %v1050_v30 = vld [vmem:[%s1406_s2 + $0x8] sm:$0xff]   ;;  %v746_v38 = vunpack.c.l.bf16 %v1043_v25  ;;  %v747_v39 = vunpack.c.h.bf16 %v1043_v25  ;;  %v1065_v25 = vld [vmem:[%s1408_s4 + $0x10] sm:$0xff]  }
   0x4   :  { %v805_v7 = vld [vmem:[%s1407_s3] sm:$0xff]   ;;  %v774_v10 = vunpack.c.l.bf16 %v773_v2  ;;  %v775_v11 = vunpack.c.h.bf16 %v773_v2  ;;  %v1057_v31 = vld [vmem:[%s1407_s3 + $0x8] sm:$0xff]   ;;  %v778_v42 = vunpack.c.l.bf16 %v1050_v30  ;;  %v779_v43 = vunpack.c.h.bf16 %v1050_v30  ;;  %v1072_v30 = vld [vmem:[%s1409_s5 + $0x10] sm:$0xff]  }
   0x5   :  { %v837_v8 = vld [vmem:[%s1408_s4] sm:$0xff]   ;;  %v806_v12 = vunpack.c.l.bf16 %v805_v7  ;;  %v96_v15 = vmax.f32 %v710_v3, %v742_v5  ;;  %v97_v16 = vmax.f32 %v711_v4, %v743_v6  ;;  %v807_v17 = vunpack.c.h.bf16 %v805_v7  ;;  %v1064_v40 = vld [vmem:[%s1408_s4 + $0x8] sm:$0xff]   ;;  %v1044_v6 = vld [vmem:[%s1405_s1 + $0x10] sm:$0xff]  }
   0x6   :  { %v869_v9 = vld [vmem:[%s1409_s5] sm:$0xff]   ;;  %v838_v18 = vunpack.c.l.bf16 %v837_v8  ;;  %v839_v21 = vunpack.c.h.bf16 %v837_v8  ;;  %v1071_v41 = vld [vmem:[%s1409_s5 + $0x8] sm:$0xff]   ;;  %v810_v44 = vunpack.c.l.bf16 %v1057_v31  ;;  %v811_v45 = vunpack.c.h.bf16 %v1057_v31  ;;  %v1051_v7 = vld [vmem:[%s1406_s2 + $0x10] sm:$0xff]  }
   0x7   :  { %v901_v13 = vld [vmem:[%s1410_s6] sm:$0xff]   ;;  %v870_v22 = vunpack.c.l.bf16 %v869_v9  ;;  %v871_v23 = vunpack.c.h.bf16 %v869_v9  ;;  %v176_v26 = vmax.f32 %v96_v15, %v774_v10  ;;  %v177_v27 = vmax.f32 %v97_v16, %v775_v11  ;;  %v1078_v50 = vld [vmem:[%s1410_s6 + $0x8] sm:$0xff]   ;;  %v1058_v16 = vld [vmem:[%s1407_s3 + $0x10] sm:$0xff]  }
   0x8   :  { %v1180_v14 = vld [vmem:[%s1411_s7] sm:$0xff]   ;;  %v902_v24 = vunpack.c.l.bf16 %v901_v13  ;;  %v903_v28 = vunpack.c.h.bf16 %v901_v13  ;;  %v98_v48 = vmax.f32 %v714_v34, %v746_v38  ;;  %v99_v49 = vmax.f32 %v715_v35, %v747_v39  ;;  %v1085_v51 = vld [vmem:[%s1411_s7 + $0x8] sm:$0xff]  }
   0x9   :  { %v1185_v19 = vld [vmem:[%s1412_s8] sm:$0xff]   ;;  %v934_v29 = vunpack.c.l.bf16 %v1180_v14  ;;  %v935_v32 = vunpack.c.h.bf16 %v1180_v14  ;;  %v256_v36 = vmax.f32 %v176_v26, %v806_v12  ;;  %v257_v37 = vmax.f32 %v177_v27, %v807_v17  ;;  %v1092_v60 = vld [vmem:[%s1412_s8 + $0x8] sm:$0xff]  }
   0xa   :  { %v966_v33 = vunpack.c.l.bf16 %v1185_v19  ;;  %v967_v52 = vunpack.c.h.bf16 %v1185_v19  ;;  %v842_v53 = vunpack.c.l.bf16 %v1064_v40  ;;  %v843_v54 = vunpack.c.h.bf16 %v1064_v40  ;;  %v1086_v40 = vld [vmem:[%s1411_s7 + $0x10] sm:$0xff]  }
   0xb   :  { %v336_v46 = vmax.f32 %v256_v36, %v838_v18  ;;  %v337_v47 = vmax.f32 %v257_v37, %v839_v21  ;;  %v874_v55 = vunpack.c.l.bf16 %v1071_v41  ;;  %v178_v58 = vmax.f32 %v98_v48, %v778_v42 }
   0xc   :  { %v179_v59 = vmax.f32 %v99_v49, %v779_v43  ;;  %v875_v62 = vunpack.c.h.bf16 %v1071_v41  ;;  %v906_v63 = vunpack.c.l.bf16 %v1078_v50  ;;  %v907_v0 = vunpack.c.h.bf16 %v1078_v50 }
   0xd   :  { %v416_v56 = vmax.f32 %v336_v46, %v870_v22  ;;  %v417_v57 = vmax.f32 %v337_v47, %v871_v23  ;;  %v938_v1 = vunpack.c.l.bf16 %v1085_v51  ;;  %v258_v4 = vmax.f32 %v178_v58, %v810_v44  ;;  %v1038_v46 = vld [vmem:[%s1404_s0 + $0x18] sm:$0xff]  }
   0xe   :  { %v259_v5 = vmax.f32 %v179_v59, %v811_v45  ;;  %v939_v8 = vunpack.c.h.bf16 %v1085_v51  ;;  %v970_v9 = vunpack.c.l.bf16 %v1092_v60  ;;  %v718_v10 = vunpack.c.l.bf16 %v1037_v61  ;;  %v1093_v45 = vld [vmem:[%s1412_s8 + $0x10] sm:$0xff]   ;;  %v1045_v51 = vld [vmem:[%s1405_s1 + $0x18] sm:$0xff]  }
   0xf   :  { %v496_v2 = vmax.f32 %v416_v56, %v902_v24  ;;  %v497_v3 = vmax.f32 %v417_v57, %v903_v28  ;;  %v719_v11 = vunpack.c.h.bf16 %v1037_v61  ;;  %v338_v14 = vmax.f32 %v258_v4, %v842_v53  ;;  %v1052_v56 = vld [vmem:[%s1406_s2 + $0x18] sm:$0xff]  }
  0x10   :  { %v339_v15 = vmax.f32 %v259_v5, %v843_v54  ;;  %v750_v17 = vunpack.c.l.bf16 %v1044_v6  ;;  %v751_v18 = vunpack.c.h.bf16 %v1044_v6  ;;  %v782_v19 = vunpack.c.l.bf16 %v1051_v7  ;;  %v1059_v61 = vld [vmem:[%s1407_s3 + $0x18] sm:$0xff]  }
  0x11   :  { %v576_v12 = vmax.f32 %v496_v2, %v934_v29  ;;  %v577_v13 = vmax.f32 %v497_v3, %v935_v32  ;;  %v783_v20 = vunpack.c.h.bf16 %v1051_v7  ;;  %v418_v23 = vmax.f32 %v338_v14, %v874_v55  ;;  %v1066_v2 = vld [vmem:[%s1408_s4 + $0x18] sm:$0xff]  }
  0x12   :  { %v419_v24 = vmax.f32 %v339_v15, %v875_v62  ;;  %v100_v26 = vmax.f32 %v718_v10, %v750_v17  ;;  %v101_v27 = vmax.f32 %v719_v11, %v751_v18  ;;  %v814_v28 = vunpack.c.l.bf16 %v1058_v16  ;;  %v1073_v7 = vld [vmem:[%s1409_s5 + $0x18] sm:$0xff]  }
  0x13   :  { %v656_v21 = vmax.f32 %v576_v12, %v966_v33  ;;  %v657_v22 = vmax.f32 %v577_v13, %v967_v52  ;;  %v815_v29 = vunpack.c.h.bf16 %v1058_v16  ;;  %v498_v32 = vmax.f32 %v418_v23, %v906_v63  ;;  %v1079_v33 = vld [vmem:[%s1410_s6 + $0x10] sm:$0xff]   ;;  %v1080_v12 = vld [vmem:[%s1410_s6 + $0x18] sm:$0xff]  }
  0x14   :  { %v499_v34 = vmax.f32 %v419_v24, %v907_v0  ;;  %v971_v35 = vunpack.c.h.bf16 %v1092_v60  ;;  %v180_v36 = vmax.f32 %v100_v26, %v782_v19  ;;  %v181_v37 = vmax.f32 %v101_v27, %v783_v20  ;;  %v1087_v17 = vld [vmem:[%s1411_s7 + $0x18] sm:$0xff]   ;;  %v1039_v27 = vld [vmem:[%s1404_s0 + $0x20] sm:$0xff]  }
  0x15   :  { %v999_v31 = vpack.c.bf16 %v657_v22, %v656_v21  ;;  %v846_v38 = vunpack.c.l.bf16 %v1065_v25  ;;  %v847_v39 = vunpack.c.h.bf16 %v1065_v25  ;;  %v578_v41 = vmax.f32 %v498_v32, %v938_v1  ;;  %v1094_v22 = vld [vmem:[%s1412_s8 + $0x18] sm:$0xff]   ;;  %v1046_v32 = vld [vmem:[%s1405_s1 + $0x20] sm:$0xff]  }
  0x16   :  { %v579_v42 = vmax.f32 %v499_v34, %v939_v8  ;;  %v878_v43 = vunpack.c.l.bf16 %v1072_v30  ;;  %v879_v44 = vunpack.c.h.bf16 %v1072_v30  ;;  %v260_v47 = vmax.f32 %v180_v36, %v814_v28  ;;  %v1053_v34 = vld [vmem:[%s1406_s2 + $0x20] sm:$0xff]  }
  0x17   :  { %1000 = vst [vmem:[%s1413_s9] sm:$0xff] %v999_v31   ;;  %v261_v48 = vmax.f32 %v181_v37, %v815_v29  ;;  %v910_v49 = vunpack.c.l.bf16 %v1079_v33  ;;  %v911_v50 = vunpack.c.h.bf16 %v1079_v33  ;;  %v658_v52 = vmax.f32 %v578_v41, %v970_v9 }
  0x18   :  { %v659_v53 = vmax.f32 %v579_v42, %v971_v35  ;;  %v942_v54 = vunpack.c.l.bf16 %v1086_v40  ;;  %v943_v55 = vunpack.c.h.bf16 %v1086_v40  ;;  %v340_v57 = vmax.f32 %v260_v47, %v846_v38  ;;  %v1060_v42 = vld [vmem:[%s1407_s3 + $0x20] sm:$0xff]  }
  0x19   :  { %v341_v58 = vmax.f32 %v261_v48, %v847_v39  ;;  %v974_v59 = vunpack.c.l.bf16 %v1093_v45  ;;  %v722_v60 = vunpack.c.l.bf16 %v1038_v46  ;;  %v723_v63 = vunpack.c.h.bf16 %v1038_v46  ;;  %v1067_v47 = vld [vmem:[%s1408_s4 + $0x20] sm:$0xff]  }
  0x1a   :  { %v1004_v62 = vpack.c.bf16 %v659_v53, %v658_v52  ;;  %v754_v0 = vunpack.c.l.bf16 %v1045_v51  ;;  %v755_v1 = vunpack.c.h.bf16 %v1045_v51  ;;  %v420_v3 = vmax.f32 %v340_v57, %v878_v43  ;;  %v1074_v52 = vld [vmem:[%s1409_s5 + $0x20] sm:$0xff]  }
  0x1b   :  { %v421_v4 = vmax.f32 %v341_v58, %v879_v44  ;;  %v786_v5 = vunpack.c.l.bf16 %v1052_v56  ;;  %v787_v6 = vunpack.c.h.bf16 %v1052_v56  ;;  %v818_v10 = vunpack.c.l.bf16 %v1059_v61  ;;  %v1081_v57 = vld [vmem:[%s1410_s6 + $0x20] sm:$0xff]  }
  0x1c   :  { %1099 = vst [vmem:[%s1413_s9 + $0x8] sm:$0xff] %v1004_v62   ;;  %v102_v8 = vmax.f32 %v722_v60, %v754_v0  ;;  %v103_v9 = vmax.f32 %v723_v63, %v755_v1  ;;  %v819_v11 = vunpack.c.h.bf16 %v1059_v61  ;;  %v500_v13 = vmax.f32 %v420_v3, %v910_v49  ;;  %v1088_v62 = vld [vmem:[%s1411_s7 + $0x20] sm:$0xff]  }
  0x1d   :  { %v501_v14 = vmax.f32 %v421_v4, %v911_v50  ;;  %v975_v15 = vunpack.c.h.bf16 %v1093_v45  ;;  %v850_v16 = vunpack.c.l.bf16 %v1066_v2  ;;  %v851_v20 = vunpack.c.h.bf16 %v1066_v2  ;;  %v1095_v3 = vld [vmem:[%s1412_s8 + $0x20] sm:$0xff]   ;;  %v1040_v4 = vld [vmem:[%s1404_s0 + $0x28] sm:$0xff]  }
  0x1e   :  { %v182_v18 = vmax.f32 %v102_v8, %v786_v5  ;;  %v183_v19 = vmax.f32 %v103_v9, %v787_v6  ;;  %v882_v21 = vunpack.c.l.bf16 %v1073_v7  ;;  %v580_v23 = vmax.f32 %v500_v13, %v942_v54  ;;  %v1047_v9 = vld [vmem:[%s1405_s1 + $0x28] sm:$0xff]  }
  0x1f   :  { %v581_v24 = vmax.f32 %v501_v14, %v943_v55  ;;  %v883_v25 = vunpack.c.h.bf16 %v1073_v7  ;;  %v914_v26 = vunpack.c.l.bf16 %v1080_v12  ;;  %v915_v30 = vunpack.c.h.bf16 %v1080_v12  ;;  %v1054_v14 = vld [vmem:[%s1406_s2 + $0x28] sm:$0xff]  }
  0x20   :  { %v262_v28 = vmax.f32 %v182_v18, %v818_v10  ;;  %v263_v29 = vmax.f32 %v183_v19, %v819_v11  ;;  %v946_v31 = vunpack.c.l.bf16 %v1087_v17  ;;  %v660_v35 = vmax.f32 %v580_v23, %v974_v59  ;;  %v1061_v19 = vld [vmem:[%s1407_s3 + $0x28] sm:$0xff]  }
  0x21   :  { %v661_v33 = vmax.f32 %v581_v24, %v975_v15  ;;  %v947_v36 = vunpack.c.h.bf16 %v1087_v17  ;;  %v978_v37 = vunpack.c.l.bf16 %v1094_v22  ;;  %v726_v40 = vunpack.c.l.bf16 %v1039_v27  ;;  %v1068_v24 = vld [vmem:[%s1408_s4 + $0x28] sm:$0xff]  }
  0x22   :  { %v342_v38 = vmax.f32 %v262_v28, %v850_v16  ;;  %v343_v39 = vmax.f32 %v263_v29, %v851_v20  ;;  %v727_v41 = vunpack.c.h.bf16 %v1039_v27  ;;  %v758_v44 = vunpack.c.l.bf16 %v1046_v32 }
  0x23   :  { %v1009_v43 = vpack.c.bf16 %v661_v33, %v660_v35  ;;  %v759_v45 = vunpack.c.h.bf16 %v1046_v32  ;;  %v790_v46 = vunpack.c.l.bf16 %v1053_v34  ;;  %v979_v50 = vunpack.c.h.bf16 %v1094_v22  ;;  %v1082_v35 = vld [vmem:[%s1410_s6 + $0x28] sm:$0xff]  }
  0x24   :  { %v422_v48 = vmax.f32 %v342_v38, %v882_v21  ;;  %v423_v49 = vmax.f32 %v343_v39, %v883_v25  ;;  %v791_v51 = vunpack.c.h.bf16 %v1053_v34  ;;  %v104_v53 = vmax.f32 %v726_v40, %v758_v44  ;;  %v1075_v34 = vld [vmem:[%s1409_s5 + $0x28] sm:$0xff]  }
  0x25   :  { %1100 = vst [vmem:[%s1413_s9 + $0x10] sm:$0xff] %v1009_v43   ;;  %v105_v54 = vmax.f32 %v727_v41, %v759_v45  ;;  %v822_v55 = vunpack.c.l.bf16 %v1060_v42  ;;  %v823_v56 = vunpack.c.h.bf16 %v1060_v42  ;;  %v854_v60 = vunpack.c.l.bf16 %v1067_v47  ;;  %v1089_v43 = vld [vmem:[%s1411_s7 + $0x28] sm:$0xff]  }
  0x26   :  { %v502_v58 = vmax.f32 %v422_v48, %v914_v26  ;;  %v503_v59 = vmax.f32 %v423_v49, %v915_v30  ;;  %v855_v61 = vunpack.c.h.bf16 %v1067_v47  ;;  %v184_v63 = vmax.f32 %v104_v53, %v790_v46  ;;  %v1096_v44 = vld [vmem:[%s1412_s8 + $0x28] sm:$0xff]   ;;  %v1041_v49 = vld [vmem:[%s1404_s0 + $0x30] sm:$0xff]  }
  0x27   :  { %v185_v0 = vmax.f32 %v105_v54, %v791_v51  ;;  %v886_v1 = vunpack.c.l.bf16 %v1074_v52  ;;  %v887_v2 = vunpack.c.h.bf16 %v1074_v52  ;;  %v918_v7 = vunpack.c.l.bf16 %v1081_v57  ;;  %v1048_v54 = vld [vmem:[%s1405_s1 + $0x30] sm:$0xff]  }
  0x28   :  { %v582_v5 = vmax.f32 %v502_v58, %v946_v31  ;;  %v583_v6 = vmax.f32 %v503_v59, %v947_v36  ;;  %v919_v8 = vunpack.c.h.bf16 %v1081_v57  ;;  %v264_v10 = vmax.f32 %v184_v63, %v822_v55  ;;  %v1055_v59 = vld [vmem:[%s1406_s2 + $0x30] sm:$0xff]  }
  0x29   :  { %v265_v11 = vmax.f32 %v185_v0, %v823_v56  ;;  %v950_v12 = vunpack.c.l.bf16 %v1088_v62  ;;  %v951_v13 = vunpack.c.h.bf16 %v1088_v62  ;;  %v982_v17 = vunpack.c.l.bf16 %v1095_v3  ;;  %v1062_v0 = vld [vmem:[%s1407_s3 + $0x30] sm:$0xff]  }
  0x2a   :  { %v662_v15 = vmax.f32 %v582_v5, %v978_v37  ;;  %v663_v16 = vmax.f32 %v583_v6, %v979_v50  ;;  %v730_v18 = vunpack.c.l.bf16 %v1040_v4  ;;  %v344_v20 = vmax.f32 %v264_v10, %v854_v60  ;;  %v1069_v5 = vld [vmem:[%s1408_s4 + $0x30] sm:$0xff]  }
  0x2b   :  { %v345_v21 = vmax.f32 %v265_v11, %v855_v61  ;;  %v731_v22 = vunpack.c.h.bf16 %v1040_v4  ;;  %v762_v23 = vunpack.c.l.bf16 %v1047_v9  ;;  %v763_v26 = vunpack.c.h.bf16 %v1047_v9 }
  0x2c   :  { %v1014_v25 = vpack.c.bf16 %v663_v16, %v662_v15  ;;  %v794_v27 = vunpack.c.l.bf16 %v1054_v14  ;;  %v795_v28 = vunpack.c.h.bf16 %v1054_v14  ;;  %v424_v29 = vmax.f32 %v344_v20, %v886_v1  ;;  %v1076_v14 = vld [vmem:[%s1409_s5 + $0x30] sm:$0xff]  }
  0x2d   :  { %v425_v30 = vmax.f32 %v345_v21, %v887_v2  ;;  %v106_v31 = vmax.f32 %v730_v18, %v762_v23  ;;  %v826_v32 = vunpack.c.l.bf16 %v1061_v19  ;;  %v983_v33 = vunpack.c.h.bf16 %v1095_v3 }
  0x2e   :  { %1101 = vst [vmem:[%s1413_s9 + $0x18] sm:$0xff] %v1014_v25   ;;  %v107_v36 = vmax.f32 %v731_v22, %v763_v26  ;;  %v827_v37 = vunpack.c.h.bf16 %v1061_v19  ;;  %v858_v38 = vunpack.c.l.bf16 %v1068_v24  ;;  %v504_v39 = vmax.f32 %v424_v29, %v918_v7  ;;  %v1083_v19 = vld [vmem:[%s1410_s6 + $0x30] sm:$0xff]  }
  0x2f   :  { %v505_v40 = vmax.f32 %v425_v30, %v919_v8  ;;  %v186_v41 = vmax.f32 %v106_v31, %v794_v27  ;;  %v859_v42 = vunpack.c.h.bf16 %v1068_v24  ;;  %v890_v46 = vunpack.c.l.bf16 %v1075_v34  ;;  %v1090_v24 = vld [vmem:[%s1411_s7 + $0x30] sm:$0xff]  }
  0x30   :  { %v187_v45 = vmax.f32 %v107_v36, %v795_v28  ;;  %v891_v47 = vunpack.c.h.bf16 %v1075_v34  ;;  %v922_v48 = vunpack.c.l.bf16 %v1082_v35  ;;  %v584_v50 = vmax.f32 %v504_v39, %v950_v12  ;;  %v1042_v28 = vld [vmem:[%s1404_s0 + $0x38] sm:$0xff]  }
  0x31   :  { %v585_v51 = vmax.f32 %v505_v40, %v951_v13  ;;  %v266_v52 = vmax.f32 %v186_v41, %v826_v32  ;;  %v923_v53 = vunpack.c.h.bf16 %v1082_v35  ;;  %v954_v56 = vunpack.c.l.bf16 %v1089_v43  ;;  %v1049_v34 = vld [vmem:[%s1405_s1 + $0x38] sm:$0xff]  }
  0x32   :  { %v267_v55 = vmax.f32 %v187_v45, %v827_v37  ;;  %v955_v57 = vunpack.c.h.bf16 %v1089_v43  ;;  %v986_v58 = vunpack.c.l.bf16 %v1096_v44  ;;  %v664_v60 = vmax.f32 %v584_v50, %v982_v17  ;;  %v1056_v35 = vld [vmem:[%s1406_s2 + $0x38] sm:$0xff]  }
  0x33   :  { %v665_v61 = vmax.f32 %v585_v51, %v983_v33  ;;  %v346_v62 = vmax.f32 %v266_v52, %v858_v38  ;;  %v734_v63 = vunpack.c.l.bf16 %v1041_v49  ;;  %v735_v2 = vunpack.c.h.bf16 %v1041_v49  ;;  %v1063_v43 = vld [vmem:[%s1407_s3 + $0x38] sm:$0xff]  }
  0x34   :  { %v347_v1 = vmax.f32 %v267_v55, %v859_v42  ;;  %v766_v3 = vunpack.c.l.bf16 %v1048_v54  ;;  %v767_v4 = vunpack.c.h.bf16 %v1048_v54  ;;  %v798_v8 = vunpack.c.l.bf16 %v1055_v59 }
  0x35   :  { %v1019_v6 = vpack.c.bf16 %v665_v61, %v664_v60  ;;  %v426_v7 = vmax.f32 %v346_v62, %v890_v46  ;;  %v799_v9 = vunpack.c.h.bf16 %v1055_v59  ;;  %v830_v13 = vunpack.c.l.bf16 %v1062_v0  ;;  %v1077_v62 = vld [vmem:[%s1409_s5 + $0x38] sm:$0xff]  }
  0x36   :  { %v427_v10 = vmax.f32 %v347_v1, %v891_v47  ;;  %v108_v11 = vmax.f32 %v734_v63, %v766_v3  ;;  %v109_v12 = vmax.f32 %v735_v2, %v767_v4  ;;  %v987_v16 = vunpack.c.h.bf16 %v1096_v44  ;;  %v1097_v44 = vld [vmem:[%s1412_s8 + $0x30] sm:$0xff]  }
  0x37   :  { %1102 = vst [vmem:[%s1413_s9 + $0x20] sm:$0xff] %v1019_v6   ;;  %v506_v15 = vmax.f32 %v426_v7, %v922_v48  ;;  %v831_v17 = vunpack.c.h.bf16 %v1062_v0  ;;  %v862_v18 = vunpack.c.l.bf16 %v1069_v5  ;;  %v863_v23 = vunpack.c.h.bf16 %v1069_v5  ;;  %v1084_v5 = vld [vmem:[%s1410_s6 + $0x38] sm:$0xff]  }
  0x38   :  { %v507_v20 = vmax.f32 %v427_v10, %v923_v53  ;;  %v188_v21 = vmax.f32 %v108_v11, %v798_v8  ;;  %v189_v22 = vmax.f32 %v109_v12, %v799_v9  ;;  %v894_v26 = vunpack.c.l.bf16 %v1076_v14  ;;  %v1070_v53 = vld [vmem:[%s1408_s4 + $0x38] sm:$0xff]  }
  0x39   :  { %v586_v25 = vmax.f32 %v506_v15, %v954_v56  ;;  %v895_v27 = vunpack.c.h.bf16 %v1076_v14  ;;  %v926_v32 = vunpack.c.l.bf16 %v1083_v19  ;;  %v927_v36 = vunpack.c.h.bf16 %v1083_v19  ;;  %v1091_v12 = vld [vmem:[%s1411_s7 + $0x38] sm:$0xff]  }
  0x3a   :  { %v587_v29 = vmax.f32 %v507_v20, %v955_v57  ;;  %v268_v30 = vmax.f32 %v188_v21, %v830_v13  ;;  %v269_v31 = vmax.f32 %v189_v22, %v831_v17  ;;  %v958_v37 = vunpack.c.l.bf16 %v1090_v24 }
  0x3b   :  { %v666_v33 = vmax.f32 %v586_v25, %v986_v58  ;;  %v959_v38 = vunpack.c.h.bf16 %v1090_v24  ;;  %v738_v42 = vunpack.c.l.bf16 %v1042_v28  ;;  %v739_v45 = vunpack.c.h.bf16 %v1042_v28 }
  0x3c   :  { %v667_v39 = vmax.f32 %v587_v29, %v987_v16  ;;  %v348_v40 = vmax.f32 %v268_v30, %v862_v18  ;;  %v349_v41 = vmax.f32 %v269_v31, %v863_v23  ;;  %v770_v46 = vunpack.c.l.bf16 %v1049_v34  ;;  %v1098_v18 = vld [vmem:[%s1412_s8 + $0x38] sm:$0xff]  }
  0x3d   :  { %v771_v47 = vunpack.c.h.bf16 %v1049_v34  ;;  %v802_v48 = vunpack.c.l.bf16 %v1056_v35  ;;  %v803_v52 = vunpack.c.h.bf16 %v1056_v35  ;;  %v834_v56 = vunpack.c.l.bf16 %v1063_v43 }
  0x3e   :  { %v1024_v49 = vpack.c.bf16 %v667_v39, %v666_v33  ;;  %v428_v50 = vmax.f32 %v348_v40, %v894_v26  ;;  %v429_v51 = vmax.f32 %v349_v41, %v895_v27  ;;  %v110_v54 = vmax.f32 %v738_v42, %v770_v46 }
  0x3f   :  { %v111_v55 = vmax.f32 %v739_v45, %v771_v47  ;;  %v835_v57 = vunpack.c.h.bf16 %v1063_v43  ;;  %v990_v60 = vunpack.c.l.bf16 %v1097_v44  ;;  %v991_v61 = vunpack.c.h.bf16 %v1097_v44 }
  0x40   :  { %1103 = vst [vmem:[%s1413_s9 + $0x28] sm:$0xff] %v1024_v49   ;;  %v508_v58 = vmax.f32 %v428_v50, %v926_v32  ;;  %v509_v59 = vmax.f32 %v429_v51, %v927_v36  ;;  %v190_v63 = vmax.f32 %v110_v54, %v802_v48  ;;  %v866_v1 = vunpack.c.l.bf16 %v1070_v53 }
  0x41   :  { %v191_v0 = vmax.f32 %v111_v55, %v803_v52  ;;  %v867_v2 = vunpack.c.h.bf16 %v1070_v53  ;;  %v898_v8 = vunpack.c.l.bf16 %v1077_v62  ;;  %v899_v9 = vunpack.c.h.bf16 %v1077_v62 }
  0x42   :  { %v588_v3 = vmax.f32 %v508_v58, %v958_v37  ;;  %v589_v4 = vmax.f32 %v509_v59, %v959_v38  ;;  %v270_v6 = vmax.f32 %v190_v63, %v834_v56  ;;  %v930_v15 = vunpack.c.l.bf16 %v1084_v5 }
  0x43   :  { %v271_v7 = vmax.f32 %v191_v0, %v835_v57  ;;  %v931_v16 = vunpack.c.h.bf16 %v1084_v5  ;;  %v962_v21 = vunpack.c.l.bf16 %v1091_v12  ;;  %v963_v22 = vunpack.c.h.bf16 %v1091_v12 }
  0x44   :  { %v668_v10 = vmax.f32 %v588_v3, %v990_v60  ;;  %v669_v11 = vmax.f32 %v589_v4, %v991_v61  ;;  %v350_v13 = vmax.f32 %v270_v6, %v866_v1  ;;  %v994_v25 = vunpack.c.l.bf16 %v1098_v18 }
  0x45   :  { %v351_v14 = vmax.f32 %v271_v7, %v867_v2  ;;  %v995_v26 = vunpack.c.h.bf16 %v1098_v18 }
  0x46   :  { %v1029_v17 = vpack.c.bf16 %v669_v11, %v668_v10  ;;  %v430_v19 = vmax.f32 %v350_v13, %v898_v8 }
  0x47   :  { %v431_v20 = vmax.f32 %v351_v14, %v899_v9 }
  0x48   :  { %1104 = vst [vmem:[%s1413_s9 + $0x30] sm:$0xff] %v1029_v17   ;;  %v510_v23 = vmax.f32 %v430_v19, %v930_v15 }
  0x49   :  { %v511_v24 = vmax.f32 %v431_v20, %v931_v16 }
  0x4a   :  { %v590_v27 = vmax.f32 %v510_v23, %v962_v21 }
  0x4b   :  { %v591_v28 = vmax.f32 %v511_v24, %v963_v22 }
  0x4c   :  { %v670_v29 = vmax.f32 %v590_v27, %v994_v25 }
  0x4d   :  { %v671_v30 = vmax.f32 %v591_v28, %v995_v26 }
  0x4f   :  { %v1034_v31 = vpack.c.bf16 %v671_v30, %v670_v29 }
  0x51   :  { %1105 = vst [vmem:[%s1413_s9 + $0x38] sm:$0xff] %v1034_v31  }

// kernel: resnet_forward.17
= control target key start
LH: loop header
LB: loop body
LE: loop exit
PB: predicated region body
PF: predicated region fallthrough
CT: control target
= control target key end

     0   :  { %s1657_s15 = smov 0   ;;  %s1659_s16 = smov 0   ;;  %s1968_s0 = inlined_call_operand.vmem [shape: bf16[128,1152], index: 0, kind: input, shape index: {}]   ;;  %s1969_s1 = inlined_call_operand.vmem [shape: bf16[1152,128], index: 1, kind: input, shape index: {}]   ;;  %s1970_s2 = inlined_call_operand.vmem [shape: f32[1,128], index: 2, kind: input, shape index: {}]   ;;  %s1971_s3 = inlined_call_operand.vmem [shape: f32[1,128], index: 3, kind: input, shape index: {}]   ;;  %s1972_s4 = inlined_call_operand.vmem [shape: bf16[128,128], index: 4, kind: output, shape index: {}]  }
   0x1   :  { %s1661_s17 = smov 0   ;;  %s1663_s18 = smov 0  }
   0x2   :  { %s1665_s19 = smov 0  }
   0x3 LB: > { %s26_s20 = sadd.s32 1, %s1625_s18  ;;  %p49_p1 = scmp.ne.s32.totalorder %s1617_s16, %s1613_s15  ;;  %s1629_s19 = sphi %s1665_s19, %s14_s19   ;;  %s1625_s18 = sphi %s1663_s18, %s1976_s18   ;;  %s1621_s17 = sphi %s1661_s17, %s1975_s17   ;;  %s1617_s16 = sphi %s1659_s16, %s1974_s16   ;;  %s1613_s15 = sphi %s1657_s15, %s1973_s15  }
   0x4   : > { %p27_p0 = scmp.ge.s32.totalorder %s26_s20, 3  ;;  %p50_p2 = scmp.eq.s32.totalorder %s1629_s19, 0 }
   0x5   : > { %s42_s22 = sadd.s32 1, %s1617_s16  ;;  %p1192_p5 = scmp.ge.s32.totalorder %s1629_s19, 3 }
   0x6   : > { %s1978_s20 = smov (%p27_p0, %s26_s20), 0  ;;  %p51_p3 = por %p50_p2, %p49_p1 }
   0x7   : > { %s38_s21 = ssub.s32 %s1625_s18, %s1978_s20  ;;  %195 = sbr.rel (%p1192_p5) target bundleno = 49 (0x31), region = 24 }
   0x8   : > { %p40_p4 = scmp.eq.s32.totalorder %s38_s21, 0 }
   0xa   : > { %s1692_s23 = scalar_select %p40_p4, %s1617_s16, %s42_s22  }
   0xc   : > { %198 = sbr.rel (!%p51_p3) target bundleno = 49 (0x31), region = 28  ;;  %s200_s24 = sand.u32 (%p51_p3), 1, %s1617_s16  }
   0xd   : > { %s1426_s25 = smul.u32 (%p51_p3), 12, %s1625_s18 }
   0xe   : > { %s1546_s26 = smul.u32 (%p51_p3), 192, %s200_s24 }
   0xf   : > { %s1700_s29 = scalar_lea.vmem (%p51_p3), %s1968_s0, %s1426_s25 }
  0x10   : > { %v223_v0 = vld [vmem:[%s1700_s29] sm:$0xff] (%p51_p3)  ;;  %v227_v2 = vld [vmem:[%s1700_s29 + $0x48] sm:$0xff] (%p51_p3)  ;;  %s1705_s30 = scalar_lea.vmem (%p51_p3), [#allocation3], %s1546_s26  ;;  %v231_v4 = vld [vmem:[%s1700_s29 + $0x90] sm:$0xff] (%p51_p3) }
  0x11   : > { %v225_v1 = vld [vmem:[%s1700_s29 + $0x24] sm:$0xff]  ;;  %224 = vst [vmem:[%s1705_s30] sm:$0xff] %v223_v0  ;;  %v229_v3 = vld [vmem:[%s1700_s29 + $0x6c] sm:$0xff]  ;;  %v233_v5 = vld [vmem:[%s1700_s29 + $0xb4] sm:$0xff] }
  0x12   : > { %226 = vst [vmem:[%s1705_s30 + $0xc] sm:$0xff] %v225_v1  ;;  %v235_v6 = vld [vmem:[%s1700_s29 + $0xd8] sm:$0xff]  ;;  %v239_v8 = vld [vmem:[%s1700_s29 + $0x120] sm:$0xff]  ;;  %v243_v10 = vld [vmem:[%s1700_s29 + $0x168] sm:$0xff] }
  0x13   : > { %228 = vst [vmem:[%s1705_s30 + $0x18] sm:$0xff] %v227_v2  ;;  %v237_v7 = vld [vmem:[%s1700_s29 + $0xfc] sm:$0xff]  ;;  %v241_v9 = vld [vmem:[%s1700_s29 + $0x144] sm:$0xff]  ;;  %v245_v11 = vld [vmem:[%s1700_s29 + $0x18c] sm:$0xff] }
  0x14   : > { %230 = vst [vmem:[%s1705_s30 + $0x24] sm:$0xff] %v229_v3  ;;  %v247_v12 = vld [vmem:[%s1700_s29 + $0x1b0] sm:$0xff]  ;;  %v251_v14 = vld [vmem:[%s1700_s29 + $0x1f8] sm:$0xff]  ;;  %v1194_v16 = vld [vmem:[%s1700_s29 + $0x8] sm:$0xf] }
  0x15   : > { %232 = vst [vmem:[%s1705_s30 + $0x30] sm:$0xff] %v231_v4  ;;  %v249_v13 = vld [vmem:[%s1700_s29 + $0x1d4] sm:$0xff]  ;;  %v253_v15 = vld [vmem:[%s1700_s29 + $0x21c] sm:$0xff]  ;;  %v1196_v17 = vld [vmem:[%s1700_s29 + $0x2c] sm:$0xf] }
  0x16   : > { %234 = vst [vmem:[%s1705_s30 + $0x3c] sm:$0xff] %v233_v5  ;;  %v1198_v18 = vld [vmem:[%s1700_s29 + $0x50] sm:$0xf]  ;;  %v1200_v19 = vld [vmem:[%s1700_s29 + $0x74] sm:$0xf] }
  0x17   : > { %236 = vst [vmem:[%s1705_s30 + $0x48] sm:$0xff] %v235_v6  ;;  %v1202_v20 = vld [vmem:[%s1700_s29 + $0x98] sm:$0xf]  ;;  %v1204_v21 = vld [vmem:[%s1700_s29 + $0xbc] sm:$0xf] }
  0x18   : > { %238 = vst [vmem:[%s1705_s30 + $0x54] sm:$0xff] %v237_v7  ;;  %v1206_v22 = vld [vmem:[%s1700_s29 + $0xe0] sm:$0xf]  ;;  %v1208_v23 = vld [vmem:[%s1700_s29 + $0x104] sm:$0xf] }
  0x19   : > { %240 = vst [vmem:[%s1705_s30 + $0x60] sm:$0xff] %v239_v8  ;;  %v1210_v24 = vld [vmem:[%s1700_s29 + $0x128] sm:$0xf]  ;;  %v1212_v25 = vld [vmem:[%s1700_s29 + $0x14c] sm:$0xf] }
  0x1a   : > { %242 = vst [vmem:[%s1705_s30 + $0x6c] sm:$0xff] %v241_v9  ;;  %v1214_v26 = vld [vmem:[%s1700_s29 + $0x170] sm:$0xf]  ;;  %v1216_v27 = vld [vmem:[%s1700_s29 + $0x194] sm:$0xf] }
  0x1b   : > { %244 = vst [vmem:[%s1705_s30 + $0x78] sm:$0xff] %v243_v10  ;;  %v1218_v28 = vld [vmem:[%s1700_s29 + $0x1b8] sm:$0xf]  ;;  %v1220_v29 = vld [vmem:[%s1700_s29 + $0x1dc] sm:$0xf] }
  0x1c   : > { %246 = vst [vmem:[%s1705_s30 + $0x84] sm:$0xff] %v245_v11  ;;  %v1222_v30 = vld [vmem:[%s1700_s29 + $0x200] sm:$0xf]  ;;  %v1224_v31 = vld [vmem:[%s1700_s29 + $0x224] sm:$0xf] }
  0x1d   : > { %248 = vst [vmem:[%s1705_s30 + $0x90] sm:$0xff] %v247_v12 }
  0x1e   : > { %250 = vst [vmem:[%s1705_s30 + $0x9c] sm:$0xff] %v249_v13 }
  0x1f   : > { %252 = vst [vmem:[%s1705_s30 + $0xa8] sm:$0xff] %v251_v14 }
  0x20   : > { %254 = vst [vmem:[%s1705_s30 + $0xb4] sm:$0xff] %v253_v15 }
  0x21   : > { %1195 = vst [vmem:[%s1705_s30 + $0x8] sm:$0xf] %v1194_v16 }
  0x22   : > { %1197 = vst [vmem:[%s1705_s30 + $0x14] sm:$0xf] %v1196_v17 }
  0x23   : > { %1199 = vst [vmem:[%s1705_s30 + $0x20] sm:$0xf] %v1198_v18 }
  0x24   : > { %1201 = vst [vmem:[%s1705_s30 + $0x2c] sm:$0xf] %v1200_v19 }
  0x25   : > { %1203 = vst [vmem:[%s1705_s30 + $0x38] sm:$0xf] %v1202_v20 }
  0x26   : > { %1205 = vst [vmem:[%s1705_s30 + $0x44] sm:$0xf] %v1204_v21 }
  0x27   : > { %1207 = vst [vmem:[%s1705_s30 + $0x50] sm:$0xf] %v1206_v22 }
  0x28   : > { %1209 = vst [vmem:[%s1705_s30 + $0x5c] sm:$0xf] %v1208_v23 }
  0x29   : > { %1211 = vst [vmem:[%s1705_s30 + $0x68] sm:$0xf] %v1210_v24 }
  0x2a   : > { %1213 = vst [vmem:[%s1705_s30 + $0x74] sm:$0xf] %v1212_v25 }
  0x2b   : > { %1215 = vst [vmem:[%s1705_s30 + $0x80] sm:$0xf] %v1214_v26 }
  0x2c   : > { %1217 = vst [vmem:[%s1705_s30 + $0x8c] sm:$0xf] %v1216_v27 }
  0x2d   : > { %1219 = vst [vmem:[%s1705_s30 + $0x98] sm:$0xf] %v1218_v28 }
  0x2e   : > { %1221 = vst [vmem:[%s1705_s30 + $0xa4] sm:$0xf] %v1220_v29 }
  0x2f   : > { %1223 = vst [vmem:[%s1705_s30 + $0xb0] sm:$0xf] %v1222_v30 }
  0x30   : > { %1225 = vst [vmem:[%s1705_s30 + $0xbc] sm:$0xf] %v1224_v31 }
  0x31 PF: > { %p1226_p6 = scmp.ge.s32.totalorder %s1629_s19, 1  ;;  %p311_p7 = scmp.lt.s32.totalorder %s1629_s19, 4 }
  0x33   : > { %p312_p8 = pnand %p1226_p6, %p311_p7 }
  0x34   : > { %s318_s5 = sand.u32 (!%p312_p8), 1, %s1613_s15   ;;  %s362_s6 = smul.u32 (!%p312_p8), 48, %s1621_s17 }
  0x35   : > { %315 = sbr.rel (%p312_p8) target bundleno = 360 (0x168), region = 58  ;;  %p1228_p10 = scmp.ne.s32.totalorder (!%p312_p8), %s1621_s17, 0 }
  0x36   : > { %s1547_s7 = smul.u32 (!%p312_p8), 192, %s318_s5  ;;  %p363_p9 = scmp.lt.s32.totalorder (!%p312_p8), %s362_s6, 143 }
  0x38   : > { %s1777_s12 = scalar_lea.vmem (!%p312_p8), [#allocation3], %s1547_s7 }
  0x3a   : > { %s1980_s6 = smov (!%p363_p9, %s362_s6), 143  ;;  %389 = sbr.rel (%p1228_p10) target bundleno = 80 (0x50), region = 66 }
  0x3b   : > { %s1227_s8 = sshll.u32 %s1980_s6, 2 }
  0x3c   : > { %s1775_s11 = scalar_lea.vmem %s1969_s1, %s1227_s8 }
  0x3f   : > { %v1631_v32 = vmov 0.0  }
  0x40   : > { %390 = vst [vmem:[#allocation2 + $0x30] sm:$0xff] %v1631_v32 }
  0x41   : > { %391 = vst [vmem:[#allocation2] sm:$0xff] %v1631_v32 }
  0x42   : > { %392 = vst [vmem:[#allocation2 + $0x58] sm:$0xff] %v1631_v32 }
  0x43   : > { %393 = vst [vmem:[#allocation2 + $0x18] sm:$0xff] %v1631_v32 }
  0x44   : > { %394 = vst [vmem:[#allocation2 + $0x50] sm:$0xff] %v1631_v32 }
  0x45   : > { %395 = vst [vmem:[#allocation2 + $0x68] sm:$0xff] %v1631_v32 }
  0x46   : > { %396 = vst [vmem:[#allocation2 + $0x8] sm:$0xff] %v1631_v32 }
  0x47   : > { %397 = vst [vmem:[#allocation2 + $0x48] sm:$0xff] %v1631_v32 }
  0x48   : > { %398 = vst [vmem:[#allocation2 + $0x40] sm:$0xff] %v1631_v32 }
  0x49   : > { %399 = vst [vmem:[#allocation2 + $0x20] sm:$0xff] %v1631_v32 }
  0x4a   : > { %400 = vst [vmem:[#allocation2 + $0x10] sm:$0xff] %v1631_v32 }
  0x4b   : > { %401 = vst [vmem:[#allocation2 + $0x38] sm:$0xff] %v1631_v32 }
  0x4c   : > { %402 = vst [vmem:[#allocation2 + $0x60] sm:$0xff] %v1631_v32 }
  0x4d   : > { %403 = vst [vmem:[#allocation2 + $0x70] sm:$0xff] %v1631_v32 }
  0x4e   : > { %404 = vst [vmem:[#allocation2 + $0x78] sm:$0xff] %v1631_v32 }
  0x4f   : > { %405 = vst [vmem:[#allocation2 + $0x28] sm:$0xff] %v1631_v32 }
  0x50 PF: > { %v1458_v33 = vld [vmem:[%s1775_s11 + $0x38] sm:$0xff]  ;;  %v1457_v36 = vld [vmem:[%s1775_s11 + $0x30] sm:$0xff]  ;;  %v1456_v39 = vld [vmem:[%s1775_s11 + $0x28] sm:$0xff]  ;;  %p1421_p11 = scmp.ne.s32.totalorder %s1621_s17, 2 }
  0x51   : > { %v1782_v34 = vld [vmem:[%s1775_s11 + $0x78] sm:$0xff]  ;;  %774 = vmatpush.bf16.msra.mxu0 %v1458_v33  ;;  %1522 = vmatpush.bf16.msra.mxu3 %v1458_v33  ;;  %v1791_v37 = vld [vmem:[%s1775_s11 + $0x70] sm:$0xff]  ;;  %v1464_v40 = vld [vmem:[%s1775_s11 + $0x68] sm:$0xff] }
  0x52   : > { %v1785_v35 = vld [vmem:[%s1775_s11 + $0xb8] sm:$0xff]  ;;  %823 = vmatpush.bf16.msra.mxu1 %v1782_v34  ;;  %v1794_v38 = vld [vmem:[%s1775_s11 + $0xb0] sm:$0xff]  ;;  %v1801_v41 = vld [vmem:[%s1775_s11 + $0xa8] sm:$0xff] }
  0x53   : > { %872 = vmatpush.bf16.msra.mxu2 %v1785_v35  ;;  %v1455_v42 = vld [vmem:[%s1775_s11 + $0x20] sm:$0xff]  ;;  %v1454_v45 = vld [vmem:[%s1775_s11 + $0x18] sm:$0xff]  ;;  %v1453_v48 = vld [vmem:[%s1775_s11 + $0x10] sm:$0xff] }
  0x54   : > { %v1463_v43 = vld [vmem:[%s1775_s11 + $0x60] sm:$0xff]  ;;  %v1462_v46 = vld [vmem:[%s1775_s11 + $0x58] sm:$0xff]  ;;  %v1461_v49 = vld [vmem:[%s1775_s11 + $0x50] sm:$0xff] }
  0x55   : > { %775 = vmatpush.bf16.msra.mxu0 %v1457_v36  ;;  %1523 = vmatpush.bf16.msra.mxu3 %v1457_v36  ;;  %v1807_v44 = vld [vmem:[%s1775_s11 + $0xa0] sm:$0xff]  ;;  %v1813_v47 = vld [vmem:[%s1775_s11 + $0x98] sm:$0xff]  ;;  %v1819_v50 = vld [vmem:[%s1775_s11 + $0x90] sm:$0xff] }
  0x56   : > { %824 = vmatpush.bf16.msra.mxu1 %v1791_v37  ;;  %v1452_v51 = vld [vmem:[%s1775_s11 + $0x8] sm:$0xff]  ;;  %v1451_v54 = vld [vmem:[%s1775_s11] sm:$0xff]  ;;  %v1303_v59 = vld [vmem:[%s1777_s12 + $0x90] sm:$0xf] }
  0x57   : > { %873 = vmatpush.bf16.msra.mxu2 %v1794_v38  ;;  %v1460_v52 = vld [vmem:[%s1775_s11 + $0x48] sm:$0xff]  ;;  %v1459_v55 = vld [vmem:[%s1775_s11 + $0x40] sm:$0xff]  ;;  %v1446_v60 = vld [vmem:[%s1777_s12 + $0x98] sm:$0xf0] }
  0x58   : > { %v1825_v53 = vld [vmem:[%s1775_s11 + $0x88] sm:$0xff]  ;;  %v1830_v56 = vld [vmem:[%s1775_s11 + $0x80] sm:$0xff]  ;;  %v1233_v62 = vld [vmem:[%s1777_s12 + $0xc] sm:$0xf0]  ;;  %v1304_v2 = vor.u32 %v1446_v60, %v1303_v59 }
  0x59   : > { %776 = vmatpush.bf16.msra.mxu0 %v1456_v39  ;;  %1524 = vmatpush.bf16.msra.mxu3 %v1456_v39  ;;  %v1231_v57 = vld [vmem:[%s1777_s12] sm:$0xf]  ;;  %v1428_v58 = vld [vmem:[%s1777_s12 + $0x8] sm:$0xf0]  ;;  %v1427_v61 = vld [vmem:[%s1777_s12 + $0x4] sm:$0xf] }
  0x5a   : > { %825 = vmatpush.bf16.msra.mxu1 %v1464_v40  ;;  %v1239_v63 = vld [vmem:[%s1777_s12 + $0x8] sm:$0xf]  ;;  %v1429_v0 = vld [vmem:[%s1777_s12 + $0x10] sm:$0xf0]  ;;  %v1232_v1 = vor.u32 %v1428_v58, %v1231_v57  ;;  %v1236_v3 = vor.u32 %v1427_v61, %v1233_v62  ;;  %v1243_v5 = vld [vmem:[%s1777_s12 + $0x18] sm:$0xf] }
  0x5b   : > { %874 = vmatpush.bf16.msra.mxu2 %v1801_v41  ;;  %v1240_v4 = vor.u32 %v1429_v0, %v1239_v63  ;;  %v1431_v6 = vld [vmem:[%s1777_s12 + $0x20] sm:$0xf0]  ;;  %v1315_v7 = vld [vmem:[%s1777_s12 + $0xa8] sm:$0xf]  ;;  %v1449_v8 = vld [vmem:[%s1777_s12 + $0xb0] sm:$0xf0] }
  0x5c   : > { %v1430_v9 = vld [vmem:[%s1777_s12 + $0x1c] sm:$0xf]  ;;  %v1245_v10 = vld [vmem:[%s1777_s12 + $0x24] sm:$0xf0]  ;;  %v1251_v11 = vld [vmem:[%s1777_s12 + $0x20] sm:$0xf]  ;;  %v1244_v13 = vor.u32 %v1431_v6, %v1243_v5  ;;  %v1316_v14 = vor.u32 %v1449_v8, %v1315_v7 }
  0x5d   : > { %777 = vmatpush.bf16.msra.mxu0 %v1455_v42  ;;  %1525 = vmatpush.bf16.msra.mxu3 %v1455_v42  ;;  %v1432_v12 = vld [vmem:[%s1777_s12 + $0x28] sm:$0xf0]  ;;  %v1248_v15 = vor.u32 %v1430_v9, %v1245_v10  ;;  %v1255_v17 = vld [vmem:[%s1777_s12 + $0x30] sm:$0xf]  ;;  %v1434_v18 = vld [vmem:[%s1777_s12 + $0x38] sm:$0xf0] }
  0x5e   : > { %826 = vmatpush.bf16.msra.mxu1 %v1463_v43  ;;  %v1252_v16 = vor.u32 %v1432_v12, %v1251_v11  ;;  %v1433_v19 = vld [vmem:[%s1777_s12 + $0x34] sm:$0xf]  ;;  %v1305_v21 = vld [vmem:[%s1777_s12 + $0x9c] sm:$0xf0]  ;;  %v1263_v23 = vld [vmem:[%s1777_s12 + $0x38] sm:$0xf]  ;;  %v1256_v25 = vor.u32 %v1434_v18, %v1255_v17 }
  0x5f   : > { %875 = vmatpush.bf16.msra.mxu2 %v1807_v44  ;;  %v1445_v20 = vld [vmem:[%s1777_s12 + $0x94] sm:$0xf]  ;;  %v1257_v22 = vld [vmem:[%s1777_s12 + $0x3c] sm:$0xf0]  ;;  %v1435_v24 = vld [vmem:[%s1777_s12 + $0x40] sm:$0xf0] }
  0x60   : > { %v1308_v26 = vor.u32 %v1445_v20, %v1305_v21  ;;  %v1260_v27 = vor.u32 %v1433_v19, %v1257_v22  ;;  %v1264_v28 = vor.u32 %v1435_v24, %v1263_v23  ;;  %v1267_v29 = vld [vmem:[%s1777_s12 + $0x48] sm:$0xf]  ;;  %v1437_v30 = vld [vmem:[%s1777_s12 + $0x50] sm:$0xf0]  ;;  %v1436_v31 = vld [vmem:[%s1777_s12 + $0x4c] sm:$0xf] }
  0x61   : > { %778 = vmatpush.bf16.msra.mxu0 %v1454_v45  ;;  %1526 = vmatpush.bf16.msra.mxu3 %v1454_v45  ;;  %v1448_v32 = vld [vmem:[%s1777_s12 + $0xac] sm:$0xf]  ;;  %v1317_v33 = vld [vmem:[%s1777_s12 + $0xb4] sm:$0xf0]  ;;  %v1438_v36 = vld [vmem:[%s1777_s12 + $0x58] sm:$0xf0] }
  0x62   : > { %827 = vmatpush.bf16.msra.mxu1 %v1462_v46  ;;  %v1320_v39 = vor.u32 %v1448_v32, %v1317_v33  ;;  %v1440_v42 = vld [vmem:[%s1777_s12 + $0x68] sm:$0xf0]  ;;  %v1447_v45 = vld [vmem:[%s1777_s12 + $0xa0] sm:$0xf0]  ;;  %v1323_v57 = vld [vmem:[%s1777_s12 + $0xb0] sm:$0xf] }
  0x63   : > { %876 = vmatpush.bf16.msra.mxu2 %v1813_v47  ;;  %v1293_v58 = vld [vmem:[%s1777_s12 + $0x84] sm:$0xf0]  ;;  %v1299_v59 = vld [vmem:[%s1777_s12 + $0x80] sm:$0xf]  ;;  %v1444_v60 = vld [vmem:[%s1777_s12 + $0x88] sm:$0xf0] }
  0x64   : > { %v1300_v0 = vor.u32 %v1444_v60, %v1299_v59  ;;  %v406_v5 = vld [vmem:[#allocation2 + $0x30] sm:$0xff]  ;;  %v408_v21 = vld [vmem:[#allocation2 + $0x58] sm:$0xff] }
  0x65   : > { %779 = vmatpush.bf16.msra.mxu0 %v1453_v48  ;;  %1527 = vmatpush.bf16.msra.mxu3 %v1453_v48  ;;  %v1441_v48 = vld [vmem:[%s1777_s12 + $0x70] sm:$0xf0] }
  0x66   : > { %828 = vmatpush.bf16.msra.mxu1 %v1461_v49 }
  0x67   : > { %877 = vmatpush.bf16.msra.mxu2 %v1819_v50 }
  0x69   : > { %780 = vmatpush.bf16.msra.mxu0 %v1452_v51  ;;  %1528 = vmatpush.bf16.msra.mxu3 %v1452_v51 }
  0x6a   : > { %829 = vmatpush.bf16.msra.mxu1 %v1460_v52 }
  0x6b   : > { %878 = vmatpush.bf16.msra.mxu2 %v1825_v53 }
  0x6d   : > { %781 = vmatpush.bf16.msra.mxu0 %v1451_v54  ;;  %1529 = vmatpush.bf16.msra.mxu3 %v1451_v54  ;;  %v1443_v54 = vld [vmem:[%s1777_s12 + $0x80] sm:$0xf0] }
  0x6e   : > { %830 = vmatpush.bf16.msra.mxu1 %v1459_v55 }
  0x6f   : > { %879 = vmatpush.bf16.msra.mxu2 %v1830_v56 }
  0x70   : > { %782 = vmatmul.bf16.vlgmr.msra.gmra.mxu0 %v1232_v1  ;;  %812 = vmatmul.bf16.vlgmr.msra.gmra.mxu3 %v1304_v2 }
  0x71   : > { %1530 = vmatpush.bf16.msrb.mxu3 %v1782_v34  ;;  %831 = vmatmul.bf16.vlgmr.msra.gmra.mxu1 %v1236_v3  ;;  %v1269_v34 = vld [vmem:[%s1777_s12 + $0x54] sm:$0xf0] }
  0x72   : > { %880 = vmatmul.bf16.vlgmr.msra.gmra.mxu2 %v1240_v4 }
  0x75   : > { %1531 = vmatpush.bf16.msrb.mxu3 %v1791_v37  ;;  %v1268_v37 = vor.u32 %v1437_v30, %v1267_v29  ;;  %v409_v29 = vld [vmem:[#allocation2 + $0x18] sm:$0xff] }
  0x79   : > { %1532 = vmatpush.bf16.msrb.mxu3 %v1464_v40 }
  0x7d   : > { %1533 = vmatpush.bf16.msrb.mxu3 %v1463_v43  ;;  %v1439_v43 = vld [vmem:[%s1777_s12 + $0x64] sm:$0xf] }
  0x80   : > { %787 = vmatmul.bf16.gmra.mxu0 %v1244_v13  ;;  %817 = vmatmul.bf16.gmra.mxu3 %v1316_v14  ;;  %v407_v13 = vld [vmem:[#allocation2] sm:$0xff] }
  0x81   : > { %1534 = vmatpush.bf16.msrb.mxu3 %v1462_v46  ;;  %836 = vmatmul.bf16.gmra.mxu1 %v1248_v15  ;;  %v1281_v46 = vld [vmem:[%s1777_s12 + $0x6c] sm:$0xf0] }
  0x82   : > { %885 = vmatmul.bf16.gmra.mxu2 %v1252_v16  ;;  %v1284_v51 = vor.u32 %v1439_v43, %v1281_v46 }
  0x85   : > { %1535 = vmatpush.bf16.msrb.mxu3 %v1461_v49 }
  0x89   : > { %1536 = vmatpush.bf16.msrb.mxu3 %v1460_v52 }
  0x8d   : > { %1537 = vmatpush.bf16.msrb.mxu3 %v1459_v55  ;;  %v1442_v55 = vld [vmem:[%s1777_s12 + $0x7c] sm:$0xf] }
  0x8e   : > { %v1296_v63 = vor.u32 %v1442_v55, %v1293_v58 }
  0x90   : > { %792 = vmatmul.bf16.gmra.mxu0 %v1256_v25  ;;  %861 = vmatmul.bf16.vlgmr.msrb.gmra.mxu3 %v1308_v26 }
  0x91   : > { %1538 = vmatpush.bf16.msra.mxu3 %v1785_v35  ;;  %841 = vmatmul.bf16.gmra.mxu1 %v1260_v27  ;;  %v1275_v35 = vld [vmem:[%s1777_s12 + $0x50] sm:$0xf] }
  0x92   : > { %890 = vmatmul.bf16.gmra.mxu2 %v1264_v28  ;;  %v1276_v40 = vor.u32 %v1438_v36, %v1275_v35 }
  0x95   : > { %1539 = vmatpush.bf16.msra.mxu3 %v1794_v38  ;;  %v1272_v38 = vor.u32 %v1436_v31, %v1269_v34 }
  0x99   : > { %1540 = vmatpush.bf16.msra.mxu3 %v1801_v41  ;;  %v1279_v41 = vld [vmem:[%s1777_s12 + $0x60] sm:$0xf] }
  0x9a   : > { %v1280_v49 = vor.u32 %v1440_v42, %v1279_v41 }
  0x9d   : > { %1541 = vmatpush.bf16.msra.mxu3 %v1807_v44  ;;  %v1311_v44 = vld [vmem:[%s1777_s12 + $0x98] sm:$0xf] }
  0xa0   : > { %797 = vmatmul.bf16.gmra.mxu0 %v1268_v37  ;;  %866 = vmatmul.bf16.gmra.mxu3 %v1320_v39  ;;  %v410_v37 = vld [vmem:[#allocation2 + $0x50] sm:$0xff] }
  0xa1   : > { %1542 = vmatpush.bf16.msra.mxu3 %v1813_v47  ;;  %846 = vmatmul.bf16.gmra.mxu1 %v1272_v38  ;;  %v1287_v47 = vld [vmem:[%s1777_s12 + $0x68] sm:$0xf] }
  0xa2   : > { %895 = vmatmul.bf16.gmra.mxu2 %v1276_v40  ;;  %v1288_v52 = vor.u32 %v1441_v48, %v1287_v47 }
  0xa5   : > { %1543 = vmatpush.bf16.msra.mxu3 %v1819_v50  ;;  %v1312_v50 = vor.u32 %v1447_v45, %v1311_v44  ;;  %v411_v45 = vld [vmem:[#allocation2 + $0x68] sm:$0xff] }
  0xa9   : > { %1544 = vmatpush.bf16.msra.mxu3 %v1825_v53  ;;  %v1291_v53 = vld [vmem:[%s1777_s12 + $0x78] sm:$0xf] }
  0xaa   : > { %v1292_v61 = vor.u32 %v1443_v54, %v1291_v53  ;;  %v412_v53 = vld [vmem:[#allocation2 + $0x8] sm:$0xff] }
  0xad   : > { %1545 = vmatpush.bf16.msra.mxu3 %v1830_v56  ;;  %v1450_v56 = vld [vmem:[%s1777_s12 + $0xb8] sm:$0xf0] }
  0xae   : > { %v1324_v62 = vor.u32 %v1450_v56, %v1323_v57 }
  0xb0   : > { %802 = vmatmul.bf16.gmra.mxu0 %v1280_v49  ;;  %910 = vmatmul.bf16.vlgmr.msra.gmra.mxu3 %v1312_v50 }
  0xb1   : > { %851 = vmatmul.bf16.gmra.mxu1 %v1284_v51 }
  0xb2   : > { %900 = vmatmul.bf16.gmra.mxu2 %v1288_v52 }
  0xc0   : > { %807 = vmatmul.bf16.gmra.mxu0 %v1292_v61  ;;  %915 = vmatmul.bf16.gmra.mxu3 %v1324_v62  ;;  %v413_v61 = vld [vmem:[#allocation2 + $0x48] sm:$0xff] }
  0xc1   : > { %856 = vmatmul.bf16.gmra.mxu1 %v1296_v63 }
  0xc2   : > { %905 = vmatmul.bf16.gmra.mxu2 %v1300_v0 }
  0xed   : > { %v783_v1 = vpop.f32.mrf.mxu0 }
  0xee   : > { %v832_v2 = vpop.f32.mrf.mxu1 }
  0xef   : > { %v833_v3 = vadd.f32 %v832_v2, %v783_v1 }
  0xf3   : > { %v1892_v4 = vpop.f32.mrf.mxu3 }
  0xf5   : > { %v881_v6 = vpop.f32.mrf.mxu2  ;;  %v785_v8 = vpop.f32.mrf.mxu0 }
  0xf6   : > { %v882_v7 = vadd.f32 %v881_v6, %v833_v3  ;;  %v834_v9 = vpop.f32.mrf.mxu1  ;;  %v418_v6 = vld [vmem:[#allocation2 + $0x60] sm:$0xff] }
  0xf7   : > { %v835_v11 = vadd.f32 %v834_v9, %v785_v8  ;;  %v414_v8 = vld [vmem:[#allocation2 + $0x40] sm:$0xff] }
  0xf8   : > { %v921_v10 = vadd.f32 %v882_v7, %v406_v5 }
  0xfa   : > { %937 = vst [vmem:[#allocation2 + $0x30] sm:$0xff] %v921_v10 }
  0xfb   : > { %v1894_v12 = vpop.f32.mrf.mxu3 }
  0xfd   : > { %v883_v14 = vpop.f32.mrf.mxu2  ;;  %v788_v16 = vpop.f32.mrf.mxu0 }
  0xfe   : > { %v884_v15 = vadd.f32 %v883_v14, %v835_v11  ;;  %v837_v17 = vpop.f32.mrf.mxu1 }
  0xff   : > { %v838_v19 = vadd.f32 %v837_v17, %v788_v16 }
 0x100   : > { %v922_v18 = vadd.f32 %v884_v15, %v407_v13 }
 0x102   : > { %938 = vst [vmem:[#allocation2] sm:$0xff] %v922_v18 }
 0x103   : > { %v1896_v20 = vpop.f32.mrf.mxu3 }
 0x105   : > { %v886_v22 = vpop.f32.mrf.mxu2  ;;  %v790_v24 = vpop.f32.mrf.mxu0 }
 0x106   : > { %v887_v23 = vadd.f32 %v886_v22, %v838_v19  ;;  %v839_v25 = vpop.f32.mrf.mxu1  ;;  %v419_v19 = vld [vmem:[#allocation2 + $0x70] sm:$0xff]  ;;  %v415_v22 = vld [vmem:[#allocation2 + $0x20] sm:$0xff] }
 0x107   : > { %v840_v27 = vadd.f32 %v839_v25, %v790_v24 }
 0x108   : > { %v923_v26 = vadd.f32 %v887_v23, %v408_v21 }
 0x10a   : > { %939 = vst [vmem:[#allocation2 + $0x58] sm:$0xff] %v923_v26 }
 0x10b   : > { %v1898_v28 = vpop.f32.mrf.mxu3 }
 0x10d   : > { %v888_v30 = vpop.f32.mrf.mxu2  ;;  %v793_v32 = vpop.f32.mrf.mxu0 }
 0x10e   : > { %v889_v31 = vadd.f32 %v888_v30, %v840_v27  ;;  %v842_v33 = vpop.f32.mrf.mxu1 }
 0x10f   : > { %v843_v35 = vadd.f32 %v842_v33, %v793_v32  ;;  %v420_v32 = vld [vmem:[#allocation2 + $0x78] sm:$0xff] }
 0x110   : > { %v924_v34 = vadd.f32 %v889_v31, %v409_v29 }
 0x112   : > { %940 = vst [vmem:[#allocation2 + $0x18] sm:$0xff] %v924_v34  ;;  %v416_v34 = vld [vmem:[#allocation2 + $0x10] sm:$0xff] }
 0x113   : > { %v862_v36 = vpop.f32.mrf.mxu3 }
 0x114   : > { %v863_v5 = vadd.f32 %v862_v36, %v1892_v4 }
 0x115   : > { %v891_v39 = vpop.f32.mrf.mxu2  ;;  %v795_v40 = vpop.f32.mrf.mxu0 }
 0x116   : > { %v892_v38 = vadd.f32 %v891_v39, %v843_v35  ;;  %v844_v41 = vpop.f32.mrf.mxu1 }
 0x117   : > { %v845_v43 = vadd.f32 %v844_v41, %v795_v40 }
 0x118   : > { %v925_v42 = vadd.f32 %v892_v38, %v410_v37 }
 0x11a   : > { %941 = vst [vmem:[#allocation2 + $0x50] sm:$0xff] %v925_v42 }
 0x11b   : > { %v864_v44 = vpop.f32.mrf.mxu3 }
 0x11c   : > { %v865_v17 = vadd.f32 %v864_v44, %v1894_v12 }
 0x11d   : > { %v893_v46 = vpop.f32.mrf.mxu2  ;;  %v798_v48 = vpop.f32.mrf.mxu0 }
 0x11e   : > { %v894_v47 = vadd.f32 %v893_v46, %v845_v43  ;;  %v847_v49 = vpop.f32.mrf.mxu1  ;;  %v421_v43 = vld [vmem:[#allocation2 + $0x28] sm:$0xff] }
 0x11f   : > { %v848_v51 = vadd.f32 %v847_v49, %v798_v48 }
 0x120   : > { %v926_v50 = vadd.f32 %v894_v47, %v411_v45  ;;  %v417_v45 = vld [vmem:[#allocation2 + $0x38] sm:$0xff] }
 0x122   : > { %942 = vst [vmem:[#allocation2 + $0x68] sm:$0xff] %v926_v50 }
 0x123   : > { %v867_v52 = vpop.f32.mrf.mxu3 }
 0x124   : > { %v868_v31 = vadd.f32 %v867_v52, %v1896_v20 }
 0x125   : > { %v896_v54 = vpop.f32.mrf.mxu2  ;;  %v800_v57 = vpop.f32.mrf.mxu0 }
 0x126   : > { %v897_v55 = vadd.f32 %v896_v54, %v848_v51  ;;  %v849_v56 = vpop.f32.mrf.mxu1 }
 0x127   : > { %v850_v59 = vadd.f32 %v849_v56, %v800_v57 }
 0x128   : > { %v927_v58 = vadd.f32 %v897_v55, %v412_v53 }
 0x12a   : > { %943 = vst [vmem:[#allocation2 + $0x8] sm:$0xff] %v927_v58 }
 0x12b   : > { %v869_v60 = vpop.f32.mrf.mxu3 }
 0x12c   : > { %v870_v41 = vadd.f32 %v869_v60, %v1898_v28 }
 0x12d   : > { %v898_v62 = vpop.f32.mrf.mxu2  ;;  %v803_v0 = vpop.f32.mrf.mxu0 }
 0x12e   : > { %v899_v63 = vadd.f32 %v898_v62, %v850_v59  ;;  %v852_v1 = vpop.f32.mrf.mxu1 }
 0x12f   : > { %v853_v3 = vadd.f32 %v852_v1, %v803_v0 }
 0x130   : > { %v928_v2 = vadd.f32 %v899_v63, %v413_v61 }
 0x132   : > { %944 = vst [vmem:[#allocation2 + $0x48] sm:$0xff] %v928_v2 }
 0x133   : > { %v911_v7 = vpop.f32.mrf.mxu3 }
 0x134   : > { %v912_v10 = vadd.f32 %v911_v7, %v863_v5 }
 0x135   : > { %v901_v9 = vpop.f32.mrf.mxu2  ;;  %v805_v13 = vpop.f32.mrf.mxu0 }
 0x136   : > { %v902_v11 = vadd.f32 %v901_v9, %v853_v3  ;;  %v933_v14 = vadd.f32 %v912_v10, %v418_v6  ;;  %v854_v15 = vpop.f32.mrf.mxu1 }
 0x137   : > { %v855_v18 = vadd.f32 %v854_v15, %v805_v13 }
 0x138   : > { %v929_v16 = vadd.f32 %v902_v11, %v414_v8  ;;  %949 = vst [vmem:[#allocation2 + $0x60] sm:$0xff] %v933_v14 }
 0x13a   : > { %945 = vst [vmem:[#allocation2 + $0x40] sm:$0xff] %v929_v16 }
 0x13b   : > { %v913_v21 = vpop.f32.mrf.mxu3 }
 0x13c   : > { %v914_v4 = vadd.f32 %v913_v21, %v865_v17 }
 0x13d   : > { %v903_v23 = vpop.f32.mrf.mxu2  ;;  %v808_v26 = vpop.f32.mrf.mxu0 }
 0x13e   : > { %v904_v24 = vadd.f32 %v903_v23, %v855_v18  ;;  %v934_v25 = vadd.f32 %v914_v4, %v419_v19  ;;  %v857_v27 = vpop.f32.mrf.mxu1 }
 0x13f   : > { %v858_v30 = vadd.f32 %v857_v27, %v808_v26 }
 0x140   : > { %v930_v29 = vadd.f32 %v904_v24, %v415_v22  ;;  %950 = vst [vmem:[#allocation2 + $0x70] sm:$0xff] %v934_v25 }
 0x142   : > { %946 = vst [vmem:[#allocation2 + $0x20] sm:$0xff] %v930_v29 }
 0x143   : > { %v916_v33 = vpop.f32.mrf.mxu3 }
 0x144   : > { %v917_v35 = vadd.f32 %v916_v33, %v868_v31 }
 0x145   : > { %v906_v12 = vpop.f32.mrf.mxu2  ;;  %v810_v38 = vpop.f32.mrf.mxu0 }
 0x146   : > { %v907_v36 = vadd.f32 %v906_v12, %v858_v30  ;;  %v935_v37 = vadd.f32 %v917_v35, %v420_v32  ;;  %v859_v40 = vpop.f32.mrf.mxu1 }
 0x147   : > { %v860_v42 = vadd.f32 %v859_v40, %v810_v38 }
 0x148   : > { %v931_v39 = vadd.f32 %v907_v36, %v416_v34  ;;  %951 = vst [vmem:[#allocation2 + $0x78] sm:$0xff] %v935_v37 }
 0x14a   : > { %947 = vst [vmem:[#allocation2 + $0x10] sm:$0xff] %v931_v39 }
 0x14b   : > { %v918_v44 = vpop.f32.mrf.mxu3 }
 0x14c   : > { %v919_v20 = vadd.f32 %v918_v44, %v870_v41 }
 0x14d   : > { %v908_v46 = vpop.f32.mrf.mxu2 }
 0x14e   : > { %v909_v47 = vadd.f32 %v908_v46, %v860_v42  ;;  %v936_v48 = vadd.f32 %v919_v20, %v421_v43  ;;  %956 = sbr.rel (%p1421_p11) target bundleno = 360 (0x168), region = 70 }
 0x150   : > { %v932_v49 = vadd.f32 %v909_v47, %v417_v45  ;;  %952 = vst [vmem:[#allocation2 + $0x28] sm:$0xff] %v936_v48 }
 0x152   : > { %948 = vst [vmem:[#allocation2 + $0x38] sm:$0xff] %v932_v49 }
 0x153   : > { %v957_v50 = vld [vmem:[#allocation2 + $0x30] sm:$0xff]  ;;  %v958_v51 = vld [vmem:[#allocation2] sm:$0xff]  ;;  %v959_v53 = vld [vmem:[#allocation2 + $0x58] sm:$0xff] }
 0x154   : > { %v1589_v28 = vld [vmem:[%s1970_s2] ss:$0 sm:$0xff]  ;;  %v960_v54 = vld [vmem:[#allocation2 + $0x18] sm:$0xff]  ;;  %v961_v55 = vld [vmem:[#allocation2 + $0x50] sm:$0xff] }
 0x155   : > { %v1911_v52 = vld [vmem:[%s1971_s3] ss:$0 sm:$0xff]  ;;  %v977_v57 = vmul.f32 %v1589_v28, %v957_v50  ;;  %v978_v56 = vmul.f32 %v1589_v28, %v958_v51  ;;  %v979_v58 = vmul.f32 %v1589_v28, %v959_v53  ;;  %v980_v59 = vmul.f32 %v1589_v28, %v960_v54  ;;  %v962_v60 = vld [vmem:[#allocation2 + $0x68] sm:$0xff]  ;;  %v967_v19 = vld [vmem:[#allocation2 + $0x10] sm:$0xff] }
 0x156   : > { %v963_v61 = vld [vmem:[#allocation2 + $0x8] sm:$0xff]  ;;  %v981_v63 = vmul.f32 %v1589_v28, %v961_v55  ;;  %v982_v0 = vmul.f32 %v1589_v28, %v962_v60  ;;  %v965_v13 = vld [vmem:[#allocation2 + $0x40] sm:$0xff]  ;;  %v970_v26 = vld [vmem:[#allocation2 + $0x70] sm:$0xff]  ;;  %v987_v35 = vmul.f32 %v1589_v28, %v967_v19 }
 0x157   : > { %v964_v62 = vld [vmem:[#allocation2 + $0x48] sm:$0xff]  ;;  %v983_v1 = vmul.f32 %v1589_v28, %v963_v61  ;;  %v997_v3 = vadd.f32 %v1911_v52, %v977_v57  ;;  %v998_v5 = vadd.f32 %v1911_v52, %v978_v56  ;;  %v999_v6 = vadd.f32 %v1911_v52, %v979_v58  ;;  %v966_v14 = vld [vmem:[#allocation2 + $0x20] sm:$0xff]  ;;  %v971_v32 = vld [vmem:[#allocation2 + $0x78] sm:$0xff] }
 0x158   : > { %v984_v2 = vmul.f32 %v1589_v28, %v964_v62  ;;  %v1000_v7 = vadd.f32 %v1911_v52, %v980_v59  ;;  %v1001_v8 = vadd.f32 %v1911_v52, %v981_v63  ;;  %v1002_v9 = vadd.f32 %v1911_v52, %v982_v0  ;;  %v969_v25 = vld [vmem:[#allocation2 + $0x60] sm:$0xff]  ;;  %v972_v33 = vld [vmem:[#allocation2 + $0x28] sm:$0xff] }
 0x159   : > { %v1003_v10 = vadd.f32 %v1911_v52, %v983_v1  ;;  %v1013_v15 = vmax.f32 %v997_v3, 0.0  ;;  %v1014_v16 = vmax.f32 %v998_v5, 0.0  ;;  %v1015_v17 = vmax.f32 %v999_v6, 0.0  ;;  %v968_v21 = vld [vmem:[#allocation2 + $0x38] sm:$0xff] }
 0x15a   : > { %v1004_v11 = vadd.f32 %v1911_v52, %v984_v2  ;;  %v1016_v18 = vmax.f32 %v1000_v7, 0.0  ;;  %v1017_v22 = vmax.f32 %v1001_v8, 0.0  ;;  %v1018_v23 = vmax.f32 %v1002_v9, 0.0 }
 0x15b   : > { %v1019_v4 = vmax.f32 %v1003_v10, 0.0  ;;  %v1478_v27 = vpack.c.bf16 %v1014_v16, %v1013_v15  ;;  %v985_v30 = vmul.f32 %v1589_v28, %v965_v13  ;;  %v986_v31 = vmul.f32 %v1589_v28, %v966_v14 }
 0x15c   : > { %v1020_v24 = vmax.f32 %v1004_v11, 0.0  ;;  %v1483_v29 = vpack.c.bf16 %v1016_v18, %v1015_v17  ;;  %v1488_v34 = vpack.c.bf16 %v1018_v23, %v1017_v22  ;;  %v988_v36 = vmul.f32 %v1589_v28, %v968_v21 }
 0x15d   : > { %1479 = vst [vmem:[%s1972_s4] sm:$0xff] %v1478_v27   ;;  %v1005_v37 = vadd.f32 %v1911_v52, %v985_v30  ;;  %v1006_v39 = vadd.f32 %v1911_v52, %v986_v31  ;;  %v989_v38 = vmul.f32 %v1589_v28, %v969_v25  ;;  %v990_v40 = vmul.f32 %v1589_v28, %v970_v26 }
 0x15e   : > { %v1493_v12 = vpack.c.bf16 %v1020_v24, %v1019_v4  ;;  %1515 = vst [vmem:[%s1972_s4 + $0x8] sm:$0xff] %v1483_v29   ;;  %v1007_v41 = vadd.f32 %v1911_v52, %v987_v35  ;;  %v1008_v42 = vadd.f32 %v1911_v52, %v988_v36  ;;  %v991_v43 = vmul.f32 %v1589_v28, %v971_v32 }
 0x15f   : > { %v992_v44 = vmul.f32 %v1589_v28, %v972_v33  ;;  %1516 = vst [vmem:[%s1972_s4 + $0x10] sm:$0xff] %v1488_v34   ;;  %v1021_v45 = vmax.f32 %v1005_v37, 0.0  ;;  %v1022_v46 = vmax.f32 %v1006_v39, 0.0  ;;  %v1009_v20 = vadd.f32 %v1911_v52, %v989_v38 }
 0x160   : > { %v1010_v47 = vadd.f32 %v1911_v52, %v990_v40  ;;  %1517 = vst [vmem:[%s1972_s4 + $0x18] sm:$0xff] %v1493_v12   ;;  %v1023_v48 = vmax.f32 %v1007_v41, 0.0  ;;  %v1024_v49 = vmax.f32 %v1008_v42, 0.0  ;;  %v1011_v50 = vadd.f32 %v1911_v52, %v991_v43 }
 0x161   : > { %v1012_v51 = vadd.f32 %v1911_v52, %v992_v44  ;;  %v1498_v28 = vpack.c.bf16 %v1022_v46, %v1021_v45  ;;  %v1025_v53 = vmax.f32 %v1009_v20, 0.0 }
 0x162   : > { %v1026_v54 = vmax.f32 %v1010_v47, 0.0  ;;  %v1503_v55 = vpack.c.bf16 %v1024_v49, %v1023_v48  ;;  %v1027_v57 = vmax.f32 %v1011_v50, 0.0 }
 0x163   : > { %v1028_v56 = vmax.f32 %v1012_v51, 0.0  ;;  %1518 = vst [vmem:[%s1972_s4 + $0x20] sm:$0xff] %v1498_v28  }
 0x164   : > { %v1508_v58 = vpack.c.bf16 %v1026_v54, %v1025_v53  ;;  %1519 = vst [vmem:[%s1972_s4 + $0x28] sm:$0xff] %v1503_v55  }
 0x165   : > { %v1513_v59 = vpack.c.bf16 %v1028_v56, %v1027_v57 }
 0x166   : > { %1520 = vst [vmem:[%s1972_s4 + $0x30] sm:$0xff] %v1508_v58  }
 0x167   : > { %1521 = vst [vmem:[%s1972_s4 + $0x38] sm:$0xff] %v1513_v59  }
 0x168 PF: > { %s14_s19 = sadd.s32 1, %s1629_s19   ;;  %s1973_s15 = smov %s1617_s16 }
 0x169   : > { %p11_p12 = scmp.ge.s32.totalorder %s14_s19, 5   ;;  %s1974_s16 = smov %s1692_s23 }
 0x16a   : > { %s1975_s17 = smov %s1625_s18  ;;  %s1976_s18 = smov %s1978_s20 }
 0x16b   :  { %13 = sbr.rel (!%p11_p12) target bundleno = 3 (0x3), region = 120 }

// kernel: resnet_forward.15
= control target key start
LH: loop header
LB: loop body
LE: loop exit
PB: predicated region body
PF: predicated region fallthrough
CT: control target
= control target key end

     0   :  { %s2820_s1 = inlined_call_operand.vmem [shape: bf16[256,128], index: 1, kind: input, shape index: {}]   ;;  %s2821_s0 = inlined_call_operand.vmem [shape: bf16[512,256], index: 0, kind: input, shape index: {}]   ;;  %s2822_s2 = inlined_call_operand.vmem [shape: f32[1,128], index: 2, kind: input, shape index: {}]   ;;  %s2823_s3 = inlined_call_operand.vmem [shape: f32[1,128], index: 3, kind: input, shape index: {}]   ;;  %s2824_s4 = inlined_call_operand.vmem [shape: bf16[512,128], index: 4, kind: output, shape index: {}]  }
   0x1   :  { %v1917_v0 = vld [vmem:[%s2820_s1 + $0x38] sm:$0xff]  ;;  %v1916_v2 = vld [vmem:[%s2820_s1 + $0x30] sm:$0xff]  ;;  %v1915_v4 = vld [vmem:[%s2820_s1 + $0x28] sm:$0xff] }
   0x2   :  { %v1925_v1 = vld [vmem:[%s2820_s1 + $0x78] sm:$0xff]  ;;  %661 = vmatpush.bf16.msra.mxu0 %v1917_v0  ;;  %2117 = vmatpush.bf16.msra.mxu2 %v1917_v0  ;;  %v1924_v3 = vld [vmem:[%s2820_s1 + $0x70] sm:$0xff]  ;;  %v1923_v5 = vld [vmem:[%s2820_s1 + $0x68] sm:$0xff] }
   0x3   :  { %830 = vmatpush.bf16.msra.mxu1 %v1925_v1  ;;  %2125 = vmatpush.bf16.msra.mxu3 %v1925_v1  ;;  %v1914_v6 = vld [vmem:[%s2820_s1 + $0x20] sm:$0xff]  ;;  %v1913_v8 = vld [vmem:[%s2820_s1 + $0x18] sm:$0xff]  ;;  %v1912_v10 = vld [vmem:[%s2820_s1 + $0x10] sm:$0xff] }
   0x4   :  { %v1922_v7 = vld [vmem:[%s2820_s1 + $0x60] sm:$0xff]  ;;  %v1921_v9 = vld [vmem:[%s2820_s1 + $0x58] sm:$0xff]  ;;  %v1920_v11 = vld [vmem:[%s2820_s1 + $0x50] sm:$0xff] }
   0x5   :  { %v1911_v12 = vld [vmem:[%s2820_s1 + $0x8] sm:$0xff]  ;;  %v1910_v14 = vld [vmem:[%s2820_s1] sm:$0xff]  ;;  %v1536_v28 = vld [vmem:[%s2821_s0 + $0x10] sm:$0xf] }
   0x6   :  { %662 = vmatpush.bf16.msra.mxu0 %v1916_v2  ;;  %2118 = vmatpush.bf16.msra.mxu2 %v1916_v2  ;;  %v1919_v13 = vld [vmem:[%s2820_s1 + $0x48] sm:$0xff]  ;;  %v1918_v15 = vld [vmem:[%s2820_s1 + $0x40] sm:$0xff]  ;;  %v1849_v29 = vld [vmem:[%s2821_s0 + $0x14] sm:$0xf0] }
   0x7   :  { %831 = vmatpush.bf16.msra.mxu1 %v1924_v3  ;;  %2126 = vmatpush.bf16.msra.mxu3 %v1924_v3  ;;  %v1528_v16 = vld [vmem:[%s2821_s0] sm:$0xf]  ;;  %v1847_v17 = vld [vmem:[%s2821_s0 + $0x4] sm:$0xf0]  ;;  %v1846_v20 = vld [vmem:[%s2821_s0 + $0x4] sm:$0xf]  ;;  %v1537_v36 = vor.u32 %v1849_v29, %v1536_v28 }
   0x8   :  { %v1656_v18 = vld [vmem:[%s2821_s0 + $0x100] sm:$0xf]  ;;  %v1879_v19 = vld [vmem:[%s2821_s0 + $0x104] sm:$0xf0]  ;;  %v1530_v21 = vld [vmem:[%s2821_s0 + $0x8] sm:$0xf0]  ;;  %v1529_v24 = vor.u32 %v1847_v17, %v1528_v16 }
   0x9   :  { %v1878_v22 = vld [vmem:[%s2821_s0 + $0x104] sm:$0xf]  ;;  %v1658_v23 = vld [vmem:[%s2821_s0 + $0x108] sm:$0xf0]  ;;  %v1657_v25 = vor.u32 %v1879_v19, %v1656_v18  ;;  %v1533_v26 = vor.u32 %v1846_v20, %v1530_v21  ;;  %v1664_v30 = vld [vmem:[%s2821_s0 + $0x110] sm:$0xf] }
   0xa   :  { %663 = vmatpush.bf16.msra.mxu0 %v1915_v4  ;;  %2119 = vmatpush.bf16.msra.mxu2 %v1915_v4  ;;  %v1661_v27 = vor.u32 %v1878_v22, %v1658_v23  ;;  %v1881_v31 = vld [vmem:[%s2821_s0 + $0x114] sm:$0xf0]  ;;  %v1848_v32 = vld [vmem:[%s2821_s0 + $0x14] sm:$0xf]  ;;  %v1538_v33 = vld [vmem:[%s2821_s0 + $0x18] sm:$0xf0] }
   0xb   :  { %832 = vmatpush.bf16.msra.mxu1 %v1923_v5  ;;  %2127 = vmatpush.bf16.msra.mxu3 %v1923_v5  ;;  %v1880_v34 = vld [vmem:[%s2821_s0 + $0x114] sm:$0xf]  ;;  %v1666_v35 = vld [vmem:[%s2821_s0 + $0x118] sm:$0xf0]  ;;  %v1665_v37 = vor.u32 %v1881_v31, %v1664_v30  ;;  %v1541_v38 = vor.u32 %v1848_v32, %v1538_v33  ;;  %v1544_v40 = vld [vmem:[%s2821_s0 + $0x20] sm:$0xf] }
   0xc   :  { %v1669_v39 = vor.u32 %v1880_v34, %v1666_v35  ;;  %v1851_v41 = vld [vmem:[%s2821_s0 + $0x24] sm:$0xf0]  ;;  %v1672_v42 = vld [vmem:[%s2821_s0 + $0x120] sm:$0xf]  ;;  %v1850_v44 = vld [vmem:[%s2821_s0 + $0x24] sm:$0xf] }
   0xd   :  { %v1883_v43 = vld [vmem:[%s2821_s0 + $0x124] sm:$0xf0]  ;;  %v1546_v45 = vld [vmem:[%s2821_s0 + $0x28] sm:$0xf0]  ;;  %v1882_v46 = vld [vmem:[%s2821_s0 + $0x124] sm:$0xf]  ;;  %v1545_v48 = vor.u32 %v1851_v41, %v1544_v40 }
   0xe   :  { %664 = vmatpush.bf16.msra.mxu0 %v1914_v6  ;;  %2120 = vmatpush.bf16.msra.mxu2 %v1914_v6  ;;  %v1674_v47 = vld [vmem:[%s2821_s0 + $0x128] sm:$0xf0]  ;;  %v1673_v49 = vor.u32 %v1883_v43, %v1672_v42  ;;  %v1549_v50 = vor.u32 %v1850_v44, %v1546_v45  ;;  %v1552_v52 = vld [vmem:[%s2821_s0 + $0x30] sm:$0xf]  ;;  %v1853_v53 = vld [vmem:[%s2821_s0 + $0x34] sm:$0xf0] }
   0xf   :  { %833 = vmatpush.bf16.msra.mxu1 %v1922_v7  ;;  %2128 = vmatpush.bf16.msra.mxu3 %v1922_v7  ;;  %v1677_v51 = vor.u32 %v1882_v46, %v1674_v47  ;;  %v1680_v54 = vld [vmem:[%s2821_s0 + $0x130] sm:$0xf]  ;;  %v1885_v55 = vld [vmem:[%s2821_s0 + $0x134] sm:$0xf0]  ;;  %v1852_v56 = vld [vmem:[%s2821_s0 + $0x34] sm:$0xf]  ;;  %v1553_v60 = vor.u32 %v1853_v53, %v1552_v52 }
  0x10   :  { %v1554_v57 = vld [vmem:[%s2821_s0 + $0x38] sm:$0xf0]  ;;  %v1884_v58 = vld [vmem:[%s2821_s0 + $0x134] sm:$0xf]  ;;  %v1681_v61 = vor.u32 %v1885_v55, %v1680_v54  ;;  %v1560_v0 = vld [vmem:[%s2821_s0 + $0x40] sm:$0xf] }
  0x11   :  { %v1682_v59 = vld [vmem:[%s2821_s0 + $0x138] sm:$0xf0]  ;;  %v1557_v62 = vor.u32 %v1852_v56, %v1554_v57  ;;  %v1855_v1 = vld [vmem:[%s2821_s0 + $0x44] sm:$0xf0]  ;;  %v1688_v2 = vld [vmem:[%s2821_s0 + $0x140] sm:$0xf] }
  0x12   :  { %665 = vmatpush.bf16.msra.mxu0 %v1913_v8  ;;  %2121 = vmatpush.bf16.msra.mxu2 %v1913_v8  ;;  %v1685_v63 = vor.u32 %v1884_v58, %v1682_v59  ;;  %v1887_v3 = vld [vmem:[%s2821_s0 + $0x144] sm:$0xf0]  ;;  %v1854_v4 = vld [vmem:[%s2821_s0 + $0x44] sm:$0xf]  ;;  %v1562_v5 = vld [vmem:[%s2821_s0 + $0x48] sm:$0xf0]  ;;  %v1561_v8 = vor.u32 %v1855_v1, %v1560_v0 }
  0x13   :  { %834 = vmatpush.bf16.msra.mxu1 %v1921_v9  ;;  %2129 = vmatpush.bf16.msra.mxu3 %v1921_v9  ;;  %v1886_v6 = vld [vmem:[%s2821_s0 + $0x144] sm:$0xf]  ;;  %v1690_v7 = vld [vmem:[%s2821_s0 + $0x148] sm:$0xf0]  ;;  %v1689_v9 = vor.u32 %v1887_v3, %v1688_v2  ;;  %v1856_v16 = vld [vmem:[%s2821_s0 + $0x54] sm:$0xf] }
  0x14   :  { %v1570_v17 = vld [vmem:[%s2821_s0 + $0x58] sm:$0xf0]  ;;  %v1888_v18 = vld [vmem:[%s2821_s0 + $0x154] sm:$0xf]  ;;  %v1858_v28 = vld [vmem:[%s2821_s0 + $0x64] sm:$0xf] }
  0x15   :  { %v1698_v19 = vld [vmem:[%s2821_s0 + $0x158] sm:$0xf0]  ;;  %v1573_v22 = vor.u32 %v1856_v16, %v1570_v17  ;;  %v1578_v29 = vld [vmem:[%s2821_s0 + $0x68] sm:$0xf0]  ;;  %v1890_v30 = vld [vmem:[%s2821_s0 + $0x164] sm:$0xf] }
  0x16   :  { %666 = vmatpush.bf16.msra.mxu0 %v1912_v10  ;;  %2122 = vmatpush.bf16.msra.mxu2 %v1912_v10  ;;  %v1565_v10 = vor.u32 %v1854_v4, %v1562_v5  ;;  %v1701_v23 = vor.u32 %v1888_v18, %v1698_v19  ;;  %v1706_v31 = vld [vmem:[%s2821_s0 + $0x168] sm:$0xf0]  ;;  %v1581_v34 = vor.u32 %v1858_v28, %v1578_v29  ;;  %v1860_v40 = vld [vmem:[%s2821_s0 + $0x74] sm:$0xf]  ;;  %v1586_v41 = vld [vmem:[%s2821_s0 + $0x78] sm:$0xf0] }
  0x17   :  { %835 = vmatpush.bf16.msra.mxu1 %v1920_v11  ;;  %2130 = vmatpush.bf16.msra.mxu3 %v1920_v11  ;;  %v1693_v11 = vor.u32 %v1886_v6, %v1690_v7  ;;  %v1709_v35 = vor.u32 %v1890_v30, %v1706_v31  ;;  %v1892_v42 = vld [vmem:[%s2821_s0 + $0x174] sm:$0xf]  ;;  %v1714_v43 = vld [vmem:[%s2821_s0 + $0x178] sm:$0xf0]  ;;  %v1589_v46 = vor.u32 %v1860_v40, %v1586_v41  ;;  %v1862_v52 = vld [vmem:[%s2821_s0 + $0x84] sm:$0xf] }
  0x18   :  { %v1717_v47 = vor.u32 %v1892_v42, %v1714_v43  ;;  %v1594_v53 = vld [vmem:[%s2821_s0 + $0x88] sm:$0xf0]  ;;  %v1894_v54 = vld [vmem:[%s2821_s0 + $0x184] sm:$0xf]  ;;  %v2435_v3 = vld [vmem:[%s2823_s3] ss:$0 sm:$0xff] }
  0x19   :  { %v1722_v55 = vld [vmem:[%s2821_s0 + $0x188] sm:$0xf0]  ;;  %v1597_v59 = vor.u32 %v1862_v52, %v1594_v53  ;;  %v1896_v16 = vld [vmem:[%s2821_s0 + $0x194] sm:$0xf]  ;;  %v1730_v17 = vld [vmem:[%s2821_s0 + $0x198] sm:$0xf0] }
  0x1a   :  { %667 = vmatpush.bf16.msra.mxu0 %v1911_v12  ;;  %2123 = vmatpush.bf16.msra.mxu2 %v1911_v12  ;;  %v1568_v12 = vld [vmem:[%s2821_s0 + $0x50] sm:$0xf]  ;;  %v1733_v29 = vor.u32 %v1896_v16, %v1730_v17  ;;  %v1866_v52 = vld [vmem:[%s2821_s0 + $0xa4] sm:$0xf]  ;;  %v1610_v53 = vld [vmem:[%s2821_s0 + $0xa8] sm:$0xf0] }
  0x1b   :  { %836 = vmatpush.bf16.msra.mxu1 %v1919_v13  ;;  %2131 = vmatpush.bf16.msra.mxu3 %v1919_v13  ;;  %v1857_v13 = vld [vmem:[%s2821_s0 + $0x54] sm:$0xf0] }
  0x1c   :  { %v1569_v20 = vor.u32 %v1857_v13, %v1568_v12  ;;  %v1897_v13 = vld [vmem:[%s2821_s0 + $0x194] sm:$0xf0] }
  0x1e   :  { %668 = vmatpush.bf16.msra.mxu0 %v1910_v14  ;;  %2124 = vmatpush.bf16.msra.mxu2 %v1910_v14  ;;  %v1696_v14 = vld [vmem:[%s2821_s0 + $0x150] sm:$0xf] }
  0x1f   :  { %837 = vmatpush.bf16.msra.mxu1 %v1918_v15  ;;  %2132 = vmatpush.bf16.msra.mxu3 %v1918_v15  ;;  %v1889_v15 = vld [vmem:[%s2821_s0 + $0x154] sm:$0xf0] }
  0x20   :  { %v1697_v21 = vor.u32 %v1889_v15, %v1696_v14  ;;  %v1864_v14 = vld [vmem:[%s2821_s0 + $0x94] sm:$0xf]  ;;  %v1602_v15 = vld [vmem:[%s2821_s0 + $0x98] sm:$0xf0] }
  0x21   :  { %669 = vmatmul.bf16.vlgmr.msra.gmra.mxu0 %v1529_v24  ;;  %749 = vmatmul.bf16.vlgmr.msra.gmra.mxu2 %v1657_v25  ;;  %v1576_v24 = vld [vmem:[%s2821_s0 + $0x60] sm:$0xf]  ;;  %v1859_v25 = vld [vmem:[%s2821_s0 + $0x64] sm:$0xf0] }
  0x22   :  { %838 = vmatmul.bf16.vlgmr.msra.gmra.mxu1 %v1533_v26  ;;  %918 = vmatmul.bf16.vlgmr.msra.gmra.mxu3 %v1661_v27  ;;  %v1704_v26 = vld [vmem:[%s2821_s0 + $0x160] sm:$0xf]  ;;  %v1891_v27 = vld [vmem:[%s2821_s0 + $0x164] sm:$0xf0]  ;;  %v1577_v32 = vor.u32 %v1859_v25, %v1576_v24  ;;  %v1605_v24 = vor.u32 %v1864_v14, %v1602_v15 }
  0x23   :  { %v1705_v33 = vor.u32 %v1891_v27, %v1704_v26 }
  0x31   :  { %674 = vmatmul.bf16.gmra.mxu0 %v1537_v36  ;;  %754 = vmatmul.bf16.gmra.mxu2 %v1665_v37  ;;  %v1584_v36 = vld [vmem:[%s2821_s0 + $0x70] sm:$0xf]  ;;  %v1861_v37 = vld [vmem:[%s2821_s0 + $0x74] sm:$0xf0] }
  0x32   :  { %843 = vmatmul.bf16.gmra.mxu1 %v1541_v38  ;;  %923 = vmatmul.bf16.gmra.mxu3 %v1669_v39  ;;  %v1712_v38 = vld [vmem:[%s2821_s0 + $0x170] sm:$0xf]  ;;  %v1893_v39 = vld [vmem:[%s2821_s0 + $0x174] sm:$0xf0]  ;;  %v1585_v44 = vor.u32 %v1861_v37, %v1584_v36 }
  0x33   :  { %v1713_v45 = vor.u32 %v1893_v39, %v1712_v38 }
  0x41   :  { %679 = vmatmul.bf16.gmra.mxu0 %v1545_v48  ;;  %759 = vmatmul.bf16.gmra.mxu2 %v1673_v49  ;;  %v1592_v48 = vld [vmem:[%s2821_s0 + $0x80] sm:$0xf]  ;;  %v1863_v49 = vld [vmem:[%s2821_s0 + $0x84] sm:$0xf0] }
  0x42   :  { %848 = vmatmul.bf16.gmra.mxu1 %v1549_v50  ;;  %928 = vmatmul.bf16.gmra.mxu3 %v1677_v51  ;;  %v1720_v50 = vld [vmem:[%s2821_s0 + $0x180] sm:$0xf]  ;;  %v1895_v51 = vld [vmem:[%s2821_s0 + $0x184] sm:$0xf0]  ;;  %v1593_v56 = vor.u32 %v1863_v49, %v1592_v48 }
  0x43   :  { %v1721_v57 = vor.u32 %v1895_v51, %v1720_v50  ;;  %v1736_v48 = vld [vmem:[%s2821_s0 + $0x1a0] sm:$0xf]  ;;  %v1899_v51 = vld [vmem:[%s2821_s0 + $0x1a4] sm:$0xf0] }
  0x51   :  { %684 = vmatmul.bf16.gmra.mxu0 %v1553_v60  ;;  %764 = vmatmul.bf16.gmra.mxu2 %v1681_v61  ;;  %v1725_v60 = vor.u32 %v1894_v54, %v1722_v55  ;;  %v1898_v54 = vld [vmem:[%s2821_s0 + $0x1a4] sm:$0xf]  ;;  %v1738_v55 = vld [vmem:[%s2821_s0 + $0x1a8] sm:$0xf0] }
  0x52   :  { %853 = vmatmul.bf16.gmra.mxu1 %v1557_v62  ;;  %933 = vmatmul.bf16.gmra.mxu3 %v1685_v63  ;;  %v2429_v63 = vld [vmem:[%s2822_s2] ss:$0 sm:$0xff] }
  0x61   :  { %689 = vmatmul.bf16.gmra.mxu0 %v1561_v8  ;;  %769 = vmatmul.bf16.gmra.mxu2 %v1689_v9  ;;  %v1600_v8 = vld [vmem:[%s2821_s0 + $0x90] sm:$0xf]  ;;  %v1865_v9 = vld [vmem:[%s2821_s0 + $0x94] sm:$0xf0] }
  0x62   :  { %858 = vmatmul.bf16.gmra.mxu1 %v1565_v10  ;;  %938 = vmatmul.bf16.gmra.mxu3 %v1693_v11  ;;  %v1728_v10 = vld [vmem:[%s2821_s0 + $0x190] sm:$0xf] }
  0x71   :  { %694 = vmatmul.bf16.gmra.mxu0 %v1569_v20  ;;  %774 = vmatmul.bf16.gmra.mxu2 %v1697_v21 }
  0x72   :  { %863 = vmatmul.bf16.gmra.mxu1 %v1573_v22  ;;  %943 = vmatmul.bf16.gmra.mxu3 %v1701_v23  ;;  %v1601_v22 = vor.u32 %v1865_v9, %v1600_v8  ;;  %v1729_v23 = vor.u32 %v1897_v13, %v1728_v10 }
  0x81   :  { %699 = vmatmul.bf16.gmra.mxu0 %v1577_v32  ;;  %779 = vmatmul.bf16.gmra.mxu2 %v1705_v33 }
  0x82   :  { %868 = vmatmul.bf16.gmra.mxu1 %v1581_v34  ;;  %948 = vmatmul.bf16.gmra.mxu3 %v1709_v35 }
  0x91   :  { %704 = vmatmul.bf16.gmra.mxu0 %v1585_v44  ;;  %784 = vmatmul.bf16.gmra.mxu2 %v1713_v45 }
  0x92   :  { %873 = vmatmul.bf16.gmra.mxu1 %v1589_v46  ;;  %953 = vmatmul.bf16.gmra.mxu3 %v1717_v47  ;;  %v1608_v46 = vld [vmem:[%s2821_s0 + $0xa0] sm:$0xf]  ;;  %v1867_v47 = vld [vmem:[%s2821_s0 + $0xa4] sm:$0xf0] }
  0x9e   :  { %v670_v58 = vpop.f32.mrf.mxu0 }
  0x9f   :  { %v839_v61 = vpop.f32.mrf.mxu1 }
  0xa0   :  { %v840_v62 = vadd.f32 %v839_v61, %v670_v58  ;;  %v1737_v61 = vor.u32 %v1899_v51, %v1736_v48 }
  0xa1   :  { %709 = vmatmul.bf16.gmra.mxu0 %v1593_v56  ;;  %789 = vmatmul.bf16.gmra.mxu2 %v1721_v57 }
  0xa2   :  { %878 = vmatmul.bf16.gmra.mxu1 %v1597_v59  ;;  %958 = vmatmul.bf16.gmra.mxu3 %v1725_v60  ;;  %v1198_v2 = vmul.f32 %v2429_v63, %v840_v62  ;;  %v1609_v60 = vor.u32 %v1867_v47, %v1608_v46  ;;  %v1613_v62 = vor.u32 %v1866_v52, %v1610_v53 }
  0xa4   :  { %v750_v0 = vpop.f32.mrf.mxu2  ;;  %v1266_v11 = vadd.f32 %v2435_v3, %v1198_v2 }
  0xa5   :  { %v919_v1 = vpop.f32.mrf.mxu3 }
  0xa6   :  { %v672_v4 = vpop.f32.mrf.mxu0  ;;  %v920_v6 = vadd.f32 %v919_v1, %v750_v0  ;;  %v1330_v25 = vmax.f32 %v1266_v11, 0.0 }
  0xa7   :  { %v841_v5 = vpop.f32.mrf.mxu1 }
  0xa8   :  { %v842_v7 = vadd.f32 %v841_v5, %v672_v4  ;;  %v1230_v18 = vmul.f32 %v2429_v63, %v920_v6  ;;  %v1741_v5 = vor.u32 %v1898_v54, %v1738_v55 }
  0xaa   :  { %v1199_v12 = vmul.f32 %v2429_v63, %v842_v7  ;;  %v1298_v31 = vadd.f32 %v2435_v3, %v1230_v18 }
  0xac   :  { %v1267_v19 = vadd.f32 %v2435_v3, %v1199_v12  ;;  %v752_v20 = vpop.f32.mrf.mxu2  ;;  %v1362_v36 = vmax.f32 %v1298_v31, 0.0  ;;  %v1746_v31 = vld [vmem:[%s2821_s0 + $0x1b8] sm:$0xf0] }
  0xad   :  { %v921_v21 = vpop.f32.mrf.mxu3 }
  0xae   :  { %v1331_v26 = vmax.f32 %v1267_v19, 0.0  ;;  %v922_v27 = vadd.f32 %v921_v21, %v752_v20  ;;  %v675_v28 = vpop.f32.mrf.mxu0 }
  0xaf   :  { %v844_v30 = vpop.f32.mrf.mxu1 }
  0xb0   :  { %v1929_v32 = vpack.c.bf16 %v1331_v26, %v1330_v25  ;;  %v1231_v33 = vmul.f32 %v2429_v63, %v922_v27  ;;  %v845_v35 = vadd.f32 %v844_v30, %v675_v28  ;;  %v1901_v27 = vld [vmem:[%s2821_s0 + $0x1b4] sm:$0xf0]  ;;  %v1868_v28 = vld [vmem:[%s2821_s0 + $0xb4] sm:$0xf] }
  0xb1   :  { %714 = vmatmul.bf16.gmra.mxu0 %v1601_v22  ;;  %794 = vmatmul.bf16.gmra.mxu2 %v1729_v23  ;;  %v1616_v22 = vld [vmem:[%s2821_s0 + $0xb0] sm:$0xf]  ;;  %v1869_v23 = vld [vmem:[%s2821_s0 + $0xb4] sm:$0xf0]  ;;  %v1900_v30 = vld [vmem:[%s2821_s0 + $0x1b4] sm:$0xf] }
  0xb2   :  { %1930 = vst [vmem:[%s2824_s4] sm:$0xff] %v1929_v32   ;;  %v1299_v34 = vadd.f32 %v2435_v3, %v1231_v33  ;;  %883 = vmatmul.bf16.gmra.mxu1 %v1605_v24  ;;  %963 = vmatmul.bf16.gmra.mxu3 %v1733_v29  ;;  %v1200_v41 = vmul.f32 %v2429_v63, %v845_v35  ;;  %v1744_v24 = vld [vmem:[%s2821_s0 + $0x1b0] sm:$0xf]  ;;  %v1618_v29 = vld [vmem:[%s2821_s0 + $0xb8] sm:$0xf0] }
  0xb4   :  { %v1363_v37 = vmax.f32 %v1299_v34, 0.0  ;;  %v755_v38 = vpop.f32.mrf.mxu2  ;;  %v1268_v49 = vadd.f32 %v2435_v3, %v1200_v41 }
  0xb5   :  { %v924_v39 = vpop.f32.mrf.mxu3 }
  0xb6   :  { %v2009_v40 = vpack.c.bf16 %v1363_v37, %v1362_v36  ;;  %v677_v42 = vpop.f32.mrf.mxu0  ;;  %v925_v44 = vadd.f32 %v924_v39, %v755_v38  ;;  %v1332_v0 = vmax.f32 %v1268_v49, 0.0  ;;  %v1617_v36 = vor.u32 %v1869_v23, %v1616_v22 }
  0xb7   :  { %v846_v43 = vpop.f32.mrf.mxu1  ;;  %v1745_v37 = vor.u32 %v1901_v27, %v1744_v24  ;;  %v1621_v38 = vor.u32 %v1868_v28, %v1618_v29 }
  0xb8   :  { %2101 = vst [vmem:[%s2824_s4 + $0x80] sm:$0xff] %v2009_v40   ;;  %v847_v45 = vadd.f32 %v846_v43, %v677_v42  ;;  %v1232_v56 = vmul.f32 %v2429_v63, %v925_v44  ;;  %v1749_v43 = vor.u32 %v1900_v30, %v1746_v31 }
  0xba   :  { %v1201_v50 = vmul.f32 %v2429_v63, %v847_v45  ;;  %v1300_v7 = vadd.f32 %v2435_v3, %v1232_v56 }
  0xbc   :  { %v1269_v57 = vadd.f32 %v2435_v3, %v1201_v50  ;;  %v757_v58 = vpop.f32.mrf.mxu2  ;;  %v1364_v12 = vmax.f32 %v1300_v7, 0.0  ;;  %v1754_v7 = vld [vmem:[%s2821_s0 + $0x1c8] sm:$0xf0] }
  0xbd   :  { %v926_v59 = vpop.f32.mrf.mxu3 }
  0xbe   :  { %v1333_v1 = vmax.f32 %v1269_v57, 0.0  ;;  %v927_v2 = vadd.f32 %v926_v59, %v757_v58  ;;  %v680_v4 = vpop.f32.mrf.mxu0 }
  0xbf   :  { %v849_v6 = vpop.f32.mrf.mxu1 }
  0xc0   :  { %v1934_v8 = vpack.c.bf16 %v1333_v1, %v1332_v0  ;;  %v1233_v9 = vmul.f32 %v2429_v63, %v927_v2  ;;  %v850_v11 = vadd.f32 %v849_v6, %v680_v4  ;;  %v1903_v2 = vld [vmem:[%s2821_s0 + $0x1c4] sm:$0xf0]  ;;  %v1870_v4 = vld [vmem:[%s2821_s0 + $0xc4] sm:$0xf] }
  0xc1   :  { %719 = vmatmul.bf16.gmra.mxu0 %v1609_v60  ;;  %799 = vmatmul.bf16.gmra.mxu2 %v1737_v61  ;;  %v1624_v60 = vld [vmem:[%s2821_s0 + $0xc0] sm:$0xf]  ;;  %v1871_v61 = vld [vmem:[%s2821_s0 + $0xc4] sm:$0xf0]  ;;  %v1902_v6 = vld [vmem:[%s2821_s0 + $0x1c4] sm:$0xf] }
  0xc2   :  { %2086 = vst [vmem:[%s2824_s4 + $0x8] sm:$0xff] %v1934_v8   ;;  %v1301_v10 = vadd.f32 %v2435_v3, %v1233_v9  ;;  %888 = vmatmul.bf16.gmra.mxu1 %v1613_v62  ;;  %968 = vmatmul.bf16.gmra.mxu3 %v1741_v5  ;;  %v1202_v17 = vmul.f32 %v2429_v63, %v850_v11  ;;  %v1752_v62 = vld [vmem:[%s2821_s0 + $0x1c0] sm:$0xf]  ;;  %v1626_v5 = vld [vmem:[%s2821_s0 + $0xc8] sm:$0xf0] }
  0xc4   :  { %v1365_v13 = vmax.f32 %v1301_v10, 0.0  ;;  %v760_v14 = vpop.f32.mrf.mxu2  ;;  %v1270_v25 = vadd.f32 %v2435_v3, %v1202_v17 }
  0xc5   :  { %v929_v15 = vpop.f32.mrf.mxu3 }
  0xc6   :  { %v2014_v16 = vpack.c.bf16 %v1365_v13, %v1364_v12  ;;  %v682_v18 = vpop.f32.mrf.mxu0  ;;  %v930_v20 = vadd.f32 %v929_v15, %v760_v14  ;;  %v1334_v39 = vmax.f32 %v1270_v25, 0.0  ;;  %v1625_v12 = vor.u32 %v1871_v61, %v1624_v60 }
  0xc7   :  { %v851_v19 = vpop.f32.mrf.mxu1  ;;  %v1753_v13 = vor.u32 %v1903_v2, %v1752_v62  ;;  %v1629_v14 = vor.u32 %v1870_v4, %v1626_v5 }
  0xc8   :  { %2102 = vst [vmem:[%s2824_s4 + $0x88] sm:$0xff] %v2014_v16   ;;  %v852_v21 = vadd.f32 %v851_v19, %v682_v18  ;;  %v1234_v32 = vmul.f32 %v2429_v63, %v930_v20  ;;  %v1757_v19 = vor.u32 %v1902_v6, %v1754_v7 }
  0xca   :  { %v1203_v26 = vmul.f32 %v2429_v63, %v852_v21  ;;  %v1302_v45 = vadd.f32 %v2435_v3, %v1234_v32 }
  0xcc   :  { %v1271_v33 = vadd.f32 %v2435_v3, %v1203_v26  ;;  %v762_v34 = vpop.f32.mrf.mxu2  ;;  %v1366_v50 = vmax.f32 %v1302_v45, 0.0  ;;  %v1762_v45 = vld [vmem:[%s2821_s0 + $0x1d8] sm:$0xf0] }
  0xcd   :  { %v931_v35 = vpop.f32.mrf.mxu3 }
  0xce   :  { %v1335_v40 = vmax.f32 %v1271_v33, 0.0  ;;  %v932_v41 = vadd.f32 %v931_v35, %v762_v34  ;;  %v685_v42 = vpop.f32.mrf.mxu0 }
  0xcf   :  { %v854_v44 = vpop.f32.mrf.mxu1 }
  0xd0   :  { %v1939_v46 = vpack.c.bf16 %v1335_v40, %v1334_v39  ;;  %v1235_v47 = vmul.f32 %v2429_v63, %v932_v41  ;;  %v855_v49 = vadd.f32 %v854_v44, %v685_v42  ;;  %v1905_v41 = vld [vmem:[%s2821_s0 + $0x1d4] sm:$0xf0]  ;;  %v1872_v42 = vld [vmem:[%s2821_s0 + $0xd4] sm:$0xf] }
  0xd1   :  { %724 = vmatmul.bf16.gmra.mxu0 %v1617_v36  ;;  %804 = vmatmul.bf16.gmra.mxu2 %v1745_v37  ;;  %v1632_v36 = vld [vmem:[%s2821_s0 + $0xd0] sm:$0xf]  ;;  %v1873_v37 = vld [vmem:[%s2821_s0 + $0xd4] sm:$0xf0]  ;;  %v1904_v44 = vld [vmem:[%s2821_s0 + $0x1d4] sm:$0xf] }
  0xd2   :  { %2087 = vst [vmem:[%s2824_s4 + $0x10] sm:$0xff] %v1939_v46   ;;  %v1303_v48 = vadd.f32 %v2435_v3, %v1235_v47  ;;  %893 = vmatmul.bf16.gmra.mxu1 %v1621_v38  ;;  %973 = vmatmul.bf16.gmra.mxu3 %v1749_v43  ;;  %v1204_v55 = vmul.f32 %v2429_v63, %v855_v49  ;;  %v1760_v38 = vld [vmem:[%s2821_s0 + $0x1d0] sm:$0xf]  ;;  %v1634_v43 = vld [vmem:[%s2821_s0 + $0xd8] sm:$0xf0] }
  0xd4   :  { %v1367_v51 = vmax.f32 %v1303_v48, 0.0  ;;  %v765_v52 = vpop.f32.mrf.mxu2  ;;  %v1272_v0 = vadd.f32 %v2435_v3, %v1204_v55 }
  0xd5   :  { %v934_v53 = vpop.f32.mrf.mxu3 }
  0xd6   :  { %v2019_v54 = vpack.c.bf16 %v1367_v51, %v1366_v50  ;;  %v687_v56 = vpop.f32.mrf.mxu0  ;;  %v935_v58 = vadd.f32 %v934_v53, %v765_v52  ;;  %v1336_v15 = vmax.f32 %v1272_v0, 0.0  ;;  %v1633_v50 = vor.u32 %v1873_v37, %v1632_v36 }
  0xd7   :  { %v856_v57 = vpop.f32.mrf.mxu1  ;;  %v1761_v51 = vor.u32 %v1905_v41, %v1760_v38  ;;  %v1637_v52 = vor.u32 %v1872_v42, %v1634_v43 }
  0xd8   :  { %2103 = vst [vmem:[%s2824_s4 + $0x90] sm:$0xff] %v2019_v54   ;;  %v857_v59 = vadd.f32 %v856_v57, %v687_v56  ;;  %v1236_v8 = vmul.f32 %v2429_v63, %v935_v58  ;;  %v1765_v57 = vor.u32 %v1904_v44, %v1762_v45 }
  0xda   :  { %v1205_v1 = vmul.f32 %v2429_v63, %v857_v59  ;;  %v1304_v21 = vadd.f32 %v2435_v3, %v1236_v8 }
  0xdc   :  { %v1273_v9 = vadd.f32 %v2435_v3, %v1205_v1  ;;  %v767_v10 = vpop.f32.mrf.mxu2  ;;  %v1368_v26 = vmax.f32 %v1304_v21, 0.0  ;;  %v1770_v21 = vld [vmem:[%s2821_s0 + $0x1e8] sm:$0xf0] }
  0xdd   :  { %v936_v11 = vpop.f32.mrf.mxu3 }
  0xde   :  { %v1337_v16 = vmax.f32 %v1273_v9, 0.0  ;;  %v937_v17 = vadd.f32 %v936_v11, %v767_v10  ;;  %v690_v18 = vpop.f32.mrf.mxu0 }
  0xdf   :  { %v859_v20 = vpop.f32.mrf.mxu1 }
  0xe0   :  { %v1944_v22 = vpack.c.bf16 %v1337_v16, %v1336_v15  ;;  %v1237_v23 = vmul.f32 %v2429_v63, %v937_v17  ;;  %v860_v25 = vadd.f32 %v859_v20, %v690_v18  ;;  %v1907_v17 = vld [vmem:[%s2821_s0 + $0x1e4] sm:$0xf0]  ;;  %v1874_v18 = vld [vmem:[%s2821_s0 + $0xe4] sm:$0xf] }
  0xe1   :  { %729 = vmatmul.bf16.gmra.mxu0 %v1625_v12  ;;  %809 = vmatmul.bf16.gmra.mxu2 %v1753_v13  ;;  %v1640_v12 = vld [vmem:[%s2821_s0 + $0xe0] sm:$0xf]  ;;  %v1875_v13 = vld [vmem:[%s2821_s0 + $0xe4] sm:$0xf0]  ;;  %v1906_v20 = vld [vmem:[%s2821_s0 + $0x1e4] sm:$0xf] }
  0xe2   :  { %2088 = vst [vmem:[%s2824_s4 + $0x18] sm:$0xff] %v1944_v22   ;;  %v1305_v24 = vadd.f32 %v2435_v3, %v1237_v23  ;;  %898 = vmatmul.bf16.gmra.mxu1 %v1629_v14  ;;  %978 = vmatmul.bf16.gmra.mxu3 %v1757_v19  ;;  %v1206_v31 = vmul.f32 %v2429_v63, %v860_v25  ;;  %v1768_v14 = vld [vmem:[%s2821_s0 + $0x1e0] sm:$0xf]  ;;  %v1642_v19 = vld [vmem:[%s2821_s0 + $0xe8] sm:$0xf0] }
  0xe4   :  { %v1369_v27 = vmax.f32 %v1305_v24, 0.0  ;;  %v770_v28 = vpop.f32.mrf.mxu2  ;;  %v1274_v39 = vadd.f32 %v2435_v3, %v1206_v31 }
  0xe5   :  { %v939_v29 = vpop.f32.mrf.mxu3 }
  0xe6   :  { %v2024_v30 = vpack.c.bf16 %v1369_v27, %v1368_v26  ;;  %v692_v32 = vpop.f32.mrf.mxu0  ;;  %v940_v34 = vadd.f32 %v939_v29, %v770_v28  ;;  %v1338_v53 = vmax.f32 %v1274_v39, 0.0  ;;  %v1641_v26 = vor.u32 %v1875_v13, %v1640_v12 }
  0xe7   :  { %v861_v33 = vpop.f32.mrf.mxu1  ;;  %v1769_v27 = vor.u32 %v1907_v17, %v1768_v14  ;;  %v1645_v28 = vor.u32 %v1874_v18, %v1642_v19 }
  0xe8   :  { %2104 = vst [vmem:[%s2824_s4 + $0x98] sm:$0xff] %v2024_v30   ;;  %v862_v35 = vadd.f32 %v861_v33, %v692_v32  ;;  %v1238_v46 = vmul.f32 %v2429_v63, %v940_v34  ;;  %v1773_v33 = vor.u32 %v1906_v20, %v1770_v21 }
  0xea   :  { %v1207_v40 = vmul.f32 %v2429_v63, %v862_v35  ;;  %v1306_v59 = vadd.f32 %v2435_v3, %v1238_v46 }
  0xec   :  { %v1275_v47 = vadd.f32 %v2435_v3, %v1207_v40  ;;  %v772_v48 = vpop.f32.mrf.mxu2  ;;  %v1370_v1 = vmax.f32 %v1306_v59, 0.0  ;;  %v1778_v59 = vld [vmem:[%s2821_s0 + $0x1f8] sm:$0xf0] }
  0xed   :  { %v941_v49 = vpop.f32.mrf.mxu3 }
  0xee   :  { %v1339_v54 = vmax.f32 %v1275_v47, 0.0  ;;  %v942_v55 = vadd.f32 %v941_v49, %v772_v48  ;;  %v695_v56 = vpop.f32.mrf.mxu0 }
  0xef   :  { %v864_v58 = vpop.f32.mrf.mxu1 }
  0xf0   :  { %v1949_v60 = vpack.c.bf16 %v1339_v54, %v1338_v53  ;;  %v1239_v61 = vmul.f32 %v2429_v63, %v942_v55  ;;  %v865_v0 = vadd.f32 %v864_v58, %v695_v56  ;;  %v1909_v55 = vld [vmem:[%s2821_s0 + $0x1f4] sm:$0xf0]  ;;  %v1876_v56 = vld [vmem:[%s2821_s0 + $0xf4] sm:$0xf] }
  0xf1   :  { %734 = vmatmul.bf16.gmra.mxu0 %v1633_v50  ;;  %814 = vmatmul.bf16.gmra.mxu2 %v1761_v51  ;;  %v1648_v50 = vld [vmem:[%s2821_s0 + $0xf0] sm:$0xf]  ;;  %v1877_v51 = vld [vmem:[%s2821_s0 + $0xf4] sm:$0xf0]  ;;  %v1908_v58 = vld [vmem:[%s2821_s0 + $0x1f4] sm:$0xf] }
  0xf2   :  { %2089 = vst [vmem:[%s2824_s4 + $0x20] sm:$0xff] %v1949_v60   ;;  %v1307_v62 = vadd.f32 %v2435_v3, %v1239_v61  ;;  %903 = vmatmul.bf16.gmra.mxu1 %v1637_v52  ;;  %983 = vmatmul.bf16.gmra.mxu3 %v1765_v57  ;;  %v1208_v7 = vmul.f32 %v2429_v63, %v865_v0  ;;  %v1776_v52 = vld [vmem:[%s2821_s0 + $0x1f0] sm:$0xf]  ;;  %v1650_v57 = vld [vmem:[%s2821_s0 + $0xf8] sm:$0xf0] }
  0xf4   :  { %v1371_v2 = vmax.f32 %v1307_v62, 0.0  ;;  %v775_v4 = vpop.f32.mrf.mxu2  ;;  %v1276_v15 = vadd.f32 %v2435_v3, %v1208_v7 }
  0xf5   :  { %v944_v5 = vpop.f32.mrf.mxu3 }
  0xf6   :  { %v2029_v6 = vpack.c.bf16 %v1371_v2, %v1370_v1  ;;  %v697_v8 = vpop.f32.mrf.mxu0  ;;  %v945_v10 = vadd.f32 %v944_v5, %v775_v4  ;;  %v1340_v29 = vmax.f32 %v1276_v15, 0.0  ;;  %v1649_v1 = vor.u32 %v1877_v51, %v1648_v50 }
  0xf7   :  { %v866_v9 = vpop.f32.mrf.mxu1  ;;  %v1777_v2 = vor.u32 %v1909_v55, %v1776_v52  ;;  %v1653_v4 = vor.u32 %v1876_v56, %v1650_v57 }
  0xf8   :  { %2105 = vst [vmem:[%s2824_s4 + $0xa0] sm:$0xff] %v2029_v6   ;;  %v867_v11 = vadd.f32 %v866_v9, %v697_v8  ;;  %v1240_v22 = vmul.f32 %v2429_v63, %v945_v10  ;;  %v1781_v9 = vor.u32 %v1908_v58, %v1778_v59 }
  0xfa   :  { %v1209_v16 = vmul.f32 %v2429_v63, %v867_v11  ;;  %v1308_v35 = vadd.f32 %v2435_v3, %v1240_v22 }
  0xfc   :  { %v1277_v23 = vadd.f32 %v2435_v3, %v1209_v16  ;;  %v777_v24 = vpop.f32.mrf.mxu2  ;;  %v1372_v40 = vmax.f32 %v1308_v35, 0.0 }
  0xfd   :  { %v946_v25 = vpop.f32.mrf.mxu3 }
  0xfe   :  { %v1341_v30 = vmax.f32 %v1277_v23, 0.0  ;;  %v947_v31 = vadd.f32 %v946_v25, %v777_v24  ;;  %v700_v32 = vpop.f32.mrf.mxu0 }
  0xff   :  { %v869_v34 = vpop.f32.mrf.mxu1 }
 0x100   :  { %v1954_v36 = vpack.c.bf16 %v1341_v30, %v1340_v29  ;;  %v1241_v37 = vmul.f32 %v2429_v63, %v947_v31  ;;  %v870_v39 = vadd.f32 %v869_v34, %v700_v32 }
 0x101   :  { %739 = vmatmul.bf16.gmra.mxu0 %v1641_v26  ;;  %819 = vmatmul.bf16.gmra.mxu2 %v1769_v27 }
 0x102   :  { %2090 = vst [vmem:[%s2824_s4 + $0x28] sm:$0xff] %v1954_v36   ;;  %v1309_v38 = vadd.f32 %v2435_v3, %v1241_v37  ;;  %908 = vmatmul.bf16.gmra.mxu1 %v1645_v28  ;;  %988 = vmatmul.bf16.gmra.mxu3 %v1773_v33  ;;  %v1210_v45 = vmul.f32 %v2429_v63, %v870_v39 }
 0x104   :  { %v1373_v41 = vmax.f32 %v1309_v38, 0.0  ;;  %v780_v42 = vpop.f32.mrf.mxu2  ;;  %v1278_v53 = vadd.f32 %v2435_v3, %v1210_v45 }
 0x105   :  { %v949_v43 = vpop.f32.mrf.mxu3 }
 0x106   :  { %v2034_v44 = vpack.c.bf16 %v1373_v41, %v1372_v40  ;;  %v702_v46 = vpop.f32.mrf.mxu0  ;;  %v950_v48 = vadd.f32 %v949_v43, %v780_v42  ;;  %v1342_v5 = vmax.f32 %v1278_v53, 0.0 }
 0x107   :  { %v871_v47 = vpop.f32.mrf.mxu1 }
 0x108   :  { %2106 = vst [vmem:[%s2824_s4 + $0xa8] sm:$0xff] %v2034_v44   ;;  %v872_v49 = vadd.f32 %v871_v47, %v702_v46  ;;  %v1242_v60 = vmul.f32 %v2429_v63, %v950_v48 }
 0x10a   :  { %v1211_v54 = vmul.f32 %v2429_v63, %v872_v49  ;;  %v1310_v11 = vadd.f32 %v2435_v3, %v1242_v60 }
 0x10c   :  { %v1279_v61 = vadd.f32 %v2435_v3, %v1211_v54  ;;  %v782_v62 = vpop.f32.mrf.mxu2  ;;  %v1374_v16 = vmax.f32 %v1310_v11, 0.0 }
 0x10d   :  { %v951_v0 = vpop.f32.mrf.mxu3 }
 0x10e   :  { %v1343_v6 = vmax.f32 %v1279_v61, 0.0  ;;  %v952_v7 = vadd.f32 %v951_v0, %v782_v62  ;;  %v705_v8 = vpop.f32.mrf.mxu0 }
 0x10f   :  { %v874_v10 = vpop.f32.mrf.mxu1 }
 0x110   :  { %v1959_v12 = vpack.c.bf16 %v1343_v6, %v1342_v5  ;;  %v1243_v13 = vmul.f32 %v2429_v63, %v952_v7  ;;  %v875_v15 = vadd.f32 %v874_v10, %v705_v8 }
 0x111   :  { %744 = vmatmul.bf16.gmra.mxu0 %v1649_v1  ;;  %824 = vmatmul.bf16.gmra.mxu2 %v1777_v2 }
 0x112   :  { %2091 = vst [vmem:[%s2824_s4 + $0x30] sm:$0xff] %v1959_v12   ;;  %v1311_v14 = vadd.f32 %v2435_v3, %v1243_v13  ;;  %913 = vmatmul.bf16.gmra.mxu1 %v1653_v4  ;;  %993 = vmatmul.bf16.gmra.mxu3 %v1781_v9  ;;  %v1212_v21 = vmul.f32 %v2429_v63, %v875_v15 }
 0x114   :  { %v1375_v17 = vmax.f32 %v1311_v14, 0.0  ;;  %v785_v18 = vpop.f32.mrf.mxu2  ;;  %v1280_v26 = vadd.f32 %v2435_v3, %v1212_v21 }
 0x115   :  { %v954_v19 = vpop.f32.mrf.mxu3 }
 0x116   :  { %v2039_v20 = vpack.c.bf16 %v1375_v17, %v1374_v16  ;;  %v707_v22 = vpop.f32.mrf.mxu0  ;;  %v955_v24 = vadd.f32 %v954_v19, %v785_v18  ;;  %v1344_v32 = vmax.f32 %v1280_v26, 0.0 }
 0x117   :  { %v876_v23 = vpop.f32.mrf.mxu1 }
 0x118   :  { %2107 = vst [vmem:[%s2824_s4 + $0xb0] sm:$0xff] %v2039_v20   ;;  %v877_v25 = vadd.f32 %v876_v23, %v707_v22  ;;  %v1244_v28 = vmul.f32 %v2429_v63, %v955_v24 }
 0x11a   :  { %v1213_v27 = vmul.f32 %v2429_v63, %v877_v25  ;;  %v1312_v37 = vadd.f32 %v2435_v3, %v1244_v28 }
 0x11c   :  { %v1281_v29 = vadd.f32 %v2435_v3, %v1213_v27  ;;  %v787_v30 = vpop.f32.mrf.mxu2  ;;  %v1376_v42 = vmax.f32 %v1312_v37, 0.0 }
 0x11d   :  { %v956_v31 = vpop.f32.mrf.mxu3 }
 0x11e   :  { %v1345_v33 = vmax.f32 %v1281_v29, 0.0  ;;  %v957_v34 = vadd.f32 %v956_v31, %v787_v30  ;;  %v710_v35 = vpop.f32.mrf.mxu0 }
 0x11f   :  { %v879_v36 = vpop.f32.mrf.mxu1 }
 0x120   :  { %v1964_v38 = vpack.c.bf16 %v1345_v33, %v1344_v32  ;;  %v1245_v39 = vmul.f32 %v2429_v63, %v957_v34  ;;  %v880_v41 = vadd.f32 %v879_v36, %v710_v35 }
 0x122   :  { %2092 = vst [vmem:[%s2824_s4 + $0x38] sm:$0xff] %v1964_v38   ;;  %v1313_v40 = vadd.f32 %v2435_v3, %v1245_v39  ;;  %v1214_v47 = vmul.f32 %v2429_v63, %v880_v41 }
 0x124   :  { %v1377_v43 = vmax.f32 %v1313_v40, 0.0  ;;  %v790_v44 = vpop.f32.mrf.mxu2  ;;  %v1282_v52 = vadd.f32 %v2435_v3, %v1214_v47 }
 0x125   :  { %v959_v45 = vpop.f32.mrf.mxu3 }
 0x126   :  { %v2044_v46 = vpack.c.bf16 %v1377_v43, %v1376_v42  ;;  %v712_v48 = vpop.f32.mrf.mxu0  ;;  %v960_v50 = vadd.f32 %v959_v45, %v790_v44  ;;  %v1346_v58 = vmax.f32 %v1282_v52, 0.0 }
 0x127   :  { %v881_v49 = vpop.f32.mrf.mxu1 }
 0x128   :  { %2108 = vst [vmem:[%s2824_s4 + $0xb8] sm:$0xff] %v2044_v46   ;;  %v882_v51 = vadd.f32 %v881_v49, %v712_v48  ;;  %v1246_v54 = vmul.f32 %v2429_v63, %v960_v50 }
 0x12a   :  { %v1215_v53 = vmul.f32 %v2429_v63, %v882_v51  ;;  %v1314_v0 = vadd.f32 %v2435_v3, %v1246_v54 }
 0x12c   :  { %v1283_v55 = vadd.f32 %v2435_v3, %v1215_v53  ;;  %v792_v56 = vpop.f32.mrf.mxu2  ;;  %v1378_v6 = vmax.f32 %v1314_v0, 0.0 }
 0x12d   :  { %v961_v57 = vpop.f32.mrf.mxu3 }
 0x12e   :  { %v1347_v59 = vmax.f32 %v1283_v55, 0.0  ;;  %v962_v60 = vadd.f32 %v961_v57, %v792_v56  ;;  %v715_v61 = vpop.f32.mrf.mxu0 }
 0x12f   :  { %v884_v62 = vpop.f32.mrf.mxu1 }
 0x130   :  { %v1969_v1 = vpack.c.bf16 %v1347_v59, %v1346_v58  ;;  %v1247_v2 = vmul.f32 %v2429_v63, %v962_v60  ;;  %v885_v5 = vadd.f32 %v884_v62, %v715_v61 }
 0x132   :  { %2093 = vst [vmem:[%s2824_s4 + $0x40] sm:$0xff] %v1969_v1   ;;  %v1315_v4 = vadd.f32 %v2435_v3, %v1247_v2  ;;  %v1216_v11 = vmul.f32 %v2429_v63, %v885_v5 }
 0x134   :  { %v1379_v7 = vmax.f32 %v1315_v4, 0.0  ;;  %v795_v8 = vpop.f32.mrf.mxu2  ;;  %v1284_v16 = vadd.f32 %v2435_v3, %v1216_v11 }
 0x135   :  { %v964_v9 = vpop.f32.mrf.mxu3 }
 0x136   :  { %v2049_v10 = vpack.c.bf16 %v1379_v7, %v1378_v6  ;;  %v717_v12 = vpop.f32.mrf.mxu0  ;;  %v965_v14 = vadd.f32 %v964_v9, %v795_v8  ;;  %v1348_v22 = vmax.f32 %v1284_v16, 0.0 }
 0x137   :  { %v886_v13 = vpop.f32.mrf.mxu1 }
 0x138   :  { %2109 = vst [vmem:[%s2824_s4 + $0xc0] sm:$0xff] %v2049_v10   ;;  %v887_v15 = vadd.f32 %v886_v13, %v717_v12  ;;  %v1248_v18 = vmul.f32 %v2429_v63, %v965_v14 }
 0x13a   :  { %v1217_v17 = vmul.f32 %v2429_v63, %v887_v15  ;;  %v1316_v27 = vadd.f32 %v2435_v3, %v1248_v18 }
 0x13c   :  { %v1285_v19 = vadd.f32 %v2435_v3, %v1217_v17  ;;  %v797_v20 = vpop.f32.mrf.mxu2  ;;  %v1380_v32 = vmax.f32 %v1316_v27, 0.0 }
 0x13d   :  { %v966_v21 = vpop.f32.mrf.mxu3 }
 0x13e   :  { %v1349_v23 = vmax.f32 %v1285_v19, 0.0  ;;  %v967_v24 = vadd.f32 %v966_v21, %v797_v20  ;;  %v720_v25 = vpop.f32.mrf.mxu0 }
 0x13f   :  { %v889_v26 = vpop.f32.mrf.mxu1 }
 0x140   :  { %v1974_v28 = vpack.c.bf16 %v1349_v23, %v1348_v22  ;;  %v1249_v29 = vmul.f32 %v2429_v63, %v967_v24  ;;  %v890_v31 = vadd.f32 %v889_v26, %v720_v25 }
 0x142   :  { %2094 = vst [vmem:[%s2824_s4 + $0x48] sm:$0xff] %v1974_v28   ;;  %v1317_v30 = vadd.f32 %v2435_v3, %v1249_v29  ;;  %v1218_v37 = vmul.f32 %v2429_v63, %v890_v31 }
 0x144   :  { %v1381_v33 = vmax.f32 %v1317_v30, 0.0  ;;  %v800_v34 = vpop.f32.mrf.mxu2  ;;  %v1286_v42 = vadd.f32 %v2435_v3, %v1218_v37 }
 0x145   :  { %v969_v35 = vpop.f32.mrf.mxu3 }
 0x146   :  { %v2054_v36 = vpack.c.bf16 %v1381_v33, %v1380_v32  ;;  %v722_v38 = vpop.f32.mrf.mxu0  ;;  %v970_v40 = vadd.f32 %v969_v35, %v800_v34  ;;  %v1350_v48 = vmax.f32 %v1286_v42, 0.0 }
 0x147   :  { %v891_v39 = vpop.f32.mrf.mxu1 }
 0x148   :  { %2110 = vst [vmem:[%s2824_s4 + $0xc8] sm:$0xff] %v2054_v36   ;;  %v892_v41 = vadd.f32 %v891_v39, %v722_v38  ;;  %v1250_v44 = vmul.f32 %v2429_v63, %v970_v40 }
 0x14a   :  { %v1219_v43 = vmul.f32 %v2429_v63, %v892_v41  ;;  %v1318_v53 = vadd.f32 %v2435_v3, %v1250_v44 }
 0x14c   :  { %v1287_v45 = vadd.f32 %v2435_v3, %v1219_v43  ;;  %v802_v46 = vpop.f32.mrf.mxu2  ;;  %v1382_v58 = vmax.f32 %v1318_v53, 0.0 }
 0x14d   :  { %v971_v47 = vpop.f32.mrf.mxu3 }
 0x14e   :  { %v1351_v49 = vmax.f32 %v1287_v45, 0.0  ;;  %v972_v50 = vadd.f32 %v971_v47, %v802_v46  ;;  %v725_v51 = vpop.f32.mrf.mxu0 }
 0x14f   :  { %v894_v52 = vpop.f32.mrf.mxu1 }
 0x150   :  { %v1979_v54 = vpack.c.bf16 %v1351_v49, %v1350_v48  ;;  %v1251_v55 = vmul.f32 %v2429_v63, %v972_v50  ;;  %v895_v57 = vadd.f32 %v894_v52, %v725_v51 }
 0x152   :  { %2095 = vst [vmem:[%s2824_s4 + $0x50] sm:$0xff] %v1979_v54   ;;  %v1319_v56 = vadd.f32 %v2435_v3, %v1251_v55  ;;  %v1220_v0 = vmul.f32 %v2429_v63, %v895_v57 }
 0x154   :  { %v1383_v59 = vmax.f32 %v1319_v56, 0.0  ;;  %v805_v60 = vpop.f32.mrf.mxu2  ;;  %v1288_v6 = vadd.f32 %v2435_v3, %v1220_v0 }
 0x155   :  { %v974_v61 = vpop.f32.mrf.mxu3 }
 0x156   :  { %v2059_v62 = vpack.c.bf16 %v1383_v59, %v1382_v58  ;;  %v727_v1 = vpop.f32.mrf.mxu0  ;;  %v975_v4 = vadd.f32 %v974_v61, %v805_v60  ;;  %v1352_v12 = vmax.f32 %v1288_v6, 0.0 }
 0x157   :  { %v896_v2 = vpop.f32.mrf.mxu1 }
 0x158   :  { %2111 = vst [vmem:[%s2824_s4 + $0xd0] sm:$0xff] %v2059_v62   ;;  %v897_v5 = vadd.f32 %v896_v2, %v727_v1  ;;  %v1252_v8 = vmul.f32 %v2429_v63, %v975_v4 }
 0x15a   :  { %v1221_v7 = vmul.f32 %v2429_v63, %v897_v5  ;;  %v1320_v17 = vadd.f32 %v2435_v3, %v1252_v8 }
 0x15c   :  { %v1289_v9 = vadd.f32 %v2435_v3, %v1221_v7  ;;  %v807_v10 = vpop.f32.mrf.mxu2  ;;  %v1384_v22 = vmax.f32 %v1320_v17, 0.0 }
 0x15d   :  { %v976_v11 = vpop.f32.mrf.mxu3 }
 0x15e   :  { %v1353_v13 = vmax.f32 %v1289_v9, 0.0  ;;  %v977_v14 = vadd.f32 %v976_v11, %v807_v10  ;;  %v730_v15 = vpop.f32.mrf.mxu0 }
 0x15f   :  { %v899_v16 = vpop.f32.mrf.mxu1 }
 0x160   :  { %v1984_v18 = vpack.c.bf16 %v1353_v13, %v1352_v12  ;;  %v1253_v19 = vmul.f32 %v2429_v63, %v977_v14  ;;  %v900_v21 = vadd.f32 %v899_v16, %v730_v15 }
 0x162   :  { %2096 = vst [vmem:[%s2824_s4 + $0x58] sm:$0xff] %v1984_v18   ;;  %v1321_v20 = vadd.f32 %v2435_v3, %v1253_v19  ;;  %v1222_v27 = vmul.f32 %v2429_v63, %v900_v21 }
 0x164   :  { %v1385_v23 = vmax.f32 %v1321_v20, 0.0  ;;  %v810_v24 = vpop.f32.mrf.mxu2  ;;  %v1290_v32 = vadd.f32 %v2435_v3, %v1222_v27 }
 0x165   :  { %v979_v25 = vpop.f32.mrf.mxu3 }
 0x166   :  { %v2064_v26 = vpack.c.bf16 %v1385_v23, %v1384_v22  ;;  %v732_v28 = vpop.f32.mrf.mxu0  ;;  %v980_v30 = vadd.f32 %v979_v25, %v810_v24  ;;  %v1354_v38 = vmax.f32 %v1290_v32, 0.0  ;;  %v2135_v23 = vld [vmem:[%s2822_s2] ss:$0 sm:$0xff] }
 0x167   :  { %v901_v29 = vpop.f32.mrf.mxu1 }
 0x168   :  { %2112 = vst [vmem:[%s2824_s4 + $0xd8] sm:$0xff] %v2064_v26   ;;  %v902_v31 = vadd.f32 %v901_v29, %v732_v28  ;;  %v1254_v34 = vmul.f32 %v2429_v63, %v980_v30 }
 0x16a   :  { %v1223_v33 = vmul.f32 %v2429_v63, %v902_v31  ;;  %v1322_v43 = vadd.f32 %v2435_v3, %v1254_v34 }
 0x16c   :  { %v1291_v35 = vadd.f32 %v2435_v3, %v1223_v33  ;;  %v812_v36 = vpop.f32.mrf.mxu2  ;;  %v1386_v48 = vmax.f32 %v1322_v43, 0.0 }
 0x16d   :  { %v981_v37 = vpop.f32.mrf.mxu3 }
 0x16e   :  { %v1355_v39 = vmax.f32 %v1291_v35, 0.0  ;;  %v982_v40 = vadd.f32 %v981_v37, %v812_v36  ;;  %v735_v41 = vpop.f32.mrf.mxu0 }
 0x16f   :  { %v904_v42 = vpop.f32.mrf.mxu1 }
 0x170   :  { %v1989_v44 = vpack.c.bf16 %v1355_v39, %v1354_v38  ;;  %v1255_v45 = vmul.f32 %v2429_v63, %v982_v40  ;;  %v905_v47 = vadd.f32 %v904_v42, %v735_v41 }
 0x172   :  { %2097 = vst [vmem:[%s2824_s4 + $0x60] sm:$0xff] %v1989_v44   ;;  %v1323_v46 = vadd.f32 %v2435_v3, %v1255_v45  ;;  %v1224_v53 = vmul.f32 %v2429_v63, %v905_v47 }
 0x174   :  { %v1387_v49 = vmax.f32 %v1323_v46, 0.0  ;;  %v815_v50 = vpop.f32.mrf.mxu2  ;;  %v1292_v58 = vadd.f32 %v2435_v3, %v1224_v53 }
 0x175   :  { %v984_v51 = vpop.f32.mrf.mxu3 }
 0x176   :  { %v2069_v52 = vpack.c.bf16 %v1387_v49, %v1386_v48  ;;  %v737_v54 = vpop.f32.mrf.mxu0  ;;  %v985_v56 = vadd.f32 %v984_v51, %v815_v50  ;;  %v1356_v1 = vmax.f32 %v1292_v58, 0.0 }
 0x177   :  { %v906_v55 = vpop.f32.mrf.mxu1 }
 0x178   :  { %2113 = vst [vmem:[%s2824_s4 + $0xe0] sm:$0xff] %v2069_v52   ;;  %v907_v57 = vadd.f32 %v906_v55, %v737_v54  ;;  %v1256_v60 = vmul.f32 %v2429_v63, %v985_v56 }
 0x17a   :  { %v1225_v59 = vmul.f32 %v2429_v63, %v907_v57  ;;  %v1324_v7 = vadd.f32 %v2435_v3, %v1256_v60 }
 0x17c   :  { %v1293_v61 = vadd.f32 %v2435_v3, %v1225_v59  ;;  %v817_v62 = vpop.f32.mrf.mxu2  ;;  %v1388_v12 = vmax.f32 %v1324_v7, 0.0 }
 0x17d   :  { %v986_v0 = vpop.f32.mrf.mxu3 }
 0x17e   :  { %v1357_v2 = vmax.f32 %v1293_v61, 0.0  ;;  %v987_v4 = vadd.f32 %v986_v0, %v817_v62  ;;  %v740_v5 = vpop.f32.mrf.mxu0 }
 0x17f   :  { %v909_v6 = vpop.f32.mrf.mxu1 }
 0x180   :  { %v1994_v8 = vpack.c.bf16 %v1357_v2, %v1356_v1  ;;  %v1257_v9 = vmul.f32 %v2429_v63, %v987_v4  ;;  %v910_v11 = vadd.f32 %v909_v6, %v740_v5 }
 0x182   :  { %2098 = vst [vmem:[%s2824_s4 + $0x68] sm:$0xff] %v1994_v8   ;;  %v1325_v10 = vadd.f32 %v2435_v3, %v1257_v9  ;;  %v1226_v17 = vmul.f32 %v2429_v63, %v910_v11  ;;  %v2136_v63 = vld [vmem:[%s2823_s3] ss:$0 sm:$0xff] }
 0x184   :  { %v1389_v13 = vmax.f32 %v1325_v10, 0.0  ;;  %v820_v14 = vpop.f32.mrf.mxu2  ;;  %v1294_v22 = vadd.f32 %v2435_v3, %v1226_v17 }
 0x185   :  { %v989_v15 = vpop.f32.mrf.mxu3 }
 0x186   :  { %v2074_v16 = vpack.c.bf16 %v1389_v13, %v1388_v12  ;;  %v742_v18 = vpop.f32.mrf.mxu0  ;;  %v990_v20 = vadd.f32 %v989_v15, %v820_v14  ;;  %v1358_v29 = vmax.f32 %v1294_v22, 0.0 }
 0x187   :  { %v911_v19 = vpop.f32.mrf.mxu1 }
 0x188   :  { %2114 = vst [vmem:[%s2824_s4 + $0xe8] sm:$0xff] %v2074_v16   ;;  %v912_v21 = vadd.f32 %v911_v19, %v742_v18  ;;  %v1258_v25 = vmul.f32 %v2135_v23, %v990_v20 }
 0x18a   :  { %v1227_v24 = vmul.f32 %v2135_v23, %v912_v21  ;;  %v1326_v34 = vadd.f32 %v2136_v63, %v1258_v25 }
 0x18c   :  { %v1295_v26 = vadd.f32 %v2136_v63, %v1227_v24  ;;  %v822_v27 = vpop.f32.mrf.mxu2  ;;  %v1390_v38 = vmax.f32 %v1326_v34, 0.0 }
 0x18d   :  { %v991_v28 = vpop.f32.mrf.mxu3 }
 0x18e   :  { %v1359_v30 = vmax.f32 %v1295_v26, 0.0  ;;  %v992_v31 = vadd.f32 %v991_v28, %v822_v27  ;;  %v745_v32 = vpop.f32.mrf.mxu0 }
 0x18f   :  { %v914_v33 = vpop.f32.mrf.mxu1 }
 0x190   :  { %v1999_v3 = vpack.c.bf16 %v1359_v30, %v1358_v29  ;;  %v1259_v35 = vmul.f32 %v2135_v23, %v992_v31  ;;  %v915_v37 = vadd.f32 %v914_v33, %v745_v32 }
 0x192   :  { %2099 = vst [vmem:[%s2824_s4 + $0x70] sm:$0xff] %v1999_v3   ;;  %v1327_v36 = vadd.f32 %v2136_v63, %v1259_v35  ;;  %v1228_v43 = vmul.f32 %v2135_v23, %v915_v37 }
 0x194   :  { %v1391_v39 = vmax.f32 %v1327_v36, 0.0  ;;  %v825_v40 = vpop.f32.mrf.mxu2  ;;  %v1296_v48 = vadd.f32 %v2136_v63, %v1228_v43 }
 0x195   :  { %v994_v41 = vpop.f32.mrf.mxu3 }
 0x196   :  { %v2079_v42 = vpack.c.bf16 %v1391_v39, %v1390_v38  ;;  %v747_v44 = vpop.f32.mrf.mxu0  ;;  %v995_v46 = vadd.f32 %v994_v41, %v825_v40  ;;  %v1360_v54 = vmax.f32 %v1296_v48, 0.0 }
 0x197   :  { %v916_v45 = vpop.f32.mrf.mxu1 }
 0x198   :  { %2115 = vst [vmem:[%s2824_s4 + $0xf0] sm:$0xff] %v2079_v42   ;;  %v917_v47 = vadd.f32 %v916_v45, %v747_v44  ;;  %v1260_v50 = vmul.f32 %v2135_v23, %v995_v46 }
 0x19a   :  { %v1229_v49 = vmul.f32 %v2135_v23, %v917_v47  ;;  %v1328_v57 = vadd.f32 %v2136_v63, %v1260_v50 }
 0x19c   :  { %v1297_v51 = vadd.f32 %v2136_v63, %v1229_v49  ;;  %v827_v52 = vpop.f32.mrf.mxu2  ;;  %v1392_v61 = vmax.f32 %v1328_v57, 0.0 }
 0x19d   :  { %v996_v53 = vpop.f32.mrf.mxu3 }
 0x19e   :  { %v1361_v55 = vmax.f32 %v1297_v51, 0.0  ;;  %v997_v56 = vadd.f32 %v996_v53, %v827_v52 }
 0x1a0   :  { %v2004_v58 = vpack.c.bf16 %v1361_v55, %v1360_v54  ;;  %v1261_v59 = vmul.f32 %v2135_v23, %v997_v56 }
 0x1a2   :  { %2100 = vst [vmem:[%s2824_s4 + $0x78] sm:$0xff] %v2004_v58   ;;  %v1329_v60 = vadd.f32 %v2136_v63, %v1261_v59 }
 0x1a4   :  { %v1393_v62 = vmax.f32 %v1329_v60, 0.0 }
 0x1a6   :  { %v2084_v0 = vpack.c.bf16 %v1393_v62, %v1392_v61 }
 0x1a8   :  { %2116 = vst [vmem:[%s2824_s4 + $0xf8] sm:$0xff] %v2084_v0  }

// kernel: resnet_forward.18
= control target key start
LH: loop header
LB: loop body
LE: loop exit
PB: predicated region body
PF: predicated region fallthrough
CT: control target
= control target key end

     0   :  { %s1828_s18 = smov 0   ;;  %s1830_s19 = smov 0   ;;  %s2181_s0 = inlined_call_operand.vmem [shape: bf16[128,1152], index: 0, kind: input, shape index: {}]   ;;  %s2182_s1 = inlined_call_operand.vmem [shape: bf16[1152,128], index: 1, kind: input, shape index: {}]   ;;  %s2183_s2 = inlined_call_operand.vmem [shape: f32[1,128], index: 2, kind: input, shape index: {}]   ;;  %s2184_s3 = inlined_call_operand.vmem [shape: f32[1,128], index: 3, kind: input, shape index: {}]   ;;  %s2185_s4 = inlined_call_operand.vmem [shape: bf16[128,128], index: 4, kind: input, shape index: {}]   ;;  %s2186_s5 = inlined_call_operand.vmem [shape: bf16[128,128], index: 5, kind: output, shape index: {}]  }
   0x1   :  { %s1832_s20 = smov 0   ;;  %s1834_s21 = smov 0  }
   0x2   :  { %s1836_s22 = smov 0  }
   0x3 LB: > { %s27_s23 = sadd.s32 1, %s1791_s21  ;;  %p50_p1 = scmp.ne.s32.totalorder %s1783_s19, %s1779_s18  ;;  %s1795_s22 = sphi %s1836_s22, %s15_s22   ;;  %s1791_s21 = sphi %s1834_s21, %s2190_s21   ;;  %s1787_s20 = sphi %s1832_s20, %s2189_s20   ;;  %s1783_s19 = sphi %s1830_s19, %s2188_s19   ;;  %s1779_s18 = sphi %s1828_s18, %s2187_s18  }
   0x4   : > { %p28_p0 = scmp.ge.s32.totalorder %s27_s23, 3  ;;  %p51_p2 = scmp.eq.s32.totalorder %s1795_s22, 0 }
   0x5   : > { %s43_s25 = sadd.s32 1, %s1783_s19  ;;  %p1319_p5 = scmp.ge.s32.totalorder %s1795_s22, 3 }
   0x6   : > { %s2192_s23 = smov (%p28_p0, %s27_s23), 0  ;;  %p52_p3 = por %p51_p2, %p50_p1 }
   0x7   : > { %s39_s24 = ssub.s32 %s1791_s21, %s2192_s23  ;;  %236 = sbr.rel (%p1319_p5) target bundleno = 49 (0x31), region = 28 }
   0x8   : > { %p41_p4 = scmp.eq.s32.totalorder %s39_s24, 0 }
   0xa   : > { %s1863_s26 = scalar_select %p41_p4, %s1783_s19, %s43_s25  }
   0xc   : > { %239 = sbr.rel (!%p52_p3) target bundleno = 49 (0x31), region = 32  ;;  %s241_s27 = sand.u32 (%p52_p3), 1, %s1783_s19  }
   0xd   : > { %s1553_s28 = smul.u32 (%p52_p3), 12, %s1791_s21 }
   0xe   : > { %s1712_s29 = smul.u32 (%p52_p3), 192, %s241_s27 }
   0xf   : > { %s1871_s7 = scalar_lea.vmem (%p52_p3), %s2181_s0, %s1553_s28 }
  0x10   : > { %v264_v0 = vld [vmem:[%s1871_s7] sm:$0xff] (%p52_p3)  ;;  %v268_v2 = vld [vmem:[%s1871_s7 + $0x48] sm:$0xff] (%p52_p3)  ;;  %s1876_s8 = scalar_lea.vmem (%p52_p3), [#allocation3], %s1712_s29  ;;  %v272_v4 = vld [vmem:[%s1871_s7 + $0x90] sm:$0xff] (%p52_p3) }
  0x11   : > { %v266_v1 = vld [vmem:[%s1871_s7 + $0x24] sm:$0xff]  ;;  %265 = vst [vmem:[%s1876_s8] sm:$0xff] %v264_v0  ;;  %v270_v3 = vld [vmem:[%s1871_s7 + $0x6c] sm:$0xff]  ;;  %v274_v5 = vld [vmem:[%s1871_s7 + $0xb4] sm:$0xff] }
  0x12   : > { %267 = vst [vmem:[%s1876_s8 + $0xc] sm:$0xff] %v266_v1  ;;  %v276_v6 = vld [vmem:[%s1871_s7 + $0xd8] sm:$0xff]  ;;  %v280_v8 = vld [vmem:[%s1871_s7 + $0x120] sm:$0xff]  ;;  %v284_v10 = vld [vmem:[%s1871_s7 + $0x168] sm:$0xff] }
  0x13   : > { %269 = vst [vmem:[%s1876_s8 + $0x18] sm:$0xff] %v268_v2  ;;  %v278_v7 = vld [vmem:[%s1871_s7 + $0xfc] sm:$0xff]  ;;  %v282_v9 = vld [vmem:[%s1871_s7 + $0x144] sm:$0xff]  ;;  %v286_v11 = vld [vmem:[%s1871_s7 + $0x18c] sm:$0xff] }
  0x14   : > { %271 = vst [vmem:[%s1876_s8 + $0x24] sm:$0xff] %v270_v3  ;;  %v288_v12 = vld [vmem:[%s1871_s7 + $0x1b0] sm:$0xff]  ;;  %v292_v14 = vld [vmem:[%s1871_s7 + $0x1f8] sm:$0xff]  ;;  %v1321_v16 = vld [vmem:[%s1871_s7 + $0x8] sm:$0xf] }
  0x15   : > { %273 = vst [vmem:[%s1876_s8 + $0x30] sm:$0xff] %v272_v4  ;;  %v290_v13 = vld [vmem:[%s1871_s7 + $0x1d4] sm:$0xff]  ;;  %v294_v15 = vld [vmem:[%s1871_s7 + $0x21c] sm:$0xff]  ;;  %v1323_v17 = vld [vmem:[%s1871_s7 + $0x2c] sm:$0xf] }
  0x16   : > { %275 = vst [vmem:[%s1876_s8 + $0x3c] sm:$0xff] %v274_v5  ;;  %v1325_v18 = vld [vmem:[%s1871_s7 + $0x50] sm:$0xf]  ;;  %v1327_v19 = vld [vmem:[%s1871_s7 + $0x74] sm:$0xf] }
  0x17   : > { %277 = vst [vmem:[%s1876_s8 + $0x48] sm:$0xff] %v276_v6  ;;  %v1329_v20 = vld [vmem:[%s1871_s7 + $0x98] sm:$0xf]  ;;  %v1331_v21 = vld [vmem:[%s1871_s7 + $0xbc] sm:$0xf] }
  0x18   : > { %279 = vst [vmem:[%s1876_s8 + $0x54] sm:$0xff] %v278_v7  ;;  %v1333_v22 = vld [vmem:[%s1871_s7 + $0xe0] sm:$0xf]  ;;  %v1335_v23 = vld [vmem:[%s1871_s7 + $0x104] sm:$0xf] }
  0x19   : > { %281 = vst [vmem:[%s1876_s8 + $0x60] sm:$0xff] %v280_v8  ;;  %v1337_v24 = vld [vmem:[%s1871_s7 + $0x128] sm:$0xf]  ;;  %v1339_v25 = vld [vmem:[%s1871_s7 + $0x14c] sm:$0xf] }
  0x1a   : > { %283 = vst [vmem:[%s1876_s8 + $0x6c] sm:$0xff] %v282_v9  ;;  %v1341_v26 = vld [vmem:[%s1871_s7 + $0x170] sm:$0xf]  ;;  %v1343_v27 = vld [vmem:[%s1871_s7 + $0x194] sm:$0xf] }
  0x1b   : > { %285 = vst [vmem:[%s1876_s8 + $0x78] sm:$0xff] %v284_v10  ;;  %v1345_v28 = vld [vmem:[%s1871_s7 + $0x1b8] sm:$0xf]  ;;  %v1347_v29 = vld [vmem:[%s1871_s7 + $0x1dc] sm:$0xf] }
  0x1c   : > { %287 = vst [vmem:[%s1876_s8 + $0x84] sm:$0xff] %v286_v11  ;;  %v1349_v30 = vld [vmem:[%s1871_s7 + $0x200] sm:$0xf]  ;;  %v1351_v31 = vld [vmem:[%s1871_s7 + $0x224] sm:$0xf] }
  0x1d   : > { %289 = vst [vmem:[%s1876_s8 + $0x90] sm:$0xff] %v288_v12 }
  0x1e   : > { %291 = vst [vmem:[%s1876_s8 + $0x9c] sm:$0xff] %v290_v13 }
  0x1f   : > { %293 = vst [vmem:[%s1876_s8 + $0xa8] sm:$0xff] %v292_v14 }
  0x20   : > { %295 = vst [vmem:[%s1876_s8 + $0xb4] sm:$0xff] %v294_v15 }
  0x21   : > { %1322 = vst [vmem:[%s1876_s8 + $0x8] sm:$0xf] %v1321_v16 }
  0x22   : > { %1324 = vst [vmem:[%s1876_s8 + $0x14] sm:$0xf] %v1323_v17 }
  0x23   : > { %1326 = vst [vmem:[%s1876_s8 + $0x20] sm:$0xf] %v1325_v18 }
  0x24   : > { %1328 = vst [vmem:[%s1876_s8 + $0x2c] sm:$0xf] %v1327_v19 }
  0x25   : > { %1330 = vst [vmem:[%s1876_s8 + $0x38] sm:$0xf] %v1329_v20 }
  0x26   : > { %1332 = vst [vmem:[%s1876_s8 + $0x44] sm:$0xf] %v1331_v21 }
  0x27   : > { %1334 = vst [vmem:[%s1876_s8 + $0x50] sm:$0xf] %v1333_v22 }
  0x28   : > { %1336 = vst [vmem:[%s1876_s8 + $0x5c] sm:$0xf] %v1335_v23 }
  0x29   : > { %1338 = vst [vmem:[%s1876_s8 + $0x68] sm:$0xf] %v1337_v24 }
  0x2a   : > { %1340 = vst [vmem:[%s1876_s8 + $0x74] sm:$0xf] %v1339_v25 }
  0x2b   : > { %1342 = vst [vmem:[%s1876_s8 + $0x80] sm:$0xf] %v1341_v26 }
  0x2c   : > { %1344 = vst [vmem:[%s1876_s8 + $0x8c] sm:$0xf] %v1343_v27 }
  0x2d   : > { %1346 = vst [vmem:[%s1876_s8 + $0x98] sm:$0xf] %v1345_v28 }
  0x2e   : > { %1348 = vst [vmem:[%s1876_s8 + $0xa4] sm:$0xf] %v1347_v29 }
  0x2f   : > { %1350 = vst [vmem:[%s1876_s8 + $0xb0] sm:$0xf] %v1349_v30 }
  0x30   : > { %1352 = vst [vmem:[%s1876_s8 + $0xbc] sm:$0xf] %v1351_v31 }
  0x31 PF: > { %p1353_p6 = scmp.ge.s32.totalorder %s1795_s22, 1  ;;  %p352_p7 = scmp.lt.s32.totalorder %s1795_s22, 4 }
  0x33   : > { %p353_p8 = pnand %p1353_p6, %p352_p7 }
  0x34   : > { %s359_s9 = sand.u32 (!%p353_p8), 1, %s1779_s18   ;;  %s413_s10 = smul.u32 (!%p353_p8), 48, %s1787_s20 }
  0x35   : > { %356 = sbr.rel (%p353_p8) target bundleno = 369 (0x171), region = 62  ;;  %p1355_p10 = scmp.ne.s32.totalorder (!%p353_p8), %s1787_s20, 0 }
  0x36   : > { %s1713_s11 = smul.u32 (!%p353_p8), 192, %s359_s9  ;;  %p414_p9 = scmp.lt.s32.totalorder (!%p353_p8), %s413_s10, 143 }
  0x38   : > { %s1948_s16 = scalar_lea.vmem (!%p353_p8), [#allocation3], %s1713_s11 }
  0x3a   : > { %s2194_s10 = smov (!%p414_p9, %s413_s10), 143  ;;  %449 = sbr.rel (%p1355_p10) target bundleno = 80 (0x50), region = 70 }
  0x3b   : > { %s1354_s12 = sshll.u32 %s2194_s10, 2 }
  0x3c   : > { %s1946_s15 = scalar_lea.vmem %s2182_s1, %s1354_s12 }
  0x3f   : > { %v1797_v32 = vmov 0.0  }
  0x40   : > { %450 = vst [vmem:[#allocation2 + $0x30] sm:$0xff] %v1797_v32 }
  0x41   : > { %451 = vst [vmem:[#allocation2] sm:$0xff] %v1797_v32 }
  0x42   : > { %452 = vst [vmem:[#allocation2 + $0x58] sm:$0xff] %v1797_v32 }
  0x43   : > { %453 = vst [vmem:[#allocation2 + $0x18] sm:$0xff] %v1797_v32 }
  0x44   : > { %454 = vst [vmem:[#allocation2 + $0x50] sm:$0xff] %v1797_v32 }
  0x45   : > { %455 = vst [vmem:[#allocation2 + $0x68] sm:$0xff] %v1797_v32 }
  0x46   : > { %456 = vst [vmem:[#allocation2 + $0x8] sm:$0xff] %v1797_v32 }
  0x47   : > { %457 = vst [vmem:[#allocation2 + $0x48] sm:$0xff] %v1797_v32 }
  0x48   : > { %458 = vst [vmem:[#allocation2 + $0x40] sm:$0xff] %v1797_v32 }
  0x49   : > { %459 = vst [vmem:[#allocation2 + $0x20] sm:$0xff] %v1797_v32 }
  0x4a   : > { %460 = vst [vmem:[#allocation2 + $0x10] sm:$0xff] %v1797_v32 }
  0x4b   : > { %461 = vst [vmem:[#allocation2 + $0x38] sm:$0xff] %v1797_v32 }
  0x4c   : > { %462 = vst [vmem:[#allocation2 + $0x60] sm:$0xff] %v1797_v32 }
  0x4d   : > { %463 = vst [vmem:[#allocation2 + $0x70] sm:$0xff] %v1797_v32 }
  0x4e   : > { %464 = vst [vmem:[#allocation2 + $0x78] sm:$0xff] %v1797_v32 }
  0x4f   : > { %465 = vst [vmem:[#allocation2 + $0x28] sm:$0xff] %v1797_v32 }
  0x50 PF: > { %v1585_v33 = vld [vmem:[%s1946_s15 + $0x38] sm:$0xff]  ;;  %v1584_v36 = vld [vmem:[%s1946_s15 + $0x30] sm:$0xff]  ;;  %v1583_v39 = vld [vmem:[%s1946_s15 + $0x28] sm:$0xff]  ;;  %p1548_p11 = scmp.ne.s32.totalorder %s1787_s20, 2 }
  0x51   : > { %v1953_v34 = vld [vmem:[%s1946_s15 + $0x78] sm:$0xff]  ;;  %834 = vmatpush.bf16.msra.mxu0 %v1585_v33  ;;  %1688 = vmatpush.bf16.msra.mxu3 %v1585_v33  ;;  %v1962_v37 = vld [vmem:[%s1946_s15 + $0x70] sm:$0xff]  ;;  %v1591_v40 = vld [vmem:[%s1946_s15 + $0x68] sm:$0xff] }
  0x52   : > { %v1956_v35 = vld [vmem:[%s1946_s15 + $0xb8] sm:$0xff]  ;;  %883 = vmatpush.bf16.msra.mxu1 %v1953_v34  ;;  %v1965_v38 = vld [vmem:[%s1946_s15 + $0xb0] sm:$0xff]  ;;  %v1972_v41 = vld [vmem:[%s1946_s15 + $0xa8] sm:$0xff] }
  0x53   : > { %932 = vmatpush.bf16.msra.mxu2 %v1956_v35  ;;  %v1582_v42 = vld [vmem:[%s1946_s15 + $0x20] sm:$0xff]  ;;  %v1581_v45 = vld [vmem:[%s1946_s15 + $0x18] sm:$0xff]  ;;  %v1580_v48 = vld [vmem:[%s1946_s15 + $0x10] sm:$0xff] }
  0x54   : > { %v1590_v43 = vld [vmem:[%s1946_s15 + $0x60] sm:$0xff]  ;;  %v1589_v46 = vld [vmem:[%s1946_s15 + $0x58] sm:$0xff]  ;;  %v1588_v49 = vld [vmem:[%s1946_s15 + $0x50] sm:$0xff] }
  0x55   : > { %835 = vmatpush.bf16.msra.mxu0 %v1584_v36  ;;  %1689 = vmatpush.bf16.msra.mxu3 %v1584_v36  ;;  %v1978_v44 = vld [vmem:[%s1946_s15 + $0xa0] sm:$0xff]  ;;  %v1984_v47 = vld [vmem:[%s1946_s15 + $0x98] sm:$0xff]  ;;  %v1990_v50 = vld [vmem:[%s1946_s15 + $0x90] sm:$0xff] }
  0x56   : > { %884 = vmatpush.bf16.msra.mxu1 %v1962_v37  ;;  %v1579_v51 = vld [vmem:[%s1946_s15 + $0x8] sm:$0xff]  ;;  %v1578_v54 = vld [vmem:[%s1946_s15] sm:$0xff]  ;;  %v1430_v59 = vld [vmem:[%s1948_s16 + $0x90] sm:$0xf] }
  0x57   : > { %933 = vmatpush.bf16.msra.mxu2 %v1965_v38  ;;  %v1587_v52 = vld [vmem:[%s1946_s15 + $0x48] sm:$0xff]  ;;  %v1586_v55 = vld [vmem:[%s1946_s15 + $0x40] sm:$0xff]  ;;  %v1573_v60 = vld [vmem:[%s1948_s16 + $0x98] sm:$0xf0] }
  0x58   : > { %v1996_v53 = vld [vmem:[%s1946_s15 + $0x88] sm:$0xff]  ;;  %v2001_v56 = vld [vmem:[%s1946_s15 + $0x80] sm:$0xff]  ;;  %v1360_v62 = vld [vmem:[%s1948_s16 + $0xc] sm:$0xf0]  ;;  %v1431_v2 = vor.u32 %v1573_v60, %v1430_v59 }
  0x59   : > { %836 = vmatpush.bf16.msra.mxu0 %v1583_v39  ;;  %1690 = vmatpush.bf16.msra.mxu3 %v1583_v39  ;;  %v1358_v57 = vld [vmem:[%s1948_s16] sm:$0xf]  ;;  %v1555_v58 = vld [vmem:[%s1948_s16 + $0x8] sm:$0xf0]  ;;  %v1554_v61 = vld [vmem:[%s1948_s16 + $0x4] sm:$0xf] }
  0x5a   : > { %885 = vmatpush.bf16.msra.mxu1 %v1591_v40  ;;  %v1366_v63 = vld [vmem:[%s1948_s16 + $0x8] sm:$0xf]  ;;  %v1556_v0 = vld [vmem:[%s1948_s16 + $0x10] sm:$0xf0]  ;;  %v1359_v1 = vor.u32 %v1555_v58, %v1358_v57  ;;  %v1363_v3 = vor.u32 %v1554_v61, %v1360_v62  ;;  %v1370_v5 = vld [vmem:[%s1948_s16 + $0x18] sm:$0xf] }
  0x5b   : > { %934 = vmatpush.bf16.msra.mxu2 %v1972_v41  ;;  %v1367_v4 = vor.u32 %v1556_v0, %v1366_v63  ;;  %v1558_v6 = vld [vmem:[%s1948_s16 + $0x20] sm:$0xf0]  ;;  %v1442_v7 = vld [vmem:[%s1948_s16 + $0xa8] sm:$0xf]  ;;  %v1576_v8 = vld [vmem:[%s1948_s16 + $0xb0] sm:$0xf0] }
  0x5c   : > { %v1557_v9 = vld [vmem:[%s1948_s16 + $0x1c] sm:$0xf]  ;;  %v1372_v10 = vld [vmem:[%s1948_s16 + $0x24] sm:$0xf0]  ;;  %v1378_v11 = vld [vmem:[%s1948_s16 + $0x20] sm:$0xf]  ;;  %v1371_v13 = vor.u32 %v1558_v6, %v1370_v5  ;;  %v1443_v14 = vor.u32 %v1576_v8, %v1442_v7 }
  0x5d   : > { %837 = vmatpush.bf16.msra.mxu0 %v1582_v42  ;;  %1691 = vmatpush.bf16.msra.mxu3 %v1582_v42  ;;  %v1559_v12 = vld [vmem:[%s1948_s16 + $0x28] sm:$0xf0]  ;;  %v1375_v15 = vor.u32 %v1557_v9, %v1372_v10  ;;  %v1382_v17 = vld [vmem:[%s1948_s16 + $0x30] sm:$0xf]  ;;  %v1561_v18 = vld [vmem:[%s1948_s16 + $0x38] sm:$0xf0] }
  0x5e   : > { %886 = vmatpush.bf16.msra.mxu1 %v1590_v43  ;;  %v1379_v16 = vor.u32 %v1559_v12, %v1378_v11  ;;  %v1560_v19 = vld [vmem:[%s1948_s16 + $0x34] sm:$0xf]  ;;  %v1432_v21 = vld [vmem:[%s1948_s16 + $0x9c] sm:$0xf0]  ;;  %v1390_v23 = vld [vmem:[%s1948_s16 + $0x38] sm:$0xf]  ;;  %v1383_v25 = vor.u32 %v1561_v18, %v1382_v17 }
  0x5f   : > { %935 = vmatpush.bf16.msra.mxu2 %v1978_v44  ;;  %v1572_v20 = vld [vmem:[%s1948_s16 + $0x94] sm:$0xf]  ;;  %v1384_v22 = vld [vmem:[%s1948_s16 + $0x3c] sm:$0xf0]  ;;  %v1562_v24 = vld [vmem:[%s1948_s16 + $0x40] sm:$0xf0] }
  0x60   : > { %v1435_v26 = vor.u32 %v1572_v20, %v1432_v21  ;;  %v1387_v27 = vor.u32 %v1560_v19, %v1384_v22  ;;  %v1391_v28 = vor.u32 %v1562_v24, %v1390_v23  ;;  %v1394_v29 = vld [vmem:[%s1948_s16 + $0x48] sm:$0xf]  ;;  %v1564_v30 = vld [vmem:[%s1948_s16 + $0x50] sm:$0xf0]  ;;  %v1563_v31 = vld [vmem:[%s1948_s16 + $0x4c] sm:$0xf] }
  0x61   : > { %838 = vmatpush.bf16.msra.mxu0 %v1581_v45  ;;  %1692 = vmatpush.bf16.msra.mxu3 %v1581_v45  ;;  %v1575_v32 = vld [vmem:[%s1948_s16 + $0xac] sm:$0xf]  ;;  %v1444_v33 = vld [vmem:[%s1948_s16 + $0xb4] sm:$0xf0]  ;;  %v1565_v36 = vld [vmem:[%s1948_s16 + $0x58] sm:$0xf0] }
  0x62   : > { %887 = vmatpush.bf16.msra.mxu1 %v1589_v46  ;;  %v1447_v39 = vor.u32 %v1575_v32, %v1444_v33  ;;  %v1567_v42 = vld [vmem:[%s1948_s16 + $0x68] sm:$0xf0]  ;;  %v1574_v45 = vld [vmem:[%s1948_s16 + $0xa0] sm:$0xf0]  ;;  %v1450_v57 = vld [vmem:[%s1948_s16 + $0xb0] sm:$0xf] }
  0x63   : > { %936 = vmatpush.bf16.msra.mxu2 %v1984_v47  ;;  %v1420_v58 = vld [vmem:[%s1948_s16 + $0x84] sm:$0xf0]  ;;  %v1426_v59 = vld [vmem:[%s1948_s16 + $0x80] sm:$0xf]  ;;  %v1571_v60 = vld [vmem:[%s1948_s16 + $0x88] sm:$0xf0] }
  0x64   : > { %v1427_v0 = vor.u32 %v1571_v60, %v1426_v59  ;;  %v466_v5 = vld [vmem:[#allocation2 + $0x30] sm:$0xff]  ;;  %v468_v21 = vld [vmem:[#allocation2 + $0x58] sm:$0xff] }
  0x65   : > { %839 = vmatpush.bf16.msra.mxu0 %v1580_v48  ;;  %1693 = vmatpush.bf16.msra.mxu3 %v1580_v48  ;;  %v1568_v48 = vld [vmem:[%s1948_s16 + $0x70] sm:$0xf0] }
  0x66   : > { %888 = vmatpush.bf16.msra.mxu1 %v1588_v49 }
  0x67   : > { %937 = vmatpush.bf16.msra.mxu2 %v1990_v50 }
  0x69   : > { %840 = vmatpush.bf16.msra.mxu0 %v1579_v51  ;;  %1694 = vmatpush.bf16.msra.mxu3 %v1579_v51 }
  0x6a   : > { %889 = vmatpush.bf16.msra.mxu1 %v1587_v52 }
  0x6b   : > { %938 = vmatpush.bf16.msra.mxu2 %v1996_v53 }
  0x6d   : > { %841 = vmatpush.bf16.msra.mxu0 %v1578_v54  ;;  %1695 = vmatpush.bf16.msra.mxu3 %v1578_v54  ;;  %v1570_v54 = vld [vmem:[%s1948_s16 + $0x80] sm:$0xf0] }
  0x6e   : > { %890 = vmatpush.bf16.msra.mxu1 %v1586_v55 }
  0x6f   : > { %939 = vmatpush.bf16.msra.mxu2 %v2001_v56 }
  0x70   : > { %842 = vmatmul.bf16.vlgmr.msra.gmra.mxu0 %v1359_v1  ;;  %872 = vmatmul.bf16.vlgmr.msra.gmra.mxu3 %v1431_v2 }
  0x71   : > { %1696 = vmatpush.bf16.msrb.mxu3 %v1953_v34  ;;  %891 = vmatmul.bf16.vlgmr.msra.gmra.mxu1 %v1363_v3  ;;  %v1396_v34 = vld [vmem:[%s1948_s16 + $0x54] sm:$0xf0] }
  0x72   : > { %940 = vmatmul.bf16.vlgmr.msra.gmra.mxu2 %v1367_v4 }
  0x75   : > { %1697 = vmatpush.bf16.msrb.mxu3 %v1962_v37  ;;  %v1395_v37 = vor.u32 %v1564_v30, %v1394_v29  ;;  %v469_v29 = vld [vmem:[#allocation2 + $0x18] sm:$0xff] }
  0x79   : > { %1698 = vmatpush.bf16.msrb.mxu3 %v1591_v40 }
  0x7d   : > { %1699 = vmatpush.bf16.msrb.mxu3 %v1590_v43  ;;  %v1566_v43 = vld [vmem:[%s1948_s16 + $0x64] sm:$0xf] }
  0x80   : > { %847 = vmatmul.bf16.gmra.mxu0 %v1371_v13  ;;  %877 = vmatmul.bf16.gmra.mxu3 %v1443_v14  ;;  %v467_v13 = vld [vmem:[#allocation2] sm:$0xff] }
  0x81   : > { %1700 = vmatpush.bf16.msrb.mxu3 %v1589_v46  ;;  %896 = vmatmul.bf16.gmra.mxu1 %v1375_v15  ;;  %v1408_v46 = vld [vmem:[%s1948_s16 + $0x6c] sm:$0xf0] }
  0x82   : > { %945 = vmatmul.bf16.gmra.mxu2 %v1379_v16  ;;  %v1411_v51 = vor.u32 %v1566_v43, %v1408_v46 }
  0x85   : > { %1701 = vmatpush.bf16.msrb.mxu3 %v1588_v49 }
  0x89   : > { %1702 = vmatpush.bf16.msrb.mxu3 %v1587_v52 }
  0x8d   : > { %1703 = vmatpush.bf16.msrb.mxu3 %v1586_v55  ;;  %v1569_v55 = vld [vmem:[%s1948_s16 + $0x7c] sm:$0xf] }
  0x8e   : > { %v1423_v63 = vor.u32 %v1569_v55, %v1420_v58 }
  0x90   : > { %852 = vmatmul.bf16.gmra.mxu0 %v1383_v25  ;;  %921 = vmatmul.bf16.vlgmr.msrb.gmra.mxu3 %v1435_v26 }
  0x91   : > { %1704 = vmatpush.bf16.msra.mxu3 %v1956_v35  ;;  %901 = vmatmul.bf16.gmra.mxu1 %v1387_v27  ;;  %v1402_v35 = vld [vmem:[%s1948_s16 + $0x50] sm:$0xf] }
  0x92   : > { %950 = vmatmul.bf16.gmra.mxu2 %v1391_v28  ;;  %v1403_v40 = vor.u32 %v1565_v36, %v1402_v35 }
  0x95   : > { %1705 = vmatpush.bf16.msra.mxu3 %v1965_v38  ;;  %v1399_v38 = vor.u32 %v1563_v31, %v1396_v34 }
  0x99   : > { %1706 = vmatpush.bf16.msra.mxu3 %v1972_v41  ;;  %v1406_v41 = vld [vmem:[%s1948_s16 + $0x60] sm:$0xf] }
  0x9a   : > { %v1407_v49 = vor.u32 %v1567_v42, %v1406_v41 }
  0x9d   : > { %1707 = vmatpush.bf16.msra.mxu3 %v1978_v44  ;;  %v1438_v44 = vld [vmem:[%s1948_s16 + $0x98] sm:$0xf] }
  0xa0   : > { %857 = vmatmul.bf16.gmra.mxu0 %v1395_v37  ;;  %926 = vmatmul.bf16.gmra.mxu3 %v1447_v39  ;;  %v470_v37 = vld [vmem:[#allocation2 + $0x50] sm:$0xff] }
  0xa1   : > { %1708 = vmatpush.bf16.msra.mxu3 %v1984_v47  ;;  %906 = vmatmul.bf16.gmra.mxu1 %v1399_v38  ;;  %v1414_v47 = vld [vmem:[%s1948_s16 + $0x68] sm:$0xf] }
  0xa2   : > { %955 = vmatmul.bf16.gmra.mxu2 %v1403_v40  ;;  %v1415_v52 = vor.u32 %v1568_v48, %v1414_v47 }
  0xa5   : > { %1709 = vmatpush.bf16.msra.mxu3 %v1990_v50  ;;  %v1439_v50 = vor.u32 %v1574_v45, %v1438_v44  ;;  %v471_v45 = vld [vmem:[#allocation2 + $0x68] sm:$0xff] }
  0xa9   : > { %1710 = vmatpush.bf16.msra.mxu3 %v1996_v53  ;;  %v1418_v53 = vld [vmem:[%s1948_s16 + $0x78] sm:$0xf] }
  0xaa   : > { %v1419_v61 = vor.u32 %v1570_v54, %v1418_v53  ;;  %v472_v53 = vld [vmem:[#allocation2 + $0x8] sm:$0xff] }
  0xad   : > { %1711 = vmatpush.bf16.msra.mxu3 %v2001_v56  ;;  %v1577_v56 = vld [vmem:[%s1948_s16 + $0xb8] sm:$0xf0] }
  0xae   : > { %v1451_v62 = vor.u32 %v1577_v56, %v1450_v57 }
  0xb0   : > { %862 = vmatmul.bf16.gmra.mxu0 %v1407_v49  ;;  %970 = vmatmul.bf16.vlgmr.msra.gmra.mxu3 %v1439_v50 }
  0xb1   : > { %911 = vmatmul.bf16.gmra.mxu1 %v1411_v51 }
  0xb2   : > { %960 = vmatmul.bf16.gmra.mxu2 %v1415_v52 }
  0xc0   : > { %867 = vmatmul.bf16.gmra.mxu0 %v1419_v61  ;;  %975 = vmatmul.bf16.gmra.mxu3 %v1451_v62  ;;  %v473_v61 = vld [vmem:[#allocation2 + $0x48] sm:$0xff] }
  0xc1   : > { %916 = vmatmul.bf16.gmra.mxu1 %v1423_v63 }
  0xc2   : > { %965 = vmatmul.bf16.gmra.mxu2 %v1427_v0 }
  0xed   : > { %v843_v1 = vpop.f32.mrf.mxu0 }
  0xee   : > { %v892_v2 = vpop.f32.mrf.mxu1 }
  0xef   : > { %v893_v3 = vadd.f32 %v892_v2, %v843_v1 }
  0xf3   : > { %v2063_v4 = vpop.f32.mrf.mxu3 }
  0xf5   : > { %v941_v6 = vpop.f32.mrf.mxu2  ;;  %v845_v8 = vpop.f32.mrf.mxu0 }
  0xf6   : > { %v942_v7 = vadd.f32 %v941_v6, %v893_v3  ;;  %v894_v9 = vpop.f32.mrf.mxu1  ;;  %v478_v6 = vld [vmem:[#allocation2 + $0x60] sm:$0xff] }
  0xf7   : > { %v895_v11 = vadd.f32 %v894_v9, %v845_v8  ;;  %v474_v8 = vld [vmem:[#allocation2 + $0x40] sm:$0xff] }
  0xf8   : > { %v981_v10 = vadd.f32 %v942_v7, %v466_v5 }
  0xfa   : > { %997 = vst [vmem:[#allocation2 + $0x30] sm:$0xff] %v981_v10 }
  0xfb   : > { %v2065_v12 = vpop.f32.mrf.mxu3 }
  0xfd   : > { %v943_v14 = vpop.f32.mrf.mxu2  ;;  %v848_v16 = vpop.f32.mrf.mxu0 }
  0xfe   : > { %v944_v15 = vadd.f32 %v943_v14, %v895_v11  ;;  %v897_v17 = vpop.f32.mrf.mxu1 }
  0xff   : > { %v898_v19 = vadd.f32 %v897_v17, %v848_v16 }
 0x100   : > { %v982_v18 = vadd.f32 %v944_v15, %v467_v13 }
 0x102   : > { %998 = vst [vmem:[#allocation2] sm:$0xff] %v982_v18 }
 0x103   : > { %v2067_v20 = vpop.f32.mrf.mxu3 }
 0x105   : > { %v946_v22 = vpop.f32.mrf.mxu2  ;;  %v850_v24 = vpop.f32.mrf.mxu0 }
 0x106   : > { %v947_v23 = vadd.f32 %v946_v22, %v898_v19  ;;  %v899_v25 = vpop.f32.mrf.mxu1  ;;  %v479_v19 = vld [vmem:[#allocation2 + $0x70] sm:$0xff]  ;;  %v475_v22 = vld [vmem:[#allocation2 + $0x20] sm:$0xff] }
 0x107   : > { %v900_v27 = vadd.f32 %v899_v25, %v850_v24 }
 0x108   : > { %v983_v26 = vadd.f32 %v947_v23, %v468_v21 }
 0x10a   : > { %999 = vst [vmem:[#allocation2 + $0x58] sm:$0xff] %v983_v26 }
 0x10b   : > { %v2069_v28 = vpop.f32.mrf.mxu3 }
 0x10d   : > { %v948_v30 = vpop.f32.mrf.mxu2  ;;  %v853_v32 = vpop.f32.mrf.mxu0 }
 0x10e   : > { %v949_v31 = vadd.f32 %v948_v30, %v900_v27  ;;  %v902_v33 = vpop.f32.mrf.mxu1 }
 0x10f   : > { %v903_v35 = vadd.f32 %v902_v33, %v853_v32  ;;  %v480_v32 = vld [vmem:[#allocation2 + $0x78] sm:$0xff] }
 0x110   : > { %v984_v34 = vadd.f32 %v949_v31, %v469_v29 }
 0x112   : > { %1000 = vst [vmem:[#allocation2 + $0x18] sm:$0xff] %v984_v34  ;;  %v476_v34 = vld [vmem:[#allocation2 + $0x10] sm:$0xff] }
 0x113   : > { %v922_v36 = vpop.f32.mrf.mxu3 }
 0x114   : > { %v923_v5 = vadd.f32 %v922_v36, %v2063_v4 }
 0x115   : > { %v951_v39 = vpop.f32.mrf.mxu2  ;;  %v855_v40 = vpop.f32.mrf.mxu0 }
 0x116   : > { %v952_v38 = vadd.f32 %v951_v39, %v903_v35  ;;  %v904_v41 = vpop.f32.mrf.mxu1 }
 0x117   : > { %v905_v43 = vadd.f32 %v904_v41, %v855_v40 }
 0x118   : > { %v985_v42 = vadd.f32 %v952_v38, %v470_v37 }
 0x11a   : > { %1001 = vst [vmem:[#allocation2 + $0x50] sm:$0xff] %v985_v42 }
 0x11b   : > { %v924_v44 = vpop.f32.mrf.mxu3 }
 0x11c   : > { %v925_v17 = vadd.f32 %v924_v44, %v2065_v12 }
 0x11d   : > { %v953_v46 = vpop.f32.mrf.mxu2  ;;  %v858_v48 = vpop.f32.mrf.mxu0 }
 0x11e   : > { %v954_v47 = vadd.f32 %v953_v46, %v905_v43  ;;  %v907_v49 = vpop.f32.mrf.mxu1  ;;  %v481_v43 = vld [vmem:[#allocation2 + $0x28] sm:$0xff] }
 0x11f   : > { %v908_v51 = vadd.f32 %v907_v49, %v858_v48 }
 0x120   : > { %v986_v50 = vadd.f32 %v954_v47, %v471_v45  ;;  %v477_v45 = vld [vmem:[#allocation2 + $0x38] sm:$0xff] }
 0x122   : > { %1002 = vst [vmem:[#allocation2 + $0x68] sm:$0xff] %v986_v50 }
 0x123   : > { %v927_v52 = vpop.f32.mrf.mxu3 }
 0x124   : > { %v928_v31 = vadd.f32 %v927_v52, %v2067_v20 }
 0x125   : > { %v956_v54 = vpop.f32.mrf.mxu2  ;;  %v860_v57 = vpop.f32.mrf.mxu0 }
 0x126   : > { %v957_v55 = vadd.f32 %v956_v54, %v908_v51  ;;  %v909_v56 = vpop.f32.mrf.mxu1 }
 0x127   : > { %v910_v59 = vadd.f32 %v909_v56, %v860_v57 }
 0x128   : > { %v987_v58 = vadd.f32 %v957_v55, %v472_v53 }
 0x12a   : > { %1003 = vst [vmem:[#allocation2 + $0x8] sm:$0xff] %v987_v58 }
 0x12b   : > { %v929_v60 = vpop.f32.mrf.mxu3 }
 0x12c   : > { %v930_v41 = vadd.f32 %v929_v60, %v2069_v28 }
 0x12d   : > { %v958_v62 = vpop.f32.mrf.mxu2  ;;  %v863_v0 = vpop.f32.mrf.mxu0 }
 0x12e   : > { %v959_v63 = vadd.f32 %v958_v62, %v910_v59  ;;  %v912_v1 = vpop.f32.mrf.mxu1 }
 0x12f   : > { %v913_v3 = vadd.f32 %v912_v1, %v863_v0 }
 0x130   : > { %v988_v2 = vadd.f32 %v959_v63, %v473_v61 }
 0x132   : > { %1004 = vst [vmem:[#allocation2 + $0x48] sm:$0xff] %v988_v2 }
 0x133   : > { %v971_v7 = vpop.f32.mrf.mxu3 }
 0x134   : > { %v972_v10 = vadd.f32 %v971_v7, %v923_v5 }
 0x135   : > { %v961_v9 = vpop.f32.mrf.mxu2  ;;  %v865_v13 = vpop.f32.mrf.mxu0 }
 0x136   : > { %v962_v11 = vadd.f32 %v961_v9, %v913_v3  ;;  %v993_v14 = vadd.f32 %v972_v10, %v478_v6  ;;  %v914_v15 = vpop.f32.mrf.mxu1 }
 0x137   : > { %v915_v18 = vadd.f32 %v914_v15, %v865_v13 }
 0x138   : > { %v989_v16 = vadd.f32 %v962_v11, %v474_v8  ;;  %1009 = vst [vmem:[#allocation2 + $0x60] sm:$0xff] %v993_v14 }
 0x13a   : > { %1005 = vst [vmem:[#allocation2 + $0x40] sm:$0xff] %v989_v16 }
 0x13b   : > { %v973_v21 = vpop.f32.mrf.mxu3 }
 0x13c   : > { %v974_v4 = vadd.f32 %v973_v21, %v925_v17 }
 0x13d   : > { %v963_v23 = vpop.f32.mrf.mxu2  ;;  %v868_v26 = vpop.f32.mrf.mxu0 }
 0x13e   : > { %v964_v24 = vadd.f32 %v963_v23, %v915_v18  ;;  %v994_v25 = vadd.f32 %v974_v4, %v479_v19  ;;  %v917_v27 = vpop.f32.mrf.mxu1 }
 0x13f   : > { %v918_v30 = vadd.f32 %v917_v27, %v868_v26 }
 0x140   : > { %v990_v29 = vadd.f32 %v964_v24, %v475_v22  ;;  %1010 = vst [vmem:[#allocation2 + $0x70] sm:$0xff] %v994_v25 }
 0x142   : > { %1006 = vst [vmem:[#allocation2 + $0x20] sm:$0xff] %v990_v29 }
 0x143   : > { %v976_v33 = vpop.f32.mrf.mxu3 }
 0x144   : > { %v977_v35 = vadd.f32 %v976_v33, %v928_v31 }
 0x145   : > { %v966_v12 = vpop.f32.mrf.mxu2  ;;  %v870_v38 = vpop.f32.mrf.mxu0 }
 0x146   : > { %v967_v36 = vadd.f32 %v966_v12, %v918_v30  ;;  %v995_v37 = vadd.f32 %v977_v35, %v480_v32  ;;  %v919_v40 = vpop.f32.mrf.mxu1 }
 0x147   : > { %v920_v42 = vadd.f32 %v919_v40, %v870_v38 }
 0x148   : > { %v991_v39 = vadd.f32 %v967_v36, %v476_v34  ;;  %1011 = vst [vmem:[#allocation2 + $0x78] sm:$0xff] %v995_v37 }
 0x14a   : > { %1007 = vst [vmem:[#allocation2 + $0x10] sm:$0xff] %v991_v39 }
 0x14b   : > { %v978_v44 = vpop.f32.mrf.mxu3 }
 0x14c   : > { %v979_v20 = vadd.f32 %v978_v44, %v930_v41 }
 0x14d   : > { %v968_v46 = vpop.f32.mrf.mxu2 }
 0x14e   : > { %v969_v47 = vadd.f32 %v968_v46, %v920_v42  ;;  %v996_v48 = vadd.f32 %v979_v20, %v481_v43  ;;  %1016 = sbr.rel (%p1548_p11) target bundleno = 369 (0x171), region = 74 }
 0x150   : > { %v992_v49 = vadd.f32 %v969_v47, %v477_v45  ;;  %1012 = vst [vmem:[#allocation2 + $0x28] sm:$0xff] %v996_v48 }
 0x152   : > { %1008 = vst [vmem:[#allocation2 + $0x38] sm:$0xff] %v992_v49 }
 0x153   : > { %v1017_v50 = vld [vmem:[#allocation2 + $0x30] sm:$0xff]  ;;  %v1018_v51 = vld [vmem:[#allocation2] sm:$0xff]  ;;  %v1019_v54 = vld [vmem:[#allocation2 + $0x58] sm:$0xff] }
 0x154   : > { %v2079_v28 = vld [vmem:[%s2183_s2] ss:$0 sm:$0xff]  ;;  %v1020_v55 = vld [vmem:[#allocation2 + $0x18] sm:$0xff]  ;;  %v1674_v60 = vld [vmem:[%s2185_s4 + $0x8] sm:$0xff]  }
 0x155   : > { %v2084_v52 = vld [vmem:[%s2184_s3] ss:$0 sm:$0xff]  ;;  %v1037_v57 = vmul.f32 %v2079_v28, %v1017_v50  ;;  %v1038_v56 = vmul.f32 %v2079_v28, %v1018_v51  ;;  %v1021_v61 = vld [vmem:[#allocation2 + $0x50] sm:$0xff]  ;;  %v1022_v62 = vld [vmem:[#allocation2 + $0x68] sm:$0xff]  ;;  %v1039_v63 = vmul.f32 %v2079_v28, %v1019_v54  ;;  %v1040_v0 = vmul.f32 %v2079_v28, %v1020_v55 }
 0x156   : > { %v1603_v53 = vld [vmem:[%s2185_s4] sm:$0xff]   ;;  %v1608_v1 = vunpack.c.l.bf16 %v1674_v60  ;;  %v1609_v2 = vunpack.c.h.bf16 %v1674_v60  ;;  %v1675_v3 = vld [vmem:[%s2185_s4 + $0x10] sm:$0xff]   ;;  %v1041_v7 = vmul.f32 %v2079_v28, %v1021_v61  ;;  %v1042_v8 = vmul.f32 %v2079_v28, %v1022_v62  ;;  %v1023_v9 = vld [vmem:[#allocation2 + $0x8] sm:$0xff] }
 0x157   : > { %v1604_v58 = vunpack.c.l.bf16 %v1603_v53  ;;  %v1605_v59 = vunpack.c.h.bf16 %v1603_v53  ;;  %v1057_v5 = vadd.f32 %v2084_v52, %v1037_v57  ;;  %v1058_v6 = vadd.f32 %v2084_v52, %v1038_v56  ;;  %v1024_v10 = vld [vmem:[#allocation2 + $0x48] sm:$0xff]  ;;  %v1676_v24 = vld [vmem:[%s2185_s4 + $0x18] sm:$0xff]   ;;  %v1025_v30 = vld [vmem:[#allocation2 + $0x40] sm:$0xff] }
 0x158   : > { %v1059_v11 = vadd.f32 %v2084_v52, %v1039_v63  ;;  %v1060_v13 = vadd.f32 %v2084_v52, %v1040_v0  ;;  %v1612_v14 = vunpack.c.l.bf16 %v1675_v3  ;;  %v1613_v15 = vunpack.c.h.bf16 %v1675_v3  ;;  %v1026_v31 = vld [vmem:[#allocation2 + $0x20] sm:$0xff]  ;;  %v1027_v40 = vld [vmem:[#allocation2 + $0x10] sm:$0xff]  ;;  %v1678_v46 = vld [vmem:[%s2185_s4 + $0x28] sm:$0xff]  }
 0x159   : > { %v1105_v16 = vadd.f32 %v1604_v58, %v1057_v5  ;;  %v1106_v17 = vadd.f32 %v1605_v59, %v1058_v6  ;;  %v1061_v18 = vadd.f32 %v2084_v52, %v1041_v7  ;;  %v1062_v19 = vadd.f32 %v2084_v52, %v1042_v8  ;;  %v1677_v35 = vld [vmem:[%s2185_s4 + $0x20] sm:$0xff]   ;;  %v1028_v45 = vld [vmem:[#allocation2 + $0x38] sm:$0xff]  ;;  %v1030_v57 = vld [vmem:[#allocation2 + $0x70] sm:$0xff] }
 0x15a   : > { %v1107_v21 = vadd.f32 %v1608_v1, %v1059_v11  ;;  %v1108_v22 = vadd.f32 %v1609_v2, %v1060_v13  ;;  %v1043_v23 = vmul.f32 %v2079_v28, %v1023_v9  ;;  %v1044_v4 = vmul.f32 %v2079_v28, %v1024_v10  ;;  %v1029_v55 = vld [vmem:[#allocation2 + $0x60] sm:$0xff]  ;;  %v1679_v56 = vld [vmem:[%s2185_s4 + $0x30] sm:$0xff]   ;;  %v1031_v7 = vld [vmem:[#allocation2 + $0x78] sm:$0xff] }
 0x15b   : > { %v1121_v25 = vmax.f32 %v1105_v16, 0.0  ;;  %v1122_v26 = vmax.f32 %v1106_v17, 0.0  ;;  %v1109_v27 = vadd.f32 %v1612_v14, %v1061_v18  ;;  %v1110_v29 = vadd.f32 %v1613_v15, %v1062_v19  ;;  %v1032_v8 = vld [vmem:[#allocation2 + $0x28] sm:$0xff]  ;;  %v1680_v14 = vld [vmem:[%s2185_s4 + $0x38] sm:$0xff]  }
 0x15c   : > { %v1123_v32 = vmax.f32 %v1107_v21, 0.0  ;;  %v1124_v33 = vmax.f32 %v1108_v22, 0.0  ;;  %v1063_v34 = vadd.f32 %v2084_v52, %v1043_v23  ;;  %v1064_v12 = vadd.f32 %v2084_v52, %v1044_v4 }
 0x15d   : > { %v1637_v36 = vpack.c.bf16 %v1122_v26, %v1121_v25  ;;  %v1125_v37 = vmax.f32 %v1109_v27, 0.0  ;;  %v1126_v39 = vmax.f32 %v1110_v29, 0.0  ;;  %v1616_v38 = vunpack.c.l.bf16 %v1676_v24 }
 0x15e   : > { %v1642_v41 = vpack.c.bf16 %v1124_v33, %v1123_v32  ;;  %v1617_v42 = vunpack.c.h.bf16 %v1676_v24  ;;  %v1045_v43 = vmul.f32 %v2079_v28, %v1025_v30  ;;  %v1046_v44 = vmul.f32 %v2079_v28, %v1026_v31 }
 0x15f   : > { %1638 = vst [vmem:[%s2186_s5] sm:$0xff] %v1637_v36   ;;  %v1647_v20 = vpack.c.bf16 %v1126_v39, %v1125_v37  ;;  %v1111_v47 = vadd.f32 %v1616_v38, %v1063_v34  ;;  %v1620_v48 = vunpack.c.l.bf16 %v1677_v35  ;;  %v1621_v49 = vunpack.c.h.bf16 %v1677_v35 }
 0x160   : > { %1681 = vst [vmem:[%s2186_s5 + $0x8] sm:$0xff] %v1642_v41   ;;  %v1112_v50 = vadd.f32 %v1617_v42, %v1064_v12  ;;  %v1065_v51 = vadd.f32 %v2084_v52, %v1045_v43  ;;  %v1066_v53 = vadd.f32 %v2084_v52, %v1046_v44  ;;  %v1047_v54 = vmul.f32 %v2079_v28, %v1027_v40 }
 0x161   : > { %1682 = vst [vmem:[%s2186_s5 + $0x10] sm:$0xff] %v1647_v20   ;;  %v1127_v58 = vmax.f32 %v1111_v47, 0.0  ;;  %v1048_v59 = vmul.f32 %v2079_v28, %v1028_v45  ;;  %v1624_v60 = vunpack.c.l.bf16 %v1678_v46  ;;  %v1625_v61 = vunpack.c.h.bf16 %v1678_v46 }
 0x162   : > { %v1128_v62 = vmax.f32 %v1112_v50, 0.0  ;;  %v1113_v63 = vadd.f32 %v1620_v48, %v1065_v51  ;;  %v1114_v0 = vadd.f32 %v1621_v49, %v1066_v53  ;;  %v1067_v1 = vadd.f32 %v2084_v52, %v1047_v54 }
 0x163   : > { %v1068_v2 = vadd.f32 %v2084_v52, %v1048_v59  ;;  %v1049_v3 = vmul.f32 %v2079_v28, %v1029_v55  ;;  %v1050_v5 = vmul.f32 %v2079_v28, %v1030_v57  ;;  %v1628_v6 = vunpack.c.l.bf16 %v1679_v56 }
 0x164   : > { %v1652_v9 = vpack.c.bf16 %v1128_v62, %v1127_v58  ;;  %v1129_v10 = vmax.f32 %v1113_v63, 0.0  ;;  %v1130_v11 = vmax.f32 %v1114_v0, 0.0  ;;  %v1115_v13 = vadd.f32 %v1624_v60, %v1067_v1 }
 0x165   : > { %v1116_v15 = vadd.f32 %v1625_v61, %v1068_v2  ;;  %v1069_v16 = vadd.f32 %v2084_v52, %v1049_v3  ;;  %v1070_v17 = vadd.f32 %v2084_v52, %v1050_v5  ;;  %v1629_v18 = vunpack.c.h.bf16 %v1679_v56 }
 0x166   : > { %1683 = vst [vmem:[%s2186_s5 + $0x18] sm:$0xff] %v1652_v9   ;;  %v1657_v19 = vpack.c.bf16 %v1130_v11, %v1129_v10  ;;  %v1131_v21 = vmax.f32 %v1115_v13, 0.0  ;;  %v1051_v22 = vmul.f32 %v2079_v28, %v1031_v7  ;;  %v1052_v23 = vmul.f32 %v2079_v28, %v1032_v8 }
 0x167   : > { %v1132_v4 = vmax.f32 %v1116_v15, 0.0  ;;  %v1117_v24 = vadd.f32 %v1628_v6, %v1069_v16  ;;  %v1118_v25 = vadd.f32 %v1629_v18, %v1070_v17  ;;  %v1632_v26 = vunpack.c.l.bf16 %v1680_v14 }
 0x168   : > { %1684 = vst [vmem:[%s2186_s5 + $0x20] sm:$0xff] %v1657_v19   ;;  %v1071_v27 = vadd.f32 %v2084_v52, %v1051_v22  ;;  %v1072_v29 = vadd.f32 %v2084_v52, %v1052_v23  ;;  %v1633_v30 = vunpack.c.h.bf16 %v1680_v14 }
 0x169   : > { %v1662_v31 = vpack.c.bf16 %v1132_v4, %v1131_v21  ;;  %v1133_v32 = vmax.f32 %v1117_v24, 0.0  ;;  %v1134_v33 = vmax.f32 %v1118_v25, 0.0 }
 0x16a   : > { %v1119_v34 = vadd.f32 %v1632_v26, %v1071_v27  ;;  %v1120_v12 = vadd.f32 %v1633_v30, %v1072_v29 }
 0x16b   : > { %1685 = vst [vmem:[%s2186_s5 + $0x28] sm:$0xff] %v1662_v31   ;;  %v1667_v28 = vpack.c.bf16 %v1134_v33, %v1133_v32 }
 0x16c   : > { %v1135_v35 = vmax.f32 %v1119_v34, 0.0  ;;  %v1136_v36 = vmax.f32 %v1120_v12, 0.0 }
 0x16d   : > { %1686 = vst [vmem:[%s2186_s5 + $0x30] sm:$0xff] %v1667_v28  }
 0x16e   : > { %v1672_v37 = vpack.c.bf16 %v1136_v36, %v1135_v35 }
 0x170   : > { %1687 = vst [vmem:[%s2186_s5 + $0x38] sm:$0xff] %v1672_v37  }
 0x171 PF: > { %s15_s22 = sadd.s32 1, %s1795_s22   ;;  %s2187_s18 = smov %s1783_s19 }
 0x172   : > { %p12_p12 = scmp.ge.s32.totalorder %s15_s22, 5   ;;  %s2188_s19 = smov %s1863_s26 }
 0x173   : > { %s2189_s20 = smov %s1791_s21  ;;  %s2190_s21 = smov %s2192_s23 }
 0x174   :  { %14 = sbr.rel (!%p12_p12) target bundleno = 3 (0x3), region = 127 }

// kernel: resnet_forward.19
= control target key start
LH: loop header
LB: loop body
LE: loop exit
PB: predicated region body
PF: predicated region fallthrough
CT: control target
= control target key end

     0   :  { %s1113_s15 = smov 0   ;;  %s1115_s16 = smov 0   ;;  %s1232_s0 = inlined_call_operand.vmem [shape: bf16[32,1152], index: 0, kind: input, shape index: {}]   ;;  %s1233_s1 = inlined_call_operand.vmem [shape: bf16[1152,128], index: 1, kind: input, shape index: {}]   ;;  %s1234_s2 = inlined_call_operand.vmem [shape: f32[1,128], index: 2, kind: input, shape index: {}]   ;;  %s1235_s3 = inlined_call_operand.vmem [shape: f32[1,128], index: 3, kind: input, shape index: {}]   ;;  %s1236_s4 = inlined_call_operand.vmem [shape: bf16[32,128], index: 4, kind: output, shape index: {}]  }
   0x1   :  { %s1117_s17 = smov 0   ;;  %s1119_s18 = smov 0  }
   0x2   :  { %s1121_s19 = smov 0  }
   0x3 LB: > { %s26_s20 = sadd.s32 1, %s1081_s18  ;;  %p49_p1 = scmp.ne.s32.totalorder %s1073_s16, %s1069_s15  ;;  %s1085_s19 = sphi %s1121_s19, %s14_s19   ;;  %s1081_s18 = sphi %s1119_s18, %s1240_s18   ;;  %s1077_s17 = sphi %s1117_s17, %s1239_s17   ;;  %s1073_s16 = sphi %s1115_s16, %s1238_s16   ;;  %s1069_s15 = sphi %s1113_s15, %s1237_s15  }
   0x4   : > { %p27_p0 = scmp.ge.s32.totalorder %s26_s20, 3  ;;  %p50_p2 = scmp.eq.s32.totalorder %s1085_s19, 0 }
   0x5   : > { %s42_s22 = sadd.s32 1, %s1073_s16  ;;  %p814_p5 = scmp.ge.s32.totalorder %s1085_s19, 3 }
   0x6   : > { %s1242_s20 = smov (%p27_p0, %s26_s20), 0  ;;  %p51_p3 = por %p50_p2, %p49_p1 }
   0x7   : > { %s38_s21 = ssub.s32 %s1081_s18, %s1242_s20  ;;  %195 = sbr.rel (%p814_p5) target bundleno = 25 (0x19), region = 24 }
   0x8   : > { %p40_p4 = scmp.eq.s32.totalorder %s38_s21, 0 }
   0xa   : > { %s1148_s23 = scalar_select %p40_p4, %s1073_s16, %s42_s22  }
   0xc   : > { %198 = sbr.rel (!%p51_p3) target bundleno = 25 (0x19), region = 28  ;;  %s200_s24 = sand.u32 (%p51_p3), 1, %s1073_s16  }
   0xd   : > { %s952_s25 = smul.u32 (%p51_p3), 12, %s1081_s18 }
   0xe   : > { %s1002_s26 = smul.u32 (%p51_p3), 48, %s200_s24 }
   0xf   : > { %s208_s29 = scalar_lea.vmem (%p51_p3), %s1232_s0, %s952_s25 }
  0x10   : > { %v223_v0 = vld [vmem:[%s208_s29] sm:$0xff] (%p51_p3)  ;;  %v227_v2 = vld [vmem:[%s208_s29 + $0x48] sm:$0xff] (%p51_p3)  ;;  %s202_s30 = scalar_lea.vmem (%p51_p3), [#allocation3], %s1002_s26  ;;  %v820_v6 = vld [vmem:[%s208_s29 + $0x50] sm:$0xf] (%p51_p3) }
  0x11   : > { %v225_v1 = vld [vmem:[%s208_s29 + $0x24] sm:$0xff]  ;;  %224 = vst [vmem:[%s202_s30] sm:$0xff] %v223_v0  ;;  %v229_v3 = vld [vmem:[%s208_s29 + $0x6c] sm:$0xff]  ;;  %v822_v7 = vld [vmem:[%s208_s29 + $0x74] sm:$0xf] }
  0x12   : > { %226 = vst [vmem:[%s202_s30 + $0xc] sm:$0xff] %v225_v1  ;;  %v816_v4 = vld [vmem:[%s208_s29 + $0x8] sm:$0xf]  ;;  %v818_v5 = vld [vmem:[%s208_s29 + $0x2c] sm:$0xf] }
  0x13   : > { %228 = vst [vmem:[%s202_s30 + $0x18] sm:$0xff] %v227_v2 }
  0x14   : > { %230 = vst [vmem:[%s202_s30 + $0x24] sm:$0xff] %v229_v3 }
  0x15   : > { %817 = vst [vmem:[%s202_s30 + $0x8] sm:$0xf] %v816_v4 }
  0x16   : > { %819 = vst [vmem:[%s202_s30 + $0x14] sm:$0xf] %v818_v5 }
  0x17   : > { %821 = vst [vmem:[%s202_s30 + $0x20] sm:$0xf] %v820_v6 }
  0x18   : > { %823 = vst [vmem:[%s202_s30 + $0x2c] sm:$0xf] %v822_v7 }
  0x19 PF: > { %p824_p6 = scmp.ge.s32.totalorder %s1085_s19, 1  ;;  %p263_p7 = scmp.lt.s32.totalorder %s1085_s19, 4 }
  0x1b   : > { %p264_p8 = pnand %p824_p6, %p263_p7 }
  0x1c   : > { %s270_s5 = sand.u32 (!%p264_p8), 1, %s1069_s15   ;;  %s314_s6 = smul.u32 (!%p264_p8), 48, %s1077_s17 }
  0x1d   : > { %267 = sbr.rel (%p264_p8) target bundleno = 255 (0xff), region = 58  ;;  %p826_p10 = scmp.ne.s32.totalorder (!%p264_p8), %s1077_s17, 0 }
  0x1e   : > { %s1003_s7 = smul.u32 (!%p264_p8), 48, %s270_s5  ;;  %p315_p9 = scmp.lt.s32.totalorder (!%p264_p8), %s314_s6, 143 }
  0x20   : > { %s1165_s12 = scalar_lea.vmem (!%p264_p8), [#allocation3], %s1003_s7 }
  0x22   : > { %s1244_s6 = smov (!%p315_p9, %s314_s6), 143  ;;  %341 = sbr.rel (%p826_p10) target bundleno = 44 (0x2c), region = 66 }
  0x23   : > { %s825_s8 = sshll.u32 %s1244_s6, 2 }
  0x24   : > { %s1163_s11 = scalar_lea.vmem %s1233_s1, %s825_s8 }
  0x27   : > { %v1087_v8 = vmov 0.0  }
  0x28   : > { %342 = vst [vmem:[#allocation2 + $0x10] sm:$0xff] %v1087_v8 }
  0x29   : > { %343 = vst [vmem:[#allocation2] sm:$0xff] %v1087_v8 }
  0x2a   : > { %344 = vst [vmem:[#allocation2 + $0x18] sm:$0xff] %v1087_v8 }
  0x2b   : > { %345 = vst [vmem:[#allocation2 + $0x8] sm:$0xff] %v1087_v8 }
  0x2c PF: > { %v966_v9 = vld [vmem:[%s1163_s11 + $0x38] sm:$0xff]  ;;  %v965_v12 = vld [vmem:[%s1163_s11 + $0x30] sm:$0xff]  ;;  %v964_v15 = vld [vmem:[%s1163_s11 + $0x28] sm:$0xff]  ;;  %p947_p11 = scmp.ne.s32.totalorder %s1077_s17, 2 }
  0x2d   : > { %v974_v10 = vld [vmem:[%s1163_s11 + $0x78] sm:$0xff]  ;;  %582 = vmatpush.bf16.msra.mxu0 %v966_v9  ;;  %v973_v13 = vld [vmem:[%s1163_s11 + $0x70] sm:$0xff]  ;;  %994 = vmatpush.bf16.msra.mxu3 %v966_v9  ;;  %v972_v16 = vld [vmem:[%s1163_s11 + $0x68] sm:$0xff] }
  0x2e   : > { %v982_v11 = vld [vmem:[%s1163_s11 + $0xb8] sm:$0xff]  ;;  %601 = vmatpush.bf16.msra.mxu1 %v974_v10  ;;  %v981_v14 = vld [vmem:[%s1163_s11 + $0xb0] sm:$0xff]  ;;  %v980_v17 = vld [vmem:[%s1163_s11 + $0xa8] sm:$0xff] }
  0x2f   : > { %620 = vmatpush.bf16.msra.mxu2 %v982_v11  ;;  %v963_v18 = vld [vmem:[%s1163_s11 + $0x20] sm:$0xff]  ;;  %v962_v21 = vld [vmem:[%s1163_s11 + $0x18] sm:$0xff]  ;;  %v961_v24 = vld [vmem:[%s1163_s11 + $0x10] sm:$0xff] }
  0x30   : > { %v971_v19 = vld [vmem:[%s1163_s11 + $0x60] sm:$0xff]  ;;  %v970_v22 = vld [vmem:[%s1163_s11 + $0x58] sm:$0xff]  ;;  %v969_v25 = vld [vmem:[%s1163_s11 + $0x50] sm:$0xff] }
  0x31   : > { %583 = vmatpush.bf16.msra.mxu0 %v965_v12  ;;  %995 = vmatpush.bf16.msra.mxu3 %v965_v12  ;;  %v979_v20 = vld [vmem:[%s1163_s11 + $0xa0] sm:$0xff]  ;;  %v978_v23 = vld [vmem:[%s1163_s11 + $0x98] sm:$0xff]  ;;  %v977_v26 = vld [vmem:[%s1163_s11 + $0x90] sm:$0xff] }
  0x32   : > { %602 = vmatpush.bf16.msra.mxu1 %v973_v13  ;;  %v960_v27 = vld [vmem:[%s1163_s11 + $0x8] sm:$0xff]  ;;  %v959_v30 = vld [vmem:[%s1163_s11] sm:$0xff]  ;;  %v346_v54 = vld [vmem:[#allocation2 + $0x10] sm:$0xff] }
  0x33   : > { %621 = vmatpush.bf16.msra.mxu2 %v981_v14  ;;  %v968_v28 = vld [vmem:[%s1163_s11 + $0x48] sm:$0xff]  ;;  %v967_v31 = vld [vmem:[%s1163_s11 + $0x40] sm:$0xff]  ;;  %v348_v4 = vld [vmem:[#allocation2 + $0x18] sm:$0xff] }
  0x34   : > { %v976_v29 = vld [vmem:[%s1163_s11 + $0x88] sm:$0xff]  ;;  %v975_v32 = vld [vmem:[%s1163_s11 + $0x80] sm:$0xff] }
  0x35   : > { %584 = vmatpush.bf16.msra.mxu0 %v964_v15  ;;  %996 = vmatpush.bf16.msra.mxu3 %v964_v15  ;;  %v829_v33 = vld [vmem:[%s1165_s12] sm:$0xf]  ;;  %v954_v34 = vld [vmem:[%s1165_s12 + $0x8] sm:$0xf0]  ;;  %v953_v35 = vld [vmem:[%s1165_s12 + $0x4] sm:$0xf] }
  0x36   : > { %603 = vmatpush.bf16.msra.mxu1 %v972_v16  ;;  %v831_v36 = vld [vmem:[%s1165_s12 + $0xc] sm:$0xf0]  ;;  %v837_v37 = vld [vmem:[%s1165_s12 + $0x8] sm:$0xf]  ;;  %v955_v38 = vld [vmem:[%s1165_s12 + $0x10] sm:$0xf0]  ;;  %v830_v41 = vor.u32 %v954_v34, %v829_v33 }
  0x37   : > { %622 = vmatpush.bf16.msra.mxu2 %v980_v17  ;;  %v841_v39 = vld [vmem:[%s1165_s12 + $0x18] sm:$0xf]  ;;  %v957_v40 = vld [vmem:[%s1165_s12 + $0x20] sm:$0xf0]  ;;  %v834_v42 = vor.u32 %v953_v35, %v831_v36  ;;  %v838_v43 = vor.u32 %v955_v38, %v837_v37  ;;  %v956_v45 = vld [vmem:[%s1165_s12 + $0x1c] sm:$0xf] }
  0x38   : > { %v842_v44 = vor.u32 %v957_v40, %v841_v39  ;;  %v843_v46 = vld [vmem:[%s1165_s12 + $0x24] sm:$0xf0]  ;;  %v849_v47 = vld [vmem:[%s1165_s12 + $0x20] sm:$0xf]  ;;  %v958_v48 = vld [vmem:[%s1165_s12 + $0x28] sm:$0xf0] }
  0x39   : > { %585 = vmatpush.bf16.msra.mxu0 %v963_v18  ;;  %997 = vmatpush.bf16.msra.mxu3 %v963_v18  ;;  %v846_v49 = vor.u32 %v956_v45, %v843_v46  ;;  %v850_v50 = vor.u32 %v958_v48, %v849_v47  ;;  %v347_v61 = vld [vmem:[#allocation2] sm:$0xff]  ;;  %v349_v11 = vld [vmem:[#allocation2 + $0x8] sm:$0xff] }
  0x3a   : > { %604 = vmatpush.bf16.msra.mxu1 %v971_v19 }
  0x3b   : > { %623 = vmatpush.bf16.msra.mxu2 %v979_v20 }
  0x3d   : > { %586 = vmatpush.bf16.msra.mxu0 %v962_v21  ;;  %998 = vmatpush.bf16.msra.mxu3 %v962_v21 }
  0x3e   : > { %605 = vmatpush.bf16.msra.mxu1 %v970_v22 }
  0x3f   : > { %624 = vmatpush.bf16.msra.mxu2 %v978_v23 }
  0x41   : > { %587 = vmatpush.bf16.msra.mxu0 %v961_v24  ;;  %999 = vmatpush.bf16.msra.mxu3 %v961_v24 }
  0x42   : > { %606 = vmatpush.bf16.msra.mxu1 %v969_v25 }
  0x43   : > { %625 = vmatpush.bf16.msra.mxu2 %v977_v26 }
  0x45   : > { %588 = vmatpush.bf16.msra.mxu0 %v960_v27  ;;  %1000 = vmatpush.bf16.msra.mxu3 %v960_v27 }
  0x46   : > { %607 = vmatpush.bf16.msra.mxu1 %v968_v28 }
  0x47   : > { %626 = vmatpush.bf16.msra.mxu2 %v976_v29 }
  0x49   : > { %589 = vmatpush.bf16.msra.mxu0 %v959_v30  ;;  %1001 = vmatpush.bf16.msra.mxu3 %v959_v30 }
  0x4a   : > { %608 = vmatpush.bf16.msra.mxu1 %v967_v31 }
  0x4b   : > { %627 = vmatpush.bf16.msra.mxu2 %v975_v32 }
  0x4c   : > { %590 = vmatmul.bf16.vlgmr.msra.gmra.mxu0 %v830_v41  ;;  %595 = vmatmul.bf16.vlgmr.msra.gmra.mxu3 %v842_v44 }
  0x4d   : > { %609 = vmatmul.bf16.vlgmr.msra.gmra.mxu1 %v834_v42 }
  0x4e   : > { %628 = vmatmul.bf16.vlgmr.msra.gmra.mxu2 %v838_v43 }
  0x5d   : > { %614 = vmatmul.bf16.gmra.mxu1 %v846_v49 }
  0x5e   : > { %633 = vmatmul.bf16.gmra.mxu2 %v850_v50 }
  0xc9   : > { %v591_v52 = vpop.f32.mrf.mxu0 }
  0xca   : > { %v610_v51 = vpop.f32.mrf.mxu1 }
  0xcb   : > { %v611_v53 = vadd.f32 %v610_v51, %v591_v52 }
  0xcf   : > { %v596_v2 = vpop.f32.mrf.mxu3 }
  0xd1   : > { %v629_v55 = vpop.f32.mrf.mxu2  ;;  %v593_v59 = vpop.f32.mrf.mxu0 }
  0xd2   : > { %v630_v56 = vadd.f32 %v629_v55, %v611_v53  ;;  %v612_v57 = vpop.f32.mrf.mxu1 }
  0xd3   : > { %v613_v60 = vadd.f32 %v612_v57, %v593_v59 }
  0xd4   : > { %v639_v58 = vadd.f32 %v630_v56, %v346_v54 }
  0xd6   : > { %643 = vst [vmem:[#allocation2 + $0x10] sm:$0xff] %v639_v58 }
  0xd7   : > { %v598_v9 = vpop.f32.mrf.mxu3 }
  0xd9   : > { %v631_v62 = vpop.f32.mrf.mxu2 }
  0xda   : > { %v632_v63 = vadd.f32 %v631_v62, %v613_v60  ;;  %v615_v0 = vpop.f32.mrf.mxu1 }
  0xdb   : > { %v616_v3 = vadd.f32 %v615_v0, %v596_v2 }
  0xdc   : > { %v640_v1 = vadd.f32 %v632_v63, %v347_v61 }
  0xde   : > { %644 = vst [vmem:[#allocation2] sm:$0xff] %v640_v1 }
  0xe1   : > { %v634_v5 = vpop.f32.mrf.mxu2 }
  0xe2   : > { %v635_v6 = vadd.f32 %v634_v5, %v616_v3  ;;  %v617_v8 = vpop.f32.mrf.mxu1 }
  0xe3   : > { %v618_v10 = vadd.f32 %v617_v8, %v598_v9 }
  0xe4   : > { %v641_v7 = vadd.f32 %v635_v6, %v348_v4 }
  0xe6   : > { %645 = vst [vmem:[#allocation2 + $0x18] sm:$0xff] %v641_v7 }
  0xe9   : > { %v636_v12 = vpop.f32.mrf.mxu2 }
  0xea   : > { %v637_v13 = vadd.f32 %v636_v12, %v618_v10  ;;  %650 = sbr.rel (%p947_p11) target bundleno = 255 (0xff), region = 70 }
  0xec   : > { %v642_v14 = vadd.f32 %v637_v13, %v349_v11 }
  0xee   : > { %646 = vst [vmem:[#allocation2 + $0x8] sm:$0xff] %v642_v14 }
  0xef   : > { %v651_v15 = vld [vmem:[#allocation2 + $0x10] sm:$0xff]  ;;  %v652_v16 = vld [vmem:[#allocation2] sm:$0xff]  ;;  %v653_v19 = vld [vmem:[#allocation2 + $0x18] sm:$0xff] }
  0xf0   : > { %v1045_v17 = vld [vmem:[%s1234_s2] ss:$0 sm:$0xff] }
  0xf1   : > { %v1046_v18 = vld [vmem:[%s1235_s3] ss:$0 sm:$0xff]  ;;  %v659_v21 = vmul.f32 %v1045_v17, %v651_v15  ;;  %v660_v22 = vmul.f32 %v1045_v17, %v652_v16  ;;  %v661_v23 = vmul.f32 %v1045_v17, %v653_v19 }
  0xf3   : > { %v667_v25 = vadd.f32 %v1046_v18, %v659_v21  ;;  %v668_v26 = vadd.f32 %v1046_v18, %v660_v22  ;;  %v669_v27 = vadd.f32 %v1046_v18, %v661_v23 }
  0xf5   : > { %v654_v20 = vld [vmem:[#allocation2 + $0x8] sm:$0xff]  ;;  %v671_v29 = vmax.f32 %v667_v25, 0.0  ;;  %v672_v30 = vmax.f32 %v668_v26, 0.0  ;;  %v673_v31 = vmax.f32 %v669_v27, 0.0 }
  0xf6   : > { %v662_v24 = vmul.f32 %v1045_v17, %v654_v20 }
  0xf7   : > { %v986_v33 = vpack.c.bf16 %v672_v30, %v671_v29 }
  0xf8   : > { %v670_v28 = vadd.f32 %v1046_v18, %v662_v24 }
  0xf9   : > { %987 = vst [vmem:[%s1236_s4] sm:$0xff] %v986_v33  }
  0xfa   : > { %v674_v32 = vmax.f32 %v670_v28, 0.0 }
  0xfc   : > { %v991_v34 = vpack.c.bf16 %v674_v32, %v673_v31 }
  0xfe   : > { %993 = vst [vmem:[%s1236_s4 + $0x8] sm:$0xff] %v991_v34  }
  0xff PF: > { %s14_s19 = sadd.s32 1, %s1085_s19   ;;  %s1237_s15 = smov %s1073_s16 }
 0x100   : > { %p11_p12 = scmp.ge.s32.totalorder %s14_s19, 5   ;;  %s1238_s16 = smov %s1148_s23 }
 0x101   : > { %s1239_s17 = smov %s1081_s18  ;;  %s1240_s18 = smov %s1242_s20 }
 0x102   :  { %13 = sbr.rel (!%p11_p12) target bundleno = 3 (0x3), region = 120 }

// kernel: resnet_forward.20
= control target key start
LH: loop header
LB: loop body
LE: loop exit
PB: predicated region body
PF: predicated region fallthrough
CT: control target
= control target key end

     0   :  { %9 = vsyncpa [#allocation4], 0  ;;  %s395_s0 = inlined_call_operand.vmem [shape: bf16[32,128], index: 0, kind: input, shape index: {}]   ;;  %s396_s1 = inlined_call_operand.vmem [shape: bf16[128,128], index: 1, kind: input, shape index: {}]   ;;  %s397_s2 = inlined_call_operand.hbm [shape: f32[1,128], index: 2, kind: input, shape index: {}]   ;;  %s398_s3 = inlined_call_operand.hbm [shape: f32[1,128], index: 3, kind: input, shape index: {}]   ;;  %s399_s4 = inlined_call_operand.vmem [shape: bf16[32,128], index: 4, kind: output, shape index: {}]  }
   0x1   :  { %s20_s17 = sshll.u32 %s397_s2, 4  ;;  %s21_s17 = int_to_ptr.hbm [resolvable:$true] %s20_s17 }
   0x2   :  { %10 = vsyncpa [#allocation6], 0  ;;  %s326_s18 = smov [#allocation3]   ;;  %s31_s22 = sshll.u32 %s398_s3, 4  ;;  %s32_s22 = int_to_ptr.hbm [resolvable:$true] %s31_s22 }
   0x3   :  { %s22_s19 = sshll.u32 %s326_s18, 4  ;;  %s327_s23 = smov [#allocation5]   ;;  %s23_s19 = int_to_ptr.vmem [resolvable:$true] %s22_s19 }
   0x4   :  { %25 = dma.hbm_to_vmem [thread:$0]  %s21_s17, 16, %s23_s19, [#allocation4]  }
   0x5   :  { %s33_s24 = sshll.u32 %s327_s23, 4  ;;  %s34_s24 = int_to_ptr.vmem [resolvable:$true] %s33_s24 }
   0x6   :  { %36 = dma.hbm_to_vmem [thread:$0]  %s32_s22, 16, %s34_s24, [#allocation6]  }
   0x7   :  { %322 = dma.done.wait [#allocation4], 16  }
   0x8   :  { %323 = vsyncadd [#allocation4], 4294967280 }
   0x9   :  { %324 = dma.done.wait [#allocation6], 16  }
   0xa   :  { %325 = vsyncadd [#allocation6], 4294967280  ;;  %v250_v0 = vld [vmem:[%s396_s1 + $0x38] sm:$0xff]  ;;  %v249_v1 = vld [vmem:[%s396_s1 + $0x30] sm:$0xff] }
   0xb   :  { %137 = vmatpush.bf16.msra.mxu0 %v250_v0  ;;  %262 = vmatpush.bf16.msra.mxu1 %v250_v0  ;;  %v248_v2 = vld [vmem:[%s396_s1 + $0x28] sm:$0xff]  ;;  %v247_v3 = vld [vmem:[%s396_s1 + $0x20] sm:$0xff]  ;;  %v246_v4 = vld [vmem:[%s396_s1 + $0x18] sm:$0xff] }
   0xc   :  { %v245_v5 = vld [vmem:[%s396_s1 + $0x10] sm:$0xff]  ;;  %v244_v6 = vld [vmem:[%s396_s1 + $0x8] sm:$0xff]  ;;  %v243_v7 = vld [vmem:[%s396_s1] sm:$0xff] }
   0xd   :  { %v241_v8 = vld [vmem:[%s395_s0] sm:$0xff]  ;;  %v242_v9 = vld [vmem:[%s395_s0 + $0x8] sm:$0xff] }
   0xe   :  { %v272_v12 = vld [vmem:[#allocation3] ss:$0 sm:$0xff]  ;;  %v273_v14 = vld [vmem:[#allocation5] ss:$0 sm:$0xff] }
   0xf   :  { %138 = vmatpush.bf16.msra.mxu0 %v249_v1  ;;  %263 = vmatpush.bf16.msra.mxu1 %v249_v1 }
  0x13   :  { %139 = vmatpush.bf16.msra.mxu0 %v248_v2  ;;  %264 = vmatpush.bf16.msra.mxu1 %v248_v2 }
  0x17   :  { %140 = vmatpush.bf16.msra.mxu0 %v247_v3  ;;  %265 = vmatpush.bf16.msra.mxu1 %v247_v3 }
  0x1b   :  { %141 = vmatpush.bf16.msra.mxu0 %v246_v4  ;;  %266 = vmatpush.bf16.msra.mxu1 %v246_v4 }
  0x1f   :  { %142 = vmatpush.bf16.msra.mxu0 %v245_v5  ;;  %267 = vmatpush.bf16.msra.mxu1 %v245_v5 }
  0x23   :  { %143 = vmatpush.bf16.msra.mxu0 %v244_v6  ;;  %268 = vmatpush.bf16.msra.mxu1 %v244_v6 }
  0x27   :  { %144 = vmatpush.bf16.msra.mxu0 %v243_v7  ;;  %269 = vmatpush.bf16.msra.mxu1 %v243_v7 }
  0x2a   :  { %145 = vmatmul.bf16.vlgmr.msra.gmra.mxu0 %v241_v8  ;;  %150 = vmatmul.bf16.vlgmr.msra.gmra.mxu1 %v242_v9 }
  0xa7   :  { %v146_v10 = vpop.f32.mrf.mxu0  ;;  %v151_v11 = vpop.f32.mrf.mxu1 }
  0xa8   :  { %v175_v13 = vmul.f32 %v272_v12, %v146_v10  ;;  %v177_v15 = vmul.f32 %v272_v12, %v151_v11 }
  0xaa   :  { %v183_v20 = vadd.f32 %v273_v14, %v175_v13  ;;  %v185_v21 = vadd.f32 %v273_v14, %v177_v15 }
  0xaf   :  { %v148_v16 = vpop.f32.mrf.mxu0  ;;  %v153_v17 = vpop.f32.mrf.mxu1 }
  0xb0   :  { %v176_v18 = vmul.f32 %v272_v12, %v148_v16  ;;  %v178_v19 = vmul.f32 %v272_v12, %v153_v17 }
  0xb2   :  { %v184_v22 = vadd.f32 %v273_v14, %v176_v18  ;;  %v186_v23 = vadd.f32 %v273_v14, %v178_v19 }
  0xb4   :  { %v254_v24 = vpack.c.bf16 %v184_v22, %v183_v20  ;;  %v259_v25 = vpack.c.bf16 %v186_v23, %v185_v21 }
  0xb6   :  { %255 = vst [vmem:[%s399_s4] sm:$0xff] %v254_v24  }
  0xb7   :  { %261 = vst [vmem:[%s399_s4 + $0x8] sm:$0xff] %v259_v25  }
  0xb8   :  { %199 = vsyncpa [#allocation4], 1 }
  0xb9   :  { %200 = vsyncpa [#allocation6], 1 }

// kernel: resnet_forward.21
= control target key start
LH: loop header
LB: loop body
LE: loop exit
PB: predicated region body
PF: predicated region fallthrough
CT: control target
= control target key end

     0   :  { %10 = vsyncpa [#allocation5], 0  ;;  %s1479_s0 = inlined_call_operand.vmem [shape: bf16[32,1152], index: 0, kind: input, shape index: {}]   ;;  %s1480_s1 = inlined_call_operand.vmem [shape: bf16[1152,128], index: 1, kind: input, shape index: {}]   ;;  %s1481_s2 = inlined_call_operand.hbm [shape: f32[1,128], index: 2, kind: input, shape index: {}]   ;;  %s1482_s3 = inlined_call_operand.hbm [shape: f32[1,128], index: 3, kind: input, shape index: {}]   ;;  %s1483_s4 = inlined_call_operand.vmem [shape: bf16[32,128], index: 4, kind: input, shape index: {}]   ;;  %s1484_s5 = inlined_call_operand.vmem [shape: bf16[32,128], index: 5, kind: output, shape index: {}]  }
   0x1   :  { %11 = vsyncpa [#allocation7], 0  ;;  %s1325_s18 = smov 0   ;;  %s1327_s19 = smov 0  }
   0x2   :  { %s1329_s20 = smov 0   ;;  %s1331_s21 = smov 0  }
   0x3   :  { %s1333_s22 = smov 0  }
   0x4 LB: > { %s914_s23 = sadd.s32 4294967295, %s1290_s22   ;;  %s29_s24 = sadd.s32 1, %s1286_s21  ;;  %s1290_s22 = sphi %s1333_s22, %s17_s22   ;;  %s1286_s21 = sphi %s1331_s21, %s1491_s21   ;;  %s1282_s20 = sphi %s1329_s20, %s1490_s20   ;;  %s1278_s19 = sphi %s1327_s19, %s1489_s19   ;;  %s1274_s18 = sphi %s1325_s18, %s1488_s18  }
   0x5   : > { %p30_p0 = scmp.ge.s32.totalorder %s29_s24, 3  ;;  %s45_s25 = sadd.s32 1, %s1278_s19 }
   0x6   : > { %p52_p1 = scmp.ne.s32.totalorder %s1278_s19, %s1274_s18  ;;  %p53_p2 = scmp.eq.s32.totalorder %s1290_s22, 0 }
   0x7   : > { %s1493_s24 = smov (%p30_p0, %s29_s24), 0  ;;  %p915_p4 = scmp.ge.s32.totalorder %s1290_s22, 1 }
   0x8   : > { %p1358_p3 = por %p53_p2, %p52_p1  ;;  %s41_s27 = ssub.s32 %s1286_s21, %s1493_s24 }
   0x9   : > { %p205_p5 = scmp.lt.s32.totalorder %s1290_s22, 4  ;;  %p43_p6 = scmp.eq.s32.totalorder %s41_s27, 0 }
   0xa   : > { %p1370_p8 = scmp.eq.s32.totalorder %s914_s23, 0  ;;  %s218_s8 = sshll.u32 %s1481_s2, 4  ;;  %s219_s8 = int_to_ptr.hbm [resolvable:$true] %s218_s8 }
   0xb   : > { %p1366_p7 = pnand %p915_p4, %p205_p5  ;;  %s1292_s9 = smov [#allocation4]  }
   0xc   : > { %s1375_s30 = scalar_select %p43_p6, %s1278_s19, %s45_s25  }
   0xd   : > { %p1128_p9 = pneg %p1366_p7  ;;  %s220_s10 = sshll.u32 %s1292_s9, 4  ;;  %s221_s10 = int_to_ptr.vmem [resolvable:$true] %s220_s10 }
   0xe   : > { %s231_s13 = sshll.u32 %s1482_s3, 4  ;;  %s1293_s14 = smov [#allocation6]   ;;  %s232_s13 = int_to_ptr.hbm [resolvable:$true] %s231_s13 }
   0xf   : > { %p1129_p10 = pnand %p1370_p8, %p1128_p9  ;;  %s233_s15 = sshll.u32 %s1293_s14, 4  ;;  %s234_s15 = int_to_ptr.vmem [resolvable:$true] %s233_s15 }
  0x10   : > { %p919_p11 = scmp.ge.s32.totalorder %s1290_s22, 3 }
  0x11   : > { %1131 = dma.hbm_to_vmem [thread:$0]  (!%p1129_p10), %s219_s8, 16, %s221_s10, [#allocation5]  }
  0x12   : > { %1134 = dma.hbm_to_vmem [thread:$0]  (!%p1129_p10), %s232_s13, 16, %s234_s15, [#allocation7]  }
  0x13   : > { %252 = sbr.rel (%p919_p11) target bundleno = 37 (0x25), region = 28 }
  0x18   : > { %255 = sbr.rel (!%p1358_p3) target bundleno = 37 (0x25), region = 32  ;;  %s257_s16 = sand.u32 (%p1358_p3), 1, %s1278_s19  }
  0x19   : > { %s1059_s17 = smul.u32 (%p1358_p3), 12, %s1286_s21 }
  0x1a   : > { %s1118_s23 = smul.u32 (%p1358_p3), 48, %s257_s16 }
  0x1b   : > { %s265_s6 = scalar_lea.vmem (%p1358_p3), %s1479_s0, %s1059_s17 }
  0x1c   : > { %v280_v0 = vld [vmem:[%s265_s6] sm:$0xff] (%p1358_p3)  ;;  %v284_v2 = vld [vmem:[%s265_s6 + $0x48] sm:$0xff] (%p1358_p3)  ;;  %s259_s7 = scalar_lea.vmem (%p1358_p3), [#allocation3], %s1118_s23  ;;  %v925_v6 = vld [vmem:[%s265_s6 + $0x50] sm:$0xf] (%p1358_p3) }
  0x1d   : > { %v282_v1 = vld [vmem:[%s265_s6 + $0x24] sm:$0xff]  ;;  %281 = vst [vmem:[%s259_s7] sm:$0xff] %v280_v0  ;;  %v286_v3 = vld [vmem:[%s265_s6 + $0x6c] sm:$0xff]  ;;  %v927_v7 = vld [vmem:[%s265_s6 + $0x74] sm:$0xf] }
  0x1e   : > { %283 = vst [vmem:[%s259_s7 + $0xc] sm:$0xff] %v282_v1  ;;  %v921_v4 = vld [vmem:[%s265_s6 + $0x8] sm:$0xf]  ;;  %v923_v5 = vld [vmem:[%s265_s6 + $0x2c] sm:$0xf] }
  0x1f   : > { %285 = vst [vmem:[%s259_s7 + $0x18] sm:$0xff] %v284_v2 }
  0x20   : > { %287 = vst [vmem:[%s259_s7 + $0x24] sm:$0xff] %v286_v3 }
  0x21   : > { %922 = vst [vmem:[%s259_s7 + $0x8] sm:$0xf] %v921_v4 }
  0x22   : > { %924 = vst [vmem:[%s259_s7 + $0x14] sm:$0xf] %v923_v5 }
  0x23   : > { %926 = vst [vmem:[%s259_s7 + $0x20] sm:$0xf] %v925_v6 }
  0x24   : > { %928 = vst [vmem:[%s259_s7 + $0x2c] sm:$0xf] %v927_v7 }
  0x25 PF: > { %324 = sbr.rel (%p1366_p7) target bundleno = 270 (0x10e), region = 62  ;;  %s327_s26 = sand.u32 (!%p1366_p7), 1, %s1274_s18  }
  0x26   : > { %s1119_s8 = smul.u32 (!%p1366_p7), 48, %s327_s26 }
  0x28   : > { %s1398_s9 = scalar_lea.vmem (!%p1366_p7), [#allocation3], %s1119_s8 }
  0x2a   : > { %1265 = dma.done.wait (%p1370_p8), [#allocation5], 16  }
  0x2b   : > { %1267 = vsyncadd (%p1370_p8), [#allocation5], 4294967280 }
  0x2c   : > { %1269 = dma.done.wait (%p1370_p8), [#allocation7], 16  }
  0x2d   : > { %1271 = vsyncadd (%p1370_p8), [#allocation7], 4294967280  ;;  %s385_s28 = smul.u32 48, %s1282_s20  ;;  %p933_p13 = scmp.ne.s32.totalorder %s1282_s20, 0 }
  0x2f   : > { %p386_p12 = scmp.lt.s32.totalorder %s385_s28, 143  ;;  %415 = sbr.rel (%p933_p13) target bundleno = 57 (0x39), region = 78 }
  0x31   : > { %s1495_s28 = smov (!%p386_p12, %s385_s28), 143 }
  0x32   : > { %s932_s10 = sshll.u32 %s1495_s28, 2 }
  0x33   : > { %s1412_s12 = scalar_lea.vmem %s1480_s1, %s932_s10 }
  0x34   : > { %v1294_v8 = vmov 0.0  }
  0x35   : > { %416 = vst [vmem:[#allocation2 + $0x10] sm:$0xff] %v1294_v8 }
  0x36   : > { %417 = vst [vmem:[#allocation2] sm:$0xff] %v1294_v8 }
  0x37   : > { %418 = vst [vmem:[#allocation2 + $0x18] sm:$0xff] %v1294_v8 }
  0x38   : > { %419 = vst [vmem:[#allocation2 + $0x8] sm:$0xff] %v1294_v8 }
  0x39 PF: > { %v1073_v9 = vld [vmem:[%s1412_s12 + $0x38] sm:$0xff]  ;;  %v1072_v12 = vld [vmem:[%s1412_s12 + $0x30] sm:$0xff]  ;;  %v1071_v15 = vld [vmem:[%s1412_s12 + $0x28] sm:$0xff]  ;;  %p1054_p0 = scmp.ne.s32.totalorder %s1282_s20, 2 }
  0x3a   : > { %v1081_v10 = vld [vmem:[%s1412_s12 + $0x78] sm:$0xff]  ;;  %656 = vmatpush.bf16.msra.mxu0 %v1073_v9  ;;  %v1080_v13 = vld [vmem:[%s1412_s12 + $0x70] sm:$0xff]  ;;  %1110 = vmatpush.bf16.msra.mxu3 %v1073_v9  ;;  %v1079_v16 = vld [vmem:[%s1412_s12 + $0x68] sm:$0xff] }
  0x3b   : > { %v1089_v11 = vld [vmem:[%s1412_s12 + $0xb8] sm:$0xff]  ;;  %675 = vmatpush.bf16.msra.mxu1 %v1081_v10  ;;  %v1088_v14 = vld [vmem:[%s1412_s12 + $0xb0] sm:$0xff]  ;;  %v1087_v17 = vld [vmem:[%s1412_s12 + $0xa8] sm:$0xff] }
  0x3c   : > { %694 = vmatpush.bf16.msra.mxu2 %v1089_v11  ;;  %v1070_v18 = vld [vmem:[%s1412_s12 + $0x20] sm:$0xff]  ;;  %v1069_v21 = vld [vmem:[%s1412_s12 + $0x18] sm:$0xff]  ;;  %v1068_v24 = vld [vmem:[%s1412_s12 + $0x10] sm:$0xff] }
  0x3d   : > { %v1078_v19 = vld [vmem:[%s1412_s12 + $0x60] sm:$0xff]  ;;  %v1077_v22 = vld [vmem:[%s1412_s12 + $0x58] sm:$0xff]  ;;  %v1076_v25 = vld [vmem:[%s1412_s12 + $0x50] sm:$0xff] }
  0x3e   : > { %657 = vmatpush.bf16.msra.mxu0 %v1072_v12  ;;  %1111 = vmatpush.bf16.msra.mxu3 %v1072_v12  ;;  %v1086_v20 = vld [vmem:[%s1412_s12 + $0xa0] sm:$0xff]  ;;  %v1085_v23 = vld [vmem:[%s1412_s12 + $0x98] sm:$0xff]  ;;  %v1084_v26 = vld [vmem:[%s1412_s12 + $0x90] sm:$0xff] }
  0x3f   : > { %676 = vmatpush.bf16.msra.mxu1 %v1080_v13  ;;  %v1067_v27 = vld [vmem:[%s1412_s12 + $0x8] sm:$0xff]  ;;  %v1066_v30 = vld [vmem:[%s1412_s12] sm:$0xff]  ;;  %v420_v54 = vld [vmem:[#allocation2 + $0x10] sm:$0xff] }
  0x40   : > { %695 = vmatpush.bf16.msra.mxu2 %v1088_v14  ;;  %v1075_v28 = vld [vmem:[%s1412_s12 + $0x48] sm:$0xff]  ;;  %v1074_v31 = vld [vmem:[%s1412_s12 + $0x40] sm:$0xff]  ;;  %v422_v4 = vld [vmem:[#allocation2 + $0x18] sm:$0xff] }
  0x41   : > { %v1083_v29 = vld [vmem:[%s1412_s12 + $0x88] sm:$0xff]  ;;  %v1082_v32 = vld [vmem:[%s1412_s12 + $0x80] sm:$0xff] }
  0x42   : > { %658 = vmatpush.bf16.msra.mxu0 %v1071_v15  ;;  %1112 = vmatpush.bf16.msra.mxu3 %v1071_v15  ;;  %v936_v33 = vld [vmem:[%s1398_s9] sm:$0xf]  ;;  %v1061_v34 = vld [vmem:[%s1398_s9 + $0x8] sm:$0xf0]  ;;  %v1060_v35 = vld [vmem:[%s1398_s9 + $0x4] sm:$0xf] }
  0x43   : > { %677 = vmatpush.bf16.msra.mxu1 %v1079_v16  ;;  %v938_v36 = vld [vmem:[%s1398_s9 + $0xc] sm:$0xf0]  ;;  %v944_v37 = vld [vmem:[%s1398_s9 + $0x8] sm:$0xf]  ;;  %v1062_v38 = vld [vmem:[%s1398_s9 + $0x10] sm:$0xf0]  ;;  %v937_v41 = vor.u32 %v1061_v34, %v936_v33 }
  0x44   : > { %696 = vmatpush.bf16.msra.mxu2 %v1087_v17  ;;  %v948_v39 = vld [vmem:[%s1398_s9 + $0x18] sm:$0xf]  ;;  %v1064_v40 = vld [vmem:[%s1398_s9 + $0x20] sm:$0xf0]  ;;  %v941_v42 = vor.u32 %v1060_v35, %v938_v36  ;;  %v945_v43 = vor.u32 %v1062_v38, %v944_v37  ;;  %v1063_v45 = vld [vmem:[%s1398_s9 + $0x1c] sm:$0xf] }
  0x45   : > { %v949_v44 = vor.u32 %v1064_v40, %v948_v39  ;;  %v950_v46 = vld [vmem:[%s1398_s9 + $0x24] sm:$0xf0]  ;;  %v956_v47 = vld [vmem:[%s1398_s9 + $0x20] sm:$0xf]  ;;  %v1065_v48 = vld [vmem:[%s1398_s9 + $0x28] sm:$0xf0] }
  0x46   : > { %659 = vmatpush.bf16.msra.mxu0 %v1070_v18  ;;  %1113 = vmatpush.bf16.msra.mxu3 %v1070_v18  ;;  %v953_v49 = vor.u32 %v1063_v45, %v950_v46  ;;  %v957_v50 = vor.u32 %v1065_v48, %v956_v47  ;;  %v421_v61 = vld [vmem:[#allocation2] sm:$0xff]  ;;  %v423_v11 = vld [vmem:[#allocation2 + $0x8] sm:$0xff] }
  0x47   : > { %678 = vmatpush.bf16.msra.mxu1 %v1078_v19 }
  0x48   : > { %697 = vmatpush.bf16.msra.mxu2 %v1086_v20 }
  0x4a   : > { %660 = vmatpush.bf16.msra.mxu0 %v1069_v21  ;;  %1114 = vmatpush.bf16.msra.mxu3 %v1069_v21 }
  0x4b   : > { %679 = vmatpush.bf16.msra.mxu1 %v1077_v22 }
  0x4c   : > { %698 = vmatpush.bf16.msra.mxu2 %v1085_v23 }
  0x4e   : > { %661 = vmatpush.bf16.msra.mxu0 %v1068_v24  ;;  %1115 = vmatpush.bf16.msra.mxu3 %v1068_v24 }
  0x4f   : > { %680 = vmatpush.bf16.msra.mxu1 %v1076_v25 }
  0x50   : > { %699 = vmatpush.bf16.msra.mxu2 %v1084_v26 }
  0x52   : > { %662 = vmatpush.bf16.msra.mxu0 %v1067_v27  ;;  %1116 = vmatpush.bf16.msra.mxu3 %v1067_v27 }
  0x53   : > { %681 = vmatpush.bf16.msra.mxu1 %v1075_v28 }
  0x54   : > { %700 = vmatpush.bf16.msra.mxu2 %v1083_v29 }
  0x56   : > { %663 = vmatpush.bf16.msra.mxu0 %v1066_v30  ;;  %1117 = vmatpush.bf16.msra.mxu3 %v1066_v30 }
  0x57   : > { %682 = vmatpush.bf16.msra.mxu1 %v1074_v31 }
  0x58   : > { %701 = vmatpush.bf16.msra.mxu2 %v1082_v32 }
  0x59   : > { %664 = vmatmul.bf16.vlgmr.msra.gmra.mxu0 %v937_v41  ;;  %669 = vmatmul.bf16.vlgmr.msra.gmra.mxu3 %v949_v44 }
  0x5a   : > { %683 = vmatmul.bf16.vlgmr.msra.gmra.mxu1 %v941_v42 }
  0x5b   : > { %702 = vmatmul.bf16.vlgmr.msra.gmra.mxu2 %v945_v43 }
  0x6a   : > { %688 = vmatmul.bf16.gmra.mxu1 %v953_v49 }
  0x6b   : > { %707 = vmatmul.bf16.gmra.mxu2 %v957_v50 }
  0xd6   : > { %v665_v52 = vpop.f32.mrf.mxu0 }
  0xd7   : > { %v684_v51 = vpop.f32.mrf.mxu1 }
  0xd8   : > { %v685_v53 = vadd.f32 %v684_v51, %v665_v52 }
  0xdc   : > { %v670_v2 = vpop.f32.mrf.mxu3 }
  0xde   : > { %v703_v55 = vpop.f32.mrf.mxu2  ;;  %v667_v59 = vpop.f32.mrf.mxu0 }
  0xdf   : > { %v704_v56 = vadd.f32 %v703_v55, %v685_v53  ;;  %v686_v57 = vpop.f32.mrf.mxu1 }
  0xe0   : > { %v687_v60 = vadd.f32 %v686_v57, %v667_v59 }
  0xe1   : > { %v713_v58 = vadd.f32 %v704_v56, %v420_v54 }
  0xe3   : > { %717 = vst [vmem:[#allocation2 + $0x10] sm:$0xff] %v713_v58 }
  0xe4   : > { %v672_v9 = vpop.f32.mrf.mxu3 }
  0xe6   : > { %v705_v62 = vpop.f32.mrf.mxu2 }
  0xe7   : > { %v706_v63 = vadd.f32 %v705_v62, %v687_v60  ;;  %v689_v0 = vpop.f32.mrf.mxu1 }
  0xe8   : > { %v690_v3 = vadd.f32 %v689_v0, %v670_v2 }
  0xe9   : > { %v714_v1 = vadd.f32 %v706_v63, %v421_v61 }
  0xeb   : > { %718 = vst [vmem:[#allocation2] sm:$0xff] %v714_v1 }
  0xee   : > { %v708_v5 = vpop.f32.mrf.mxu2 }
  0xef   : > { %v709_v6 = vadd.f32 %v708_v5, %v690_v3  ;;  %v691_v8 = vpop.f32.mrf.mxu1 }
  0xf0   : > { %v692_v10 = vadd.f32 %v691_v8, %v672_v9 }
  0xf1   : > { %v715_v7 = vadd.f32 %v709_v6, %v422_v4 }
  0xf3   : > { %719 = vst [vmem:[#allocation2 + $0x18] sm:$0xff] %v715_v7 }
  0xf6   : > { %v710_v12 = vpop.f32.mrf.mxu2 }
  0xf7   : > { %v711_v13 = vadd.f32 %v710_v12, %v692_v10  ;;  %724 = sbr.rel (%p1054_p0) target bundleno = 270 (0x10e), region = 82 }
  0xf9   : > { %v716_v14 = vadd.f32 %v711_v13, %v423_v11 }
  0xfb   : > { %720 = vst [vmem:[#allocation2 + $0x8] sm:$0xff] %v716_v14 }
  0xfc   : > { %v725_v15 = vld [vmem:[#allocation2 + $0x10] sm:$0xff]  ;;  %v726_v16 = vld [vmem:[#allocation2] sm:$0xff]  ;;  %v727_v20 = vld [vmem:[#allocation2 + $0x18] sm:$0xff] }
  0xfd   : > { %v1182_v17 = vld [vmem:[#allocation4] ss:$0 sm:$0xff]  ;;  %v1183_v18 = vld [vmem:[#allocation6] ss:$0 sm:$0xff]  ;;  %v1108_v26 = vld [vmem:[%s1483_s4 + $0x8] sm:$0xff]  }
  0xfe   : > { %v1091_v19 = vld [vmem:[%s1483_s4] sm:$0xff]   ;;  %v733_v22 = vmul.f32 %v1182_v17, %v725_v15  ;;  %v734_v23 = vmul.f32 %v1182_v17, %v726_v16  ;;  %v735_v27 = vmul.f32 %v1182_v17, %v727_v20  ;;  %v1096_v29 = vunpack.c.l.bf16 %v1108_v26 }
  0xff   : > { %v1092_v24 = vunpack.c.l.bf16 %v1091_v19  ;;  %v1093_v25 = vunpack.c.h.bf16 %v1091_v19  ;;  %v1097_v30 = vunpack.c.h.bf16 %v1108_v26 }
 0x100   : > { %v741_v31 = vadd.f32 %v1183_v18, %v733_v22  ;;  %v742_v32 = vadd.f32 %v1183_v18, %v734_v23  ;;  %v743_v33 = vadd.f32 %v1183_v18, %v735_v27 }
 0x102   : > { %v728_v21 = vld [vmem:[#allocation2 + $0x8] sm:$0xff]  ;;  %v753_v35 = vadd.f32 %v1092_v24, %v741_v31  ;;  %v754_v36 = vadd.f32 %v1093_v25, %v742_v32  ;;  %v755_v37 = vadd.f32 %v1096_v29, %v743_v33 }
 0x103   : > { %v736_v28 = vmul.f32 %v1182_v17, %v728_v21 }
 0x104   : > { %v757_v39 = vmax.f32 %v753_v35, 0.0  ;;  %v758_v40 = vmax.f32 %v754_v36, 0.0  ;;  %v759_v41 = vmax.f32 %v755_v37, 0.0 }
 0x105   : > { %v744_v34 = vadd.f32 %v1183_v18, %v736_v28 }
 0x106   : > { %v1101_v43 = vpack.c.bf16 %v758_v40, %v757_v39 }
 0x107   : > { %v756_v38 = vadd.f32 %v1097_v30, %v744_v34 }
 0x108   : > { %1102 = vst [vmem:[%s1484_s5] sm:$0xff] %v1101_v43  }
 0x109   : > { %v760_v42 = vmax.f32 %v756_v38, 0.0 }
 0x10b   : > { %v1106_v44 = vpack.c.bf16 %v760_v42, %v759_v41 }
 0x10d   : > { %1109 = vst [vmem:[%s1484_s5 + $0x8] sm:$0xff] %v1106_v44  }
 0x10e PF: > { %s17_s22 = sadd.s32 1, %s1290_s22   ;;  %s1488_s18 = smov %s1278_s19 }
 0x10f   : > { %p14_p1 = scmp.ge.s32.totalorder %s17_s22, 5   ;;  %s1489_s19 = smov %s1375_s30 }
 0x110   : > { %s1490_s20 = smov %s1286_s21  ;;  %s1491_s21 = smov %s1493_s24 }
 0x111   :  { %16 = sbr.rel (!%p14_p1) target bundleno = 4 (0x4), region = 132 }
 0x116   :  { %797 = vsyncpa [#allocation5], 1 }
 0x117   :  { %799 = vsyncpa [#allocation5 + $0x1], 1 }
 0x118   :  { %800 = vsyncpa [#allocation7], 1 }

// kernel: resnet_forward.23
= control target key start
LH: loop header
LB: loop body
LE: loop exit
PB: predicated region body
PF: predicated region fallthrough
CT: control target
= control target key end

     0   :  { %s392_s1 = inlined_call_operand.vmem [shape: bf16[128,256], index: 1, kind: input, shape index: {}]   ;;  %s393_s0 = inlined_call_operand.vmem [shape: bf16[8,128], index: 0, kind: input, shape index: {}]   ;;  %s394_s2 = inlined_call_operand.vmem [shape: f32[1,256], index: 2, kind: input, shape index: {}]   ;;  %s395_s3 = inlined_call_operand.vmem [shape: f32[1,256], index: 3, kind: input, shape index: {}]   ;;  %s396_s4 = inlined_call_operand.vmem [shape: bf16[8,256], index: 4, kind: output, shape index: {}]  }
   0x1   :  { %v237_v0 = vld [vmem:[%s392_s1 + $0x70] sm:$0xf]  ;;  %v258_v1 = vld [vmem:[%s392_s1 + $0x74] sm:$0xf0]  ;;  %v257_v2 = vld [vmem:[%s392_s1 + $0x74] sm:$0xf] }
   0x2   :  { %v238_v3 = vor.u32 %v258_v1, %v237_v0  ;;  %v239_v4 = vld [vmem:[%s392_s1 + $0x78] sm:$0xf0]  ;;  %v229_v5 = vld [vmem:[%s392_s1 + $0x60] sm:$0xf]  ;;  %v256_v6 = vld [vmem:[%s392_s1 + $0x64] sm:$0xf0] }
   0x3   :  { %v242_v7 = vor.u32 %v257_v2, %v239_v4  ;;  %v255_v8 = vld [vmem:[%s392_s1 + $0x64] sm:$0xf]  ;;  %v231_v9 = vld [vmem:[%s392_s1 + $0x68] sm:$0xf0]  ;;  %v230_v10 = vor.u32 %v256_v6, %v229_v5  ;;  %v221_v12 = vld [vmem:[%s392_s1 + $0x50] sm:$0xf] }
   0x4   :  { %122 = vmatpush.bf16.msra.mxu0 %v238_v3  ;;  %v234_v11 = vor.u32 %v255_v8, %v231_v9  ;;  %v254_v13 = vld [vmem:[%s392_s1 + $0x54] sm:$0xf0]  ;;  %v253_v14 = vld [vmem:[%s392_s1 + $0x54] sm:$0xf]  ;;  %v223_v15 = vld [vmem:[%s392_s1 + $0x58] sm:$0xf0] }
   0x5   :  { %135 = vmatpush.bf16.msra.mxu1 %v242_v7  ;;  %v222_v16 = vor.u32 %v254_v13, %v221_v12  ;;  %v226_v17 = vor.u32 %v253_v14, %v223_v15  ;;  %v213_v18 = vld [vmem:[%s392_s1 + $0x40] sm:$0xf]  ;;  %v252_v19 = vld [vmem:[%s392_s1 + $0x44] sm:$0xf0]  ;;  %v251_v20 = vld [vmem:[%s392_s1 + $0x44] sm:$0xf] }
   0x6   :  { %v215_v21 = vld [vmem:[%s392_s1 + $0x48] sm:$0xf0]  ;;  %v214_v22 = vor.u32 %v252_v19, %v213_v18  ;;  %v205_v24 = vld [vmem:[%s392_s1 + $0x30] sm:$0xf]  ;;  %v250_v25 = vld [vmem:[%s392_s1 + $0x34] sm:$0xf0] }
   0x7   :  { %v218_v23 = vor.u32 %v251_v20, %v215_v21  ;;  %v249_v26 = vld [vmem:[%s392_s1 + $0x34] sm:$0xf]  ;;  %v207_v27 = vld [vmem:[%s392_s1 + $0x38] sm:$0xf0]  ;;  %v206_v28 = vor.u32 %v250_v25, %v205_v24  ;;  %v197_v30 = vld [vmem:[%s392_s1 + $0x20] sm:$0xf] }
   0x8   :  { %123 = vmatpush.bf16.msra.mxu0 %v230_v10  ;;  %v210_v29 = vor.u32 %v249_v26, %v207_v27  ;;  %v248_v31 = vld [vmem:[%s392_s1 + $0x24] sm:$0xf0]  ;;  %v247_v32 = vld [vmem:[%s392_s1 + $0x24] sm:$0xf]  ;;  %v199_v33 = vld [vmem:[%s392_s1 + $0x28] sm:$0xf0] }
   0x9   :  { %136 = vmatpush.bf16.msra.mxu1 %v234_v11  ;;  %v198_v34 = vor.u32 %v248_v31, %v197_v30  ;;  %v202_v35 = vor.u32 %v247_v32, %v199_v33  ;;  %v189_v36 = vld [vmem:[%s392_s1 + $0x10] sm:$0xf]  ;;  %v246_v37 = vld [vmem:[%s392_s1 + $0x14] sm:$0xf0]  ;;  %v245_v38 = vld [vmem:[%s392_s1 + $0x14] sm:$0xf] }
   0xa   :  { %v191_v39 = vld [vmem:[%s392_s1 + $0x18] sm:$0xf0]  ;;  %v190_v40 = vor.u32 %v246_v37, %v189_v36  ;;  %v181_v42 = vld [vmem:[%s392_s1] sm:$0xf]  ;;  %v244_v43 = vld [vmem:[%s392_s1 + $0x4] sm:$0xf0] }
   0xb   :  { %v194_v41 = vor.u32 %v245_v38, %v191_v39  ;;  %v243_v44 = vld [vmem:[%s392_s1 + $0x4] sm:$0xf]  ;;  %v183_v45 = vld [vmem:[%s392_s1 + $0x8] sm:$0xf0]  ;;  %v182_v46 = vor.u32 %v244_v43, %v181_v42  ;;  %v25_v48 = vld [vmem:[%s393_s0] sm:$0xf] }
   0xc   :  { %124 = vmatpush.bf16.msra.mxu0 %v222_v16  ;;  %v186_v47 = vor.u32 %v243_v44, %v183_v45  ;;  %v157_v49 = vld [vmem:[%s394_s2] sm:$0x3] }
   0xd   :  { %137 = vmatpush.bf16.msra.mxu1 %v226_v17  ;;  %v165_v50 = vld [vmem:[%s395_s3] sm:$0x3]  ;;  %v159_v51 = vperm.slane %v157_v49, 0  ;;  %v160_v52 = vperm.slane %v157_v49, 1 }
   0xe   :  { %v167_v53 = vperm.slane %v165_v50, 0  ;;  %v168_v55 = vperm.slane %v165_v50, 1 }
  0x10   :  { %125 = vmatpush.bf16.msra.mxu0 %v214_v22 }
  0x11   :  { %138 = vmatpush.bf16.msra.mxu1 %v218_v23 }
  0x14   :  { %126 = vmatpush.bf16.msra.mxu0 %v206_v28 }
  0x15   :  { %139 = vmatpush.bf16.msra.mxu1 %v210_v29 }
  0x18   :  { %127 = vmatpush.bf16.msra.mxu0 %v198_v34 }
  0x19   :  { %140 = vmatpush.bf16.msra.mxu1 %v202_v35 }
  0x1c   :  { %128 = vmatpush.bf16.msra.mxu0 %v190_v40 }
  0x1d   :  { %141 = vmatpush.bf16.msra.mxu1 %v194_v41 }
  0x20   :  { %129 = vmatpush.bf16.msra.mxu0 %v182_v46 }
  0x21   :  { %142 = vmatpush.bf16.msra.mxu1 %v186_v47 }
  0x23   :  { %130 = vmatmul.bf16.vlgmr.msra.gmra.mxu0 %v25_v48 }
  0x24   :  { %143 = vmatmul.bf16.vlgmr.msra.gmra.mxu1 %v25_v48 }
  0xa0   :  { %v131_v54 = vpop.f32.mrf.mxu0 }
  0xa1   :  { %v163_v56 = vmul.f32 %v159_v51, %v131_v54  ;;  %v144_v57 = vpop.f32.mrf.mxu1 }
  0xa2   :  { %v164_v58 = vmul.f32 %v160_v52, %v144_v57 }
  0xa3   :  { %v171_v59 = vadd.f32 %v167_v53, %v163_v56 }
  0xa4   :  { %v172_v60 = vadd.f32 %v168_v55, %v164_v58 }
  0xa6   :  { %v173_v61 = vpack.c.bf16 %v172_v60, %v171_v59 }
  0xa8   :  { %174 = vst [vmem:[%s396_s4] sm:$0xff] %v173_v61  ;;  %v133_v62 = vpop.f32.mrf.mxu0 }
  0xa9   :  { %v146_v63 = vpop.f32.mrf.mxu1 }

// kernel: resnet_forward.22
= control target key start
LH: loop header
LB: loop body
LE: loop exit
PB: predicated region body
PF: predicated region fallthrough
CT: control target
= control target key end

     0   :  { %s1200_s15 = smov 0   ;;  %s1202_s16 = smov 0   ;;  %s1354_s0 = inlined_call_operand.vmem [shape: bf16[8,1152], index: 0, kind: input, shape index: {}]   ;;  %s1355_s1 = inlined_call_operand.vmem [shape: bf16[1152,256], index: 1, kind: input, shape index: {}]   ;;  %s1356_s2 = inlined_call_operand.vmem [shape: f32[1,256], index: 2, kind: input, shape index: {}]   ;;  %s1357_s3 = inlined_call_operand.vmem [shape: f32[1,256], index: 3, kind: input, shape index: {}]   ;;  %s1358_s4 = inlined_call_operand.vmem [shape: bf16[8,256], index: 4, kind: output, shape index: {}]  }
   0x1   :  { %s1204_s17 = smov 0  }
   0x2 LB: > { %s26_s18 = sadd.s32 1, %s1168_s16  ;;  %p874_p0 = scmp.ge.s32.totalorder %s1172_s17, 1  ;;  %s1172_s17 = sphi %s1204_s17, %s14_s17   ;;  %s1168_s16 = sphi %s1202_s16, %s1360_s16   ;;  %s1164_s15 = sphi %s1200_s15, %s1359_s15  }
   0x3   : > { %p27_p1 = scmp.ge.s32.totalorder %s26_s18, 3  ;;  %p229_p2 = scmp.lt.s32.totalorder %s1172_s17, 4 }
   0x5   : > { %s1362_s18 = smov (%p27_p1, %s26_s18), 0  ;;  %p230_p3 = pnand %p874_p0, %p229_p2 }
   0x6   : > { %s281_s19 = smul.u32 (!%p230_p3), 3, %s1164_s15  ;;  %p878_p6 = scmp.ne.s32.totalorder (!%p230_p3), %s1164_s15, 0 }
   0x7   : > { %233 = sbr.rel (%p230_p3) target bundleno = 238 (0xee), region = 36 }
   0x8   : > { %s291_s20 = smul.u32 (!%p230_p3), 48, %s1164_s15  ;;  %p284_p4 = scmp.lt.s32.totalorder (!%p230_p3), %s281_s19, 8 }
   0xa   : > { %p293_p5 = scmp.lt.s32.totalorder (!%p230_p3), %s291_s20, 143 }
   0xc   : > { %s1364_s19 = smov (!%p284_p4, %s281_s19), 8  ;;  %s1366_s20 = smov (!%p293_p5, %s291_s20), 143 }
   0xd   : > { %s875_s21 = sshll.u32 %s1364_s19, 2  ;;  %s1076_s25 = sshll.u32 %s1366_s20, 3 }
   0xe   : > { %s1225_s24 = scalar_lea.vmem %s1354_s0, %s875_s21  ;;  %s1230_s28 = scalar_lea.vmem %s1355_s1, %s1076_s25 }
   0xf   : > { %326 = sbr.rel (%p878_p6) target bundleno = 23 (0x17), region = 40 }
  0x14   : > { %v1174_v0 = vmov 0.0  }
  0x15   : > { %327 = vst [vmem:[#allocation2] sm:$0xff] %v1174_v0 }
  0x16   : > { %328 = vst [vmem:[#allocation2 + $0x8] sm:$0xff] %v1174_v0 }
  0x17 PF: > { %v937_v1 = vld [vmem:[%s1230_s28 + $0x70] sm:$0xf]  ;;  %v1092_v2 = vld [vmem:[%s1230_s28 + $0x74] sm:$0xf0]  ;;  %v929_v6 = vld [vmem:[%s1230_s28 + $0x60] sm:$0xf] }
  0x18   : > { %v1001_v3 = vld [vmem:[%s1230_s28 + $0xf0] sm:$0xf]  ;;  %v938_v4 = vor.u32 %v1092_v2, %v937_v1  ;;  %v1108_v5 = vld [vmem:[%s1230_s28 + $0xf4] sm:$0xf0]  ;;  %v1090_v7 = vld [vmem:[%s1230_s28 + $0x64] sm:$0xf0] }
  0x19   : > { %v1002_v8 = vor.u32 %v1108_v5, %v1001_v3  ;;  %v993_v9 = vld [vmem:[%s1230_s28 + $0xe0] sm:$0xf]  ;;  %v1106_v10 = vld [vmem:[%s1230_s28 + $0xe4] sm:$0xf0]  ;;  %v930_v11 = vor.u32 %v1090_v7, %v929_v6  ;;  %v921_v12 = vld [vmem:[%s1230_s28 + $0x50] sm:$0xf] }
  0x1a   : > { %632 = vmatpush.bf16.msra.mxu0 %v938_v4  ;;  %v994_v13 = vor.u32 %v1106_v10, %v993_v9  ;;  %v1088_v14 = vld [vmem:[%s1230_s28 + $0x54] sm:$0xf0]  ;;  %v1065_v15 = vld [vmem:[%s1230_s28 + $0x170] sm:$0xf]  ;;  %v1057_v20 = vld [vmem:[%s1230_s28 + $0x160] sm:$0xf] }
  0x1b   : > { %645 = vmatpush.bf16.msra.mxu1 %v1002_v8  ;;  %v1124_v16 = vld [vmem:[%s1230_s28 + $0x174] sm:$0xf0]  ;;  %v985_v17 = vld [vmem:[%s1230_s28 + $0xd0] sm:$0xf]  ;;  %v1122_v21 = vld [vmem:[%s1230_s28 + $0x164] sm:$0xf0]  ;;  %v922_v23 = vor.u32 %v1088_v14, %v921_v12 }
  0x1c   : > { %v1104_v18 = vld [vmem:[%s1230_s28 + $0xd4] sm:$0xf0]  ;;  %v1066_v19 = vor.u32 %v1124_v16, %v1065_v15  ;;  %v1091_v22 = vld [vmem:[%s1230_s28 + $0x74] sm:$0xf]  ;;  %v913_v24 = vld [vmem:[%s1230_s28 + $0x40] sm:$0xf]  ;;  %v1058_v26 = vor.u32 %v1122_v21, %v1057_v20 }
  0x1d   : > { %v1086_v25 = vld [vmem:[%s1230_s28 + $0x44] sm:$0xf0]  ;;  %v939_v27 = vld [vmem:[%s1230_s28 + $0x78] sm:$0xf0]  ;;  %v986_v28 = vor.u32 %v1104_v18, %v985_v17  ;;  %v977_v29 = vld [vmem:[%s1230_s28 + $0xc0] sm:$0xf] }
  0x1e   : > { %633 = vmatpush.bf16.msra.mxu0 %v930_v11  ;;  %658 = vmatpush.bf16.msra.mxu2 %v1066_v19  ;;  %v1102_v30 = vld [vmem:[%s1230_s28 + $0xc4] sm:$0xf0]  ;;  %v942_v31 = vor.u32 %v1091_v22, %v939_v27  ;;  %v1049_v32 = vld [vmem:[%s1230_s28 + $0x150] sm:$0xf]  ;;  %v1120_v33 = vld [vmem:[%s1230_s28 + $0x154] sm:$0xf0]  ;;  %v914_v37 = vor.u32 %v1086_v25, %v913_v24 }
  0x1f   : > { %646 = vmatpush.bf16.msra.mxu1 %v994_v13  ;;  %v1089_v34 = vld [vmem:[%s1230_s28 + $0x64] sm:$0xf]  ;;  %v931_v35 = vld [vmem:[%s1230_s28 + $0x68] sm:$0xf0]  ;;  %v905_v38 = vld [vmem:[%s1230_s28 + $0x30] sm:$0xf]  ;;  %v1050_v40 = vor.u32 %v1120_v33, %v1049_v32  ;;  %v978_v42 = vor.u32 %v1102_v30, %v977_v29 }
  0x20   : > { %671 = vmatpush.bf16.msra.mxu3 %v942_v31  ;;  %v934_v36 = vor.u32 %v1089_v34, %v931_v35  ;;  %v1084_v39 = vld [vmem:[%s1230_s28 + $0x34] sm:$0xf0]  ;;  %v1041_v41 = vld [vmem:[%s1230_s28 + $0x140] sm:$0xf]  ;;  %v1118_v43 = vld [vmem:[%s1230_s28 + $0x144] sm:$0xf0] }
  0x21   : > { %v1087_v44 = vld [vmem:[%s1230_s28 + $0x54] sm:$0xf]  ;;  %v923_v45 = vld [vmem:[%s1230_s28 + $0x58] sm:$0xf0]  ;;  %v969_v46 = vld [vmem:[%s1230_s28 + $0xb0] sm:$0xf]  ;;  %v906_v49 = vor.u32 %v1084_v39, %v905_v38  ;;  %v1042_v51 = vor.u32 %v1118_v43, %v1041_v41 }
  0x22   : > { %634 = vmatpush.bf16.msra.mxu0 %v922_v23  ;;  %659 = vmatpush.bf16.msra.mxu2 %v1058_v26  ;;  %v1100_v47 = vld [vmem:[%s1230_s28 + $0xb4] sm:$0xf0]  ;;  %v926_v48 = vor.u32 %v1087_v44, %v923_v45  ;;  %v897_v50 = vld [vmem:[%s1230_s28 + $0x20] sm:$0xf]  ;;  %v1085_v52 = vld [vmem:[%s1230_s28 + $0x44] sm:$0xf] }
  0x23   : > { %647 = vmatpush.bf16.msra.mxu1 %v986_v28  ;;  %v915_v53 = vld [vmem:[%s1230_s28 + $0x48] sm:$0xf0]  ;;  %v970_v54 = vor.u32 %v1100_v47, %v969_v46  ;;  %v1082_v55 = vld [vmem:[%s1230_s28 + $0x24] sm:$0xf0]  ;;  %v1033_v56 = vld [vmem:[%s1230_s28 + $0x130] sm:$0xf] }
  0x24   : > { %672 = vmatpush.bf16.msra.mxu3 %v934_v36  ;;  %v1116_v57 = vld [vmem:[%s1230_s28 + $0x134] sm:$0xf0]  ;;  %v961_v58 = vld [vmem:[%s1230_s28 + $0xa0] sm:$0xf]  ;;  %v1098_v59 = vld [vmem:[%s1230_s28 + $0xa4] sm:$0xf0]  ;;  %v918_v60 = vor.u32 %v1085_v52, %v915_v53  ;;  %v898_v61 = vor.u32 %v1082_v55, %v897_v50 }
  0x25   : > { %v889_v62 = vld [vmem:[%s1230_s28 + $0x10] sm:$0xf]  ;;  %v1034_v63 = vor.u32 %v1116_v57, %v1033_v56  ;;  %v1083_v0 = vld [vmem:[%s1230_s28 + $0x34] sm:$0xf]  ;;  %v907_v1 = vld [vmem:[%s1230_s28 + $0x38] sm:$0xf0]  ;;  %v962_v2 = vor.u32 %v1098_v59, %v961_v58 }
  0x26   : > { %635 = vmatpush.bf16.msra.mxu0 %v914_v37  ;;  %660 = vmatpush.bf16.msra.mxu2 %v1050_v40  ;;  %v1080_v3 = vld [vmem:[%s1230_s28 + $0x14] sm:$0xf0]  ;;  %v1025_v4 = vld [vmem:[%s1230_s28 + $0x120] sm:$0xf]  ;;  %v1114_v5 = vld [vmem:[%s1230_s28 + $0x124] sm:$0xf0]  ;;  %v910_v10 = vor.u32 %v1083_v0, %v907_v1 }
  0x27   : > { %648 = vmatpush.bf16.msra.mxu1 %v978_v42  ;;  %v953_v6 = vld [vmem:[%s1230_s28 + $0x90] sm:$0xf]  ;;  %v1096_v7 = vld [vmem:[%s1230_s28 + $0x94] sm:$0xf0]  ;;  %v881_v8 = vld [vmem:[%s1230_s28] sm:$0xf]  ;;  %v890_v11 = vor.u32 %v1080_v3, %v889_v62  ;;  %v1026_v12 = vor.u32 %v1114_v5, %v1025_v4 }
  0x28   : > { %673 = vmatpush.bf16.msra.mxu3 %v926_v48  ;;  %v1078_v9 = vld [vmem:[%s1230_s28 + $0x4] sm:$0xf0]  ;;  %v1081_v13 = vld [vmem:[%s1230_s28 + $0x24] sm:$0xf]  ;;  %v899_v14 = vld [vmem:[%s1230_s28 + $0x28] sm:$0xf0]  ;;  %v954_v16 = vor.u32 %v1096_v7, %v953_v6 }
  0x29   : > { %v331_v15 = vld [vmem:[%s1225_s24] sm:$0xff]  ;;  %v1017_v18 = vld [vmem:[%s1230_s28 + $0x110] sm:$0xf]  ;;  %v1112_v19 = vld [vmem:[%s1230_s28 + $0x114] sm:$0xf0]  ;;  %v902_v25 = vor.u32 %v1081_v13, %v899_v14  ;;  %v882_v27 = vor.u32 %v1078_v9, %v881_v8  ;;  %p1071_p7 = scmp.ne.s32.totalorder %s1164_s15, 2 }
  0x2a   : > { %636 = vmatpush.bf16.msra.mxu0 %v906_v49  ;;  %661 = vmatpush.bf16.msra.mxu2 %v1042_v51  ;;  %v945_v17 = vld [vmem:[%s1230_s28 + $0x80] sm:$0xf]  ;;  %v1094_v20 = vld [vmem:[%s1230_s28 + $0x84] sm:$0xf0]  ;;  %v1107_v21 = vld [vmem:[%s1230_s28 + $0xf4] sm:$0xf]  ;;  %v383_v26 = vunpack.c.l.b16 %v331_v15  ;;  %v1018_v28 = vor.u32 %v1112_v19, %v1017_v18  ;;  %v384_v29 = vunpack.c.h.b16 %v331_v15 }
  0x2b   : > { %649 = vmatpush.bf16.msra.mxu1 %v970_v54  ;;  %v1003_v22 = vld [vmem:[%s1230_s28 + $0xf8] sm:$0xf0]  ;;  %v1123_v23 = vld [vmem:[%s1230_s28 + $0x174] sm:$0xf]  ;;  %v332_v32 = vld [vmem:[%s1225_s24 + $0x8] sm:$0xf]  ;;  %v946_v33 = vor.u32 %v1094_v20, %v945_v17 }
  0x2c   : > { %674 = vmatpush.bf16.msra.mxu3 %v918_v60  ;;  %v1067_v24 = vld [vmem:[%s1230_s28 + $0x178] sm:$0xf0]  ;;  %v1079_v30 = vld [vmem:[%s1230_s28 + $0x14] sm:$0xf]  ;;  %v1006_v34 = vor.u32 %v1107_v21, %v1003_v22  ;;  %v1009_v35 = vld [vmem:[%s1230_s28 + $0x100] sm:$0xf]  ;;  %v386_v42 = vpack.c.b16 %v383_v26, %v383_v26  ;;  %v385_v44 = vunpack.c.l.b16 %v332_v32  ;;  %v1305_v45 = vpack.c.b16 %v384_v29, %v384_v29 }
  0x2d   : > { %v891_v31 = vld [vmem:[%s1230_s28 + $0x18] sm:$0xf0]  ;;  %v1110_v36 = vld [vmem:[%s1230_s28 + $0x104] sm:$0xf0]  ;;  %v1070_v37 = vor.u32 %v1123_v23, %v1067_v24  ;;  %v1105_v38 = vld [vmem:[%s1230_s28 + $0xe4] sm:$0xf] }
  0x2e   : > { %637 = vmatpush.bf16.msra.mxu0 %v898_v61  ;;  %662 = vmatpush.bf16.msra.mxu2 %v1034_v63  ;;  %v995_v39 = vld [vmem:[%s1230_s28 + $0xe8] sm:$0xf0]  ;;  %v1121_v40 = vld [vmem:[%s1230_s28 + $0x164] sm:$0xf]  ;;  %v894_v43 = vor.u32 %v1079_v30, %v891_v31  ;;  %v1010_v46 = vor.u32 %v1110_v36, %v1009_v35  ;;  %v1103_v51 = vld [vmem:[%s1230_s28 + $0xd4] sm:$0xf]  ;;  %v388_v55 = vpack.c.b16 %v385_v44, %v385_v44 }
  0x2f   : > { %650 = vmatpush.bf16.msra.mxu1 %v962_v2  ;;  %v1059_v41 = vld [vmem:[%s1230_s28 + $0x168] sm:$0xf0]  ;;  %v1077_v47 = vld [vmem:[%s1230_s28 + $0x4] sm:$0xf]  ;;  %v998_v49 = vor.u32 %v1105_v38, %v995_v39  ;;  %v987_v52 = vld [vmem:[%s1230_s28 + $0xd8] sm:$0xf0] }
  0x30   : > { %675 = vmatpush.bf16.msra.mxu3 %v910_v10  ;;  %v883_v48 = vld [vmem:[%s1230_s28 + $0x8] sm:$0xf0]  ;;  %v1062_v50 = vor.u32 %v1121_v40, %v1059_v41  ;;  %v1119_v53 = vld [vmem:[%s1230_s28 + $0x154] sm:$0xf]  ;;  %v1051_v54 = vld [vmem:[%s1230_s28 + $0x158] sm:$0xf0]  ;;  %v990_v57 = vor.u32 %v1103_v51, %v987_v52 }
  0x31   : > { %v886_v56 = vor.u32 %v1077_v47, %v883_v48  ;;  %v1054_v58 = vor.u32 %v1119_v53, %v1051_v54  ;;  %v1101_v59 = vld [vmem:[%s1230_s28 + $0xc4] sm:$0xf]  ;;  %v979_v60 = vld [vmem:[%s1230_s28 + $0xc8] sm:$0xf0]  ;;  %v1099_v1 = vld [vmem:[%s1230_s28 + $0xb4] sm:$0xf] }
  0x32   : > { %638 = vmatpush.bf16.msra.mxu0 %v890_v11  ;;  %663 = vmatpush.bf16.msra.mxu2 %v1026_v12  ;;  %v1117_v61 = vld [vmem:[%s1230_s28 + $0x144] sm:$0xf]  ;;  %v1043_v62 = vld [vmem:[%s1230_s28 + $0x148] sm:$0xf0]  ;;  %v982_v63 = vor.u32 %v1101_v59, %v979_v60  ;;  %v971_v2 = vld [vmem:[%s1230_s28 + $0xb8] sm:$0xf0] }
  0x33   : > { %651 = vmatpush.bf16.msra.mxu1 %v954_v16  ;;  %v1046_v0 = vor.u32 %v1117_v61, %v1043_v62  ;;  %v1115_v3 = vld [vmem:[%s1230_s28 + $0x134] sm:$0xf]  ;;  %v1035_v4 = vld [vmem:[%s1230_s28 + $0x138] sm:$0xf0]  ;;  %v974_v5 = vor.u32 %v1099_v1, %v971_v2  ;;  %v1097_v7 = vld [vmem:[%s1230_s28 + $0xa4] sm:$0xf] }
  0x34   : > { %676 = vmatpush.bf16.msra.mxu3 %v902_v25  ;;  %v1038_v6 = vor.u32 %v1115_v3, %v1035_v4  ;;  %v963_v8 = vld [vmem:[%s1230_s28 + $0xa8] sm:$0xf0]  ;;  %v1113_v9 = vld [vmem:[%s1230_s28 + $0x124] sm:$0xf]  ;;  %v1095_v13 = vld [vmem:[%s1230_s28 + $0x94] sm:$0xf] }
  0x35   : > { %v1027_v10 = vld [vmem:[%s1230_s28 + $0x128] sm:$0xf0]  ;;  %v966_v11 = vor.u32 %v1097_v7, %v963_v8  ;;  %v955_v14 = vld [vmem:[%s1230_s28 + $0x98] sm:$0xf0]  ;;  %v1111_v15 = vld [vmem:[%s1230_s28 + $0x114] sm:$0xf] }
  0x36   : > { %639 = vmatpush.bf16.msra.mxu0 %v882_v27  ;;  %664 = vmatpush.bf16.msra.mxu2 %v1018_v28  ;;  %v1030_v12 = vor.u32 %v1113_v9, %v1027_v10  ;;  %v1019_v16 = vld [vmem:[%s1230_s28 + $0x118] sm:$0xf0]  ;;  %v958_v17 = vor.u32 %v1095_v13, %v955_v14  ;;  %v1093_v19 = vld [vmem:[%s1230_s28 + $0x84] sm:$0xf]  ;;  %v947_v20 = vld [vmem:[%s1230_s28 + $0x88] sm:$0xf0] }
  0x37   : > { %652 = vmatpush.bf16.msra.mxu1 %v946_v33  ;;  %v1022_v18 = vor.u32 %v1111_v15, %v1019_v16  ;;  %v1109_v21 = vld [vmem:[%s1230_s28 + $0x104] sm:$0xf]  ;;  %v1011_v22 = vld [vmem:[%s1230_s28 + $0x108] sm:$0xf0]  ;;  %v950_v23 = vor.u32 %v1093_v19, %v947_v20 }
  0x38   : > { %677 = vmatpush.bf16.msra.mxu3 %v894_v43  ;;  %v1014_v24 = vor.u32 %v1109_v21, %v1011_v22  ;;  %v329_v30 = vld [vmem:[#allocation2] sm:$0xff]  ;;  %v330_v40 = vld [vmem:[#allocation2 + $0x8] sm:$0xff] }
  0x39   : > { %640 = vmatmul.bf16.vlgmr.msra.gmra.mxu0 %v386_v42 }
  0x3a   : > { %684 = vmatpush.bf16.msrb.mxu0 %v1006_v34  ;;  %653 = vmatmul.bf16.vlgmr.msra.gmra.mxu1 %v1305_v45 }
  0x3b   : > { %697 = vmatpush.bf16.msrb.mxu1 %v1070_v37  ;;  %665 = vmatpush.bf16.msra.mxu2 %v1010_v46 }
  0x3c   : > { %678 = vmatpush.bf16.msra.mxu3 %v886_v56 }
  0x3e   : > { %685 = vmatpush.bf16.msrb.mxu0 %v998_v49  ;;  %666 = vmatmul.bf16.vlgmr.msra.gmra.mxu2 %v388_v55 }
  0x3f   : > { %698 = vmatpush.bf16.msrb.mxu1 %v1062_v50  ;;  %679 = vmatmul.bf16.vlgmr.msra.gmra.mxu3 %v386_v42 }
  0x42   : > { %686 = vmatpush.bf16.msrb.mxu0 %v990_v57 }
  0x43   : > { %699 = vmatpush.bf16.msrb.mxu1 %v1054_v58 }
  0x46   : > { %687 = vmatpush.bf16.msrb.mxu0 %v982_v63 }
  0x47   : > { %700 = vmatpush.bf16.msrb.mxu1 %v1046_v0 }
  0x4a   : > { %688 = vmatpush.bf16.msrb.mxu0 %v974_v5 }
  0x4b   : > { %701 = vmatpush.bf16.msrb.mxu1 %v1038_v6 }
  0x4e   : > { %689 = vmatpush.bf16.msrb.mxu0 %v966_v11 }
  0x4f   : > { %702 = vmatpush.bf16.msrb.mxu1 %v1030_v12 }
  0x52   : > { %690 = vmatpush.bf16.msrb.mxu0 %v958_v17 }
  0x53   : > { %703 = vmatpush.bf16.msrb.mxu1 %v1022_v18 }
  0x56   : > { %691 = vmatpush.bf16.msrb.mxu0 %v950_v23 }
  0x57   : > { %704 = vmatpush.bf16.msrb.mxu1 %v1014_v24 }
  0x59   : > { %692 = vmatmul.bf16.vlgmr.msrb.gmra.mxu0 %v1305_v45 }
  0x5a   : > { %705 = vmatmul.bf16.vlgmr.msrb.gmra.mxu1 %v388_v55 }
  0xb6   : > { %v641_v25 = vpop.f32.mrf.mxu0 }
  0xb7   : > { %v654_v26 = vpop.f32.mrf.mxu1 }
  0xb8   : > { %v655_v27 = vadd.f32 %v654_v26, %v641_v25 }
  0xbe   : > { %v643_v28 = vpop.f32.mrf.mxu0 }
  0xbf   : > { %v656_v29 = vpop.f32.mrf.mxu1 }
  0xc1   : > { %v667_v31 = vpop.f32.mrf.mxu2 }
  0xc2   : > { %v668_v32 = vadd.f32 %v667_v31, %v655_v27  ;;  %v680_v34 = vpop.f32.mrf.mxu3 }
  0xc4   : > { %v710_v33 = vadd.f32 %v668_v32, %v329_v30 }
  0xc6   : > { %712 = vst [vmem:[#allocation2] sm:$0xff] %v710_v33 }
  0xc9   : > { %v669_v35 = vpop.f32.mrf.mxu2 }
  0xca   : > { %v682_v36 = vpop.f32.mrf.mxu3 }
  0xd6   : > { %v693_v37 = vpop.f32.mrf.mxu0 }
  0xd7   : > { %v694_v38 = vadd.f32 %v693_v37, %v680_v34  ;;  %v706_v39 = vpop.f32.mrf.mxu1 }
  0xd9   : > { %v707_v41 = vadd.f32 %v706_v39, %v694_v38 }
  0xdb   : > { %v711_v42 = vadd.f32 %v707_v41, %v330_v40  ;;  %717 = sbr.rel (%p1071_p7) target bundleno = 238 (0xee), region = 44 }
  0xdd   : > { %713 = vst [vmem:[#allocation2 + $0x8] sm:$0xff] %v711_v42 }
  0xde   : > { %v695_v43 = vpop.f32.mrf.mxu0 }
  0xdf   : > { %v708_v44 = vpop.f32.mrf.mxu1 }
  0xe0   : > { %v718_v45 = vld [vmem:[#allocation2] sm:$0xff] }
  0xe1   : > { %v720_v47 = vld [vmem:[%s1356_s2] sm:$0x3] }
  0xe2   : > { %v722_v48 = vperm.slane %v720_v47, 0  ;;  %v723_v49 = vperm.slane %v720_v47, 1  ;;  %v728_v50 = vld [vmem:[%s1357_s3] sm:$0x3] }
  0xe3   : > { %v730_v51 = vperm.slane %v728_v50, 0  ;;  %v731_v52 = vperm.slane %v728_v50, 1 }
  0xe4   : > { %v719_v46 = vld [vmem:[#allocation2 + $0x8] sm:$0xff]  ;;  %v726_v53 = vmul.f32 %v722_v48, %v718_v45 }
  0xe5   : > { %v727_v54 = vmul.f32 %v723_v49, %v719_v46 }
  0xe6   : > { %v734_v55 = vadd.f32 %v730_v51, %v726_v53 }
  0xe7   : > { %v735_v56 = vadd.f32 %v731_v52, %v727_v54 }
  0xe8   : > { %v736_v57 = vmax.f32 %v734_v55, 0.0 }
  0xe9   : > { %v737_v58 = vmax.f32 %v735_v56, 0.0 }
  0xeb   : > { %v738_v59 = vpack.c.bf16 %v737_v58, %v736_v57 }
  0xed   : > { %739 = vst [vmem:[%s1358_s4] sm:$0xff] %v738_v59 }
  0xee PF: > { %s14_s17 = sadd.s32 1, %s1172_s17   ;;  %s1359_s15 = smov %s1168_s16 }
  0xef   : > { %p11_p8 = scmp.ge.s32.totalorder %s14_s17, 5   ;;  %s1360_s16 = smov %s1362_s18 }
  0xf1   :  { %13 = sbr.rel (!%p11_p8) target bundleno = 2 (0x2), region = 83 }

// kernel: resnet_forward.24
= control target key start
LH: loop header
LB: loop body
LE: loop exit
PB: predicated region body
PF: predicated region fallthrough
CT: control target
= control target key end

     0   :  { %s1295_s18 = smov 0   ;;  %s1297_s19 = smov 0   ;;  %s1452_s0 = inlined_call_operand.vmem [shape: bf16[8,2304], index: 0, kind: input, shape index: {}]   ;;  %s1453_s1 = inlined_call_operand.vmem [shape: bf16[2304,256], index: 1, kind: input, shape index: {}]   ;;  %s1454_s2 = inlined_call_operand.vmem [shape: f32[1,256], index: 2, kind: input, shape index: {}]   ;;  %s1455_s3 = inlined_call_operand.vmem [shape: f32[1,256], index: 3, kind: input, shape index: {}]   ;;  %s1456_s4 = inlined_call_operand.vmem [shape: bf16[8,256], index: 4, kind: input, shape index: {}]   ;;  %s1457_s5 = inlined_call_operand.vmem [shape: bf16[8,256], index: 5, kind: output, shape index: {}]  }
   0x1   :  { %s1299_s20 = smov 0  }
   0x2 LB: > { %s27_s21 = sadd.s32 1, %s1258_s19  ;;  %p964_p0 = scmp.ge.s32.totalorder %s1262_s20, 1  ;;  %s1262_s20 = sphi %s1299_s20, %s15_s20   ;;  %s1258_s19 = sphi %s1297_s19, %s1459_s19   ;;  %s1254_s18 = sphi %s1295_s18, %s1458_s18  }
   0x3   : > { %p28_p1 = scmp.ge.s32.totalorder %s27_s21, 6  ;;  %p271_p2 = scmp.lt.s32.totalorder %s1262_s20, 7 }
   0x5   : > { %s1461_s21 = smov (%p28_p1, %s27_s21), 0  ;;  %p272_p3 = pnand %p964_p0, %p271_p2 }
   0x6   : > { %s334_s22 = smul.u32 (!%p272_p3), 3, %s1254_s18  ;;  %p968_p6 = scmp.ne.s32.totalorder (!%p272_p3), %s1254_s18, 0 }
   0x7   : > { %275 = sbr.rel (%p272_p3) target bundleno = 240 (0xf0), region = 40 }
   0x8   : > { %s344_s23 = smul.u32 (!%p272_p3), 48, %s1254_s18  ;;  %p337_p4 = scmp.lt.s32.totalorder (!%p272_p3), %s334_s22, 17 }
   0xa   : > { %p346_p5 = scmp.lt.s32.totalorder (!%p272_p3), %s344_s23, 287 }
   0xc   : > { %s1463_s22 = smov (!%p337_p4, %s334_s22), 17  ;;  %s1465_s23 = smov (!%p346_p5, %s344_s23), 287 }
   0xd   : > { %s965_s24 = sshll.u32 %s1463_s22, 2  ;;  %s1166_s28 = sshll.u32 %s1465_s23, 3 }
   0xe   : > { %s1320_s27 = scalar_lea.vmem %s1452_s0, %s965_s24  ;;  %s1325_s6 = scalar_lea.vmem %s1453_s1, %s1166_s28 }
   0xf   : > { %389 = sbr.rel (%p968_p6) target bundleno = 23 (0x17), region = 44 }
  0x14   : > { %v1264_v0 = vmov 0.0  }
  0x15   : > { %390 = vst [vmem:[#allocation2] sm:$0xff] %v1264_v0 }
  0x16   : > { %391 = vst [vmem:[#allocation2 + $0x8] sm:$0xff] %v1264_v0 }
  0x17 PF: > { %v1027_v1 = vld [vmem:[%s1325_s6 + $0x70] sm:$0xf]  ;;  %v1182_v2 = vld [vmem:[%s1325_s6 + $0x74] sm:$0xf0]  ;;  %v1019_v6 = vld [vmem:[%s1325_s6 + $0x60] sm:$0xf] }
  0x18   : > { %v1091_v3 = vld [vmem:[%s1325_s6 + $0xf0] sm:$0xf]  ;;  %v1028_v4 = vor.u32 %v1182_v2, %v1027_v1  ;;  %v1198_v5 = vld [vmem:[%s1325_s6 + $0xf4] sm:$0xf0]  ;;  %v1180_v7 = vld [vmem:[%s1325_s6 + $0x64] sm:$0xf0] }
  0x19   : > { %v1092_v8 = vor.u32 %v1198_v5, %v1091_v3  ;;  %v1083_v9 = vld [vmem:[%s1325_s6 + $0xe0] sm:$0xf]  ;;  %v1196_v10 = vld [vmem:[%s1325_s6 + $0xe4] sm:$0xf0]  ;;  %v1020_v11 = vor.u32 %v1180_v7, %v1019_v6  ;;  %v1011_v12 = vld [vmem:[%s1325_s6 + $0x50] sm:$0xf] }
  0x1a   : > { %695 = vmatpush.bf16.msra.mxu0 %v1028_v4  ;;  %v1084_v13 = vor.u32 %v1196_v10, %v1083_v9  ;;  %v1178_v14 = vld [vmem:[%s1325_s6 + $0x54] sm:$0xf0]  ;;  %v1155_v15 = vld [vmem:[%s1325_s6 + $0x170] sm:$0xf]  ;;  %v1147_v20 = vld [vmem:[%s1325_s6 + $0x160] sm:$0xf] }
  0x1b   : > { %708 = vmatpush.bf16.msra.mxu1 %v1092_v8  ;;  %v1214_v16 = vld [vmem:[%s1325_s6 + $0x174] sm:$0xf0]  ;;  %v1075_v17 = vld [vmem:[%s1325_s6 + $0xd0] sm:$0xf]  ;;  %v1212_v21 = vld [vmem:[%s1325_s6 + $0x164] sm:$0xf0]  ;;  %v1012_v23 = vor.u32 %v1178_v14, %v1011_v12 }
  0x1c   : > { %v1194_v18 = vld [vmem:[%s1325_s6 + $0xd4] sm:$0xf0]  ;;  %v1156_v19 = vor.u32 %v1214_v16, %v1155_v15  ;;  %v1181_v22 = vld [vmem:[%s1325_s6 + $0x74] sm:$0xf]  ;;  %v1003_v24 = vld [vmem:[%s1325_s6 + $0x40] sm:$0xf]  ;;  %v1148_v26 = vor.u32 %v1212_v21, %v1147_v20 }
  0x1d   : > { %v1176_v25 = vld [vmem:[%s1325_s6 + $0x44] sm:$0xf0]  ;;  %v1029_v27 = vld [vmem:[%s1325_s6 + $0x78] sm:$0xf0]  ;;  %v1076_v28 = vor.u32 %v1194_v18, %v1075_v17  ;;  %v1067_v29 = vld [vmem:[%s1325_s6 + $0xc0] sm:$0xf] }
  0x1e   : > { %696 = vmatpush.bf16.msra.mxu0 %v1020_v11  ;;  %721 = vmatpush.bf16.msra.mxu2 %v1156_v19  ;;  %v1192_v30 = vld [vmem:[%s1325_s6 + $0xc4] sm:$0xf0]  ;;  %v1032_v31 = vor.u32 %v1181_v22, %v1029_v27  ;;  %v1139_v32 = vld [vmem:[%s1325_s6 + $0x150] sm:$0xf]  ;;  %v1210_v33 = vld [vmem:[%s1325_s6 + $0x154] sm:$0xf0]  ;;  %v1004_v37 = vor.u32 %v1176_v25, %v1003_v24 }
  0x1f   : > { %709 = vmatpush.bf16.msra.mxu1 %v1084_v13  ;;  %v1179_v34 = vld [vmem:[%s1325_s6 + $0x64] sm:$0xf]  ;;  %v1021_v35 = vld [vmem:[%s1325_s6 + $0x68] sm:$0xf0]  ;;  %v995_v38 = vld [vmem:[%s1325_s6 + $0x30] sm:$0xf]  ;;  %v1140_v40 = vor.u32 %v1210_v33, %v1139_v32  ;;  %v1068_v42 = vor.u32 %v1192_v30, %v1067_v29 }
  0x20   : > { %734 = vmatpush.bf16.msra.mxu3 %v1032_v31  ;;  %v1024_v36 = vor.u32 %v1179_v34, %v1021_v35  ;;  %v1174_v39 = vld [vmem:[%s1325_s6 + $0x34] sm:$0xf0]  ;;  %v1131_v41 = vld [vmem:[%s1325_s6 + $0x140] sm:$0xf]  ;;  %v1208_v43 = vld [vmem:[%s1325_s6 + $0x144] sm:$0xf0] }
  0x21   : > { %v1177_v44 = vld [vmem:[%s1325_s6 + $0x54] sm:$0xf]  ;;  %v1013_v45 = vld [vmem:[%s1325_s6 + $0x58] sm:$0xf0]  ;;  %v1059_v46 = vld [vmem:[%s1325_s6 + $0xb0] sm:$0xf]  ;;  %v996_v49 = vor.u32 %v1174_v39, %v995_v38  ;;  %v1132_v51 = vor.u32 %v1208_v43, %v1131_v41 }
  0x22   : > { %697 = vmatpush.bf16.msra.mxu0 %v1012_v23  ;;  %722 = vmatpush.bf16.msra.mxu2 %v1148_v26  ;;  %v1190_v47 = vld [vmem:[%s1325_s6 + $0xb4] sm:$0xf0]  ;;  %v1016_v48 = vor.u32 %v1177_v44, %v1013_v45  ;;  %v987_v50 = vld [vmem:[%s1325_s6 + $0x20] sm:$0xf]  ;;  %v1175_v52 = vld [vmem:[%s1325_s6 + $0x44] sm:$0xf] }
  0x23   : > { %710 = vmatpush.bf16.msra.mxu1 %v1076_v28  ;;  %v1005_v53 = vld [vmem:[%s1325_s6 + $0x48] sm:$0xf0]  ;;  %v1060_v54 = vor.u32 %v1190_v47, %v1059_v46  ;;  %v1172_v55 = vld [vmem:[%s1325_s6 + $0x24] sm:$0xf0]  ;;  %v1123_v56 = vld [vmem:[%s1325_s6 + $0x130] sm:$0xf] }
  0x24   : > { %735 = vmatpush.bf16.msra.mxu3 %v1024_v36  ;;  %v1206_v57 = vld [vmem:[%s1325_s6 + $0x134] sm:$0xf0]  ;;  %v1051_v58 = vld [vmem:[%s1325_s6 + $0xa0] sm:$0xf]  ;;  %v1188_v59 = vld [vmem:[%s1325_s6 + $0xa4] sm:$0xf0]  ;;  %v1008_v60 = vor.u32 %v1175_v52, %v1005_v53  ;;  %v988_v61 = vor.u32 %v1172_v55, %v987_v50 }
  0x25   : > { %v979_v62 = vld [vmem:[%s1325_s6 + $0x10] sm:$0xf]  ;;  %v1124_v63 = vor.u32 %v1206_v57, %v1123_v56  ;;  %v1173_v0 = vld [vmem:[%s1325_s6 + $0x34] sm:$0xf]  ;;  %v997_v1 = vld [vmem:[%s1325_s6 + $0x38] sm:$0xf0]  ;;  %v1052_v2 = vor.u32 %v1188_v59, %v1051_v58 }
  0x26   : > { %698 = vmatpush.bf16.msra.mxu0 %v1004_v37  ;;  %723 = vmatpush.bf16.msra.mxu2 %v1140_v40  ;;  %v1170_v3 = vld [vmem:[%s1325_s6 + $0x14] sm:$0xf0]  ;;  %v1115_v4 = vld [vmem:[%s1325_s6 + $0x120] sm:$0xf]  ;;  %v1204_v5 = vld [vmem:[%s1325_s6 + $0x124] sm:$0xf0]  ;;  %v1000_v10 = vor.u32 %v1173_v0, %v997_v1 }
  0x27   : > { %711 = vmatpush.bf16.msra.mxu1 %v1068_v42  ;;  %v1043_v6 = vld [vmem:[%s1325_s6 + $0x90] sm:$0xf]  ;;  %v1186_v7 = vld [vmem:[%s1325_s6 + $0x94] sm:$0xf0]  ;;  %v971_v8 = vld [vmem:[%s1325_s6] sm:$0xf]  ;;  %v980_v11 = vor.u32 %v1170_v3, %v979_v62  ;;  %v1116_v12 = vor.u32 %v1204_v5, %v1115_v4 }
  0x28   : > { %736 = vmatpush.bf16.msra.mxu3 %v1016_v48  ;;  %v1168_v9 = vld [vmem:[%s1325_s6 + $0x4] sm:$0xf0]  ;;  %v1171_v13 = vld [vmem:[%s1325_s6 + $0x24] sm:$0xf]  ;;  %v989_v14 = vld [vmem:[%s1325_s6 + $0x28] sm:$0xf0]  ;;  %v1044_v16 = vor.u32 %v1186_v7, %v1043_v6 }
  0x29   : > { %v394_v15 = vld [vmem:[%s1320_s27] sm:$0xff]  ;;  %v1107_v18 = vld [vmem:[%s1325_s6 + $0x110] sm:$0xf]  ;;  %v1202_v19 = vld [vmem:[%s1325_s6 + $0x114] sm:$0xf0]  ;;  %v992_v25 = vor.u32 %v1171_v13, %v989_v14  ;;  %v972_v27 = vor.u32 %v1168_v9, %v971_v8  ;;  %p1161_p7 = scmp.ne.s32.totalorder %s1254_s18, 5 }
  0x2a   : > { %699 = vmatpush.bf16.msra.mxu0 %v996_v49  ;;  %724 = vmatpush.bf16.msra.mxu2 %v1132_v51  ;;  %v1035_v17 = vld [vmem:[%s1325_s6 + $0x80] sm:$0xf]  ;;  %v1184_v20 = vld [vmem:[%s1325_s6 + $0x84] sm:$0xf0]  ;;  %v1197_v21 = vld [vmem:[%s1325_s6 + $0xf4] sm:$0xf]  ;;  %v446_v26 = vunpack.c.l.b16 %v394_v15  ;;  %v1108_v28 = vor.u32 %v1202_v19, %v1107_v18  ;;  %v447_v29 = vunpack.c.h.b16 %v394_v15 }
  0x2b   : > { %712 = vmatpush.bf16.msra.mxu1 %v1060_v54  ;;  %v1093_v22 = vld [vmem:[%s1325_s6 + $0xf8] sm:$0xf0]  ;;  %v1213_v23 = vld [vmem:[%s1325_s6 + $0x174] sm:$0xf]  ;;  %v395_v32 = vld [vmem:[%s1320_s27 + $0x8] sm:$0xf]  ;;  %v1036_v33 = vor.u32 %v1184_v20, %v1035_v17 }
  0x2c   : > { %737 = vmatpush.bf16.msra.mxu3 %v1008_v60  ;;  %v1157_v24 = vld [vmem:[%s1325_s6 + $0x178] sm:$0xf0]  ;;  %v1169_v30 = vld [vmem:[%s1325_s6 + $0x14] sm:$0xf]  ;;  %v1096_v34 = vor.u32 %v1197_v21, %v1093_v22  ;;  %v1099_v35 = vld [vmem:[%s1325_s6 + $0x100] sm:$0xf]  ;;  %v449_v42 = vpack.c.b16 %v446_v26, %v446_v26  ;;  %v448_v44 = vunpack.c.l.b16 %v395_v32  ;;  %v1400_v45 = vpack.c.b16 %v447_v29, %v447_v29 }
  0x2d   : > { %v981_v31 = vld [vmem:[%s1325_s6 + $0x18] sm:$0xf0]  ;;  %v1200_v36 = vld [vmem:[%s1325_s6 + $0x104] sm:$0xf0]  ;;  %v1160_v37 = vor.u32 %v1213_v23, %v1157_v24  ;;  %v1195_v38 = vld [vmem:[%s1325_s6 + $0xe4] sm:$0xf] }
  0x2e   : > { %700 = vmatpush.bf16.msra.mxu0 %v988_v61  ;;  %725 = vmatpush.bf16.msra.mxu2 %v1124_v63  ;;  %v1085_v39 = vld [vmem:[%s1325_s6 + $0xe8] sm:$0xf0]  ;;  %v1211_v40 = vld [vmem:[%s1325_s6 + $0x164] sm:$0xf]  ;;  %v984_v43 = vor.u32 %v1169_v30, %v981_v31  ;;  %v1100_v46 = vor.u32 %v1200_v36, %v1099_v35  ;;  %v1193_v51 = vld [vmem:[%s1325_s6 + $0xd4] sm:$0xf]  ;;  %v451_v55 = vpack.c.b16 %v448_v44, %v448_v44 }
  0x2f   : > { %713 = vmatpush.bf16.msra.mxu1 %v1052_v2  ;;  %v1149_v41 = vld [vmem:[%s1325_s6 + $0x168] sm:$0xf0]  ;;  %v1167_v47 = vld [vmem:[%s1325_s6 + $0x4] sm:$0xf]  ;;  %v1088_v49 = vor.u32 %v1195_v38, %v1085_v39  ;;  %v1077_v52 = vld [vmem:[%s1325_s6 + $0xd8] sm:$0xf0] }
  0x30   : > { %738 = vmatpush.bf16.msra.mxu3 %v1000_v10  ;;  %v973_v48 = vld [vmem:[%s1325_s6 + $0x8] sm:$0xf0]  ;;  %v1152_v50 = vor.u32 %v1211_v40, %v1149_v41  ;;  %v1209_v53 = vld [vmem:[%s1325_s6 + $0x154] sm:$0xf]  ;;  %v1141_v54 = vld [vmem:[%s1325_s6 + $0x158] sm:$0xf0]  ;;  %v1080_v57 = vor.u32 %v1193_v51, %v1077_v52 }
  0x31   : > { %v976_v56 = vor.u32 %v1167_v47, %v973_v48  ;;  %v1144_v58 = vor.u32 %v1209_v53, %v1141_v54  ;;  %v1191_v59 = vld [vmem:[%s1325_s6 + $0xc4] sm:$0xf]  ;;  %v1069_v60 = vld [vmem:[%s1325_s6 + $0xc8] sm:$0xf0]  ;;  %v1189_v1 = vld [vmem:[%s1325_s6 + $0xb4] sm:$0xf] }
  0x32   : > { %701 = vmatpush.bf16.msra.mxu0 %v980_v11  ;;  %726 = vmatpush.bf16.msra.mxu2 %v1116_v12  ;;  %v1207_v61 = vld [vmem:[%s1325_s6 + $0x144] sm:$0xf]  ;;  %v1133_v62 = vld [vmem:[%s1325_s6 + $0x148] sm:$0xf0]  ;;  %v1072_v63 = vor.u32 %v1191_v59, %v1069_v60  ;;  %v1061_v2 = vld [vmem:[%s1325_s6 + $0xb8] sm:$0xf0] }
  0x33   : > { %714 = vmatpush.bf16.msra.mxu1 %v1044_v16  ;;  %v1136_v0 = vor.u32 %v1207_v61, %v1133_v62  ;;  %v1205_v3 = vld [vmem:[%s1325_s6 + $0x134] sm:$0xf]  ;;  %v1125_v4 = vld [vmem:[%s1325_s6 + $0x138] sm:$0xf0]  ;;  %v1064_v5 = vor.u32 %v1189_v1, %v1061_v2  ;;  %v1187_v7 = vld [vmem:[%s1325_s6 + $0xa4] sm:$0xf] }
  0x34   : > { %739 = vmatpush.bf16.msra.mxu3 %v992_v25  ;;  %v1128_v6 = vor.u32 %v1205_v3, %v1125_v4  ;;  %v1053_v8 = vld [vmem:[%s1325_s6 + $0xa8] sm:$0xf0]  ;;  %v1203_v9 = vld [vmem:[%s1325_s6 + $0x124] sm:$0xf]  ;;  %v1185_v13 = vld [vmem:[%s1325_s6 + $0x94] sm:$0xf] }
  0x35   : > { %v1117_v10 = vld [vmem:[%s1325_s6 + $0x128] sm:$0xf0]  ;;  %v1056_v11 = vor.u32 %v1187_v7, %v1053_v8  ;;  %v1045_v14 = vld [vmem:[%s1325_s6 + $0x98] sm:$0xf0]  ;;  %v1201_v15 = vld [vmem:[%s1325_s6 + $0x114] sm:$0xf] }
  0x36   : > { %702 = vmatpush.bf16.msra.mxu0 %v972_v27  ;;  %727 = vmatpush.bf16.msra.mxu2 %v1108_v28  ;;  %v1120_v12 = vor.u32 %v1203_v9, %v1117_v10  ;;  %v1109_v16 = vld [vmem:[%s1325_s6 + $0x118] sm:$0xf0]  ;;  %v1048_v17 = vor.u32 %v1185_v13, %v1045_v14  ;;  %v1183_v19 = vld [vmem:[%s1325_s6 + $0x84] sm:$0xf]  ;;  %v1037_v20 = vld [vmem:[%s1325_s6 + $0x88] sm:$0xf0] }
  0x37   : > { %715 = vmatpush.bf16.msra.mxu1 %v1036_v33  ;;  %v1112_v18 = vor.u32 %v1201_v15, %v1109_v16  ;;  %v1199_v21 = vld [vmem:[%s1325_s6 + $0x104] sm:$0xf]  ;;  %v1101_v22 = vld [vmem:[%s1325_s6 + $0x108] sm:$0xf0]  ;;  %v1040_v23 = vor.u32 %v1183_v19, %v1037_v20 }
  0x38   : > { %740 = vmatpush.bf16.msra.mxu3 %v984_v43  ;;  %v1104_v24 = vor.u32 %v1199_v21, %v1101_v22  ;;  %v392_v30 = vld [vmem:[#allocation2] sm:$0xff]  ;;  %v393_v40 = vld [vmem:[#allocation2 + $0x8] sm:$0xff] }
  0x39   : > { %703 = vmatmul.bf16.vlgmr.msra.gmra.mxu0 %v449_v42 }
  0x3a   : > { %747 = vmatpush.bf16.msrb.mxu0 %v1096_v34  ;;  %716 = vmatmul.bf16.vlgmr.msra.gmra.mxu1 %v1400_v45 }
  0x3b   : > { %760 = vmatpush.bf16.msrb.mxu1 %v1160_v37  ;;  %728 = vmatpush.bf16.msra.mxu2 %v1100_v46 }
  0x3c   : > { %741 = vmatpush.bf16.msra.mxu3 %v976_v56 }
  0x3e   : > { %748 = vmatpush.bf16.msrb.mxu0 %v1088_v49  ;;  %729 = vmatmul.bf16.vlgmr.msra.gmra.mxu2 %v451_v55 }
  0x3f   : > { %761 = vmatpush.bf16.msrb.mxu1 %v1152_v50  ;;  %742 = vmatmul.bf16.vlgmr.msra.gmra.mxu3 %v449_v42 }
  0x42   : > { %749 = vmatpush.bf16.msrb.mxu0 %v1080_v57 }
  0x43   : > { %762 = vmatpush.bf16.msrb.mxu1 %v1144_v58 }
  0x46   : > { %750 = vmatpush.bf16.msrb.mxu0 %v1072_v63 }
  0x47   : > { %763 = vmatpush.bf16.msrb.mxu1 %v1136_v0 }
  0x4a   : > { %751 = vmatpush.bf16.msrb.mxu0 %v1064_v5 }
  0x4b   : > { %764 = vmatpush.bf16.msrb.mxu1 %v1128_v6 }
  0x4e   : > { %752 = vmatpush.bf16.msrb.mxu0 %v1056_v11 }
  0x4f   : > { %765 = vmatpush.bf16.msrb.mxu1 %v1120_v12 }
  0x52   : > { %753 = vmatpush.bf16.msrb.mxu0 %v1048_v17 }
  0x53   : > { %766 = vmatpush.bf16.msrb.mxu1 %v1112_v18 }
  0x56   : > { %754 = vmatpush.bf16.msrb.mxu0 %v1040_v23 }
  0x57   : > { %767 = vmatpush.bf16.msrb.mxu1 %v1104_v24 }
  0x59   : > { %755 = vmatmul.bf16.vlgmr.msrb.gmra.mxu0 %v1400_v45 }
  0x5a   : > { %768 = vmatmul.bf16.vlgmr.msrb.gmra.mxu1 %v451_v55 }
  0xb6   : > { %v704_v25 = vpop.f32.mrf.mxu0 }
  0xb7   : > { %v717_v26 = vpop.f32.mrf.mxu1 }
  0xb8   : > { %v718_v27 = vadd.f32 %v717_v26, %v704_v25 }
  0xbe   : > { %v706_v28 = vpop.f32.mrf.mxu0 }
  0xbf   : > { %v719_v29 = vpop.f32.mrf.mxu1 }
  0xc1   : > { %v730_v31 = vpop.f32.mrf.mxu2 }
  0xc2   : > { %v731_v32 = vadd.f32 %v730_v31, %v718_v27  ;;  %v743_v34 = vpop.f32.mrf.mxu3 }
  0xc4   : > { %v773_v33 = vadd.f32 %v731_v32, %v392_v30 }
  0xc6   : > { %775 = vst [vmem:[#allocation2] sm:$0xff] %v773_v33 }
  0xc9   : > { %v732_v35 = vpop.f32.mrf.mxu2 }
  0xca   : > { %v745_v36 = vpop.f32.mrf.mxu3 }
  0xd6   : > { %v756_v37 = vpop.f32.mrf.mxu0 }
  0xd7   : > { %v757_v38 = vadd.f32 %v756_v37, %v743_v34  ;;  %v769_v39 = vpop.f32.mrf.mxu1 }
  0xd9   : > { %v770_v41 = vadd.f32 %v769_v39, %v757_v38 }
  0xdb   : > { %v774_v42 = vadd.f32 %v770_v41, %v393_v40  ;;  %780 = sbr.rel (%p1161_p7) target bundleno = 240 (0xf0), region = 48 }
  0xdd   : > { %776 = vst [vmem:[#allocation2 + $0x8] sm:$0xff] %v774_v42 }
  0xde   : > { %v758_v43 = vpop.f32.mrf.mxu0 }
  0xdf   : > { %v771_v44 = vpop.f32.mrf.mxu1 }
  0xe0   : > { %v781_v45 = vld [vmem:[#allocation2] sm:$0xff] }
  0xe1   : > { %v783_v47 = vld [vmem:[%s1454_s2] sm:$0x3] }
  0xe2   : > { %v785_v48 = vperm.slane %v783_v47, 0  ;;  %v786_v49 = vperm.slane %v783_v47, 1  ;;  %v791_v50 = vld [vmem:[%s1455_s3] sm:$0x3] }
  0xe3   : > { %v799_v51 = vld [vmem:[%s1456_s4] sm:$0xff]  ;;  %v793_v52 = vperm.slane %v791_v50, 0  ;;  %v794_v53 = vperm.slane %v791_v50, 1 }
  0xe4   : > { %v782_v46 = vld [vmem:[#allocation2 + $0x8] sm:$0xff]  ;;  %v789_v54 = vmul.f32 %v785_v48, %v781_v45  ;;  %v800_v56 = vunpack.c.l.bf16 %v799_v51  ;;  %v801_v57 = vunpack.c.h.bf16 %v799_v51 }
  0xe5   : > { %v790_v55 = vmul.f32 %v786_v49, %v782_v46 }
  0xe6   : > { %v797_v58 = vadd.f32 %v793_v52, %v789_v54 }
  0xe7   : > { %v798_v59 = vadd.f32 %v794_v53, %v790_v55 }
  0xe8   : > { %v802_v60 = vadd.f32 %v800_v56, %v797_v58 }
  0xe9   : > { %v803_v61 = vadd.f32 %v801_v57, %v798_v59 }
  0xea   : > { %v804_v62 = vmax.f32 %v802_v60, 0.0 }
  0xeb   : > { %v805_v63 = vmax.f32 %v803_v61, 0.0 }
  0xed   : > { %v806_v0 = vpack.c.bf16 %v805_v63, %v804_v62 }
  0xef   : > { %807 = vst [vmem:[%s1457_s5] sm:$0xff] %v806_v0 }
  0xf0 PF: > { %s15_s20 = sadd.s32 1, %s1262_s20   ;;  %s1458_s18 = smov %s1258_s19 }
  0xf1   : > { %p12_p8 = scmp.ge.s32.totalorder %s15_s20, 8   ;;  %s1459_s19 = smov %s1461_s21 }
  0xf3   :  { %14 = sbr.rel (!%p12_p8) target bundleno = 2 (0x2), region = 90 }

// kernel: resnet_forward.25
= control target key start
LH: loop header
LB: loop body
LE: loop exit
PB: predicated region body
PF: predicated region fallthrough
CT: control target
= control target key end

     0   :  { %s1481_s15 = smov 0   ;;  %s1483_s16 = smov 0   ;;  %s1805_s0 = inlined_call_operand.vmem [shape: bf16[8,2304], index: 0, kind: input, shape index: {}]   ;;  %s1806_s1 = inlined_call_operand.vmem [shape: bf16[2304,512], index: 1, kind: input, shape index: {}]   ;;  %s1807_s2 = inlined_call_operand.vmem [shape: f32[1,512], index: 2, kind: input, shape index: {}]   ;;  %s1808_s3 = inlined_call_operand.vmem [shape: f32[1,512], index: 3, kind: input, shape index: {}]   ;;  %s1809_s4 = inlined_call_operand.vmem [shape: bf16[8,512], index: 4, kind: output, shape index: {}]  }
   0x1   :  { %s1485_s17 = smov 0   ;;  %s1487_s18 = smov 0  }
   0x2   :  { %s1489_s19 = smov 0   ;;  %s1491_s20 = smov 0  }
   0x3   :  { %s1493_s21 = smov 0  }
   0x4 LB: > { %s26_s22 = sadd.s32 1, %s1445_s19  ;;  %s29_s23 = sadd.s32 1, %s1449_s20  ;;  %s1453_s21 = sphi %s1493_s21, %s14_s21   ;;  %s1449_s20 = sphi %s1491_s20, %s1815_s20   ;;  %s1445_s19 = sphi %s1489_s19, %s1814_s19   ;;  %s1441_s18 = sphi %s1487_s18, %s1813_s18   ;;  %s1437_s17 = sphi %s1485_s17, %s1812_s17   ;;  %s1433_s16 = sphi %s1483_s16, %s1811_s16   ;;  %s1429_s15 = sphi %s1481_s15, %s1810_s15  }
   0x5   : > { %p27_p0 = scmp.ge.s32.totalorder %s26_s22, 6  ;;  %p77_p1 = scmp.ne.s32.totalorder %s1433_s16, %s1429_s15 }
   0x6   : > { %p78_p2 = scmp.eq.s32.totalorder %s1453_s21, 0  ;;  %s70_s27 = sadd.s32 1, %s1433_s16 }
   0x7   : > { %s1817_s22 = smov (%p27_p0, %s26_s22), 0  ;;  %s1819_s23 = smov (!%p27_p0, %s29_s23), %s1449_s20 }
   0x8   : > { %p79_p3 = por %p78_p2, %p77_p1  ;;  %p31_p4 = scmp.ge.s32.totalorder %s1819_s23, 2 }
   0x9   : > { %s65_s24 = ssub.s32 %s1445_s19, %s1817_s22  ;;  %p1085_p6 = scmp.ge.s32.totalorder %s1453_s21, 12 }
   0xa   : > { %s1821_s23 = smov (%p31_p4, %s1819_s23), 0 }
   0xb   : > { %s66_s25 = ssub.s32 %s1449_s20, %s1821_s23  ;;  %183 = sbr.rel (%p1085_p6) target bundleno = 72 (0x48), region = 16 }
   0xc   : > { %s67_s26 = sor.u32 %s66_s25, %s65_s24 }
   0xd   : > { %p68_p5 = scmp.eq.s32.totalorder %s67_s26, 0 }
   0xf   : > { %s1532_s28 = scalar_select %p68_p5, %s1433_s16, %s70_s27  }
  0x10   : > { %199 = sbr.rel (!%p79_p3) target bundleno = 72 (0x48), region = 24  ;;  %s201_s29 = sand.u32 (%p79_p3), 1, %s1433_s16  }
  0x11   : > { %s1340_s30 = smul.u32 (%p79_p3), 384, %s201_s29  ;;  %s1086_s5 = sshll.u32 (%p79_p3), %s1449_s20, 1 }
  0x12   : > { %s1291_s6 = smul.u32 (%p79_p3), 192, %s1445_s19 }
  0x13   : > { %s1546_s12 = scalar_lea.vmem (%p79_p3), [#allocation3], %s1340_s30 }
  0x14   : > { %s207_s7 = sadd.s32 (%p79_p3), %s1291_s6, %s1086_s5 }
  0x15   : > { %s1088_s8 = sshll.u32 %s207_s7, 2 }
  0x16   : > { %s1541_s11 = scalar_lea.vmem %s1806_s1, %s1088_s8 }
  0x17   : > { %v332_v0 = vld [vmem:[%s1541_s11] sm:$0xff]  ;;  %v334_v1 = vld [vmem:[%s1541_s11 + $0x10] sm:$0xff] }
  0x18   : > { %v336_v2 = vld [vmem:[%s1541_s11 + $0x20] sm:$0xff]  ;;  %333 = vst [vmem:[%s1546_s12] sm:$0xff] %v332_v0  ;;  %v338_v3 = vld [vmem:[%s1541_s11 + $0x30] sm:$0xff] }
  0x19   : > { %335 = vst [vmem:[%s1546_s12 + $0x8] sm:$0xff] %v334_v1  ;;  %v340_v4 = vld [vmem:[%s1541_s11 + $0x40] sm:$0xff]  ;;  %v342_v5 = vld [vmem:[%s1541_s11 + $0x50] sm:$0xff] }
  0x1a   : > { %337 = vst [vmem:[%s1546_s12 + $0x10] sm:$0xff] %v336_v2  ;;  %v344_v6 = vld [vmem:[%s1541_s11 + $0x60] sm:$0xff]  ;;  %v346_v7 = vld [vmem:[%s1541_s11 + $0x70] sm:$0xff] }
  0x1b   : > { %339 = vst [vmem:[%s1546_s12 + $0x18] sm:$0xff] %v338_v3  ;;  %v348_v8 = vld [vmem:[%s1541_s11 + $0x80] sm:$0xff]  ;;  %v350_v9 = vld [vmem:[%s1541_s11 + $0x90] sm:$0xff] }
  0x1c   : > { %341 = vst [vmem:[%s1546_s12 + $0x20] sm:$0xff] %v340_v4  ;;  %v352_v10 = vld [vmem:[%s1541_s11 + $0xa0] sm:$0xff]  ;;  %v354_v11 = vld [vmem:[%s1541_s11 + $0xb0] sm:$0xff] }
  0x1d   : > { %343 = vst [vmem:[%s1546_s12 + $0x28] sm:$0xff] %v342_v5  ;;  %v356_v12 = vld [vmem:[%s1541_s11 + $0xc0] sm:$0xff]  ;;  %v358_v13 = vld [vmem:[%s1541_s11 + $0xd0] sm:$0xff] }
  0x1e   : > { %345 = vst [vmem:[%s1546_s12 + $0x30] sm:$0xff] %v344_v6  ;;  %v360_v14 = vld [vmem:[%s1541_s11 + $0xe0] sm:$0xff]  ;;  %v362_v15 = vld [vmem:[%s1541_s11 + $0xf0] sm:$0xff] }
  0x1f   : > { %347 = vst [vmem:[%s1546_s12 + $0x38] sm:$0xff] %v346_v7  ;;  %v364_v16 = vld [vmem:[%s1541_s11 + $0x100] sm:$0xff]  ;;  %v366_v17 = vld [vmem:[%s1541_s11 + $0x110] sm:$0xff] }
  0x20   : > { %349 = vst [vmem:[%s1546_s12 + $0x40] sm:$0xff] %v348_v8  ;;  %v368_v18 = vld [vmem:[%s1541_s11 + $0x120] sm:$0xff]  ;;  %v370_v19 = vld [vmem:[%s1541_s11 + $0x130] sm:$0xff] }
  0x21   : > { %351 = vst [vmem:[%s1546_s12 + $0x48] sm:$0xff] %v350_v9  ;;  %v372_v20 = vld [vmem:[%s1541_s11 + $0x140] sm:$0xff]  ;;  %v374_v21 = vld [vmem:[%s1541_s11 + $0x150] sm:$0xff] }
  0x22   : > { %353 = vst [vmem:[%s1546_s12 + $0x50] sm:$0xff] %v352_v10  ;;  %v376_v22 = vld [vmem:[%s1541_s11 + $0x160] sm:$0xff]  ;;  %v378_v23 = vld [vmem:[%s1541_s11 + $0x170] sm:$0xff] }
  0x23   : > { %355 = vst [vmem:[%s1546_s12 + $0x58] sm:$0xff] %v354_v11  ;;  %v380_v24 = vld [vmem:[%s1541_s11 + $0x180] sm:$0xff]  ;;  %v382_v25 = vld [vmem:[%s1541_s11 + $0x190] sm:$0xff] }
  0x24   : > { %357 = vst [vmem:[%s1546_s12 + $0x60] sm:$0xff] %v356_v12  ;;  %v384_v26 = vld [vmem:[%s1541_s11 + $0x1a0] sm:$0xff]  ;;  %v386_v27 = vld [vmem:[%s1541_s11 + $0x1b0] sm:$0xff] }
  0x25   : > { %359 = vst [vmem:[%s1546_s12 + $0x68] sm:$0xff] %v358_v13  ;;  %v388_v28 = vld [vmem:[%s1541_s11 + $0x1c0] sm:$0xff]  ;;  %v390_v29 = vld [vmem:[%s1541_s11 + $0x1d0] sm:$0xff] }
  0x26   : > { %361 = vst [vmem:[%s1546_s12 + $0x70] sm:$0xff] %v360_v14  ;;  %v392_v30 = vld [vmem:[%s1541_s11 + $0x1e0] sm:$0xff]  ;;  %v394_v31 = vld [vmem:[%s1541_s11 + $0x1f0] sm:$0xff] }
  0x27   : > { %363 = vst [vmem:[%s1546_s12 + $0x78] sm:$0xff] %v362_v15  ;;  %v396_v32 = vld [vmem:[%s1541_s11 + $0x200] sm:$0xff]  ;;  %v398_v33 = vld [vmem:[%s1541_s11 + $0x210] sm:$0xff] }
  0x28   : > { %365 = vst [vmem:[%s1546_s12 + $0x80] sm:$0xff] %v364_v16  ;;  %v400_v34 = vld [vmem:[%s1541_s11 + $0x220] sm:$0xff]  ;;  %v402_v35 = vld [vmem:[%s1541_s11 + $0x230] sm:$0xff] }
  0x29   : > { %367 = vst [vmem:[%s1546_s12 + $0x88] sm:$0xff] %v366_v17  ;;  %v404_v36 = vld [vmem:[%s1541_s11 + $0x240] sm:$0xff]  ;;  %v406_v37 = vld [vmem:[%s1541_s11 + $0x250] sm:$0xff] }
  0x2a   : > { %369 = vst [vmem:[%s1546_s12 + $0x90] sm:$0xff] %v368_v18  ;;  %v408_v38 = vld [vmem:[%s1541_s11 + $0x260] sm:$0xff]  ;;  %v410_v39 = vld [vmem:[%s1541_s11 + $0x270] sm:$0xff] }
  0x2b   : > { %371 = vst [vmem:[%s1546_s12 + $0x98] sm:$0xff] %v370_v19  ;;  %v412_v40 = vld [vmem:[%s1541_s11 + $0x280] sm:$0xff]  ;;  %v414_v41 = vld [vmem:[%s1541_s11 + $0x290] sm:$0xff] }
  0x2c   : > { %373 = vst [vmem:[%s1546_s12 + $0xa0] sm:$0xff] %v372_v20  ;;  %v416_v42 = vld [vmem:[%s1541_s11 + $0x2a0] sm:$0xff]  ;;  %v418_v43 = vld [vmem:[%s1541_s11 + $0x2b0] sm:$0xff] }
  0x2d   : > { %375 = vst [vmem:[%s1546_s12 + $0xa8] sm:$0xff] %v374_v21  ;;  %v420_v44 = vld [vmem:[%s1541_s11 + $0x2c0] sm:$0xff]  ;;  %v422_v45 = vld [vmem:[%s1541_s11 + $0x2d0] sm:$0xff] }
  0x2e   : > { %377 = vst [vmem:[%s1546_s12 + $0xb0] sm:$0xff] %v376_v22  ;;  %v424_v46 = vld [vmem:[%s1541_s11 + $0x2e0] sm:$0xff]  ;;  %v426_v47 = vld [vmem:[%s1541_s11 + $0x2f0] sm:$0xff] }
  0x2f   : > { %379 = vst [vmem:[%s1546_s12 + $0xb8] sm:$0xff] %v378_v23 }
  0x30   : > { %381 = vst [vmem:[%s1546_s12 + $0xc0] sm:$0xff] %v380_v24 }
  0x31   : > { %383 = vst [vmem:[%s1546_s12 + $0xc8] sm:$0xff] %v382_v25 }
  0x32   : > { %385 = vst [vmem:[%s1546_s12 + $0xd0] sm:$0xff] %v384_v26 }
  0x33   : > { %387 = vst [vmem:[%s1546_s12 + $0xd8] sm:$0xff] %v386_v27 }
  0x34   : > { %389 = vst [vmem:[%s1546_s12 + $0xe0] sm:$0xff] %v388_v28 }
  0x35   : > { %391 = vst [vmem:[%s1546_s12 + $0xe8] sm:$0xff] %v390_v29 }
  0x36   : > { %393 = vst [vmem:[%s1546_s12 + $0xf0] sm:$0xff] %v392_v30 }
  0x37   : > { %395 = vst [vmem:[%s1546_s12 + $0xf8] sm:$0xff] %v394_v31 }
  0x38   : > { %397 = vst [vmem:[%s1546_s12 + $0x100] sm:$0xff] %v396_v32 }
  0x39   : > { %399 = vst [vmem:[%s1546_s12 + $0x108] sm:$0xff] %v398_v33 }
  0x3a   : > { %401 = vst [vmem:[%s1546_s12 + $0x110] sm:$0xff] %v400_v34 }
  0x3b   : > { %403 = vst [vmem:[%s1546_s12 + $0x118] sm:$0xff] %v402_v35 }
  0x3c   : > { %405 = vst [vmem:[%s1546_s12 + $0x120] sm:$0xff] %v404_v36 }
  0x3d   : > { %407 = vst [vmem:[%s1546_s12 + $0x128] sm:$0xff] %v406_v37 }
  0x3e   : > { %409 = vst [vmem:[%s1546_s12 + $0x130] sm:$0xff] %v408_v38 }
  0x3f   : > { %411 = vst [vmem:[%s1546_s12 + $0x138] sm:$0xff] %v410_v39 }
  0x40   : > { %413 = vst [vmem:[%s1546_s12 + $0x140] sm:$0xff] %v412_v40 }
  0x41   : > { %415 = vst [vmem:[%s1546_s12 + $0x148] sm:$0xff] %v414_v41 }
  0x42   : > { %417 = vst [vmem:[%s1546_s12 + $0x150] sm:$0xff] %v416_v42 }
  0x43   : > { %419 = vst [vmem:[%s1546_s12 + $0x158] sm:$0xff] %v418_v43 }
  0x44   : > { %421 = vst [vmem:[%s1546_s12 + $0x160] sm:$0xff] %v420_v44 }
  0x45   : > { %423 = vst [vmem:[%s1546_s12 + $0x168] sm:$0xff] %v422_v45 }
  0x46   : > { %425 = vst [vmem:[%s1546_s12 + $0x170] sm:$0xff] %v424_v46 }
  0x47   : > { %427 = vst [vmem:[%s1546_s12 + $0x178] sm:$0xff] %v426_v47 }
  0x48 PF: > { %p1089_p7 = scmp.ge.s32.totalorder %s1453_s21, 1  ;;  %p448_p8 = scmp.lt.s32.totalorder %s1453_s21, 13 }
  0x4a   : > { %p449_p9 = pnand %p1089_p7, %p448_p8 }
  0x4b   : > { %s455_s13 = sand.u32 (!%p449_p9), 1, %s1429_s15   ;;  %s501_s14 = smul.u32 (!%p449_p9), 3, %s1437_s17 }
  0x4c   : > { %452 = sbr.rel (%p449_p9) target bundleno = 307 (0x133), region = 70  ;;  %s1091_s25 = sshll.u32 (!%p449_p9), %s1441_s18, 1 }
  0x4d   : > { %s1341_s24 = smul.u32 (!%p449_p9), 384, %s455_s13  ;;  %p504_p10 = scmp.lt.s32.totalorder (!%p449_p9), %s501_s14, 17 }
  0x4e   : > { %p514_p11 = scmp.lt.s32.totalorder (!%p449_p9), %s1091_s25, 3  ;;  %p1095_p12 = scmp.ne.s32.totalorder (!%p449_p9), %s1437_s17, 0 }
  0x4f   : > { %s1667_s13 = scalar_lea.vmem (!%p449_p9), [#allocation3], %s1341_s24 }
  0x51   : > { %s1823_s14 = smov (!%p504_p10, %s501_s14), 17  ;;  %s1825_s25 = smov (!%p514_p11, %s1091_s25), 3 }
  0x52   : > { %s1090_s26 = sshll.u32 %s1823_s14, 2  ;;  %s516_s15 = scalar_lea.vmem %s1807_s2, %s1825_s25 }
  0x53   : > { %s1651_s30 = scalar_lea.vmem %s1805_s0, %s1090_s26  ;;  %s521_s8 = scalar_lea.vmem %s1808_s3, %s1825_s25 }
  0x54   : > { %s1094_s9 = sshll.u32 %s1825_s25, 2  ;;  %536 = sbr.rel (%p1095_p12) target bundleno = 92 (0x5c), region = 78 }
  0x55   : > { %s1665_s12 = scalar_lea.vmem %s1809_s4, %s1094_s9 }
  0x59   : > { %v1455_v48 = vmov 0.0  }
  0x5a   : > { %537 = vst [vmem:[#allocation2] sm:$0xff] %v1455_v48 }
  0x5b   : > { %538 = vst [vmem:[#allocation2 + $0x8] sm:$0xff] %v1455_v48 }
  0x5c PF: > { %v1154_v49 = vld [vmem:[%s1667_s13 + $0x70] sm:$0xf]  ;;  %v1307_v50 = vld [vmem:[%s1667_s13 + $0x74] sm:$0xf0]  ;;  %v1146_v54 = vld [vmem:[%s1667_s13 + $0x60] sm:$0xf] }
  0x5d   : > { %v1218_v51 = vld [vmem:[%s1667_s13 + $0xf0] sm:$0xf]  ;;  %v1155_v52 = vor.u32 %v1307_v50, %v1154_v49  ;;  %v1323_v53 = vld [vmem:[%s1667_s13 + $0xf4] sm:$0xf0]  ;;  %v1305_v55 = vld [vmem:[%s1667_s13 + $0x64] sm:$0xf0] }
  0x5e   : > { %v1219_v56 = vor.u32 %v1323_v53, %v1218_v51  ;;  %v1210_v57 = vld [vmem:[%s1667_s13 + $0xe0] sm:$0xf]  ;;  %v1321_v58 = vld [vmem:[%s1667_s13 + $0xe4] sm:$0xf0]  ;;  %v1147_v59 = vor.u32 %v1305_v55, %v1146_v54  ;;  %v1138_v60 = vld [vmem:[%s1667_s13 + $0x50] sm:$0xf] }
  0x5f   : > { %842 = vmatpush.bf16.msra.mxu0 %v1155_v52  ;;  %v1211_v61 = vor.u32 %v1321_v58, %v1210_v57  ;;  %v1303_v62 = vld [vmem:[%s1667_s13 + $0x54] sm:$0xf0]  ;;  %v1282_v63 = vld [vmem:[%s1667_s13 + $0x170] sm:$0xf]  ;;  %v1274_v4 = vld [vmem:[%s1667_s13 + $0x160] sm:$0xf] }
  0x60   : > { %855 = vmatpush.bf16.msra.mxu1 %v1219_v56  ;;  %v1339_v0 = vld [vmem:[%s1667_s13 + $0x174] sm:$0xf0]  ;;  %v1202_v1 = vld [vmem:[%s1667_s13 + $0xd0] sm:$0xf]  ;;  %v1337_v5 = vld [vmem:[%s1667_s13 + $0x164] sm:$0xf0]  ;;  %v1139_v7 = vor.u32 %v1303_v62, %v1138_v60 }
  0x61   : > { %v1319_v2 = vld [vmem:[%s1667_s13 + $0xd4] sm:$0xf0]  ;;  %v1283_v3 = vor.u32 %v1339_v0, %v1282_v63  ;;  %v1306_v6 = vld [vmem:[%s1667_s13 + $0x74] sm:$0xf]  ;;  %v1130_v8 = vld [vmem:[%s1667_s13 + $0x40] sm:$0xf]  ;;  %v1275_v10 = vor.u32 %v1337_v5, %v1274_v4 }
  0x62   : > { %v1301_v9 = vld [vmem:[%s1667_s13 + $0x44] sm:$0xf0]  ;;  %v1156_v11 = vld [vmem:[%s1667_s13 + $0x78] sm:$0xf0]  ;;  %v1203_v12 = vor.u32 %v1319_v2, %v1202_v1  ;;  %v1194_v13 = vld [vmem:[%s1667_s13 + $0xc0] sm:$0xf] }
  0x63   : > { %843 = vmatpush.bf16.msra.mxu0 %v1147_v59  ;;  %868 = vmatpush.bf16.msra.mxu2 %v1283_v3  ;;  %v1317_v14 = vld [vmem:[%s1667_s13 + $0xc4] sm:$0xf0]  ;;  %v1159_v15 = vor.u32 %v1306_v6, %v1156_v11  ;;  %v1266_v16 = vld [vmem:[%s1667_s13 + $0x150] sm:$0xf]  ;;  %v1335_v17 = vld [vmem:[%s1667_s13 + $0x154] sm:$0xf0]  ;;  %v1131_v21 = vor.u32 %v1301_v9, %v1130_v8 }
  0x64   : > { %856 = vmatpush.bf16.msra.mxu1 %v1211_v61  ;;  %v1304_v18 = vld [vmem:[%s1667_s13 + $0x64] sm:$0xf]  ;;  %v1148_v19 = vld [vmem:[%s1667_s13 + $0x68] sm:$0xf0]  ;;  %v1122_v22 = vld [vmem:[%s1667_s13 + $0x30] sm:$0xf]  ;;  %v1267_v24 = vor.u32 %v1335_v17, %v1266_v16  ;;  %v1195_v26 = vor.u32 %v1317_v14, %v1194_v13 }
  0x65   : > { %881 = vmatpush.bf16.msra.mxu3 %v1159_v15  ;;  %v1151_v20 = vor.u32 %v1304_v18, %v1148_v19  ;;  %v1299_v23 = vld [vmem:[%s1667_s13 + $0x34] sm:$0xf0]  ;;  %v1258_v25 = vld [vmem:[%s1667_s13 + $0x140] sm:$0xf]  ;;  %v1333_v27 = vld [vmem:[%s1667_s13 + $0x144] sm:$0xf0] }
  0x66   : > { %v1302_v28 = vld [vmem:[%s1667_s13 + $0x54] sm:$0xf]  ;;  %v1140_v29 = vld [vmem:[%s1667_s13 + $0x58] sm:$0xf0]  ;;  %v1186_v30 = vld [vmem:[%s1667_s13 + $0xb0] sm:$0xf]  ;;  %v1123_v33 = vor.u32 %v1299_v23, %v1122_v22  ;;  %v1259_v35 = vor.u32 %v1333_v27, %v1258_v25 }
  0x67   : > { %844 = vmatpush.bf16.msra.mxu0 %v1139_v7  ;;  %869 = vmatpush.bf16.msra.mxu2 %v1275_v10  ;;  %v1315_v31 = vld [vmem:[%s1667_s13 + $0xb4] sm:$0xf0]  ;;  %v1143_v32 = vor.u32 %v1302_v28, %v1140_v29  ;;  %v1114_v34 = vld [vmem:[%s1667_s13 + $0x20] sm:$0xf]  ;;  %v1300_v36 = vld [vmem:[%s1667_s13 + $0x44] sm:$0xf] }
  0x68   : > { %857 = vmatpush.bf16.msra.mxu1 %v1203_v12  ;;  %v1132_v37 = vld [vmem:[%s1667_s13 + $0x48] sm:$0xf0]  ;;  %v1187_v38 = vor.u32 %v1315_v31, %v1186_v30  ;;  %v1297_v39 = vld [vmem:[%s1667_s13 + $0x24] sm:$0xf0]  ;;  %v1250_v40 = vld [vmem:[%s1667_s13 + $0x130] sm:$0xf] }
  0x69   : > { %882 = vmatpush.bf16.msra.mxu3 %v1151_v20  ;;  %v1331_v41 = vld [vmem:[%s1667_s13 + $0x134] sm:$0xf0]  ;;  %v1178_v42 = vld [vmem:[%s1667_s13 + $0xa0] sm:$0xf]  ;;  %v1313_v43 = vld [vmem:[%s1667_s13 + $0xa4] sm:$0xf0]  ;;  %v1135_v44 = vor.u32 %v1300_v36, %v1132_v37  ;;  %v1115_v45 = vor.u32 %v1297_v39, %v1114_v34 }
  0x6a   : > { %v1106_v46 = vld [vmem:[%s1667_s13 + $0x10] sm:$0xf]  ;;  %v1251_v47 = vor.u32 %v1331_v41, %v1250_v40  ;;  %v1298_v48 = vld [vmem:[%s1667_s13 + $0x34] sm:$0xf]  ;;  %v1124_v49 = vld [vmem:[%s1667_s13 + $0x38] sm:$0xf0]  ;;  %v1179_v50 = vor.u32 %v1313_v43, %v1178_v42 }
  0x6b   : > { %845 = vmatpush.bf16.msra.mxu0 %v1131_v21  ;;  %870 = vmatpush.bf16.msra.mxu2 %v1267_v24  ;;  %v1295_v51 = vld [vmem:[%s1667_s13 + $0x14] sm:$0xf0]  ;;  %v1242_v52 = vld [vmem:[%s1667_s13 + $0x120] sm:$0xf]  ;;  %v1329_v53 = vld [vmem:[%s1667_s13 + $0x124] sm:$0xf0]  ;;  %v1127_v58 = vor.u32 %v1298_v48, %v1124_v49 }
  0x6c   : > { %858 = vmatpush.bf16.msra.mxu1 %v1195_v26  ;;  %v1170_v54 = vld [vmem:[%s1667_s13 + $0x90] sm:$0xf]  ;;  %v1311_v55 = vld [vmem:[%s1667_s13 + $0x94] sm:$0xf0]  ;;  %v1098_v56 = vld [vmem:[%s1667_s13] sm:$0xf]  ;;  %v1107_v59 = vor.u32 %v1295_v51, %v1106_v46  ;;  %v1243_v60 = vor.u32 %v1329_v53, %v1242_v52 }
  0x6d   : > { %883 = vmatpush.bf16.msra.mxu3 %v1143_v32  ;;  %v1293_v57 = vld [vmem:[%s1667_s13 + $0x4] sm:$0xf0]  ;;  %v1296_v61 = vld [vmem:[%s1667_s13 + $0x24] sm:$0xf]  ;;  %v1116_v62 = vld [vmem:[%s1667_s13 + $0x28] sm:$0xf0]  ;;  %v1171_v0 = vor.u32 %v1311_v55, %v1170_v54 }
  0x6e   : > { %v541_v63 = vld [vmem:[%s1651_s30] sm:$0xff]  ;;  %v1162_v1 = vld [vmem:[%s1667_s13 + $0x80] sm:$0xf]  ;;  %v1327_v3 = vld [vmem:[%s1667_s13 + $0x114] sm:$0xf0]  ;;  %v1119_v9 = vor.u32 %v1296_v61, %v1116_v62  ;;  %v1099_v11 = vor.u32 %v1293_v57, %v1098_v56  ;;  %p1288_p13 = scmp.ne.s32.totalorder %s1437_s17, 5 }
  0x6f   : > { %846 = vmatpush.bf16.msra.mxu0 %v1123_v33  ;;  %871 = vmatpush.bf16.msra.mxu2 %v1259_v35  ;;  %v1234_v2 = vld [vmem:[%s1667_s13 + $0x110] sm:$0xf]  ;;  %v1309_v4 = vld [vmem:[%s1667_s13 + $0x84] sm:$0xf0]  ;;  %v1322_v5 = vld [vmem:[%s1667_s13 + $0xf4] sm:$0xf]  ;;  %v593_v10 = vunpack.c.l.b16 %v541_v63  ;;  %v594_v13 = vunpack.c.h.b16 %v541_v63 }
  0x70   : > { %859 = vmatpush.bf16.msra.mxu1 %v1187_v38  ;;  %v1220_v6 = vld [vmem:[%s1667_s13 + $0xf8] sm:$0xf0]  ;;  %v1338_v7 = vld [vmem:[%s1667_s13 + $0x174] sm:$0xf]  ;;  %v1235_v12 = vor.u32 %v1327_v3, %v1234_v2  ;;  %v542_v16 = vld [vmem:[%s1651_s30 + $0x8] sm:$0xf]  ;;  %v1163_v17 = vor.u32 %v1309_v4, %v1162_v1 }
  0x71   : > { %884 = vmatpush.bf16.msra.mxu3 %v1135_v44  ;;  %v1284_v8 = vld [vmem:[%s1667_s13 + $0x178] sm:$0xf0]  ;;  %v1294_v14 = vld [vmem:[%s1667_s13 + $0x14] sm:$0xf]  ;;  %v1223_v18 = vor.u32 %v1322_v5, %v1220_v6  ;;  %v1226_v19 = vld [vmem:[%s1667_s13 + $0x100] sm:$0xf]  ;;  %v596_v26 = vpack.c.b16 %v593_v10, %v593_v10  ;;  %v595_v28 = vunpack.c.l.b16 %v542_v16  ;;  %v1742_v29 = vpack.c.b16 %v594_v13, %v594_v13 }
  0x72   : > { %v1108_v15 = vld [vmem:[%s1667_s13 + $0x18] sm:$0xf0]  ;;  %v1325_v20 = vld [vmem:[%s1667_s13 + $0x104] sm:$0xf0]  ;;  %v1287_v21 = vor.u32 %v1338_v7, %v1284_v8  ;;  %v1320_v22 = vld [vmem:[%s1667_s13 + $0xe4] sm:$0xf] }
  0x73   : > { %847 = vmatpush.bf16.msra.mxu0 %v1115_v45  ;;  %872 = vmatpush.bf16.msra.mxu2 %v1251_v47  ;;  %v1212_v23 = vld [vmem:[%s1667_s13 + $0xe8] sm:$0xf0]  ;;  %v1336_v24 = vld [vmem:[%s1667_s13 + $0x164] sm:$0xf]  ;;  %v1111_v27 = vor.u32 %v1294_v14, %v1108_v15  ;;  %v1227_v30 = vor.u32 %v1325_v20, %v1226_v19  ;;  %v1318_v35 = vld [vmem:[%s1667_s13 + $0xd4] sm:$0xf]  ;;  %v598_v39 = vpack.c.b16 %v595_v28, %v595_v28 }
  0x74   : > { %860 = vmatpush.bf16.msra.mxu1 %v1179_v50  ;;  %v1276_v25 = vld [vmem:[%s1667_s13 + $0x168] sm:$0xf0]  ;;  %v1292_v31 = vld [vmem:[%s1667_s13 + $0x4] sm:$0xf]  ;;  %v1215_v33 = vor.u32 %v1320_v22, %v1212_v23  ;;  %v1204_v36 = vld [vmem:[%s1667_s13 + $0xd8] sm:$0xf0] }
  0x75   : > { %885 = vmatpush.bf16.msra.mxu3 %v1127_v58  ;;  %v1100_v32 = vld [vmem:[%s1667_s13 + $0x8] sm:$0xf0]  ;;  %v1279_v34 = vor.u32 %v1336_v24, %v1276_v25  ;;  %v1334_v37 = vld [vmem:[%s1667_s13 + $0x154] sm:$0xf]  ;;  %v1268_v38 = vld [vmem:[%s1667_s13 + $0x158] sm:$0xf0]  ;;  %v1207_v41 = vor.u32 %v1318_v35, %v1204_v36 }
  0x76   : > { %v1103_v40 = vor.u32 %v1292_v31, %v1100_v32  ;;  %v1271_v42 = vor.u32 %v1334_v37, %v1268_v38  ;;  %v1316_v43 = vld [vmem:[%s1667_s13 + $0xc4] sm:$0xf]  ;;  %v1196_v44 = vld [vmem:[%s1667_s13 + $0xc8] sm:$0xf0]  ;;  %v1314_v49 = vld [vmem:[%s1667_s13 + $0xb4] sm:$0xf] }
  0x77   : > { %848 = vmatpush.bf16.msra.mxu0 %v1107_v59  ;;  %873 = vmatpush.bf16.msra.mxu2 %v1243_v60  ;;  %v1332_v45 = vld [vmem:[%s1667_s13 + $0x144] sm:$0xf]  ;;  %v1260_v46 = vld [vmem:[%s1667_s13 + $0x148] sm:$0xf0]  ;;  %v1199_v47 = vor.u32 %v1316_v43, %v1196_v44  ;;  %v1188_v50 = vld [vmem:[%s1667_s13 + $0xb8] sm:$0xf0] }
  0x78   : > { %861 = vmatpush.bf16.msra.mxu1 %v1171_v0  ;;  %v1263_v48 = vor.u32 %v1332_v45, %v1260_v46  ;;  %v1330_v51 = vld [vmem:[%s1667_s13 + $0x134] sm:$0xf]  ;;  %v1252_v52 = vld [vmem:[%s1667_s13 + $0x138] sm:$0xf0]  ;;  %v1191_v53 = vor.u32 %v1314_v49, %v1188_v50  ;;  %v1312_v55 = vld [vmem:[%s1667_s13 + $0xa4] sm:$0xf] }
  0x79   : > { %886 = vmatpush.bf16.msra.mxu3 %v1119_v9  ;;  %v1255_v54 = vor.u32 %v1330_v51, %v1252_v52  ;;  %v1180_v56 = vld [vmem:[%s1667_s13 + $0xa8] sm:$0xf0]  ;;  %v1328_v57 = vld [vmem:[%s1667_s13 + $0x124] sm:$0xf]  ;;  %v1310_v61 = vld [vmem:[%s1667_s13 + $0x94] sm:$0xf] }
  0x7a   : > { %v1244_v58 = vld [vmem:[%s1667_s13 + $0x128] sm:$0xf0]  ;;  %v1183_v59 = vor.u32 %v1312_v55, %v1180_v56  ;;  %v1172_v62 = vld [vmem:[%s1667_s13 + $0x98] sm:$0xf0]  ;;  %v1326_v63 = vld [vmem:[%s1667_s13 + $0x114] sm:$0xf] }
  0x7b   : > { %849 = vmatpush.bf16.msra.mxu0 %v1099_v11  ;;  %874 = vmatpush.bf16.msra.mxu2 %v1235_v12  ;;  %v1247_v60 = vor.u32 %v1328_v57, %v1244_v58  ;;  %v1236_v0 = vld [vmem:[%s1667_s13 + $0x118] sm:$0xf0]  ;;  %v1175_v1 = vor.u32 %v1310_v61, %v1172_v62  ;;  %v1308_v3 = vld [vmem:[%s1667_s13 + $0x84] sm:$0xf]  ;;  %v1164_v4 = vld [vmem:[%s1667_s13 + $0x88] sm:$0xf0] }
  0x7c   : > { %862 = vmatpush.bf16.msra.mxu1 %v1163_v17  ;;  %v1239_v2 = vor.u32 %v1326_v63, %v1236_v0  ;;  %v1324_v5 = vld [vmem:[%s1667_s13 + $0x104] sm:$0xf]  ;;  %v1228_v6 = vld [vmem:[%s1667_s13 + $0x108] sm:$0xf0]  ;;  %v1167_v7 = vor.u32 %v1308_v3, %v1164_v4  ;;  %v539_v14 = vld [vmem:[#allocation2] sm:$0xff] }
  0x7d   : > { %887 = vmatpush.bf16.msra.mxu3 %v1111_v27  ;;  %v1231_v8 = vor.u32 %v1324_v5, %v1228_v6  ;;  %v540_v24 = vld [vmem:[#allocation2 + $0x8] sm:$0xff] }
  0x7e   : > { %850 = vmatmul.bf16.vlgmr.msra.gmra.mxu0 %v596_v26 }
  0x7f   : > { %894 = vmatpush.bf16.msrb.mxu0 %v1223_v18  ;;  %863 = vmatmul.bf16.vlgmr.msra.gmra.mxu1 %v1742_v29 }
  0x80   : > { %907 = vmatpush.bf16.msrb.mxu1 %v1287_v21  ;;  %875 = vmatpush.bf16.msra.mxu2 %v1227_v30 }
  0x81   : > { %888 = vmatpush.bf16.msra.mxu3 %v1103_v40 }
  0x83   : > { %895 = vmatpush.bf16.msrb.mxu0 %v1215_v33  ;;  %876 = vmatmul.bf16.vlgmr.msra.gmra.mxu2 %v598_v39 }
  0x84   : > { %908 = vmatpush.bf16.msrb.mxu1 %v1279_v34  ;;  %889 = vmatmul.bf16.vlgmr.msra.gmra.mxu3 %v596_v26 }
  0x87   : > { %896 = vmatpush.bf16.msrb.mxu0 %v1207_v41 }
  0x88   : > { %909 = vmatpush.bf16.msrb.mxu1 %v1271_v42 }
  0x8b   : > { %897 = vmatpush.bf16.msrb.mxu0 %v1199_v47 }
  0x8c   : > { %910 = vmatpush.bf16.msrb.mxu1 %v1263_v48 }
  0x8f   : > { %898 = vmatpush.bf16.msrb.mxu0 %v1191_v53 }
  0x90   : > { %911 = vmatpush.bf16.msrb.mxu1 %v1255_v54 }
  0x93   : > { %899 = vmatpush.bf16.msrb.mxu0 %v1183_v59 }
  0x94   : > { %912 = vmatpush.bf16.msrb.mxu1 %v1247_v60 }
  0x97   : > { %900 = vmatpush.bf16.msrb.mxu0 %v1175_v1 }
  0x98   : > { %913 = vmatpush.bf16.msrb.mxu1 %v1239_v2 }
  0x9b   : > { %901 = vmatpush.bf16.msrb.mxu0 %v1167_v7 }
  0x9c   : > { %914 = vmatpush.bf16.msrb.mxu1 %v1231_v8 }
  0x9e   : > { %902 = vmatmul.bf16.vlgmr.msrb.gmra.mxu0 %v1742_v29 }
  0x9f   : > { %915 = vmatmul.bf16.vlgmr.msrb.gmra.mxu1 %v598_v39 }
  0xfb   : > { %v851_v9 = vpop.f32.mrf.mxu0 }
  0xfc   : > { %v864_v10 = vpop.f32.mrf.mxu1 }
  0xfd   : > { %v865_v11 = vadd.f32 %v864_v10, %v851_v9 }
 0x103   : > { %v853_v12 = vpop.f32.mrf.mxu0 }
 0x104   : > { %v866_v13 = vpop.f32.mrf.mxu1 }
 0x106   : > { %v877_v15 = vpop.f32.mrf.mxu2 }
 0x107   : > { %v878_v16 = vadd.f32 %v877_v15, %v865_v11  ;;  %v890_v18 = vpop.f32.mrf.mxu3 }
 0x109   : > { %v920_v17 = vadd.f32 %v878_v16, %v539_v14 }
 0x10b   : > { %922 = vst [vmem:[#allocation2] sm:$0xff] %v920_v17 }
 0x10e   : > { %v879_v19 = vpop.f32.mrf.mxu2 }
 0x10f   : > { %v892_v20 = vpop.f32.mrf.mxu3 }
 0x11b   : > { %v903_v21 = vpop.f32.mrf.mxu0 }
 0x11c   : > { %v904_v22 = vadd.f32 %v903_v21, %v890_v18  ;;  %v916_v23 = vpop.f32.mrf.mxu1 }
 0x11e   : > { %v917_v25 = vadd.f32 %v916_v23, %v904_v22 }
 0x120   : > { %v921_v26 = vadd.f32 %v917_v25, %v540_v24  ;;  %927 = sbr.rel (%p1288_p13) target bundleno = 307 (0x133), region = 82 }
 0x122   : > { %923 = vst [vmem:[#allocation2 + $0x8] sm:$0xff] %v921_v26 }
 0x123   : > { %v905_v27 = vpop.f32.mrf.mxu0 }
 0x124   : > { %v918_v28 = vpop.f32.mrf.mxu1 }
 0x125   : > { %v928_v29 = vld [vmem:[#allocation2] sm:$0xff] }
 0x126   : > { %v930_v31 = vld [vmem:[%s516_s15] sm:$0x3] }
 0x127   : > { %v932_v32 = vperm.slane %v930_v31, 0  ;;  %v933_v33 = vperm.slane %v930_v31, 1  ;;  %v938_v34 = vld [vmem:[%s521_s8] sm:$0x3] }
 0x128   : > { %v940_v35 = vperm.slane %v938_v34, 0  ;;  %v941_v36 = vperm.slane %v938_v34, 1 }
 0x129   : > { %v929_v30 = vld [vmem:[#allocation2 + $0x8] sm:$0xff]  ;;  %v936_v37 = vmul.f32 %v932_v32, %v928_v29 }
 0x12a   : > { %v937_v38 = vmul.f32 %v933_v33, %v929_v30 }
 0x12b   : > { %v944_v39 = vadd.f32 %v940_v35, %v936_v37 }
 0x12c   : > { %v945_v40 = vadd.f32 %v941_v36, %v937_v38 }
 0x12d   : > { %v946_v41 = vmax.f32 %v944_v39, 0.0 }
 0x12e   : > { %v947_v42 = vmax.f32 %v945_v40, 0.0 }
 0x130   : > { %v948_v43 = vpack.c.bf16 %v947_v42, %v946_v41 }
 0x132   : > { %949 = vst [vmem:[%s1665_s12] sm:$0xff] %v948_v43 }
 0x133 PF: > { %s14_s21 = sadd.s32 1, %s1453_s21   ;;  %s1810_s15 = smov %s1433_s16 }
 0x134   : > { %p11_p0 = scmp.ge.s32.totalorder %s14_s21, 14   ;;  %s1811_s16 = smov %s1532_s28 }
 0x135   : > { %s1812_s17 = smov %s1445_s19  ;;  %s1813_s18 = smov %s1449_s20 }
 0x136   : > { %s1814_s19 = smov %s1817_s22  ;;  %s1815_s20 = smov %s1821_s23 }
 0x137   :  { %13 = sbr.rel (!%p11_p0) target bundleno = 4 (0x4), region = 126 }

// kernel: resnet_forward.27
= control target key start
LH: loop header
LB: loop body
LE: loop exit
PB: predicated region body
PF: predicated region fallthrough
CT: control target
= control target key end

     0   :  { %s1845_s18 = smov 0   ;;  %s1847_s19 = smov 0   ;;  %s2251_s0 = inlined_call_operand.vmem [shape: bf16[8,4608], index: 0, kind: input, shape index: {}]   ;;  %s2252_s1 = inlined_call_operand.vmem [shape: bf16[4608,512], index: 1, kind: input, shape index: {}]   ;;  %s2253_s2 = inlined_call_operand.vmem [shape: f32[1,512], index: 2, kind: input, shape index: {}]   ;;  %s2254_s3 = inlined_call_operand.vmem [shape: f32[1,512], index: 3, kind: input, shape index: {}]   ;;  %s2255_s4 = inlined_call_operand.vmem [shape: bf16[8,512], index: 4, kind: input, shape index: {}]   ;;  %s2256_s5 = inlined_call_operand.vmem [shape: bf16[8,512], index: 5, kind: output, shape index: {}]  }
   0x1   :  { %s1849_s20 = smov 0   ;;  %s1851_s21 = smov 0  }
   0x2   :  { %s1853_s22 = smov 0   ;;  %s1855_s23 = smov 0  }
   0x3   :  { %s1857_s24 = smov 0  }
   0x4 LB: > { %s27_s25 = sadd.s32 1, %s1804_s22  ;;  %s30_s26 = sadd.s32 1, %s1808_s23  ;;  %s1812_s24 = sphi %s1857_s24, %s15_s24   ;;  %s1808_s23 = sphi %s1855_s23, %s2262_s23   ;;  %s1804_s22 = sphi %s1853_s22, %s2261_s22   ;;  %s1800_s21 = sphi %s1851_s21, %s2260_s21   ;;  %s1796_s20 = sphi %s1849_s20, %s2259_s20   ;;  %s1792_s19 = sphi %s1847_s19, %s2258_s19   ;;  %s1788_s18 = sphi %s1845_s18, %s2257_s18  }
   0x5   : > { %p28_p0 = scmp.ge.s32.totalorder %s27_s25, 9  ;;  %p78_p1 = scmp.ne.s32.totalorder %s1792_s19, %s1788_s18 }
   0x6   : > { %p79_p2 = scmp.eq.s32.totalorder %s1812_s24, 0  ;;  %s71_s30 = sadd.s32 1, %s1792_s19 }
   0x7   : > { %s2264_s25 = smov (%p28_p0, %s27_s25), 0  ;;  %s2266_s26 = smov (!%p28_p0, %s30_s26), %s1808_s23 }
   0x8   : > { %p80_p3 = por %p79_p2, %p78_p1  ;;  %p32_p4 = scmp.ge.s32.totalorder %s2266_s26, 2 }
   0x9   : > { %s66_s27 = ssub.s32 %s1804_s22, %s2264_s25  ;;  %p1360_p6 = scmp.ge.s32.totalorder %s1812_s24, 18 }
   0xa   : > { %s2268_s26 = smov (%p32_p4, %s2266_s26), 0 }
   0xb   : > { %s67_s28 = ssub.s32 %s1808_s23, %s2268_s26  ;;  %212 = sbr.rel (%p1360_p6) target bundleno = 87 (0x57), region = 16 }
   0xc   : > { %s68_s29 = sor.u32 %s67_s28, %s66_s27 }
   0xd   : > { %p69_p5 = scmp.eq.s32.totalorder %s68_s29, 0 }
   0xf   : > { %s1896_s6 = scalar_select %p69_p5, %s1792_s19, %s71_s30  }
  0x10   : > { %228 = sbr.rel (!%p80_p3) target bundleno = 87 (0x57), region = 24  ;;  %s230_s7 = sand.u32 (%p80_p3), 1, %s1792_s19  }
  0x11   : > { %s1363_s8 = sshll.u32 (%p80_p3), %s1808_s23, 1  ;;  %s1361_s9 = sshll.u32 (%p80_p3), %s230_s7, 9 }
  0x12   : > { %s1636_s10 = sshll.u32 (%p80_p3), %s1804_s22, 8  ;;  %s1910_s16 = scalar_lea.vmem (%p80_p3), [#allocation3], %s1361_s9 }
  0x13   : > { %s236_s11 = sadd.s32 (%p80_p3), %s1636_s10, %s1363_s8 }
  0x14   : > { %s1365_s12 = sshll.u32 (%p80_p3), %s236_s11, 2 }
  0x15   : > { %s1905_s15 = scalar_lea.vmem %s2252_s1, %s1365_s12 }
  0x16   : > { %v393_v0 = vld [vmem:[%s1905_s15] sm:$0xff]  ;;  %v395_v1 = vld [vmem:[%s1905_s15 + $0x10] sm:$0xff] }
  0x17   : > { %v397_v2 = vld [vmem:[%s1905_s15 + $0x20] sm:$0xff]  ;;  %394 = vst [vmem:[%s1910_s16] sm:$0xff] %v393_v0  ;;  %v399_v3 = vld [vmem:[%s1905_s15 + $0x30] sm:$0xff] }
  0x18   : > { %396 = vst [vmem:[%s1910_s16 + $0x8] sm:$0xff] %v395_v1  ;;  %v401_v4 = vld [vmem:[%s1905_s15 + $0x40] sm:$0xff]  ;;  %v403_v5 = vld [vmem:[%s1905_s15 + $0x50] sm:$0xff] }
  0x19   : > { %398 = vst [vmem:[%s1910_s16 + $0x10] sm:$0xff] %v397_v2  ;;  %v405_v6 = vld [vmem:[%s1905_s15 + $0x60] sm:$0xff]  ;;  %v407_v7 = vld [vmem:[%s1905_s15 + $0x70] sm:$0xff] }
  0x1a   : > { %400 = vst [vmem:[%s1910_s16 + $0x18] sm:$0xff] %v399_v3  ;;  %v409_v8 = vld [vmem:[%s1905_s15 + $0x80] sm:$0xff]  ;;  %v411_v9 = vld [vmem:[%s1905_s15 + $0x90] sm:$0xff] }
  0x1b   : > { %402 = vst [vmem:[%s1910_s16 + $0x20] sm:$0xff] %v401_v4  ;;  %v413_v10 = vld [vmem:[%s1905_s15 + $0xa0] sm:$0xff]  ;;  %v415_v11 = vld [vmem:[%s1905_s15 + $0xb0] sm:$0xff] }
  0x1c   : > { %404 = vst [vmem:[%s1910_s16 + $0x28] sm:$0xff] %v403_v5  ;;  %v417_v12 = vld [vmem:[%s1905_s15 + $0xc0] sm:$0xff]  ;;  %v419_v13 = vld [vmem:[%s1905_s15 + $0xd0] sm:$0xff] }
  0x1d   : > { %406 = vst [vmem:[%s1910_s16 + $0x30] sm:$0xff] %v405_v6  ;;  %v421_v14 = vld [vmem:[%s1905_s15 + $0xe0] sm:$0xff]  ;;  %v423_v15 = vld [vmem:[%s1905_s15 + $0xf0] sm:$0xff] }
  0x1e   : > { %408 = vst [vmem:[%s1910_s16 + $0x38] sm:$0xff] %v407_v7  ;;  %v425_v16 = vld [vmem:[%s1905_s15 + $0x100] sm:$0xff]  ;;  %v427_v17 = vld [vmem:[%s1905_s15 + $0x110] sm:$0xff] }
  0x1f   : > { %410 = vst [vmem:[%s1910_s16 + $0x40] sm:$0xff] %v409_v8  ;;  %v429_v18 = vld [vmem:[%s1905_s15 + $0x120] sm:$0xff]  ;;  %v431_v19 = vld [vmem:[%s1905_s15 + $0x130] sm:$0xff] }
  0x20   : > { %412 = vst [vmem:[%s1910_s16 + $0x48] sm:$0xff] %v411_v9  ;;  %v433_v20 = vld [vmem:[%s1905_s15 + $0x140] sm:$0xff]  ;;  %v435_v21 = vld [vmem:[%s1905_s15 + $0x150] sm:$0xff] }
  0x21   : > { %414 = vst [vmem:[%s1910_s16 + $0x50] sm:$0xff] %v413_v10  ;;  %v437_v22 = vld [vmem:[%s1905_s15 + $0x160] sm:$0xff]  ;;  %v439_v23 = vld [vmem:[%s1905_s15 + $0x170] sm:$0xff] }
  0x22   : > { %416 = vst [vmem:[%s1910_s16 + $0x58] sm:$0xff] %v415_v11  ;;  %v441_v24 = vld [vmem:[%s1905_s15 + $0x180] sm:$0xff]  ;;  %v443_v25 = vld [vmem:[%s1905_s15 + $0x190] sm:$0xff] }
  0x23   : > { %418 = vst [vmem:[%s1910_s16 + $0x60] sm:$0xff] %v417_v12  ;;  %v445_v26 = vld [vmem:[%s1905_s15 + $0x1a0] sm:$0xff]  ;;  %v447_v27 = vld [vmem:[%s1905_s15 + $0x1b0] sm:$0xff] }
  0x24   : > { %420 = vst [vmem:[%s1910_s16 + $0x68] sm:$0xff] %v419_v13  ;;  %v449_v28 = vld [vmem:[%s1905_s15 + $0x1c0] sm:$0xff]  ;;  %v451_v29 = vld [vmem:[%s1905_s15 + $0x1d0] sm:$0xff] }
  0x25   : > { %422 = vst [vmem:[%s1910_s16 + $0x70] sm:$0xff] %v421_v14  ;;  %v453_v30 = vld [vmem:[%s1905_s15 + $0x1e0] sm:$0xff]  ;;  %v455_v31 = vld [vmem:[%s1905_s15 + $0x1f0] sm:$0xff] }
  0x26   : > { %424 = vst [vmem:[%s1910_s16 + $0x78] sm:$0xff] %v423_v15  ;;  %v457_v32 = vld [vmem:[%s1905_s15 + $0x200] sm:$0xff]  ;;  %v459_v33 = vld [vmem:[%s1905_s15 + $0x210] sm:$0xff] }
  0x27   : > { %426 = vst [vmem:[%s1910_s16 + $0x80] sm:$0xff] %v425_v16  ;;  %v461_v34 = vld [vmem:[%s1905_s15 + $0x220] sm:$0xff]  ;;  %v463_v35 = vld [vmem:[%s1905_s15 + $0x230] sm:$0xff] }
  0x28   : > { %428 = vst [vmem:[%s1910_s16 + $0x88] sm:$0xff] %v427_v17  ;;  %v465_v36 = vld [vmem:[%s1905_s15 + $0x240] sm:$0xff]  ;;  %v467_v37 = vld [vmem:[%s1905_s15 + $0x250] sm:$0xff] }
  0x29   : > { %430 = vst [vmem:[%s1910_s16 + $0x90] sm:$0xff] %v429_v18  ;;  %v469_v38 = vld [vmem:[%s1905_s15 + $0x260] sm:$0xff]  ;;  %v471_v39 = vld [vmem:[%s1905_s15 + $0x270] sm:$0xff] }
  0x2a   : > { %432 = vst [vmem:[%s1910_s16 + $0x98] sm:$0xff] %v431_v19  ;;  %v473_v40 = vld [vmem:[%s1905_s15 + $0x280] sm:$0xff]  ;;  %v475_v41 = vld [vmem:[%s1905_s15 + $0x290] sm:$0xff] }
  0x2b   : > { %434 = vst [vmem:[%s1910_s16 + $0xa0] sm:$0xff] %v433_v20  ;;  %v477_v42 = vld [vmem:[%s1905_s15 + $0x2a0] sm:$0xff]  ;;  %v479_v43 = vld [vmem:[%s1905_s15 + $0x2b0] sm:$0xff] }
  0x2c   : > { %436 = vst [vmem:[%s1910_s16 + $0xa8] sm:$0xff] %v435_v21  ;;  %v481_v44 = vld [vmem:[%s1905_s15 + $0x2c0] sm:$0xff]  ;;  %v483_v45 = vld [vmem:[%s1905_s15 + $0x2d0] sm:$0xff] }
  0x2d   : > { %438 = vst [vmem:[%s1910_s16 + $0xb0] sm:$0xff] %v437_v22  ;;  %v485_v46 = vld [vmem:[%s1905_s15 + $0x2e0] sm:$0xff]  ;;  %v487_v47 = vld [vmem:[%s1905_s15 + $0x2f0] sm:$0xff] }
  0x2e   : > { %440 = vst [vmem:[%s1910_s16 + $0xb8] sm:$0xff] %v439_v23  ;;  %v489_v48 = vld [vmem:[%s1905_s15 + $0x300] sm:$0xff]  ;;  %v491_v49 = vld [vmem:[%s1905_s15 + $0x310] sm:$0xff] }
  0x2f   : > { %442 = vst [vmem:[%s1910_s16 + $0xc0] sm:$0xff] %v441_v24  ;;  %v493_v50 = vld [vmem:[%s1905_s15 + $0x320] sm:$0xff]  ;;  %v495_v51 = vld [vmem:[%s1905_s15 + $0x330] sm:$0xff] }
  0x30   : > { %444 = vst [vmem:[%s1910_s16 + $0xc8] sm:$0xff] %v443_v25  ;;  %v497_v52 = vld [vmem:[%s1905_s15 + $0x340] sm:$0xff]  ;;  %v499_v53 = vld [vmem:[%s1905_s15 + $0x350] sm:$0xff] }
  0x31   : > { %446 = vst [vmem:[%s1910_s16 + $0xd0] sm:$0xff] %v445_v26  ;;  %v501_v54 = vld [vmem:[%s1905_s15 + $0x360] sm:$0xff]  ;;  %v503_v55 = vld [vmem:[%s1905_s15 + $0x370] sm:$0xff] }
  0x32   : > { %448 = vst [vmem:[%s1910_s16 + $0xd8] sm:$0xff] %v447_v27  ;;  %v505_v56 = vld [vmem:[%s1905_s15 + $0x380] sm:$0xff]  ;;  %v507_v57 = vld [vmem:[%s1905_s15 + $0x390] sm:$0xff] }
  0x33   : > { %450 = vst [vmem:[%s1910_s16 + $0xe0] sm:$0xff] %v449_v28  ;;  %v509_v58 = vld [vmem:[%s1905_s15 + $0x3a0] sm:$0xff]  ;;  %v511_v59 = vld [vmem:[%s1905_s15 + $0x3b0] sm:$0xff] }
  0x34   : > { %452 = vst [vmem:[%s1910_s16 + $0xe8] sm:$0xff] %v451_v29  ;;  %v513_v60 = vld [vmem:[%s1905_s15 + $0x3c0] sm:$0xff]  ;;  %v515_v61 = vld [vmem:[%s1905_s15 + $0x3d0] sm:$0xff] }
  0x35   : > { %454 = vst [vmem:[%s1910_s16 + $0xf0] sm:$0xff] %v453_v30  ;;  %v517_v62 = vld [vmem:[%s1905_s15 + $0x3e0] sm:$0xff]  ;;  %v519_v63 = vld [vmem:[%s1905_s15 + $0x3f0] sm:$0xff] }
  0x36   : > { %456 = vst [vmem:[%s1910_s16 + $0xf8] sm:$0xff] %v455_v31 }
  0x37   : > { %458 = vst [vmem:[%s1910_s16 + $0x100] sm:$0xff] %v457_v32 }
  0x38   : > { %460 = vst [vmem:[%s1910_s16 + $0x108] sm:$0xff] %v459_v33 }
  0x39   : > { %462 = vst [vmem:[%s1910_s16 + $0x110] sm:$0xff] %v461_v34 }
  0x3a   : > { %464 = vst [vmem:[%s1910_s16 + $0x118] sm:$0xff] %v463_v35 }
  0x3b   : > { %466 = vst [vmem:[%s1910_s16 + $0x120] sm:$0xff] %v465_v36 }
  0x3c   : > { %468 = vst [vmem:[%s1910_s16 + $0x128] sm:$0xff] %v467_v37 }
  0x3d   : > { %470 = vst [vmem:[%s1910_s16 + $0x130] sm:$0xff] %v469_v38 }
  0x3e   : > { %472 = vst [vmem:[%s1910_s16 + $0x138] sm:$0xff] %v471_v39 }
  0x3f   : > { %474 = vst [vmem:[%s1910_s16 + $0x140] sm:$0xff] %v473_v40 }
  0x40   : > { %476 = vst [vmem:[%s1910_s16 + $0x148] sm:$0xff] %v475_v41 }
  0x41   : > { %478 = vst [vmem:[%s1910_s16 + $0x150] sm:$0xff] %v477_v42 }
  0x42   : > { %480 = vst [vmem:[%s1910_s16 + $0x158] sm:$0xff] %v479_v43 }
  0x43   : > { %482 = vst [vmem:[%s1910_s16 + $0x160] sm:$0xff] %v481_v44 }
  0x44   : > { %484 = vst [vmem:[%s1910_s16 + $0x168] sm:$0xff] %v483_v45 }
  0x45   : > { %486 = vst [vmem:[%s1910_s16 + $0x170] sm:$0xff] %v485_v46 }
  0x46   : > { %488 = vst [vmem:[%s1910_s16 + $0x178] sm:$0xff] %v487_v47 }
  0x47   : > { %490 = vst [vmem:[%s1910_s16 + $0x180] sm:$0xff] %v489_v48 }
  0x48   : > { %492 = vst [vmem:[%s1910_s16 + $0x188] sm:$0xff] %v491_v49 }
  0x49   : > { %494 = vst [vmem:[%s1910_s16 + $0x190] sm:$0xff] %v493_v50 }
  0x4a   : > { %496 = vst [vmem:[%s1910_s16 + $0x198] sm:$0xff] %v495_v51 }
  0x4b   : > { %498 = vst [vmem:[%s1910_s16 + $0x1a0] sm:$0xff] %v497_v52 }
  0x4c   : > { %500 = vst [vmem:[%s1910_s16 + $0x1a8] sm:$0xff] %v499_v53 }
  0x4d   : > { %502 = vst [vmem:[%s1910_s16 + $0x1b0] sm:$0xff] %v501_v54 }
  0x4e   : > { %504 = vst [vmem:[%s1910_s16 + $0x1b8] sm:$0xff] %v503_v55 }
  0x4f   : > { %506 = vst [vmem:[%s1910_s16 + $0x1c0] sm:$0xff] %v505_v56 }
  0x50   : > { %508 = vst [vmem:[%s1910_s16 + $0x1c8] sm:$0xff] %v507_v57 }
  0x51   : > { %510 = vst [vmem:[%s1910_s16 + $0x1d0] sm:$0xff] %v509_v58 }
  0x52   : > { %512 = vst [vmem:[%s1910_s16 + $0x1d8] sm:$0xff] %v511_v59 }
  0x53   : > { %514 = vst [vmem:[%s1910_s16 + $0x1e0] sm:$0xff] %v513_v60 }
  0x54   : > { %516 = vst [vmem:[%s1910_s16 + $0x1e8] sm:$0xff] %v515_v61 }
  0x55   : > { %518 = vst [vmem:[%s1910_s16 + $0x1f0] sm:$0xff] %v517_v62 }
  0x56   : > { %520 = vst [vmem:[%s1910_s16 + $0x1f8] sm:$0xff] %v519_v63 }
  0x57 PF: > { %p1366_p7 = scmp.ge.s32.totalorder %s1812_s24, 1  ;;  %p554_p8 = scmp.lt.s32.totalorder %s1812_s24, 19 }
  0x59   : > { %p555_p9 = pnand %p1366_p7, %p554_p8 }
  0x5a   : > { %s561_s17 = sand.u32 (!%p555_p9), 1, %s1788_s18   ;;  %s1368_s27 = sshll.u32 (!%p555_p9), %s1796_s20, 2 }
  0x5b   : > { %558 = sbr.rel (%p555_p9) target bundleno = 332 (0x14c), region = 74  ;;  %s1367_s28 = sshll.u32 (!%p555_p9), %s561_s17, 9 }
  0x5c   : > { %p621_p10 = scmp.lt.s32.totalorder (!%p555_p9), %s1368_s27, 35  ;;  %s1370_s29 = sshll.u32 (!%p555_p9), %s1800_s21, 1 }
  0x5d   : > { %p631_p11 = scmp.lt.s32.totalorder (!%p555_p9), %s1370_s29, 3  ;;  %s2068_s8 = scalar_lea.vmem (!%p555_p9), [#allocation3], %s1367_s28 }
  0x5e   : > { %p1376_p12 = scmp.ne.s32.totalorder (!%p555_p9), %s1796_s20, 0 }
  0x60   : > { %s2270_s27 = smov (!%p621_p10, %s1368_s27), 35  ;;  %s2272_s29 = smov (!%p631_p11, %s1370_s29), 3 }
  0x61   : > { %s1369_s30 = sshll.u32 %s2270_s27, 2  ;;  %s633_s18 = scalar_lea.vmem %s2253_s2, %s2272_s29 }
  0x62   : > { %s2045_s9 = scalar_lea.vmem %s2251_s0, %s1369_s30  ;;  %s638_s21 = scalar_lea.vmem %s2254_s3, %s2272_s29 }
  0x63   : > { %s1373_s14 = sshll.u32 %s2272_s29, 2  ;;  %663 = sbr.rel (%p1376_p12) target bundleno = 107 (0x6b), region = 82 }
  0x64   : > { %s2061_s17 = scalar_lea.vmem %s2255_s4, %s1373_s14  ;;  %s2066_s7 = scalar_lea.vmem %s2256_s5, %s1373_s14 }
  0x68   : > { %v1814_v0 = vmov 0.0  }
  0x69   : > { %664 = vst [vmem:[#allocation2] sm:$0xff] %v1814_v0 }
  0x6a   : > { %665 = vst [vmem:[#allocation2 + $0x8] sm:$0xff] %v1814_v0 }
  0x6b PF: > { %v1435_v1 = vld [vmem:[%s2068_s8 + $0x70] sm:$0xf]  ;;  %v1652_v2 = vld [vmem:[%s2068_s8 + $0x74] sm:$0xf0]  ;;  %v1427_v12 = vld [vmem:[%s2068_s8 + $0x60] sm:$0xf] }
  0x6c   : > { %v1499_v3 = vld [vmem:[%s2068_s8 + $0xf0] sm:$0xf]  ;;  %v1436_v4 = vor.u32 %v1652_v2, %v1435_v1  ;;  %v1668_v5 = vld [vmem:[%s2068_s8 + $0xf4] sm:$0xf0]  ;;  %v1650_v14 = vld [vmem:[%s2068_s8 + $0x64] sm:$0xf0] }
  0x6d   : > { %v1563_v6 = vld [vmem:[%s2068_s8 + $0x170] sm:$0xf]  ;;  %v1684_v7 = vld [vmem:[%s2068_s8 + $0x174] sm:$0xf0]  ;;  %v1500_v8 = vor.u32 %v1668_v5, %v1499_v3  ;;  %v1491_v15 = vld [vmem:[%s2068_s8 + $0xe0] sm:$0xf]  ;;  %v1428_v17 = vor.u32 %v1650_v14, %v1427_v12 }
  0x6e   : > { %v1564_v9 = vor.u32 %v1684_v7, %v1563_v6  ;;  %v1627_v10 = vld [vmem:[%s2068_s8 + $0x1f0] sm:$0xf]  ;;  %v1700_v11 = vld [vmem:[%s2068_s8 + $0x1f4] sm:$0xf0]  ;;  %1068 = vmatpush.bf16.msra.mxu0 %v1436_v4  ;;  %v1666_v16 = vld [vmem:[%s2068_s8 + $0xe4] sm:$0xf0] }
  0x6f   : > { %v1628_v13 = vor.u32 %v1700_v11, %v1627_v10  ;;  %1081 = vmatpush.bf16.msra.mxu1 %v1500_v8  ;;  %v1492_v18 = vor.u32 %v1666_v16, %v1491_v15  ;;  %v1555_v19 = vld [vmem:[%s2068_s8 + $0x160] sm:$0xf]  ;;  %v1682_v20 = vld [vmem:[%s2068_s8 + $0x164] sm:$0xf0]  ;;  %v1419_v24 = vld [vmem:[%s2068_s8 + $0x50] sm:$0xf] }
  0x70   : > { %1094 = vmatpush.bf16.msra.mxu2 %v1564_v9  ;;  %v1619_v21 = vld [vmem:[%s2068_s8 + $0x1e0] sm:$0xf]  ;;  %v1556_v22 = vor.u32 %v1682_v20, %v1555_v19  ;;  %v1698_v23 = vld [vmem:[%s2068_s8 + $0x1e4] sm:$0xf0]  ;;  %v1648_v25 = vld [vmem:[%s2068_s8 + $0x54] sm:$0xf0] }
  0x71   : > { %1107 = vmatpush.bf16.msra.mxu3 %v1628_v13  ;;  %v1620_v26 = vor.u32 %v1698_v23, %v1619_v21  ;;  %v1483_v27 = vld [vmem:[%s2068_s8 + $0xd0] sm:$0xf]  ;;  %v1664_v28 = vld [vmem:[%s2068_s8 + $0xd4] sm:$0xf0]  ;;  %v1420_v30 = vor.u32 %v1648_v25, %v1419_v24  ;;  %v1411_v36 = vld [vmem:[%s2068_s8 + $0x40] sm:$0xf] }
  0x72   : > { %v1547_v29 = vld [vmem:[%s2068_s8 + $0x150] sm:$0xf]  ;;  %1069 = vmatpush.bf16.msra.mxu0 %v1428_v17  ;;  %v1680_v31 = vld [vmem:[%s2068_s8 + $0x154] sm:$0xf0]  ;;  %v1484_v34 = vor.u32 %v1664_v28, %v1483_v27  ;;  %v1646_v37 = vld [vmem:[%s2068_s8 + $0x44] sm:$0xf0] }
  0x73   : > { %v1611_v32 = vld [vmem:[%s2068_s8 + $0x1d0] sm:$0xf]  ;;  %v1696_v33 = vld [vmem:[%s2068_s8 + $0x1d4] sm:$0xf0]  ;;  %1082 = vmatpush.bf16.msra.mxu1 %v1492_v18  ;;  %v1548_v35 = vor.u32 %v1680_v31, %v1547_v29  ;;  %v1475_v38 = vld [vmem:[%s2068_s8 + $0xc0] sm:$0xf]  ;;  %v1412_v45 = vor.u32 %v1646_v37, %v1411_v36 }
  0x74   : > { %1095 = vmatpush.bf16.msra.mxu2 %v1556_v22  ;;  %v1612_v39 = vor.u32 %v1696_v33, %v1611_v32  ;;  %v1662_v40 = vld [vmem:[%s2068_s8 + $0xc4] sm:$0xf0]  ;;  %v1539_v41 = vld [vmem:[%s2068_s8 + $0x140] sm:$0xf]  ;;  %v1403_v48 = vld [vmem:[%s2068_s8 + $0x30] sm:$0xf] }
  0x75   : > { %1108 = vmatpush.bf16.msra.mxu3 %v1620_v26  ;;  %v1678_v42 = vld [vmem:[%s2068_s8 + $0x144] sm:$0xf0]  ;;  %v1603_v43 = vld [vmem:[%s2068_s8 + $0x1c0] sm:$0xf]  ;;  %v1476_v46 = vor.u32 %v1662_v40, %v1475_v38  ;;  %v1644_v49 = vld [vmem:[%s2068_s8 + $0x34] sm:$0xf0] }
  0x76   : > { %v1694_v44 = vld [vmem:[%s2068_s8 + $0x1c4] sm:$0xf0]  ;;  %1070 = vmatpush.bf16.msra.mxu0 %v1420_v30  ;;  %v1540_v47 = vor.u32 %v1678_v42, %v1539_v41  ;;  %v1467_v50 = vld [vmem:[%s2068_s8 + $0xb0] sm:$0xf]  ;;  %v1660_v52 = vld [vmem:[%s2068_s8 + $0xb4] sm:$0xf0]  ;;  %v1404_v57 = vor.u32 %v1644_v49, %v1403_v48 }
  0x77   : > { %1083 = vmatpush.bf16.msra.mxu1 %v1484_v34  ;;  %v1604_v51 = vor.u32 %v1694_v44, %v1603_v43  ;;  %v1531_v53 = vld [vmem:[%s2068_s8 + $0x130] sm:$0xf]  ;;  %v1676_v54 = vld [vmem:[%s2068_s8 + $0x134] sm:$0xf0]  ;;  %v1468_v58 = vor.u32 %v1660_v52, %v1467_v50  ;;  %v1395_v60 = vld [vmem:[%s2068_s8 + $0x20] sm:$0xf] }
  0x78   : > { %1096 = vmatpush.bf16.msra.mxu2 %v1548_v35  ;;  %v1595_v55 = vld [vmem:[%s2068_s8 + $0x1b0] sm:$0xf]  ;;  %v1692_v56 = vld [vmem:[%s2068_s8 + $0x1b4] sm:$0xf0]  ;;  %v1532_v59 = vor.u32 %v1676_v54, %v1531_v53  ;;  %v1642_v61 = vld [vmem:[%s2068_s8 + $0x24] sm:$0xf0] }
  0x79   : > { %1109 = vmatpush.bf16.msra.mxu3 %v1612_v39  ;;  %v1459_v62 = vld [vmem:[%s2068_s8 + $0xa0] sm:$0xf]  ;;  %v1596_v63 = vor.u32 %v1692_v56, %v1595_v55  ;;  %v1658_v0 = vld [vmem:[%s2068_s8 + $0xa4] sm:$0xf0]  ;;  %v1396_v5 = vor.u32 %v1642_v61, %v1395_v60  ;;  %v1387_v8 = vld [vmem:[%s2068_s8 + $0x10] sm:$0xf] }
  0x7a   : > { %1071 = vmatpush.bf16.msra.mxu0 %v1412_v45  ;;  %v1523_v1 = vld [vmem:[%s2068_s8 + $0x120] sm:$0xf]  ;;  %v1674_v2 = vld [vmem:[%s2068_s8 + $0x124] sm:$0xf0]  ;;  %v1460_v6 = vor.u32 %v1658_v0, %v1459_v62  ;;  %v1640_v9 = vld [vmem:[%s2068_s8 + $0x14] sm:$0xf0] }
  0x7b   : > { %1084 = vmatpush.bf16.msra.mxu1 %v1476_v46  ;;  %v1587_v3 = vld [vmem:[%s2068_s8 + $0x1a0] sm:$0xf]  ;;  %v1690_v4 = vld [vmem:[%s2068_s8 + $0x1a4] sm:$0xf0]  ;;  %v1524_v7 = vor.u32 %v1674_v2, %v1523_v1  ;;  %v1451_v10 = vld [vmem:[%s2068_s8 + $0x90] sm:$0xf]  ;;  %v1388_v17 = vor.u32 %v1640_v9, %v1387_v8 }
  0x7c   : > { %1097 = vmatpush.bf16.msra.mxu2 %v1540_v47  ;;  %v1588_v11 = vor.u32 %v1690_v4, %v1587_v3  ;;  %v1656_v12 = vld [vmem:[%s2068_s8 + $0x94] sm:$0xf0]  ;;  %v1515_v13 = vld [vmem:[%s2068_s8 + $0x110] sm:$0xf]  ;;  %v1379_v18 = vld [vmem:[%s2068_s8] sm:$0xf] }
  0x7d   : > { %1110 = vmatpush.bf16.msra.mxu3 %v1604_v51  ;;  %v1672_v14 = vld [vmem:[%s2068_s8 + $0x114] sm:$0xf0]  ;;  %v1579_v15 = vld [vmem:[%s2068_s8 + $0x190] sm:$0xf]  ;;  %v1638_v19 = vld [vmem:[%s2068_s8 + $0x4] sm:$0xf0]  ;;  %v1452_v21 = vor.u32 %v1656_v12, %v1451_v10 }
  0x7e   : > { %1072 = vmatpush.bf16.msra.mxu0 %v1404_v57  ;;  %v1688_v16 = vld [vmem:[%s2068_s8 + $0x194] sm:$0xf0]  ;;  %v1443_v20 = vld [vmem:[%s2068_s8 + $0x80] sm:$0xf]  ;;  %v1516_v22 = vor.u32 %v1672_v14, %v1515_v13  ;;  %v1654_v23 = vld [vmem:[%s2068_s8 + $0x84] sm:$0xf0]  ;;  %v1380_v33 = vor.u32 %v1638_v19, %v1379_v18 }
  0x7f   : > { %1085 = vmatpush.bf16.msra.mxu1 %v1468_v58  ;;  %v1507_v24 = vld [vmem:[%s2068_s8 + $0x100] sm:$0xf]  ;;  %v1670_v25 = vld [vmem:[%s2068_s8 + $0x104] sm:$0xf0]  ;;  %v1580_v26 = vor.u32 %v1688_v16, %v1579_v15  ;;  %v1651_v29 = vld [vmem:[%s2068_s8 + $0x74] sm:$0xf]  ;;  %v1444_v38 = vor.u32 %v1654_v23, %v1443_v20 }
  0x80   : > { %1098 = vmatpush.bf16.msra.mxu2 %v1532_v59  ;;  %v1571_v27 = vld [vmem:[%s2068_s8 + $0x180] sm:$0xf]  ;;  %v1686_v28 = vld [vmem:[%s2068_s8 + $0x184] sm:$0xf0]  ;;  %v1437_v30 = vld [vmem:[%s2068_s8 + $0x78] sm:$0xf0]  ;;  %v1508_v39 = vor.u32 %v1670_v25, %v1507_v24 }
  0x81   : > { %1111 = vmatpush.bf16.msra.mxu3 %v1596_v63  ;;  %v1667_v31 = vld [vmem:[%s2068_s8 + $0xf4] sm:$0xf]  ;;  %v669_v32 = vld [vmem:[%s2045_s9 + $0x8] sm:$0xff]  ;;  %v1572_v43 = vor.u32 %v1686_v28, %v1571_v27  ;;  %v1440_v44 = vor.u32 %v1651_v29, %v1437_v30  ;;  %v1649_v48 = vld [vmem:[%s2068_s8 + $0x64] sm:$0xf]  ;;  %p1633_p13 = scmp.ne.s32.totalorder %s1796_s20, 8 }
  0x82   : > { %1073 = vmatpush.bf16.msra.mxu0 %v1396_v5  ;;  %v1501_v34 = vld [vmem:[%s2068_s8 + $0xf8] sm:$0xf0]  ;;  %v1683_v35 = vld [vmem:[%s2068_s8 + $0x174] sm:$0xf]  ;;  %v738_v37 = vunpack.c.l.b16 %v669_v32  ;;  %v739_v42 = vunpack.c.h.b16 %v669_v32  ;;  %v1429_v49 = vld [vmem:[%s2068_s8 + $0x68] sm:$0xf0] }
  0x83   : > { %1086 = vmatpush.bf16.msra.mxu1 %v1460_v6  ;;  %v1565_v36 = vld [vmem:[%s2068_s8 + $0x178] sm:$0xf0]  ;;  %v1699_v40 = vld [vmem:[%s2068_s8 + $0x1f4] sm:$0xf]  ;;  %v1504_v46 = vor.u32 %v1667_v31, %v1501_v34  ;;  %v1665_v50 = vld [vmem:[%s2068_s8 + $0xe4] sm:$0xf]  ;;  %v1432_v62 = vor.u32 %v1649_v48, %v1429_v49 }
  0x84   : > { %1099 = vmatpush.bf16.msra.mxu2 %v1524_v7  ;;  %v1629_v41 = vld [vmem:[%s2068_s8 + $0x1f8] sm:$0xf0]  ;;  %v668_v45 = vld [vmem:[%s2045_s9] sm:$0xff]  ;;  %v1568_v47 = vor.u32 %v1683_v35, %v1565_v36  ;;  %v1493_v54 = vld [vmem:[%s2068_s8 + $0xe8] sm:$0xf0]  ;;  %v2151_v57 = vpack.c.b16 %v738_v37, %v738_v37  ;;  %v2155_v60 = vpack.c.b16 %v739_v42, %v739_v42 }
  0x85   : > { %1112 = vmatpush.bf16.msra.mxu3 %v1588_v11  ;;  %v736_v51 = vunpack.c.l.b16 %v668_v45  ;;  %v737_v52 = vunpack.c.h.b16 %v668_v45  ;;  %v1632_v53 = vor.u32 %v1699_v40, %v1629_v41  ;;  %v1681_v55 = vld [vmem:[%s2068_s8 + $0x164] sm:$0xf]  ;;  %v1557_v56 = vld [vmem:[%s2068_s8 + $0x168] sm:$0xf0]  ;;  %v1496_v0 = vor.u32 %v1665_v50, %v1493_v54  ;;  %v1647_v2 = vld [vmem:[%s2068_s8 + $0x54] sm:$0xf] }
  0x86   : > { %1074 = vmatpush.bf16.msra.mxu0 %v1388_v17  ;;  %v1697_v58 = vld [vmem:[%s2068_s8 + $0x1e4] sm:$0xf]  ;;  %v1621_v59 = vld [vmem:[%s2068_s8 + $0x1e8] sm:$0xf0]  ;;  %v1560_v1 = vor.u32 %v1681_v55, %v1557_v56  ;;  %v1421_v3 = vld [vmem:[%s2068_s8 + $0x58] sm:$0xf0] }
  0x87   : > { %1087 = vmatpush.bf16.msra.mxu1 %v1452_v21  ;;  %v2157_v61 = vpack.c.b16 %v736_v51, %v736_v51  ;;  %v2159_v63 = vpack.c.b16 %v737_v52, %v737_v52  ;;  %v1663_v4 = vld [vmem:[%s2068_s8 + $0xd4] sm:$0xf]  ;;  %v1624_v5 = vor.u32 %v1697_v58, %v1621_v59  ;;  %v1485_v6 = vld [vmem:[%s2068_s8 + $0xd8] sm:$0xf0]  ;;  %v1424_v11 = vor.u32 %v1647_v2, %v1421_v3  ;;  %v1645_v14 = vld [vmem:[%s2068_s8 + $0x44] sm:$0xf] }
  0x88   : > { %1100 = vmatpush.bf16.msra.mxu2 %v1516_v22  ;;  %v1679_v7 = vld [vmem:[%s2068_s8 + $0x154] sm:$0xf]  ;;  %v1549_v8 = vld [vmem:[%s2068_s8 + $0x158] sm:$0xf0]  ;;  %v1488_v12 = vor.u32 %v1663_v4, %v1485_v6  ;;  %v1413_v15 = vld [vmem:[%s2068_s8 + $0x48] sm:$0xf0] }
  0x89   : > { %1113 = vmatpush.bf16.msra.mxu3 %v1580_v26  ;;  %v1695_v9 = vld [vmem:[%s2068_s8 + $0x1d4] sm:$0xf]  ;;  %v1613_v10 = vld [vmem:[%s2068_s8 + $0x1d8] sm:$0xf0]  ;;  %v1552_v13 = vor.u32 %v1679_v7, %v1549_v8  ;;  %v1661_v16 = vld [vmem:[%s2068_s8 + $0xc4] sm:$0xf]  ;;  %v1416_v23 = vor.u32 %v1645_v14, %v1413_v15 }
  0x8a   : > { %1075 = vmatpush.bf16.msra.mxu0 %v1380_v33  ;;  %v1616_v17 = vor.u32 %v1695_v9, %v1613_v10  ;;  %v1477_v18 = vld [vmem:[%s2068_s8 + $0xc8] sm:$0xf0]  ;;  %v1677_v19 = vld [vmem:[%s2068_s8 + $0x144] sm:$0xf]  ;;  %v1643_v26 = vld [vmem:[%s2068_s8 + $0x34] sm:$0xf] }
  0x8b   : > { %1088 = vmatpush.bf16.msra.mxu1 %v1444_v38  ;;  %v1541_v20 = vld [vmem:[%s2068_s8 + $0x148] sm:$0xf0]  ;;  %v1693_v21 = vld [vmem:[%s2068_s8 + $0x1c4] sm:$0xf]  ;;  %v1480_v24 = vor.u32 %v1661_v16, %v1477_v18  ;;  %v1405_v27 = vld [vmem:[%s2068_s8 + $0x38] sm:$0xf0] }
  0x8c   : > { %1101 = vmatpush.bf16.msra.mxu2 %v1508_v39  ;;  %v1605_v22 = vld [vmem:[%s2068_s8 + $0x1c8] sm:$0xf0]  ;;  %v1544_v25 = vor.u32 %v1677_v19, %v1541_v20  ;;  %v1659_v28 = vld [vmem:[%s2068_s8 + $0xb4] sm:$0xf]  ;;  %v1469_v30 = vld [vmem:[%s2068_s8 + $0xb8] sm:$0xf0]  ;;  %v1408_v35 = vor.u32 %v1643_v26, %v1405_v27 }
  0x8d   : > { %1114 = vmatpush.bf16.msra.mxu3 %v1572_v43  ;;  %1076 = vmatmul.bf16.vlgmr.msra.gmra.mxu0 %v2157_v61  ;;  %v1608_v29 = vor.u32 %v1693_v21, %v1605_v22  ;;  %v1675_v31 = vld [vmem:[%s2068_s8 + $0x134] sm:$0xf]  ;;  %v1533_v32 = vld [vmem:[%s2068_s8 + $0x138] sm:$0xf0]  ;;  %v1472_v36 = vor.u32 %v1659_v28, %v1469_v30  ;;  %v1641_v38 = vld [vmem:[%s2068_s8 + $0x24] sm:$0xf] }
  0x8e   : > { %1120 = vmatpush.bf16.msrb.mxu0 %v1440_v44  ;;  %1089 = vmatmul.bf16.vlgmr.msra.gmra.mxu1 %v2159_v63  ;;  %v1691_v33 = vld [vmem:[%s2068_s8 + $0x1b4] sm:$0xf]  ;;  %v1597_v34 = vld [vmem:[%s2068_s8 + $0x1b8] sm:$0xf0]  ;;  %v1536_v37 = vor.u32 %v1675_v31, %v1533_v32  ;;  %v1397_v39 = vld [vmem:[%s2068_s8 + $0x28] sm:$0xf0] }
  0x8f   : > { %1133 = vmatpush.bf16.msrb.mxu1 %v1504_v46  ;;  %1102 = vmatmul.bf16.vlgmr.msra.gmra.mxu2 %v2151_v57  ;;  %v1657_v40 = vld [vmem:[%s2068_s8 + $0xa4] sm:$0xf]  ;;  %v1600_v41 = vor.u32 %v1691_v33, %v1597_v34  ;;  %v1461_v42 = vld [vmem:[%s2068_s8 + $0xa8] sm:$0xf0]  ;;  %v1639_v50 = vld [vmem:[%s2068_s8 + $0x14] sm:$0xf] }
  0x90   : > { %1146 = vmatpush.bf16.msrb.mxu2 %v1568_v47  ;;  %1115 = vmatmul.bf16.vlgmr.msra.gmra.mxu3 %v2155_v60  ;;  %v1673_v43 = vld [vmem:[%s2068_s8 + $0x124] sm:$0xf]  ;;  %v1525_v44 = vld [vmem:[%s2068_s8 + $0x128] sm:$0xf0]  ;;  %v1400_v47 = vor.u32 %v1641_v38, %v1397_v39  ;;  %v1464_v48 = vor.u32 %v1657_v40, %v1461_v42  ;;  %v1389_v51 = vld [vmem:[%s2068_s8 + $0x18] sm:$0xf0] }
  0x91   : > { %1159 = vmatpush.bf16.msrb.mxu3 %v1632_v53  ;;  %v1689_v45 = vld [vmem:[%s2068_s8 + $0x1a4] sm:$0xf]  ;;  %v1589_v46 = vld [vmem:[%s2068_s8 + $0x1a8] sm:$0xf0]  ;;  %v1528_v49 = vor.u32 %v1673_v43, %v1525_v44  ;;  %v1655_v52 = vld [vmem:[%s2068_s8 + $0x94] sm:$0xf] }
  0x92   : > { %1121 = vmatpush.bf16.msrb.mxu0 %v1432_v62  ;;  %v1592_v53 = vor.u32 %v1689_v45, %v1589_v46  ;;  %v1453_v54 = vld [vmem:[%s2068_s8 + $0x98] sm:$0xf0]  ;;  %v1671_v55 = vld [vmem:[%s2068_s8 + $0x114] sm:$0xf]  ;;  %v1392_v62 = vor.u32 %v1639_v50, %v1389_v51  ;;  %v1637_v2 = vld [vmem:[%s2068_s8 + $0x4] sm:$0xf] }
  0x93   : > { %1134 = vmatpush.bf16.msrb.mxu1 %v1496_v0  ;;  %v1517_v56 = vld [vmem:[%s2068_s8 + $0x118] sm:$0xf0]  ;;  %v1687_v58 = vld [vmem:[%s2068_s8 + $0x194] sm:$0xf]  ;;  %v1456_v0 = vor.u32 %v1655_v52, %v1453_v54  ;;  %v1381_v3 = vld [vmem:[%s2068_s8 + $0x8] sm:$0xf0] }
  0x94   : > { %1147 = vmatpush.bf16.msrb.mxu2 %v1560_v1  ;;  %v1581_v59 = vld [vmem:[%s2068_s8 + $0x198] sm:$0xf0]  ;;  %v1520_v1 = vor.u32 %v1671_v55, %v1517_v56  ;;  %v1653_v4 = vld [vmem:[%s2068_s8 + $0x84] sm:$0xf]  ;;  %v1445_v6 = vld [vmem:[%s2068_s8 + $0x88] sm:$0xf0] }
  0x95   : > { %1160 = vmatpush.bf16.msrb.mxu3 %v1624_v5  ;;  %v1584_v5 = vor.u32 %v1687_v58, %v1581_v59  ;;  %v1669_v7 = vld [vmem:[%s2068_s8 + $0x104] sm:$0xf]  ;;  %v1509_v8 = vld [vmem:[%s2068_s8 + $0x108] sm:$0xf0]  ;;  %v666_v21 = vld [vmem:[#allocation2] sm:$0xff] }
  0x96   : > { %1122 = vmatpush.bf16.msrb.mxu0 %v1424_v11  ;;  %v1685_v9 = vld [vmem:[%s2068_s8 + $0x184] sm:$0xf]  ;;  %v1573_v10 = vld [vmem:[%s2068_s8 + $0x188] sm:$0xf0]  ;;  %v1384_v11 = vor.u32 %v1637_v2, %v1381_v3  ;;  %v667_v31 = vld [vmem:[#allocation2 + $0x8] sm:$0xff] }
  0x97   : > { %1135 = vmatpush.bf16.msrb.mxu1 %v1488_v12  ;;  %v1448_v12 = vor.u32 %v1653_v4, %v1445_v6  ;;  %v1576_v14 = vor.u32 %v1685_v9, %v1573_v10 }
  0x98   : > { %1148 = vmatpush.bf16.msrb.mxu2 %v1552_v13  ;;  %v1512_v13 = vor.u32 %v1669_v7, %v1509_v8 }
  0x99   : > { %1161 = vmatpush.bf16.msrb.mxu3 %v1616_v17 }
  0x9a   : > { %1123 = vmatpush.bf16.msrb.mxu0 %v1416_v23 }
  0x9b   : > { %1136 = vmatpush.bf16.msrb.mxu1 %v1480_v24 }
  0x9c   : > { %1149 = vmatpush.bf16.msrb.mxu2 %v1544_v25 }
  0x9d   : > { %1162 = vmatpush.bf16.msrb.mxu3 %v1608_v29 }
  0x9e   : > { %1124 = vmatpush.bf16.msrb.mxu0 %v1408_v35 }
  0x9f   : > { %1137 = vmatpush.bf16.msrb.mxu1 %v1472_v36 }
  0xa0   : > { %1150 = vmatpush.bf16.msrb.mxu2 %v1536_v37 }
  0xa1   : > { %1163 = vmatpush.bf16.msrb.mxu3 %v1600_v41 }
  0xa2   : > { %1125 = vmatpush.bf16.msrb.mxu0 %v1400_v47 }
  0xa3   : > { %1138 = vmatpush.bf16.msrb.mxu1 %v1464_v48 }
  0xa4   : > { %1151 = vmatpush.bf16.msrb.mxu2 %v1528_v49 }
  0xa5   : > { %1164 = vmatpush.bf16.msrb.mxu3 %v1592_v53 }
  0xa6   : > { %1126 = vmatpush.bf16.msrb.mxu0 %v1392_v62 }
  0xa7   : > { %1139 = vmatpush.bf16.msrb.mxu1 %v1456_v0 }
  0xa8   : > { %1152 = vmatpush.bf16.msrb.mxu2 %v1520_v1 }
  0xa9   : > { %1165 = vmatpush.bf16.msrb.mxu3 %v1584_v5 }
  0xaa   : > { %1127 = vmatpush.bf16.msrb.mxu0 %v1384_v11 }
  0xab   : > { %1140 = vmatpush.bf16.msrb.mxu1 %v1448_v12 }
  0xac   : > { %1153 = vmatpush.bf16.msrb.mxu2 %v1512_v13 }
  0xad   : > { %1166 = vmatpush.bf16.msrb.mxu3 %v1576_v14  ;;  %1128 = vmatmul.bf16.vlgmr.msrb.gmra.mxu0 %v2157_v61 }
  0xae   : > { %1141 = vmatmul.bf16.vlgmr.msrb.gmra.mxu1 %v2159_v63 }
  0xaf   : > { %1154 = vmatmul.bf16.vlgmr.msrb.gmra.mxu2 %v2151_v57 }
  0xb0   : > { %1167 = vmatmul.bf16.vlgmr.msrb.gmra.mxu3 %v2155_v60 }
 0x10a   : > { %v1077_v15 = vpop.f32.mrf.mxu0 }
 0x10b   : > { %v1090_v16 = vpop.f32.mrf.mxu1 }
 0x10c   : > { %v1091_v17 = vadd.f32 %v1090_v16, %v1077_v15 }
 0x112   : > { %v1103_v18 = vpop.f32.mrf.mxu2  ;;  %v1079_v23 = vpop.f32.mrf.mxu0 }
 0x113   : > { %v1104_v19 = vadd.f32 %v1103_v18, %v1091_v17  ;;  %v1116_v20 = vpop.f32.mrf.mxu3  ;;  %v1092_v24 = vpop.f32.mrf.mxu1 }
 0x115   : > { %v1117_v22 = vadd.f32 %v1116_v20, %v1104_v19 }
 0x117   : > { %v1172_v25 = vadd.f32 %v1117_v22, %v666_v21 }
 0x119   : > { %1174 = vst [vmem:[#allocation2] sm:$0xff] %v1172_v25 }
 0x11a   : > { %v1105_v26 = vpop.f32.mrf.mxu2 }
 0x11b   : > { %v1118_v61 = vpop.f32.mrf.mxu3 }
 0x12a   : > { %v1129_v27 = vpop.f32.mrf.mxu0 }
 0x12b   : > { %v1142_v63 = vpop.f32.mrf.mxu1 }
 0x12c   : > { %v1143_v28 = vadd.f32 %v1142_v63, %v1129_v27 }
 0x132   : > { %v1155_v57 = vpop.f32.mrf.mxu2  ;;  %v1131_v30 = vpop.f32.mrf.mxu0 }
 0x133   : > { %v1156_v29 = vadd.f32 %v1155_v57, %v1143_v28  ;;  %v1168_v60 = vpop.f32.mrf.mxu3  ;;  %v1144_v32 = vpop.f32.mrf.mxu1 }
 0x135   : > { %v1169_v33 = vadd.f32 %v1168_v60, %v1156_v29 }
 0x137   : > { %v1173_v34 = vadd.f32 %v1169_v33, %v667_v31  ;;  %1179 = sbr.rel (%p1633_p13) target bundleno = 332 (0x14c), region = 86 }
 0x139   : > { %1175 = vst [vmem:[#allocation2 + $0x8] sm:$0xff] %v1173_v34 }
 0x13a   : > { %v1157_v35 = vpop.f32.mrf.mxu2 }
 0x13b   : > { %v1170_v36 = vpop.f32.mrf.mxu3 }
 0x13c   : > { %v1180_v37 = vld [vmem:[#allocation2] sm:$0xff] }
 0x13d   : > { %v1182_v39 = vld [vmem:[%s633_s18] sm:$0x3] }
 0x13e   : > { %v1184_v40 = vperm.slane %v1182_v39, 0  ;;  %v1185_v41 = vperm.slane %v1182_v39, 1  ;;  %v1190_v42 = vld [vmem:[%s638_s21] sm:$0x3] }
 0x13f   : > { %v1198_v43 = vld [vmem:[%s2061_s17] sm:$0xff]  ;;  %v1192_v44 = vperm.slane %v1190_v42, 0  ;;  %v1193_v45 = vperm.slane %v1190_v42, 1 }
 0x140   : > { %v1181_v38 = vld [vmem:[#allocation2 + $0x8] sm:$0xff]  ;;  %v1188_v46 = vmul.f32 %v1184_v40, %v1180_v37  ;;  %v1199_v48 = vunpack.c.l.bf16 %v1198_v43  ;;  %v1200_v49 = vunpack.c.h.bf16 %v1198_v43 }
 0x141   : > { %v1189_v47 = vmul.f32 %v1185_v41, %v1181_v38 }
 0x142   : > { %v1196_v50 = vadd.f32 %v1192_v44, %v1188_v46 }
 0x143   : > { %v1197_v51 = vadd.f32 %v1193_v45, %v1189_v47 }
 0x144   : > { %v1201_v52 = vadd.f32 %v1199_v48, %v1196_v50 }
 0x145   : > { %v1202_v53 = vadd.f32 %v1200_v49, %v1197_v51 }
 0x146   : > { %v1203_v54 = vmax.f32 %v1201_v52, 0.0 }
 0x147   : > { %v1204_v55 = vmax.f32 %v1202_v53, 0.0 }
 0x149   : > { %v1205_v56 = vpack.c.bf16 %v1204_v55, %v1203_v54 }
 0x14b   : > { %1206 = vst [vmem:[%s2066_s7] sm:$0xff] %v1205_v56 }
 0x14c PF: > { %s15_s24 = sadd.s32 1, %s1812_s24   ;;  %s2257_s18 = smov %s1792_s19 }
 0x14d   : > { %p12_p0 = scmp.ge.s32.totalorder %s15_s24, 20   ;;  %s2258_s19 = smov %s1896_s6 }
 0x14e   : > { %s2259_s20 = smov %s1804_s22  ;;  %s2260_s21 = smov %s1808_s23 }
 0x14f   : > { %s2261_s22 = smov %s2264_s25  ;;  %s2262_s23 = smov %s2268_s26 }
 0x150   :  { %14 = sbr.rel (!%p12_p0) target bundleno = 4 (0x4), region = 133 }

// kernel: resnet_forward.28
= control target key start
LH: loop header
LB: loop body
LE: loop exit
PB: predicated region body
PF: predicated region fallthrough
CT: control target
= control target key end

     0   :  { %vm46_vm0 = vcmask 1040384   ;;  %vm50_vm1 = vcmask 1042434   ;;  %vm54_vm2 = vcmask 1041408   ;;  %vm83_vm3 = vcmask 1041409   ;;  %s142_s0 = inlined_call_operand.vmem [shape: bf16[2,1,512], index: 0, kind: input, shape index: {}]   ;;  %s143_s1 = inlined_call_operand.vmem [shape: bf16[2,512], index: 1, kind: output, shape index: {}]  }
   0x1   :  { %v110_v0 = vld [vmem:[%s142_s0] sm:$0xff]  }
   0x2   :  { %v112_v1 = vunpack.c.h.bf16 %v110_v0  ;;  %v111_v2 = vunpack.c.l.bf16 %v110_v0 }
   0x4   :  { %v20_v3 = vperm.slane %v112_v1, 0  ;;  %v21_v4 = vperm.slane %v112_v1, 2  ;;  %v22_v5 = vperm.slane %v112_v1, 4  ;;  %v23_v6 = vperm.slane %v112_v1, 6 }
   0x5   :  { %v16_v7 = vperm.slane %v111_v2, 0  ;;  %v17_v8 = vperm.slane %v111_v2, 2  ;;  %v18_v9 = vperm.slane %v111_v2, 4  ;;  %v19_v10 = vperm.slane %v111_v2, 6 }
   0x6   :  { %v34_v11 = vpack.c.bf16 %v21_v4, %v20_v3  ;;  %v35_v12 = vpack.c.bf16 %v23_v6, %v22_v5 }
   0x7   :  { %v32_v13 = vpack.c.bf16 %v17_v8, %v16_v7  ;;  %v33_v14 = vpack.c.bf16 %v19_v10, %v18_v9 }
   0x8   :  { %v43_v15 = vrot.slane %v34_v11, 3  ;;  %v44_v16 = vrot.slane %v35_v12, 6  ;;  %v45_v17 = vrot.slane %v35_v12, 1 }
   0x9   :  { %v40_v18 = vrot.slane %v32_v13, 3  ;;  %v41_v19 = vrot.slane %v33_v14, 6  ;;  %v42_v20 = vrot.slane %v33_v14, 1 }
   0xa   :  { %v58_v21 = vsel %vm46_vm0, %v34_v11, %v43_v15  ;;  %v61_v22 = vsel %vm50_vm1, %v44_v16, %v45_v17 }
   0xb   :  { %v62_v23 = vsel %vm54_vm2, %v58_v21, %v61_v22  ;;  %v49_v24 = vsel %vm46_vm0, %v32_v13, %v40_v18  ;;  %v53_v25 = vsel %vm50_vm1, %v41_v19, %v42_v20 }
   0xc   :  { %69 = vst [vmem:[#allocation1 + $0x20] ss:$4 sm:$0xff] %v62_v23  ;;  %v55_v26 = vsel %vm54_vm2, %v49_v24, %v53_v25 }
   0xd   :  { %63 = vst [vmem:[#allocation1] ss:$4 sm:$0xff] %v55_v26 }
  0x13   :  { %v70_v27 = vld [vmem:[#allocation1 + $0x20] sm:$0xff]  ;;  %v72_v28 = vld [vmem:[#allocation1 + $0x28] sm:$0xff] }
  0x14   :  { %v64_v29 = vld [vmem:[#allocation1] sm:$0xff]  ;;  %v66_v30 = vld [vmem:[#allocation1 + $0x8] sm:$0xff]  ;;  %v78_v31 = vunpack.c.l.b16 %v70_v27  ;;  %v79_v32 = vunpack.c.h.b16 %v70_v27  ;;  %v80_v33 = vunpack.c.l.b16 %v72_v28  ;;  %v81_v34 = vunpack.c.h.b16 %v72_v28 }
  0x15   :  { %v74_v35 = vunpack.c.l.b16 %v64_v29  ;;  %v75_v36 = vunpack.c.h.b16 %v64_v29  ;;  %v76_v37 = vunpack.c.l.b16 %v66_v30  ;;  %v77_v38 = vunpack.c.h.b16 %v66_v30 }
  0x16   :  { %v82_v39 = vrot.slane %v78_v31, 7  ;;  %v85_v40 = vrot.slane %v79_v32, 7  ;;  %v87_v41 = vrot.slane %v80_v33, 7  ;;  %v89_v42 = vrot.slane %v81_v34, 7 }
  0x18   :  { %v84_v43 = vsel %vm83_vm3, %v82_v39, %v74_v35  ;;  %v86_v44 = vsel %vm83_vm3, %v85_v40, %v75_v36  ;;  %v88_v45 = vsel %vm83_vm3, %v87_v41, %v76_v37  ;;  %v90_v46 = vsel %vm83_vm3, %v89_v42, %v77_v38 }
  0x19   :  { %v91_v47 = vpack.c.b16 %v86_v44, %v84_v43  ;;  %v92_v48 = vpack.c.b16 %v90_v46, %v88_v45 }
  0x1b   :  { %v93_v49 = vrot.slane %v91_v47, 3  ;;  %v94_v50 = vrot.slane %v92_v48, 6  ;;  %v95_v51 = vrot.slane %v92_v48, 1 }
  0x1d   :  { %v98_v52 = vsel %vm46_vm0, %v91_v47, %v93_v49  ;;  %v101_v53 = vsel %vm50_vm1, %v94_v50, %v95_v51 }
  0x1e   :  { %v102_v54 = vsel %vm54_vm2, %v98_v52, %v101_v53 }
  0x1f   :  { %104 = vst [vmem:[%s143_s1] sm:$0xf] %v102_v54 }

// kernel: resnet_forward.26
= control target key start
LH: loop header
LB: loop body
LE: loop exit
PB: predicated region body
PF: predicated region fallthrough
CT: control target
= control target key end

     0   :  { %s1170_s15 = smov 0   ;;  %s1172_s16 = smov 0   ;;  %s1378_s0 = inlined_call_operand.vmem [shape: bf16[8,256], index: 0, kind: input, shape index: {}]   ;;  %s1379_s1 = inlined_call_operand.vmem [shape: bf16[256,512], index: 1, kind: input, shape index: {}]   ;;  %s1380_s2 = inlined_call_operand.vmem [shape: f32[1,512], index: 2, kind: input, shape index: {}]   ;;  %s1381_s3 = inlined_call_operand.vmem [shape: f32[1,512], index: 3, kind: input, shape index: {}]   ;;  %s1382_s4 = inlined_call_operand.vmem [shape: bf16[8,512], index: 4, kind: output, shape index: {}]  }
   0x1   :  { %s1174_s17 = smov 0   ;;  %s1176_s18 = smov 0  }
   0x2   :  { %s1178_s19 = smov 0  }
   0x3 LB: > { %s29_s20 = sadd.s32 1, %s1139_s18  ;;  %p77_p1 = scmp.ne.s32.totalorder %s1131_s16, %s1127_s15  ;;  %s1143_s19 = sphi %s1178_s19, %s14_s19   ;;  %s1139_s18 = sphi %s1176_s18, %s1386_s18   ;;  %s1135_s17 = sphi %s1174_s17, %s1385_s17   ;;  %s1131_s16 = sphi %s1172_s16, %s1384_s16   ;;  %s1127_s15 = sphi %s1170_s15, %s1383_s15  }
   0x4   : > { %p31_p0 = scmp.ge.s32.totalorder %s29_s20, 2  ;;  %p78_p2 = scmp.eq.s32.totalorder %s1143_s19, 0 }
   0x5   : > { %s70_s22 = sadd.s32 1, %s1131_s16  ;;  %p892_p5 = scmp.ge.s32.totalorder %s1143_s19, 2 }
   0x6   : > { %s1388_s20 = smov (%p31_p0, %s29_s20), 0  ;;  %p79_p3 = por %p78_p2, %p77_p1 }
   0x7   : > { %s66_s21 = ssub.s32 %s1139_s18, %s1388_s20  ;;  %196 = sbr.rel (%p892_p5) target bundleno = 48 (0x30), region = 20 }
   0x8   : > { %p68_p4 = scmp.eq.s32.totalorder %s66_s21, 0 }
   0xa   : > { %s1205_s23 = scalar_select %p68_p4, %s1131_s16, %s70_s22  }
   0xc   : > { %199 = sbr.rel (!%p79_p3) target bundleno = 48 (0x30), region = 24  ;;  %s201_s24 = sand.u32 (%p79_p3), 1, %s1131_s16  }
   0xd   : > { %s1032_s25 = sshll.u32 (%p79_p3), %s1139_s18, 3  ;;  %s893_s26 = sshll.u32 (%p79_p3), %s201_s24, 8 }
   0xe   : > { %s1213_s29 = scalar_lea.vmem (%p79_p3), %s1379_s1, %s1032_s25  ;;  %s1218_s30 = scalar_lea.vmem (%p79_p3), [#allocation3], %s893_s26 }
   0xf   : > { %v300_v0 = vld [vmem:[%s1213_s29] sm:$0xff] (%p79_p3)  ;;  %v302_v1 = vld [vmem:[%s1213_s29 + $0x10] sm:$0xff] (%p79_p3) }
  0x10   : > { %v304_v2 = vld [vmem:[%s1213_s29 + $0x20] sm:$0xff] (%p79_p3)  ;;  %301 = vst [vmem:[%s1218_s30] sm:$0xff] (%p79_p3), %v300_v0  ;;  %v306_v3 = vld [vmem:[%s1213_s29 + $0x30] sm:$0xff] (%p79_p3) }
  0x11   : > { %303 = vst [vmem:[%s1218_s30 + $0x8] sm:$0xff] %v302_v1  ;;  %v308_v4 = vld [vmem:[%s1213_s29 + $0x40] sm:$0xff]  ;;  %v310_v5 = vld [vmem:[%s1213_s29 + $0x50] sm:$0xff] }
  0x12   : > { %305 = vst [vmem:[%s1218_s30 + $0x10] sm:$0xff] %v304_v2  ;;  %v312_v6 = vld [vmem:[%s1213_s29 + $0x60] sm:$0xff]  ;;  %v314_v7 = vld [vmem:[%s1213_s29 + $0x70] sm:$0xff] }
  0x13   : > { %307 = vst [vmem:[%s1218_s30 + $0x18] sm:$0xff] %v306_v3  ;;  %v316_v8 = vld [vmem:[%s1213_s29 + $0x80] sm:$0xff]  ;;  %v318_v9 = vld [vmem:[%s1213_s29 + $0x90] sm:$0xff] }
  0x14   : > { %309 = vst [vmem:[%s1218_s30 + $0x20] sm:$0xff] %v308_v4  ;;  %v320_v10 = vld [vmem:[%s1213_s29 + $0xa0] sm:$0xff]  ;;  %v322_v11 = vld [vmem:[%s1213_s29 + $0xb0] sm:$0xff] }
  0x15   : > { %311 = vst [vmem:[%s1218_s30 + $0x28] sm:$0xff] %v310_v5  ;;  %v324_v12 = vld [vmem:[%s1213_s29 + $0xc0] sm:$0xff]  ;;  %v326_v13 = vld [vmem:[%s1213_s29 + $0xd0] sm:$0xff] }
  0x16   : > { %313 = vst [vmem:[%s1218_s30 + $0x30] sm:$0xff] %v312_v6  ;;  %v328_v14 = vld [vmem:[%s1213_s29 + $0xe0] sm:$0xff]  ;;  %v330_v15 = vld [vmem:[%s1213_s29 + $0xf0] sm:$0xff] }
  0x17   : > { %315 = vst [vmem:[%s1218_s30 + $0x38] sm:$0xff] %v314_v7  ;;  %v332_v16 = vld [vmem:[%s1213_s29 + $0x100] sm:$0xff]  ;;  %v334_v17 = vld [vmem:[%s1213_s29 + $0x110] sm:$0xff] }
  0x18   : > { %317 = vst [vmem:[%s1218_s30 + $0x40] sm:$0xff] %v316_v8  ;;  %v336_v18 = vld [vmem:[%s1213_s29 + $0x120] sm:$0xff]  ;;  %v338_v19 = vld [vmem:[%s1213_s29 + $0x130] sm:$0xff] }
  0x19   : > { %319 = vst [vmem:[%s1218_s30 + $0x48] sm:$0xff] %v318_v9  ;;  %v340_v20 = vld [vmem:[%s1213_s29 + $0x140] sm:$0xff]  ;;  %v342_v21 = vld [vmem:[%s1213_s29 + $0x150] sm:$0xff] }
  0x1a   : > { %321 = vst [vmem:[%s1218_s30 + $0x50] sm:$0xff] %v320_v10  ;;  %v344_v22 = vld [vmem:[%s1213_s29 + $0x160] sm:$0xff]  ;;  %v346_v23 = vld [vmem:[%s1213_s29 + $0x170] sm:$0xff] }
  0x1b   : > { %323 = vst [vmem:[%s1218_s30 + $0x58] sm:$0xff] %v322_v11  ;;  %v348_v24 = vld [vmem:[%s1213_s29 + $0x180] sm:$0xff]  ;;  %v350_v25 = vld [vmem:[%s1213_s29 + $0x190] sm:$0xff] }
  0x1c   : > { %325 = vst [vmem:[%s1218_s30 + $0x60] sm:$0xff] %v324_v12  ;;  %v352_v26 = vld [vmem:[%s1213_s29 + $0x1a0] sm:$0xff]  ;;  %v354_v27 = vld [vmem:[%s1213_s29 + $0x1b0] sm:$0xff] }
  0x1d   : > { %327 = vst [vmem:[%s1218_s30 + $0x68] sm:$0xff] %v326_v13  ;;  %v356_v28 = vld [vmem:[%s1213_s29 + $0x1c0] sm:$0xff]  ;;  %v358_v29 = vld [vmem:[%s1213_s29 + $0x1d0] sm:$0xff] }
  0x1e   : > { %329 = vst [vmem:[%s1218_s30 + $0x70] sm:$0xff] %v328_v14  ;;  %v360_v30 = vld [vmem:[%s1213_s29 + $0x1e0] sm:$0xff]  ;;  %v362_v31 = vld [vmem:[%s1213_s29 + $0x1f0] sm:$0xff] }
  0x1f   : > { %331 = vst [vmem:[%s1218_s30 + $0x78] sm:$0xff] %v330_v15 }
  0x20   : > { %333 = vst [vmem:[%s1218_s30 + $0x80] sm:$0xff] %v332_v16 }
  0x21   : > { %335 = vst [vmem:[%s1218_s30 + $0x88] sm:$0xff] %v334_v17 }
  0x22   : > { %337 = vst [vmem:[%s1218_s30 + $0x90] sm:$0xff] %v336_v18 }
  0x23   : > { %339 = vst [vmem:[%s1218_s30 + $0x98] sm:$0xff] %v338_v19 }
  0x24   : > { %341 = vst [vmem:[%s1218_s30 + $0xa0] sm:$0xff] %v340_v20 }
  0x25   : > { %343 = vst [vmem:[%s1218_s30 + $0xa8] sm:$0xff] %v342_v21 }
  0x26   : > { %345 = vst [vmem:[%s1218_s30 + $0xb0] sm:$0xff] %v344_v22 }
  0x27   : > { %347 = vst [vmem:[%s1218_s30 + $0xb8] sm:$0xff] %v346_v23 }
  0x28   : > { %349 = vst [vmem:[%s1218_s30 + $0xc0] sm:$0xff] %v348_v24 }
  0x29   : > { %351 = vst [vmem:[%s1218_s30 + $0xc8] sm:$0xff] %v350_v25 }
  0x2a   : > { %353 = vst [vmem:[%s1218_s30 + $0xd0] sm:$0xff] %v352_v26 }
  0x2b   : > { %355 = vst [vmem:[%s1218_s30 + $0xd8] sm:$0xff] %v354_v27 }
  0x2c   : > { %357 = vst [vmem:[%s1218_s30 + $0xe0] sm:$0xff] %v356_v28 }
  0x2d   : > { %359 = vst [vmem:[%s1218_s30 + $0xe8] sm:$0xff] %v358_v29 }
  0x2e   : > { %361 = vst [vmem:[%s1218_s30 + $0xf0] sm:$0xff] %v360_v30 }
  0x2f   : > { %363 = vst [vmem:[%s1218_s30 + $0xf8] sm:$0xff] %v362_v31 }
  0x30 PF: > { %p896_p6 = scmp.ge.s32.totalorder %s1143_s19, 1  ;;  %p384_p7 = scmp.lt.s32.totalorder %s1143_s19, 3 }
  0x32   : > { %p385_p8 = pnand %p896_p6, %p384_p7 }
  0x33   : > { %s391_s5 = sand.u32 (!%p385_p8), 1, %s1127_s15   ;;  %s898_s10 = sshll.u32 (!%p385_p8), %s1135_s17, 1 }
  0x34   : > { %388 = sbr.rel (%p385_p8) target bundleno = 234 (0xea), region = 70  ;;  %s897_s6 = sshll.u32 (!%p385_p8), %s391_s5, 8 }
  0x35   : > { %s1284_s7 = scalar_lea.vmem (!%p385_p8), [#allocation3], %s897_s6  ;;  %p450_p9 = scmp.lt.s32.totalorder (!%p385_p8), %s898_s10, 3 }
  0x39   : > { %v960_v32 = vld [vmem:[%s1284_s7 + $0x70] sm:$0xf]  ;;  %v1048_v33 = vld [vmem:[%s1284_s7 + $0x74] sm:$0xf0]  ;;  %v1047_v37 = vld [vmem:[%s1284_s7 + $0x74] sm:$0xf] }
  0x3a   : > { %v1024_v34 = vld [vmem:[%s1284_s7 + $0xf0] sm:$0xf]  ;;  %v961_v35 = vor.u32 %v1048_v33, %v960_v32  ;;  %v1064_v36 = vld [vmem:[%s1284_s7 + $0xf4] sm:$0xf0]  ;;  %v962_v38 = vld [vmem:[%s1284_s7 + $0x78] sm:$0xf0] }
  0x3b   : > { %v1025_v39 = vor.u32 %v1064_v36, %v1024_v34  ;;  %v965_v40 = vor.u32 %v1047_v37, %v962_v38  ;;  %v1063_v41 = vld [vmem:[%s1284_s7 + $0xf4] sm:$0xf]  ;;  %v1026_v42 = vld [vmem:[%s1284_s7 + $0xf8] sm:$0xf0]  ;;  %v952_v43 = vld [vmem:[%s1284_s7 + $0x60] sm:$0xf] }
  0x3c   : > { %677 = vmatpush.bf16.msra.mxu0 %v961_v35  ;;  %v1029_v44 = vor.u32 %v1063_v41, %v1026_v42  ;;  %v1046_v45 = vld [vmem:[%s1284_s7 + $0x64] sm:$0xf0]  ;;  %v1016_v46 = vld [vmem:[%s1284_s7 + $0xe0] sm:$0xf]  ;;  %v1045_v50 = vld [vmem:[%s1284_s7 + $0x64] sm:$0xf] }
  0x3d   : > { %v1062_v47 = vld [vmem:[%s1284_s7 + $0xe4] sm:$0xf0]  ;;  %690 = vmatpush.bf16.msra.mxu1 %v1025_v39  ;;  %703 = vmatpush.bf16.msra.mxu2 %v965_v40  ;;  %v953_v48 = vor.u32 %v1046_v45, %v952_v43  ;;  %v954_v51 = vld [vmem:[%s1284_s7 + $0x68] sm:$0xf0]  ;;  %v1061_v52 = vld [vmem:[%s1284_s7 + $0xe4] sm:$0xf] }
  0x3e   : > { %v1017_v49 = vor.u32 %v1062_v47, %v1016_v46  ;;  %716 = vmatpush.bf16.msra.mxu3 %v1029_v44  ;;  %v957_v53 = vor.u32 %v1045_v50, %v954_v51  ;;  %v1018_v54 = vld [vmem:[%s1284_s7 + $0xe8] sm:$0xf0]  ;;  %v944_v55 = vld [vmem:[%s1284_s7 + $0x50] sm:$0xf]  ;;  %v1044_v56 = vld [vmem:[%s1284_s7 + $0x54] sm:$0xf0] }
  0x3f   : > { %v1021_v57 = vor.u32 %v1061_v52, %v1018_v54  ;;  %v1008_v58 = vld [vmem:[%s1284_s7 + $0xd0] sm:$0xf]  ;;  %v1060_v59 = vld [vmem:[%s1284_s7 + $0xd4] sm:$0xf0]  ;;  %v1043_v60 = vld [vmem:[%s1284_s7 + $0x54] sm:$0xf]  ;;  %v945_v61 = vor.u32 %v1044_v56, %v944_v55 }
  0x40   : > { %678 = vmatpush.bf16.msra.mxu0 %v953_v48  ;;  %v946_v62 = vld [vmem:[%s1284_s7 + $0x58] sm:$0xf0]  ;;  %v1059_v63 = vld [vmem:[%s1284_s7 + $0xd4] sm:$0xf]  ;;  %v1009_v1 = vor.u32 %v1060_v59, %v1008_v58  ;;  %v936_v3 = vld [vmem:[%s1284_s7 + $0x40] sm:$0xf] }
  0x41   : > { %v1010_v0 = vld [vmem:[%s1284_s7 + $0xd8] sm:$0xf0]  ;;  %691 = vmatpush.bf16.msra.mxu1 %v1017_v49  ;;  %704 = vmatpush.bf16.msra.mxu2 %v957_v53  ;;  %v949_v2 = vor.u32 %v1043_v60, %v946_v62  ;;  %v1042_v4 = vld [vmem:[%s1284_s7 + $0x44] sm:$0xf0]  ;;  %v1000_v5 = vld [vmem:[%s1284_s7 + $0xc0] sm:$0xf] }
  0x42   : > { %717 = vmatpush.bf16.msra.mxu3 %v1021_v57  ;;  %v1013_v6 = vor.u32 %v1059_v63, %v1010_v0  ;;  %v1058_v7 = vld [vmem:[%s1284_s7 + $0xc4] sm:$0xf0]  ;;  %v1041_v8 = vld [vmem:[%s1284_s7 + $0x44] sm:$0xf]  ;;  %v938_v9 = vld [vmem:[%s1284_s7 + $0x48] sm:$0xf0]  ;;  %v937_v12 = vor.u32 %v1042_v4, %v936_v3 }
  0x43   : > { %v1057_v10 = vld [vmem:[%s1284_s7 + $0xc4] sm:$0xf]  ;;  %v1002_v11 = vld [vmem:[%s1284_s7 + $0xc8] sm:$0xf0]  ;;  %v1001_v13 = vor.u32 %v1058_v7, %v1000_v5  ;;  %v941_v14 = vor.u32 %v1041_v8, %v938_v9  ;;  %v928_v15 = vld [vmem:[%s1284_s7 + $0x30] sm:$0xf] }
  0x44   : > { %679 = vmatpush.bf16.msra.mxu0 %v945_v61  ;;  %v1040_v16 = vld [vmem:[%s1284_s7 + $0x34] sm:$0xf0]  ;;  %v992_v17 = vld [vmem:[%s1284_s7 + $0xb0] sm:$0xf]  ;;  %v1005_v18 = vor.u32 %v1057_v10, %v1002_v11  ;;  %v1039_v20 = vld [vmem:[%s1284_s7 + $0x34] sm:$0xf] }
  0x45   : > { %692 = vmatpush.bf16.msra.mxu1 %v1009_v1  ;;  %705 = vmatpush.bf16.msra.mxu2 %v949_v2  ;;  %v1056_v19 = vld [vmem:[%s1284_s7 + $0xb4] sm:$0xf0]  ;;  %v930_v21 = vld [vmem:[%s1284_s7 + $0x38] sm:$0xf0]  ;;  %v1055_v22 = vld [vmem:[%s1284_s7 + $0xb4] sm:$0xf]  ;;  %v929_v24 = vor.u32 %v1040_v16, %v928_v15 }
  0x46   : > { %718 = vmatpush.bf16.msra.mxu3 %v1013_v6  ;;  %v994_v23 = vld [vmem:[%s1284_s7 + $0xb8] sm:$0xf0]  ;;  %v993_v25 = vor.u32 %v1056_v19, %v992_v17  ;;  %v933_v26 = vor.u32 %v1039_v20, %v930_v21  ;;  %v920_v27 = vld [vmem:[%s1284_s7 + $0x20] sm:$0xf]  ;;  %v1038_v28 = vld [vmem:[%s1284_s7 + $0x24] sm:$0xf0] }
  0x47   : > { %v984_v29 = vld [vmem:[%s1284_s7 + $0xa0] sm:$0xf]  ;;  %v997_v30 = vor.u32 %v1055_v22, %v994_v23  ;;  %v1054_v31 = vld [vmem:[%s1284_s7 + $0xa4] sm:$0xf0]  ;;  %v1037_v32 = vld [vmem:[%s1284_s7 + $0x24] sm:$0xf]  ;;  %v921_v36 = vor.u32 %v1038_v28, %v920_v27 }
  0x48   : > { %680 = vmatpush.bf16.msra.mxu0 %v937_v12  ;;  %v922_v33 = vld [vmem:[%s1284_s7 + $0x28] sm:$0xf0]  ;;  %v1053_v34 = vld [vmem:[%s1284_s7 + $0xa4] sm:$0xf]  ;;  %v985_v37 = vor.u32 %v1054_v31, %v984_v29  ;;  %v912_v39 = vld [vmem:[%s1284_s7 + $0x10] sm:$0xf] }
  0x49   : > { %693 = vmatpush.bf16.msra.mxu1 %v1001_v13  ;;  %706 = vmatpush.bf16.msra.mxu2 %v941_v14  ;;  %v986_v35 = vld [vmem:[%s1284_s7 + $0xa8] sm:$0xf0]  ;;  %v925_v38 = vor.u32 %v1037_v32, %v922_v33  ;;  %v1036_v40 = vld [vmem:[%s1284_s7 + $0x14] sm:$0xf0]  ;;  %v976_v41 = vld [vmem:[%s1284_s7 + $0x90] sm:$0xf] }
  0x4a   : > { %719 = vmatpush.bf16.msra.mxu3 %v1005_v18  ;;  %v989_v42 = vor.u32 %v1053_v34, %v986_v35  ;;  %v1052_v43 = vld [vmem:[%s1284_s7 + $0x94] sm:$0xf0]  ;;  %v1035_v44 = vld [vmem:[%s1284_s7 + $0x14] sm:$0xf]  ;;  %v914_v45 = vld [vmem:[%s1284_s7 + $0x18] sm:$0xf0]  ;;  %v913_v48 = vor.u32 %v1036_v40, %v912_v39 }
  0x4b   : > { %v1051_v46 = vld [vmem:[%s1284_s7 + $0x94] sm:$0xf]  ;;  %v978_v47 = vld [vmem:[%s1284_s7 + $0x98] sm:$0xf0]  ;;  %v477_v49 = vld [vmem:[%s1378_s0] sm:$0xff]  ;;  %v977_v50 = vor.u32 %v1052_v43, %v976_v41  ;;  %v917_v51 = vor.u32 %v1035_v44, %v914_v45  ;;  %s1390_s10 = smov (!%p450_p9, %s898_s10), 3 }
  0x4c   : > { %681 = vmatpush.bf16.msra.mxu0 %v929_v24  ;;  %v904_v52 = vld [vmem:[%s1284_s7] sm:$0xf]  ;;  %v1034_v53 = vld [vmem:[%s1284_s7 + $0x4] sm:$0xf0]  ;;  %v981_v55 = vor.u32 %v1051_v46, %v978_v47  ;;  %v1033_v57 = vld [vmem:[%s1284_s7 + $0x4] sm:$0xf]  ;;  %v511_v61 = vunpack.c.l.b16 %v477_v49  ;;  %v512_v63 = vunpack.c.h.b16 %v477_v49  ;;  %s452_s13 = scalar_lea.vmem %s1380_s2, %s1390_s10  ;;  %s457_s21 = scalar_lea.vmem %s1381_s3, %s1390_s10 }
  0x4d   : > { %694 = vmatpush.bf16.msra.mxu1 %v993_v25  ;;  %707 = vmatpush.bf16.msra.mxu2 %v933_v26  ;;  %v968_v54 = vld [vmem:[%s1284_s7 + $0x80] sm:$0xf]  ;;  %v1050_v56 = vld [vmem:[%s1284_s7 + $0x84] sm:$0xf0]  ;;  %v906_v58 = vld [vmem:[%s1284_s7 + $0x8] sm:$0xf0]  ;;  %v905_v62 = vor.u32 %v1034_v53, %v904_v52 }
  0x4e   : > { %720 = vmatpush.bf16.msra.mxu3 %v997_v30  ;;  %v1049_v59 = vld [vmem:[%s1284_s7 + $0x84] sm:$0xf]  ;;  %v970_v60 = vld [vmem:[%s1284_s7 + $0x88] sm:$0xf0]  ;;  %v969_v0 = vor.u32 %v1050_v56, %v968_v54  ;;  %v909_v1 = vor.u32 %v1033_v57, %v906_v58  ;;  %v513_v3 = vpack.c.b16 %v511_v61, %v511_v61  ;;  %v514_v4 = vpack.c.b16 %v512_v63, %v512_v63  ;;  %v738_v6 = vld [vmem:[%s452_s13] sm:$0x3] }
  0x4f   : > { %v973_v2 = vor.u32 %v1049_v59, %v970_v60  ;;  %v740_v9 = vperm.slane %v738_v6, 0  ;;  %v746_v10 = vld [vmem:[%s457_s21] sm:$0x3]  ;;  %v741_v14 = vperm.slane %v738_v6, 1  ;;  %s901_s17 = sshll.u32 %s1390_s10, 2 }
  0x50   : > { %682 = vmatpush.bf16.msra.mxu0 %v921_v36  ;;  %v748_v12 = vperm.slane %v746_v10, 0  ;;  %v749_v18 = vperm.slane %v746_v10, 1  ;;  %s467_s25 = scalar_lea.vmem %s1382_s4, %s901_s17 }
  0x51   : > { %695 = vmatpush.bf16.msra.mxu1 %v985_v37  ;;  %708 = vmatpush.bf16.msra.mxu2 %v925_v38 }
  0x52   : > { %721 = vmatpush.bf16.msra.mxu3 %v989_v42 }
  0x54   : > { %683 = vmatpush.bf16.msra.mxu0 %v913_v48 }
  0x55   : > { %696 = vmatpush.bf16.msra.mxu1 %v977_v50  ;;  %709 = vmatpush.bf16.msra.mxu2 %v917_v51 }
  0x56   : > { %722 = vmatpush.bf16.msra.mxu3 %v981_v55 }
  0x58   : > { %684 = vmatpush.bf16.msra.mxu0 %v905_v62 }
  0x59   : > { %697 = vmatpush.bf16.msra.mxu1 %v969_v0  ;;  %710 = vmatpush.bf16.msra.mxu2 %v909_v1 }
  0x5a   : > { %723 = vmatpush.bf16.msra.mxu3 %v973_v2 }
  0x5b   : > { %685 = vmatmul.bf16.vlgmr.msra.gmra.mxu0 %v513_v3 }
  0x5c   : > { %698 = vmatmul.bf16.vlgmr.msra.gmra.mxu1 %v514_v4  ;;  %711 = vmatmul.bf16.vlgmr.msra.gmra.mxu2 %v513_v3 }
  0x5d   : > { %724 = vmatmul.bf16.vlgmr.msra.gmra.mxu3 %v514_v4 }
  0xd8   : > { %v686_v5 = vpop.f32.mrf.mxu0 }
  0xd9   : > { %v699_v7 = vpop.f32.mrf.mxu1 }
  0xda   : > { %v700_v8 = vadd.f32 %v699_v7, %v686_v5 }
  0xdc   : > { %v744_v11 = vmul.f32 %v740_v9, %v700_v8 }
  0xde   : > { %v752_v20 = vadd.f32 %v748_v12, %v744_v11 }
  0xdf   : > { %v712_v13 = vpop.f32.mrf.mxu2 }
  0xe0   : > { %v725_v15 = vpop.f32.mrf.mxu3  ;;  %v688_v16 = vpop.f32.mrf.mxu0 }
  0xe1   : > { %v726_v17 = vadd.f32 %v725_v15, %v712_v13  ;;  %v701_v19 = vpop.f32.mrf.mxu1 }
  0xe3   : > { %v745_v21 = vmul.f32 %v741_v14, %v726_v17 }
  0xe5   : > { %v753_v22 = vadd.f32 %v749_v18, %v745_v21 }
  0xe7   : > { %v754_v23 = vpack.c.bf16 %v753_v22, %v752_v20  ;;  %v714_v24 = vpop.f32.mrf.mxu2 }
  0xe8   : > { %v727_v25 = vpop.f32.mrf.mxu3 }
  0xe9   : > { %755 = vst [vmem:[%s467_s25] sm:$0xff] %v754_v23 }
  0xea PF: > { %s14_s19 = sadd.s32 1, %s1143_s19   ;;  %s1383_s15 = smov %s1131_s16 }
  0xeb   : > { %p11_p10 = scmp.ge.s32.totalorder %s14_s19, 4   ;;  %s1384_s16 = smov %s1205_s23 }
  0xec   : > { %s1385_s17 = smov %s1139_s18  ;;  %s1386_s18 = smov %s1388_s20 }
  0xed   :  { %13 = sbr.rel (!%p11_p10) target bundleno = 3 (0x3), region = 126 }

// kernel: resnet_forward.29
= control target key start
LH: loop header
LB: loop body
LE: loop exit
PB: predicated region body
PF: predicated region fallthrough
CT: control target
= control target key end

     0   :  { %9 = vsyncpa [#allocation4], 0  ;;  %s752_s0 = inlined_call_operand.vmem [shape: bf16[8,512], index: 0, kind: input, shape index: {}]   ;;  %s753_s1 = inlined_call_operand.vmem [shape: bf16[512,128], index: 1, kind: input, shape index: {}]   ;;  %s754_s2 = inlined_call_operand.hbm [shape: f32[1,128], index: 2, kind: input, shape index: {}]   ;;  %s755_s3 = inlined_call_operand.hbm [shape: f32[1,128], index: 3, kind: input, shape index: {}]   ;;  %s756_s4 = inlined_call_operand.vmem [shape: f32[8,128], index: 4, kind: output, shape index: {}]  }
   0x1   :  { %s20_s17 = sshll.u32 %s754_s2, 4  ;;  %s21_s17 = int_to_ptr.hbm [resolvable:$true] %s20_s17 }
   0x2   :  { %10 = vsyncpa [#allocation6], 0  ;;  %s614_s18 = smov [#allocation3]   ;;  %s31_s22 = sshll.u32 %s755_s3, 4  ;;  %s32_s22 = int_to_ptr.hbm [resolvable:$true] %s31_s22 }
   0x3   :  { %s22_s19 = sshll.u32 %s614_s18, 4  ;;  %s615_s23 = smov [#allocation5]   ;;  %s23_s19 = int_to_ptr.vmem [resolvable:$true] %s22_s19 }
   0x4   :  { %25 = dma.hbm_to_vmem [thread:$0]  %s21_s17, 16, %s23_s19, [#allocation4]  }
   0x5   :  { %s33_s24 = sshll.u32 %s615_s23, 4  ;;  %s34_s24 = int_to_ptr.vmem [resolvable:$true] %s33_s24 }
   0x6   :  { %36 = dma.hbm_to_vmem [thread:$0]  %s32_s22, 16, %s34_s24, [#allocation6]  }
   0x7   :  { %610 = dma.done.wait [#allocation4], 16  }
   0x8   :  { %611 = vsyncadd [#allocation4], 4294967280 }
   0x9   :  { %612 = dma.done.wait [#allocation6], 16  }
   0xa   :  { %613 = vsyncadd [#allocation6], 4294967280  ;;  %v533_v0 = vld [vmem:[%s753_s1 + $0x38] sm:$0xff]  ;;  %v532_v4 = vld [vmem:[%s753_s1 + $0x30] sm:$0xff] }
   0xb   :  { %v541_v1 = vld [vmem:[%s753_s1 + $0x78] sm:$0xff]  ;;  %323 = vmatpush.bf16.msra.mxu0 %v533_v0  ;;  %v540_v5 = vld [vmem:[%s753_s1 + $0x70] sm:$0xff]  ;;  %v531_v8 = vld [vmem:[%s753_s1 + $0x28] sm:$0xff] }
   0xc   :  { %v549_v2 = vld [vmem:[%s753_s1 + $0xb8] sm:$0xff]  ;;  %336 = vmatpush.bf16.msra.mxu1 %v541_v1  ;;  %v548_v6 = vld [vmem:[%s753_s1 + $0xb0] sm:$0xff]  ;;  %v539_v9 = vld [vmem:[%s753_s1 + $0x68] sm:$0xff] }
   0xd   :  { %v557_v3 = vld [vmem:[%s753_s1 + $0xf8] sm:$0xff]  ;;  %349 = vmatpush.bf16.msra.mxu2 %v549_v2  ;;  %v556_v7 = vld [vmem:[%s753_s1 + $0xf0] sm:$0xff]  ;;  %v547_v10 = vld [vmem:[%s753_s1 + $0xa8] sm:$0xff] }
   0xe   :  { %362 = vmatpush.bf16.msra.mxu3 %v557_v3  ;;  %v555_v11 = vld [vmem:[%s753_s1 + $0xe8] sm:$0xff]  ;;  %v530_v12 = vld [vmem:[%s753_s1 + $0x20] sm:$0xff]  ;;  %v529_v16 = vld [vmem:[%s753_s1 + $0x18] sm:$0xff] }
   0xf   :  { %324 = vmatpush.bf16.msra.mxu0 %v532_v4  ;;  %v538_v13 = vld [vmem:[%s753_s1 + $0x60] sm:$0xff]  ;;  %v537_v17 = vld [vmem:[%s753_s1 + $0x58] sm:$0xff]  ;;  %v528_v20 = vld [vmem:[%s753_s1 + $0x10] sm:$0xff] }
  0x10   :  { %337 = vmatpush.bf16.msra.mxu1 %v540_v5  ;;  %v546_v14 = vld [vmem:[%s753_s1 + $0xa0] sm:$0xff]  ;;  %v545_v18 = vld [vmem:[%s753_s1 + $0x98] sm:$0xff]  ;;  %v536_v21 = vld [vmem:[%s753_s1 + $0x50] sm:$0xff] }
  0x11   :  { %350 = vmatpush.bf16.msra.mxu2 %v548_v6  ;;  %v554_v15 = vld [vmem:[%s753_s1 + $0xe0] sm:$0xff]  ;;  %v553_v19 = vld [vmem:[%s753_s1 + $0xd8] sm:$0xff]  ;;  %v544_v22 = vld [vmem:[%s753_s1 + $0x90] sm:$0xff] }
  0x12   :  { %363 = vmatpush.bf16.msra.mxu3 %v556_v7  ;;  %v552_v23 = vld [vmem:[%s753_s1 + $0xd0] sm:$0xff]  ;;  %v527_v24 = vld [vmem:[%s753_s1 + $0x8] sm:$0xff]  ;;  %v51_v26 = vld [vmem:[%s752_s0] sm:$0xff] }
  0x13   :  { %325 = vmatpush.bf16.msra.mxu0 %v531_v8  ;;  %v535_v25 = vld [vmem:[%s753_s1 + $0x48] sm:$0xff]  ;;  %v119_v30 = vunpack.c.l.b16 %v51_v26  ;;  %v120_v31 = vunpack.c.h.b16 %v51_v26  ;;  %v526_v32 = vld [vmem:[%s753_s1] sm:$0xff] }
  0x14   :  { %338 = vmatpush.bf16.msra.mxu1 %v539_v9  ;;  %v543_v27 = vld [vmem:[%s753_s1 + $0x88] sm:$0xff]  ;;  %v534_v33 = vld [vmem:[%s753_s1 + $0x40] sm:$0xff] }
  0x15   :  { %351 = vmatpush.bf16.msra.mxu2 %v547_v10  ;;  %v551_v28 = vld [vmem:[%s753_s1 + $0xc8] sm:$0xff]  ;;  %v542_v36 = vld [vmem:[%s753_s1 + $0x80] sm:$0xff]  ;;  %v123_v38 = vpack.c.b16 %v119_v30, %v119_v30  ;;  %v124_v39 = vpack.c.b16 %v120_v31, %v120_v31 }
  0x16   :  { %364 = vmatpush.bf16.msra.mxu3 %v555_v11  ;;  %v52_v29 = vld [vmem:[%s752_s0 + $0x8] sm:$0xff]  ;;  %v550_v37 = vld [vmem:[%s753_s1 + $0xc0] sm:$0xff] }
  0x17   :  { %326 = vmatpush.bf16.msra.mxu0 %v530_v12  ;;  %v121_v34 = vunpack.c.l.b16 %v52_v29  ;;  %v122_v35 = vunpack.c.h.b16 %v52_v29  ;;  %v560_v48 = vld [vmem:[#allocation3] ss:$0 sm:$0xff]  ;;  %v561_v52 = vld [vmem:[#allocation5] ss:$0 sm:$0xff] }
  0x18   :  { %339 = vmatpush.bf16.msra.mxu1 %v538_v13 }
  0x19   :  { %352 = vmatpush.bf16.msra.mxu2 %v546_v14  ;;  %v125_v40 = vpack.c.b16 %v121_v34, %v121_v34  ;;  %v126_v41 = vpack.c.b16 %v122_v35, %v122_v35 }
  0x1a   :  { %365 = vmatpush.bf16.msra.mxu3 %v554_v15 }
  0x1b   :  { %327 = vmatpush.bf16.msra.mxu0 %v529_v16 }
  0x1c   :  { %340 = vmatpush.bf16.msra.mxu1 %v537_v17 }
  0x1d   :  { %353 = vmatpush.bf16.msra.mxu2 %v545_v18 }
  0x1e   :  { %366 = vmatpush.bf16.msra.mxu3 %v553_v19 }
  0x1f   :  { %328 = vmatpush.bf16.msra.mxu0 %v528_v20 }
  0x20   :  { %341 = vmatpush.bf16.msra.mxu1 %v536_v21 }
  0x21   :  { %354 = vmatpush.bf16.msra.mxu2 %v544_v22 }
  0x22   :  { %367 = vmatpush.bf16.msra.mxu3 %v552_v23 }
  0x23   :  { %329 = vmatpush.bf16.msra.mxu0 %v527_v24 }
  0x24   :  { %342 = vmatpush.bf16.msra.mxu1 %v535_v25 }
  0x25   :  { %355 = vmatpush.bf16.msra.mxu2 %v543_v27 }
  0x26   :  { %368 = vmatpush.bf16.msra.mxu3 %v551_v28 }
  0x27   :  { %330 = vmatpush.bf16.msra.mxu0 %v526_v32 }
  0x28   :  { %343 = vmatpush.bf16.msra.mxu1 %v534_v33 }
  0x29   :  { %356 = vmatpush.bf16.msra.mxu2 %v542_v36 }
  0x2a   :  { %369 = vmatpush.bf16.msra.mxu3 %v550_v37  ;;  %331 = vmatmul.bf16.vlgmr.msra.gmra.mxu0 %v123_v38 }
  0x2b   :  { %344 = vmatmul.bf16.vlgmr.msra.gmra.mxu1 %v124_v39 }
  0x2c   :  { %357 = vmatmul.bf16.vlgmr.msra.gmra.mxu2 %v125_v40 }
  0x2d   :  { %370 = vmatmul.bf16.vlgmr.msra.gmra.mxu3 %v126_v41 }
  0xa7   :  { %v332_v42 = vpop.f32.mrf.mxu0 }
  0xa8   :  { %v345_v43 = vpop.f32.mrf.mxu1 }
  0xa9   :  { %v346_v44 = vadd.f32 %v345_v43, %v332_v42 }
  0xaf   :  { %v358_v45 = vpop.f32.mrf.mxu2  ;;  %v334_v49 = vpop.f32.mrf.mxu0 }
  0xb0   :  { %v371_v46 = vpop.f32.mrf.mxu3  ;;  %v359_v47 = vadd.f32 %v358_v45, %v346_v44  ;;  %v347_v50 = vpop.f32.mrf.mxu1 }
  0xb2   :  { %v372_v51 = vadd.f32 %v371_v46, %v359_v47 }
  0xb4   :  { %v385_v53 = vmul.f32 %v560_v48, %v372_v51 }
  0xb6   :  { %v390_v54 = vadd.f32 %v561_v52, %v385_v53 }
  0xb7   :  { %v360_v55 = vpop.f32.mrf.mxu2 }
  0xb8   :  { %v373_v56 = vpop.f32.mrf.mxu3  ;;  %391 = vst [vmem:[%s756_s4] sm:$0xff] %v390_v54 }
  0xb9   :  { %396 = vsyncpa [#allocation4], 1 }
  0xba   :  { %397 = vsyncpa [#allocation6], 1 }

</bundles_post_ra>
